<compile_context>
chip_gen: v7x
topology: tpu7x:2x2x1
jax: 0.10.0
libtpu: 0.0.40
codegen_flags: <defaults>
</compile_context>

<pallas_src>
import functools
import numpy as np

import jax
import jax.numpy as jnp
from jax.experimental import pallas as pl
from jax.experimental.pallas import tpu as pltpu


# ----------------------------------------------------------------------------
# Per-generation sizing (v5e/v6e: 128 MiB VMEM, v7x: 64 MiB per TensorCore)
# ----------------------------------------------------------------------------
def _tpu_vmem_capacity():
    try:
        info = pltpu.get_tpu_info()
        cap = int(getattr(info, "vmem_capacity_bytes", 0) or 0)
        if cap > 0:
            return cap
    except Exception:
        pass
    return 64 * 1024 * 1024          # conservative default (v7x per-core VMEM)


_VMEM_CAP = _tpu_vmem_capacity()
_VMEM_LIMIT = max(32 << 20, min(_VMEM_CAP - (16 << 20), int(_VMEM_CAP * 0.75)))
_VMEM_LIMIT = min(_VMEM_LIMIT, 112 << 20)
_MAX_TM = 512 if _VMEM_CAP >= (96 << 20) else 256   # row-tile cap (multiple of 16)
_MAX_TW = 16                                        # windows per attention grid step


def _round_up(x, m):
    return ((x + m - 1) // m) * m


# ----------------------------------------------------------------------------
# In-kernel activation helpers (f32 math)
# ----------------------------------------------------------------------------
def _gelu_tanh(x):
    # tanh-form GELU; |err| vs exact-erf nn.GELU() < ~1e-3.  tanh runs on the EUP
    # slot, so the GEMM epilogue stops competing with MXU work for VALU slots.
    return 0.5 * x * (1.0 + jnp.tanh(0.7978845608028654 * (x + 0.044715 * x * x * x)))


def _apply_act(acc, activation):
    if activation == "tanh":
        return jnp.tanh(acc)
    if activation == "gelu":
        return _gelu_tanh(acc)
    return acc


# ----------------------------------------------------------------------------
# Pallas kernels: matmul (+bias, +fused activation)
# ----------------------------------------------------------------------------
def _mm_kernel(x_ref, w_ref, b_ref, o_ref, *, activation):
    acc = jnp.dot(x_ref[...], w_ref[...], preferred_element_type=jnp.float32)
    o_ref[...] = _apply_act(acc + b_ref[...], activation).astype(o_ref.dtype)


def _mm_acc_kernel(x_ref, w_ref, b_ref, o_ref, acc_ref, *, activation):
    k = pl.program_id(2)

    @pl.when(k == 0)
    def _():
        acc_ref[...] = jnp.zeros_like(acc_ref)

    acc_ref[...] += jnp.dot(x_ref[...], w_ref[...], preferred_element_type=jnp.float32)

    @pl.when(k == pl.num_programs(2) - 1)
    def _():
        o_ref[...] = _apply_act(acc_ref[...] + b_ref[...], activation).astype(o_ref.dtype)


def matmul_bias(x, w, b=None, activation="none", out_dtype=jnp.float32):
    """y = act(x @ w + b).  bf16 MXU operands, f32 accumulate.  x:(M,K) w:(K,N) b:(N,)."""
    M, K = x.shape
    K2, N = w.shape
    assert K == K2
    x = x.astype(jnp.bfloat16)       # no-op when already bf16
    w = w.astype(jnp.bfloat16)       # weights are pre-cast once at init
    if b is None:
        b = jnp.zeros((N,), jnp.float32)
    b = b.astype(jnp.float32).reshape(1, N)

    Mp = _round_up(M, 16)            # bf16 packs (16,128) sublane tiles
    if Mp != M:
        x = jnp.pad(x, ((0, Mp - M), (0, 0)))
    TM = min(_MAX_TM, Mp)
    nm = pl.cdiv(Mp, TM)
    out_bytes = jnp.dtype(out_dtype).itemsize

    # Single-shot weight-resident path whenever it fits VMEM: covers the huge-K
    # final dense (K up to ~31k, N=128 -> ~8 MB of bf16 weight).
    single_est = (K * N * 2 + N * 4
                  + 2 * (TM * K * 2 + TM * N * out_bytes) + TM * N * 4)
    if single_est <= (_VMEM_LIMIT * 3) // 4:
        out = pl.pallas_call(
            functools.partial(_mm_kernel, activation=activation),
            out_shape=jax.ShapeDtypeStruct((Mp, N), out_dtype),
            grid=(nm,),
            in_specs=[
                pl.BlockSpec((TM, K), lambda i: (i, 0)),
                pl.BlockSpec((K, N), lambda i: (0, 0)),
                pl.BlockSpec((1, N), lambda i: (0, 0)),
            ],
            out_specs=pl.BlockSpec((TM, N), lambda i: (i, 0)),
            compiler_params=pltpu.CompilerParams(
                dimension_semantics=("parallel",),
                vmem_limit_bytes=_VMEM_LIMIT),
        )(x, w, b)
    else:
        # K-tiled accumulator path.  Also split N when possible so both v7x
        # TensorCores get work even when there is only a single row tile.
        if N > 512 and N % 512 == 0:
            TN = 512
        elif N > 256 and N % 256 == 0:
            TN = 256
        else:
            TN = N
        TK = 4096
        while TK > 512:
            est = 2 * (TM * TK * 2 + TK * TN * 2) + TM * TN * (4 + 2 * out_bytes)
            if est <= (_VMEM_LIMIT * 3) // 4:
                break
            TK //= 2
        Kp = _round_up(K, TK)
        if Kp != K:
            x = jnp.pad(x, ((0, 0), (0, Kp - K)))
            w = jnp.pad(w, ((0, Kp - K), (0, 0)))
        nk = Kp // TK
        nn = N // TN
        out = pl.pallas_call(
            functools.partial(_mm_acc_kernel, activation=activation),
            out_shape=jax.ShapeDtypeStruct((Mp, N), out_dtype),
            grid=(nm, nn, nk),
            in_specs=[
                pl.BlockSpec((TM, TK), lambda i, j, k: (i, k)),
                pl.BlockSpec((TK, TN), lambda i, j, k: (k, j)),
                pl.BlockSpec((1, TN), lambda i, j, k: (0, j)),
            ],
            out_specs=pl.BlockSpec((TM, TN), lambda i, j, k: (i, j)),
            scratch_shapes=[pltpu.VMEM((TM, TN), jnp.float32)],
            compiler_params=pltpu.CompilerParams(
                dimension_semantics=("parallel", "parallel", "arbitrary"),
                vmem_limit_bytes=_VMEM_LIMIT),
        )(x, w, b)
    return out[:M] if Mp != M else out


# ----------------------------------------------------------------------------
# Pallas kernel: LayerNorm (row-wise, f32 math, bf16 output for GEMM consumers)
# ----------------------------------------------------------------------------
def _layernorm_kernel(x_ref, g_ref, b_ref, o_ref):
    x = x_ref[...].astype(jnp.float32)
    mean = jnp.mean(x, axis=-1, keepdims=True)
    var = jnp.mean(jnp.square(x - mean), axis=-1, keepdims=True)
    y = (x - mean) * jax.lax.rsqrt(var + 1e-5)
    o_ref[...] = (y * g_ref[...] + b_ref[...]).astype(o_ref.dtype)


def layernorm(x, gamma, beta, out_dtype=jnp.bfloat16):
    shp = x.shape
    C = shp[-1]
    x2 = x.reshape(-1, C)
    M = x2.shape[0]
    Mp = _round_up(M, 16)
    if Mp != M:
        x2 = jnp.pad(x2, ((0, Mp - M), (0, 0)))
    TM = min(_MAX_TM, Mp)
    nm = pl.cdiv(Mp, TM)
    out = pl.pallas_call(
        _layernorm_kernel,
        out_shape=jax.ShapeDtypeStruct((Mp, C), out_dtype),
        grid=(nm,),
        in_specs=[
            pl.BlockSpec((TM, C), lambda i: (i, 0)),
            pl.BlockSpec((1, C), lambda i: (0, 0)),
            pl.BlockSpec((1, C), lambda i: (0, 0)),
        ],
        out_specs=pl.BlockSpec((TM, C), lambda i: (i, 0)),
        compiler_params=pltpu.CompilerParams(
            dimension_semantics=("parallel",), vmem_limit_bytes=_VMEM_LIMIT),
    )(x2, gamma.reshape(1, C).astype(jnp.float32),
      beta.reshape(1, C).astype(jnp.float32))
    if Mp != M:
        out = out[:M]
    return out.reshape(shp)


# ----------------------------------------------------------------------------
# Pallas kernel: fused MLP  (LN(norm2) -> fc1 + GELU -> fc2)
# ----------------------------------------------------------------------------
def _mlp_kernel(x_ref, g_ref, b_ref, w1_ref, b1_ref, w2_ref, b2_ref, o_ref):
    x = x_ref[...].astype(jnp.float32)
    mean = jnp.mean(x, axis=-1, keepdims=True)
    var = jnp.mean(jnp.square(x - mean), axis=-1, keepdims=True)
    h = (x - mean) * jax.lax.rsqrt(var + 1e-5)
    h = (h * g_ref[...] + b_ref[...]).astype(jnp.bfloat16)
    h1 = jnp.dot(h, w1_ref[...], preferred_element_type=jnp.float32) + b1_ref[...]
    h1 = _gelu_tanh(h1).astype(jnp.bfloat16)
    y = jnp.dot(h1, w2_ref[...], preferred_element_type=jnp.float32) + b2_ref[...]
    o_ref[...] = y.astype(o_ref.dtype)


def mlp_block(x2, blk):
    """x2: (M, C) f32 residual.  The (TM, hidden) intermediate never leaves VMEM."""
    M, C = x2.shape
    hidden = blk["fc1_w"].shape[1]
    Mp = _round_up(M, 16)
    if Mp != M:
        x2 = jnp.pad(x2, ((0, Mp - M), (0, 0)))
    TM = min(_MAX_TM, Mp)
    while TM > 16 and (4 * TM * C * 4 + (C * hidden * 2) * 2
                       + TM * hidden * 6 + TM * C * 6) > _VMEM_LIMIT // 2:
        TM //= 2
    nm = pl.cdiv(Mp, TM)
    out = pl.pallas_call(
        _mlp_kernel,
        out_shape=jax.ShapeDtypeStruct((Mp, C), jnp.float32),
        grid=(nm,),
        in_specs=[
            pl.BlockSpec((TM, C), lambda i: (i, 0)),
            pl.BlockSpec((1, C), lambda i: (0, 0)),
            pl.BlockSpec((1, C), lambda i: (0, 0)),
            pl.BlockSpec((C, hidden), lambda i: (0, 0)),
            pl.BlockSpec((1, hidden), lambda i: (0, 0)),
            pl.BlockSpec((hidden, C), lambda i: (0, 0)),
            pl.BlockSpec((1, C), lambda i: (0, 0)),
        ],
        out_specs=pl.BlockSpec((TM, C), lambda i: (i, 0)),
        compiler_params=pltpu.CompilerParams(
            dimension_semantics=("parallel",), vmem_limit_bytes=_VMEM_LIMIT),
    )(x2,
      blk["norm2_g"].reshape(1, C).astype(jnp.float32),
      blk["norm2_b"].reshape(1, C).astype(jnp.float32),
      blk["fc1_w"].astype(jnp.bfloat16),
      blk["fc1_b"].reshape(1, hidden).astype(jnp.float32),
      blk["fc2_w"].astype(jnp.bfloat16),
      blk["fc2_b"].reshape(1, C).astype(jnp.float32))
    return out[:M] if Mp != M else out


# ----------------------------------------------------------------------------
# Pallas kernel: fused window attention (QKV GEMM + all heads + output proj)
# ----------------------------------------------------------------------------
def _window_attn_kernel(x_ref, qkvw_ref, qkvb_ref, bias_ref, projw_ref, projb_ref,
                        o_ref, *, num_heads, scale, tw):
    # TODO(synk): for realistic window sizes (N~392) the per-head (N,N) f32 score
    # should be key-tiled with an online softmax instead of held whole in vregs.
    N = x_ref.shape[1]
    C = x_ref.shape[2]
    d = C // num_heads
    n_bias = bias_ref.shape[0]
    xw = x_ref[...].reshape(tw * N, C)                               # bf16
    qkv = jnp.dot(xw, qkvw_ref[...], preferred_element_type=jnp.float32) + qkvb_ref[...]
    qkv = qkv.astype(jnp.bfloat16)                                   # (tw*N, 3C)
    win_outs = []
    for w in range(tw):                                              # static loops
        rows = qkv[w * N:(w + 1) * N]                                # (N, 3C)
        head_outs = []
        for h in range(num_heads):
            q = rows[:, h * d:(h + 1) * d]
            k = rows[:, C + h * d: C + (h + 1) * d]
            v = rows[:, 2 * C + h * d: 2 * C + (h + 1) * d]
            bias = bias_ref[w % n_bias, h]                           # (N, N) f32, static idx
            s = jnp.dot(q, k.T, preferred_element_type=jnp.float32) * scale + bias
            m = jnp.max(s, axis=-1, keepdims=True)
            p = jnp.exp(s - m)
            l = jnp.sum(p, axis=-1, keepdims=True)
            o = jnp.dot(p.astype(jnp.bfloat16), v, preferred_element_type=jnp.float32)
            head_outs.append(o * pl.reciprocal(l, approx=True))      # deferred norm (EUP)
        win_outs.append(jnp.concatenate(head_outs, axis=-1))         # (N, C) f32
    attn = jnp.concatenate(win_outs, axis=0).astype(jnp.bfloat16)    # (tw*N, C)
    proj = jnp.dot(attn, projw_ref[...], preferred_element_type=jnp.float32) + projb_ref[...]
    o_ref[...] = proj.reshape(tw, N, C).astype(o_ref.dtype)          # one lane-dense store


def _choose_tw(B_, nWb, N, C, num_heads):
    """Largest window-tile dividing B_ with static bias indexing and bounded VMEM."""
    best = 1
    for tw in range(1, min(B_, _MAX_TW) + 1):
        if B_ % tw:
            continue
        if not (tw % nWb == 0 or nWb % tw == 0):
            continue
        bias_rows = nWb if tw % nWb == 0 else tw
        est = (2 * tw * N * C * (2 + 4)                 # x in (bf16) + out (f32), dbl-buffered
               + (C * 3 * C + C * C) * 2                # resident qkv/proj bf16 weights
               + bias_rows * num_heads * N * N * 4      # resident bias table
               + tw * N * (3 * C + C) * 6               # in-kernel qkv/attn intermediates
               + num_heads * N * N * 8)                 # per-head score/prob working set
        if est <= _VMEM_LIMIT // 2:
            best = tw
    return best


def window_attention(x_windows, blk, num_heads, bias_b):
    """x_windows: (B_, N, C) bf16 (already LayerNormed); bias_b: (nWb, nH, N, N) f32.
    Fused QKV GEMM + multi-head attention + output projection -> (B_, N, C) f32."""
    B_, N, C = x_windows.shape
    scale = (C // num_heads) ** -0.5
    nWb = bias_b.shape[0]
    tw = _choose_tw(B_, nWb, N, C, num_heads)
    if tw % nWb == 0:
        # Whole bias table resident (block index constant); in-kernel idx = w % nWb.
        bias_spec = pl.BlockSpec((nWb, num_heads, N, N), lambda i: (0, 0, 0, 0))
    else:
        nblk = nWb // tw
        bias_spec = pl.BlockSpec((tw, num_heads, N, N), lambda i: (i % nblk, 0, 0, 0))
    grid = (B_ // tw,)
    return pl.pallas_call(
        functools.partial(_window_attn_kernel, num_heads=num_heads, scale=scale, tw=tw),
        out_shape=jax.ShapeDtypeStruct((B_, N, C), jnp.float32),
        grid=grid,
        in_specs=[
            pl.BlockSpec((tw, N, C), lambda i: (i, 0, 0)),
            pl.BlockSpec((C, 3 * C), lambda i: (0, 0)),
            pl.BlockSpec((1, 3 * C), lambda i: (0, 0)),
            bias_spec,
            pl.BlockSpec((C, C), lambda i: (0, 0)),
            pl.BlockSpec((1, C), lambda i: (0, 0)),
        ],
        out_specs=pl.BlockSpec((tw, N, C), lambda i: (i, 0, 0)),
        compiler_params=pltpu.CompilerParams(
            dimension_semantics=("parallel",), vmem_limit_bytes=_VMEM_LIMIT),
    )(x_windows.astype(jnp.bfloat16),
      blk["qkv_w"].astype(jnp.bfloat16),
      blk["qkv_b"].astype(jnp.float32).reshape(1, 3 * C),
      bias_b.astype(jnp.float32),
      blk["proj_w"].astype(jnp.bfloat16),
      blk["proj_b"].astype(jnp.float32).reshape(1, C))


# ----------------------------------------------------------------------------
# Video-Swin-3D building blocks (glue in plain JAX, compute via Pallas kernels)
# ----------------------------------------------------------------------------
def compute_rel_pos_index(window_size):
    wd, wh, ww = window_size
    coords = np.stack(np.meshgrid(np.arange(wd), np.arange(wh), np.arange(ww), indexing="ij"))
    cf = coords.reshape(3, -1)
    rel = cf[:, :, None] - cf[:, None, :]
    rel = rel.transpose(1, 2, 0).astype(np.int64)
    rel[:, :, 0] += wd - 1
    rel[:, :, 1] += wh - 1
    rel[:, :, 2] += ww - 1
    rel[:, :, 0] *= (2 * wh - 1) * (2 * ww - 1)
    rel[:, :, 1] *= (2 * ww - 1)
    return rel.sum(-1)  # (wd*wh*ww, wd*wh*ww)


def compute_attn_mask(Dp, Hp, Wp, ws, ss):
    """Shifted-window attention mask (trace-time numpy constant), shape (nW, N, N)."""
    img_mask = np.zeros((1, Dp, Hp, Wp, 1), np.float32)
    cnt = 0
    for d in (slice(-ws[0]), slice(-ws[0], -ss[0]), slice(-ss[0], None)):
        for hh in (slice(-ws[1]), slice(-ws[1], -ss[1]), slice(-ss[1], None)):
            for www in (slice(-ws[2]), slice(-ws[2], -ss[2]), slice(-ss[2], None)):
                img_mask[:, d, hh, www, :] = cnt
                cnt += 1
    mw = img_mask.reshape(1, Dp // ws[0], ws[0], Hp // ws[1], ws[1], Wp // ws[2], ws[2], 1)
    mw = mw.transpose(0, 1, 3, 5, 2, 4, 6, 7).reshape(-1, ws[0] * ws[1] * ws[2])
    am = mw[:, None, :] - mw[:, :, None]
    return np.where(am != 0, -100.0, 0.0).astype(np.float32)


def get_window_size(x_size, window_size, shift_size):
    use_w, use_s = list(window_size), list(shift_size)
    for i in range(3):
        if x_size[i] <= window_size[i]:
            use_w[i] = x_size[i]
            use_s[i] = 0
    return tuple(use_w), tuple(use_s)


def window_partition(x, ws):
    B, D, H, W, C = x.shape
    x = x.reshape(B, D // ws[0], ws[0], H // ws[1], ws[1], W // ws[2], ws[2], C)
    x = jnp.transpose(x, (0, 1, 3, 5, 2, 4, 6, 7))
    return x.reshape(-1, ws[0] * ws[1] * ws[2], C)


def window_reverse(windows, ws, B, D, H, W):
    x = windows.reshape(B, D // ws[0], H // ws[1], W // ws[2], ws[0], ws[1], ws[2], -1)
    x = jnp.transpose(x, (0, 1, 4, 2, 5, 3, 6, 7))
    return x.reshape(B, D, H, W, -1)


def swin_block(x, blk, window_size, shift_size, num_heads, rel_index):
    # TODO(synk): norm1 could also be fused into the attention kernel when no window
    # padding is required (padded key rows must stay exactly zero, i.e. post-norm).
    B, D, H, W, C = x.shape
    ws, ss = get_window_size((D, H, W), window_size, shift_size)
    shortcut = x
    h = layernorm(x, blk["norm1_g"], blk["norm1_b"])                  # bf16 (pre-pad, as in ref)
    pad_d = (ws[0] - D % ws[0]) % ws[0]
    pad_b = (ws[1] - H % ws[1]) % ws[1]
    pad_r = (ws[2] - W % ws[2]) % ws[2]
    if pad_d or pad_b or pad_r:
        h = jnp.pad(h, ((0, 0), (0, pad_d), (0, pad_b), (0, pad_r), (0, 0)))
    _, Dp, Hp, Wp, _ = h.shape
    shifted = any(s > 0 for s in ss)
    if shifted:
        h = jnp.roll(h, shift=(-ss[0], -ss[1], -ss[2]), axis=(1, 2, 3))
    windows = window_partition(h, ws)                                  # (B_, N, C) bf16

    N = ws[0] * ws[1] * ws[2]
    idx = np.asarray(rel_index)[:N, :N].reshape(-1)                    # trace-time constant
    bias = blk["rel_bias"][idx].reshape(N, N, num_heads)
    bias = jnp.transpose(bias, (2, 0, 1)).astype(jnp.float32)          # (nH, N, N)
    if shifted:
        mask = compute_attn_mask(Dp, Hp, Wp, ws, ss)                   # (nW, N, N) numpy
        bias_b = bias[None, :, :, :] + jnp.asarray(mask)[:, None, :, :]
    else:
        bias_b = bias[None, :, :, :]                                   # (1, nH, N, N)

    attn = window_attention(windows, blk, num_heads, bias_b)           # (B_, N, C) f32
    h = window_reverse(attn, ws, B, Dp, Hp, Wp)
    if shifted:
        h = jnp.roll(h, shift=(ss[0], ss[1], ss[2]), axis=(1, 2, 3))
    h = h[:, :D, :H, :W, :]
    x = shortcut + h                                                   # drop_path = identity (eval)
    y = mlp_block(x.reshape(-1, C), blk).reshape(x.shape)              # fused LN+fc1+GELU+fc2
    return x + y


def patch_merging(x, p):
    B, D, H, W, C = x.shape
    if (H % 2) or (W % 2):
        x = jnp.pad(x, ((0, 0), (0, 0), (0, H % 2), (0, W % 2), (0, 0)))
    x0 = x[:, :, 0::2, 0::2, :]
    x1 = x[:, :, 1::2, 0::2, :]
    x2 = x[:, :, 0::2, 1::2, :]
    x3 = x[:, :, 1::2, 1::2, :]
    x = jnp.concatenate([x0, x1, x2, x3], axis=-1)                     # (B, D, H2, W2, 4C)
    B2, D2, H2, W2, C4 = x.shape
    x = layernorm(x, p["norm_g"], p["norm_b"])                         # bf16
    x = matmul_bias(x.reshape(-1, C4), p["red_w"], None, out_dtype=jnp.float32)
    return x.reshape(B2, D2, H2, W2, 2 * C)


def basic_layer(x, lp, depth, num_heads, window_size, rel_index):
    # x: (B, C, D, H, W) channel-first, like the PyTorch BasicLayer
    x = jnp.transpose(x, (0, 2, 3, 4, 1))                              # b d h w c
    base_shift = tuple(w // 2 for w in window_size)
    for bidx in range(depth):
        ss = (0, 0, 0) if bidx % 2 == 0 else base_shift
        x = swin_block(x, lp["blocks"][bidx], window_size, ss, num_heads, rel_index)
    if lp["downsample"] is not None:
        x = patch_merging(x, lp["downsample"])
    return jnp.transpose(x, (0, 4, 1, 2, 3))                           # b c d h w


def patch_embed3d(x, w, b, patch_size):
    # Conv3d(in_chans, embed_dim, kernel=stride=patch_size)  ==  patchify + GEMM
    B, C, D, H, W = x.shape
    pd, ph, pw = patch_size
    x = jnp.pad(x, ((0, 0), (0, 0),
                    (0, (pd - D % pd) % pd),
                    (0, (ph - H % ph) % ph),
                    (0, (pw - W % pw) % pw)))
    _, _, Dp, Hp, Wp = x.shape
    Do, Ho, Wo = Dp // pd, Hp // ph, Wp // pw
    E = w.shape[0]
    patches = x.reshape(B, C, Do, pd, Ho, ph, Wo, pw)
    patches = jnp.transpose(patches, (0, 2, 4, 6, 1, 3, 5, 7)).reshape(
        B * Do * Ho * Wo, C * pd * ph * pw)
    w2 = w.reshape(E, -1).T
    out = matmul_bias(patches, w2, b, out_dtype=jnp.float32).reshape(B, Do, Ho, Wo, E)
    return jnp.transpose(out, (0, 4, 1, 2, 3))                         # (B, E, D', H', W')


# ----------------------------------------------------------------------------
# VSWM forward
# ----------------------------------------------------------------------------
def vswm_forward(params, inputs, cfg):
    nt, c, H, W = inputs.shape
    D, B, C = nt, 1, c
    # torch: inputs.unsqueeze(1).view(B, C, D, H, W)  == raw reinterpret, not a transpose
    x = inputs.reshape(B, C, D, H, W)
    x = patch_embed3d(x, params["pe_w"], params["pe_b"], cfg["patch_size"])
    # pos_drop (p=0) -> identity
    rel_index = compute_rel_pos_index(cfg["window_size"])              # trace-time constant
    for i, depth in enumerate(cfg["depths"]):
        x = basic_layer(x, params["layers"][i], depth, cfg["num_heads"][i],
                        cfg["window_size"], rel_index)
    n, cc, d, h, w = x.shape
    x = jnp.transpose(x, (0, 2, 3, 4, 1))                              # n d h w c
    x = jnp.transpose(x, (0, 1, 4, 2, 3)).reshape(n * d, cc, h, w)     # (n d) c h w
    d9 = x.reshape(x.shape[0], -1)
    d10 = matmul_bias(d9, params["fd1_w"], params["fd1_b"], activation="tanh")
    d11 = d10                                                          # dropout_4 -> identity (eval)
    d12 = matmul_bias(d11, params["fd3_w"], params["fd3_b"])
    # Matches torch's `d12.reshape(D)`: requires (n*d)*4 == D.
    assert int(np.prod(d12.shape)) == D, (d12.shape, D)
    out = d12.reshape(D)[:, None]                                      # (D, 1)
    return out


# ----------------------------------------------------------------------------
# Deterministic parameter init (GEMM weights pre-cast to bf16 once)
# ----------------------------------------------------------------------------
def init_params(key, cfg, nt, H, W):
    keys = iter(jax.random.split(key, 512))

    def nrm(shape, dtype=jnp.float32):
        return (0.02 * jax.random.normal(next(keys), shape, jnp.float32)).astype(dtype)

    def wgt(shape):                       # GEMM weight: stored bf16 (cast once, outside jit)
        return nrm(shape, jnp.bfloat16)

    def zeros(shape):
        return jnp.zeros(shape, jnp.float32)

    def ones(shape):
        return jnp.ones(shape, jnp.float32)

    E = cfg["embed_dim"]
    pd, ph, pw = cfg["patch_size"]
    C_in = cfg["in_chans"]
    wd, wh, ww = cfg["window_size"]
    table_len = (2 * wd - 1) * (2 * wh - 1) * (2 * ww - 1)
    nl = len(cfg["depths"])

    p = {"pe_w": wgt((E, C_in, pd, ph, pw)), "pe_b": zeros((E,))}
    layers = []
    for i in range(nl):
        dim = E * 2 ** i
        heads = cfg["num_heads"][i]
        hidden = int(dim * cfg["mlp_ratio"])
        blocks = []
        for _ in range(cfg["depths"][i]):
            blocks.append(dict(
                norm1_g=ones((dim,)), norm1_b=zeros((dim,)),
                qkv_w=wgt((dim, 3 * dim)), qkv_b=zeros((3 * dim,)),
                rel_bias=nrm((table_len, heads)),
                proj_w=wgt((dim, dim)), proj_b=zeros((dim,)),
                norm2_g=ones((dim,)), norm2_b=zeros((dim,)),
                fc1_w=wgt((dim, hidden)), fc1_b=zeros((hidden,)),
                fc2_w=wgt((hidden, dim)), fc2_b=zeros((dim,)),
            ))
        down = None
        if i < nl - 1:
            down = dict(norm_g=ones((4 * dim,)), norm_b=zeros((4 * dim,)),
                        red_w=wgt((4 * dim, 2 * dim)))
        layers.append(dict(blocks=blocks, downsample=down))
    p["layers"] = layers

    # TODO(synk): the original hard-codes final_dense_1 in_features per img_size
    # (e.g. 3136 for img_size=36); here it is derived from the actual feature map
    # so the graph is self-consistent at small synthetic shapes.
    cdiv = lambda a, b: -(-a // b)
    Ho, Wo = cdiv(H, ph), cdiv(W, pw)
    for _ in range(nl - 1):
        Ho, Wo = cdiv(Ho, 2), cdiv(Wo, 2)
    num_features = E * 2 ** (nl - 1)
    feat = num_features * Ho * Wo
    p["fd1_w"] = wgt((feat, cfg["nb_dense"]))
    p["fd1_b"] = zeros((cfg["nb_dense"],))
    p["fd3_w"] = wgt((cfg["nb_dense"], 4))
    p["fd3_b"] = zeros((4,))
    return p


# ----------------------------------------------------------------------------
if __name__ == "__main__":
    cfg = dict(
        in_chans=3,
        embed_dim=32,
        depths=(2, 2),
        num_heads=(2, 4),
        window_size=(2, 4, 4),
        patch_size=(4, 4, 4),
        mlp_ratio=4.0,
        nb_dense=128,
    )
    # nt divisible by patch_size[0]; 32x32 spatial exercises shifted windows and
    # multi-window attention batches.
    nt, c, H, W = 8, 3, 32, 32

    key = jax.random.PRNGKey(0)
    k_in, k_par = jax.random.split(key)
    inputs = jax.random.normal(k_in, (nt, c, H, W), jnp.float32)
    params = init_params(k_par, cfg, nt, H, W)

    fwd = jax.jit(lambda p, x: vswm_forward(p, x, cfg))
    out = fwd(params, inputs)
    out = jax.block_until_ready(out)

    assert out.shape == (nt, 1), out.shape
    assert bool(jnp.all(jnp.isfinite(out)))
    print("KERNEL_OK")
</pallas_src>

<mosaic_0001>
module attributes {stable_mosaic.version = 11 : i64} {
  func.func @_mm_kernel(%arg0: i32, %arg1: memref<128x192xbf16, #tpu.memory_space<vmem>>, %arg2: memref<192x32xbf16, #tpu.memory_space<vmem>>, %arg3: memref<1x32xf32, #tpu.memory_space<vmem>>, %arg4: memref<128x32xf32, #tpu.memory_space<vmem>>) attributes {dimension_semantics = [#tpu.dimension_semantics<parallel>], iteration_bounds = array<i64: 1>, scalar_prefetch = 0 : i64, scratch_operands = 0 : i64, tpu.core_type = #tpu.core_type<tc>, window_params = [{transform_indices = @transform_0, window_bounds = array<i64: 128, 192>}, {pipeline_mode = #tpu.pipeline_mode<synchronous>, transform_indices = @transform_1, window_bounds = array<i64: 192, 32>}, {pipeline_mode = #tpu.pipeline_mode<synchronous>, transform_indices = @transform_2, window_bounds = array<i64: 1, 32>}, {transform_indices = @transform_3, window_bounds = array<i64: 128, 32>}]} {
    %c0 = arith.constant 0 : index
    %c0_0 = arith.constant 0 : index
    %0 = vector.load %arg1[%c0, %c0_0] : memref<128x192xbf16, #tpu.memory_space<vmem>>, vector<128x192xbf16>
    %c0_1 = arith.constant 0 : index
    %c0_2 = arith.constant 0 : index
    %1 = vector.load %arg2[%c0_1, %c0_2] : memref<192x32xbf16, #tpu.memory_space<vmem>>, vector<192x32xbf16>
    %cst = arith.constant dense<0.000000e+00> : vector<128x32xf32>
    %2 = tpu.matmul %0, %1, %cst {dimension_numbers = #tpu.dot_dimension_numbers<[1], [0], [0], [1], [0, 0, 1, 1], [], []>} : vector<128x192xbf16>, vector<192x32xbf16>, vector<128x32xf32> -> vector<128x32xf32>
    %c0_3 = arith.constant 0 : index
    %c0_4 = arith.constant 0 : index
    %3 = vector.load %arg3[%c0_3, %c0_4] : memref<1x32xf32, #tpu.memory_space<vmem>>, vector<1x32xf32>
    %4 = vector.broadcast %3 : vector<1x32xf32> to vector<128x32xf32>
    %5 = arith.addf %2, %4 : vector<128x32xf32>
    %c0_5 = arith.constant 0 : index
    %c0_6 = arith.constant 0 : index
    %6 = vector.load %arg4[%c0_5, %c0_6] : memref<128x32xf32, #tpu.memory_space<vmem>>, vector<128x32xf32>
    tpu.vector_store %arg4[%c0_5, %c0_6], %5 {strides = array<i32>} : memref<128x32xf32, #tpu.memory_space<vmem>>, vector<128x32xf32>,
    return
  }
  func.func @transform_0(%arg0: i32) -> (i32, i32) {
    %c0_i32 = arith.constant 0 : i32
    %c0_i32_0 = arith.constant 0 : i32
    return %arg0, %c0_i32 : i32, i32
  }
  func.func @transform_1(%arg0: i32) -> (i32, i32) {
    %c0_i32 = arith.constant 0 : i32
    %c0_i32_0 = arith.constant 0 : i32
    %c0_i32_1 = arith.constant 0 : i32
    return %c0_i32, %c0_i32_0 : i32, i32
  }
  func.func @transform_2(%arg0: i32) -> (i32, i32) {
    %c0_i32 = arith.constant 0 : i32
    %c0_i32_0 = arith.constant 0 : i32
    %c0_i32_1 = arith.constant 0 : i32
    return %c0_i32, %c0_i32_0 : i32, i32
  }
  func.func @transform_3(%arg0: i32) -> (i32, i32) {
    %c0_i32 = arith.constant 0 : i32
    %c0_i32_0 = arith.constant 0 : i32
    return %arg0, %c0_i32 : i32, i32
  }
}

module attributes {stable_mosaic.version = 11 : i64} {
  func.func @_layernorm_kernel(%arg0: i32, %arg1: memref<128x32xf32, #tpu.memory_space<vmem>>, %arg2: memref<1x32xf32, #tpu.memory_space<vmem>>, %arg3: memref<1x32xf32, #tpu.memory_space<vmem>>, %arg4: memref<128x32xbf16, #tpu.memory_space<vmem>>) attributes {dimension_semantics = [#tpu.dimension_semantics<parallel>], iteration_bounds = array<i64: 1>, scalar_prefetch = 0 : i64, scratch_operands = 0 : i64, tpu.core_type = #tpu.core_type<tc>, window_params = [{transform_indices = @transform_0, window_bounds = array<i64: 128, 32>}, {pipeline_mode = #tpu.pipeline_mode<synchronous>, transform_indices = @transform_1, window_bounds = array<i64: 1, 32>}, {pipeline_mode = #tpu.pipeline_mode<synchronous>, transform_indices = @transform_2, window_bounds = array<i64: 1, 32>}, {transform_indices = @transform_3, window_bounds = array<i64: 128, 32>}]} {
    %c0 = arith.constant 0 : index
    %c0_0 = arith.constant 0 : index
    %0 = vector.load %arg1[%c0, %c0_0] : memref<128x32xf32, #tpu.memory_space<vmem>>, vector<128x32xf32>
    %cst = arith.constant dense<0.000000e+00> : vector<128xf32>
    %1 = vector.multi_reduction <add>, %0, %cst [1] : vector<128x32xf32> to vector<128xf32>
    %2 = vector.shape_cast %1 : vector<128xf32> to vector<128x1xf32>
    %cst_1 = arith.constant 3.200000e+01 : f32
    %3 = vector.broadcast %cst_1 : f32 to vector<128x1xf32>
    %4 = arith.divf %2, %3 : vector<128x1xf32>
    %5 = vector.broadcast %4 : vector<128x1xf32> to vector<128x32xf32>
    %6 = arith.subf %0, %5 : vector<128x32xf32>
    %7 = arith.mulf %6, %6 : vector<128x32xf32>
    %cst_2 = arith.constant dense<0.000000e+00> : vector<128xf32>
    %8 = vector.multi_reduction <add>, %7, %cst_2 [1] : vector<128x32xf32> to vector<128xf32>
    %9 = vector.shape_cast %8 : vector<128xf32> to vector<128x1xf32>
    %cst_3 = arith.constant 3.200000e+01 : f32
    %10 = vector.broadcast %cst_3 : f32 to vector<128x1xf32>
    %11 = arith.divf %9, %10 : vector<128x1xf32>
    %12 = vector.broadcast %4 : vector<128x1xf32> to vector<128x32xf32>
    %13 = arith.subf %0, %12 : vector<128x32xf32>
    %cst_4 = arith.constant 9.99999974E-6 : f32
    %14 = vector.broadcast %cst_4 : f32 to vector<128x1xf32>
    %15 = arith.addf %11, %14 : vector<128x1xf32>
    %16 = math.rsqrt %15 : vector<128x1xf32>
    %17 = vector.broadcast %16 : vector<128x1xf32> to vector<128x32xf32>
    %18 = arith.mulf %13, %17 : vector<128x32xf32>
    %c0_5 = arith.constant 0 : index
    %c0_6 = arith.constant 0 : index
    %19 = vector.load %arg2[%c0_5, %c0_6] : memref<1x32xf32, #tpu.memory_space<vmem>>, vector<1x32xf32>
    %20 = vector.broadcast %19 : vector<1x32xf32> to vector<128x32xf32>
    %21 = arith.mulf %18, %20 : vector<128x32xf32>
    %c0_7 = arith.constant 0 : index
    %c0_8 = arith.constant 0 : index
    %22 = vector.load %arg3[%c0_7, %c0_8] : memref<1x32xf32, #tpu.memory_space<vmem>>, vector<1x32xf32>
    %23 = vector.broadcast %22 : vector<1x32xf32> to vector<128x32xf32>
    %24 = arith.addf %21, %23 : vector<128x32xf32>
    %25 = arith.truncf %24 : vector<128x32xf32> to vector<128x32xbf16>
    %c0_9 = arith.constant 0 : index
    %c0_10 = arith.constant 0 : index
    %26 = vector.load %arg4[%c0_9, %c0_10] : memref<128x32xbf16, #tpu.memory_space<vmem>>, vector<128x32xbf16>
    tpu.vector_store %arg4[%c0_9, %c0_10], %25 {strides = array<i32>} : memref<128x32xbf16, #tpu.memory_space<vmem>>, vector<128x32xbf16>,
    return
  }
  func.func @transform_0(%arg0: i32) -> (i32, i32) {
    %c0_i32 = arith.constant 0 : i32
    %c0_i32_0 = arith.constant 0 : i32
    return %arg0, %c0_i32 : i32, i32
  }
  func.func @transform_1(%arg0: i32) -> (i32, i32) {
    %c0_i32 = arith.constant 0 : i32
    %c0_i32_0 = arith.constant 0 : i32
    %c0_i32_1 = arith.constant 0 : i32
    return %c0_i32, %c0_i32_0 : i32, i32
  }
  func.func @transform_2(%arg0: i32) -> (i32, i32) {
    %c0_i32 = arith.constant 0 : i32
    %c0_i32_0 = arith.constant 0 : i32
    %c0_i32_1 = arith.constant 0 : i32
    return %c0_i32, %c0_i32_0 : i32, i32
  }
  func.func @transform_3(%arg0: i32) -> (i32, i32) {
    %c0_i32 = arith.constant 0 : i32
    %c0_i32_0 = arith.constant 0 : i32
    return %arg0, %c0_i32 : i32, i32
  }
}

module attributes {stable_mosaic.version = 11 : i64} {
  func.func @_window_attn_kernel(%arg0: i32, %arg1: memref<4x32x32xbf16, #tpu.memory_space<vmem>>, %arg2: memref<32x96xbf16, #tpu.memory_space<vmem>>, %arg3: memref<1x96xf32, #tpu.memory_space<vmem>>, %arg4: memref<1x2x32x32xf32, #tpu.memory_space<vmem>>, %arg5: memref<32x32xbf16, #tpu.memory_space<vmem>>, %arg6: memref<1x32xf32, #tpu.memory_space<vmem>>, %arg7: memref<4x32x32xf32, #tpu.memory_space<vmem>>) attributes {dimension_semantics = [#tpu.dimension_semantics<parallel>], iteration_bounds = array<i64: 1>, scalar_prefetch = 0 : i64, scratch_operands = 0 : i64, tpu.core_type = #tpu.core_type<tc>, window_params = [{transform_indices = @transform_0, window_bounds = array<i64: 4, 32, 32>}, {pipeline_mode = #tpu.pipeline_mode<synchronous>, transform_indices = @transform_1, window_bounds = array<i64: 32, 96>}, {pipeline_mode = #tpu.pipeline_mode<synchronous>, transform_indices = @transform_2, window_bounds = array<i64: 1, 96>}, {pipeline_mode = #tpu.pipeline_mode<synchronous>, transform_indices = @transform_3, window_bounds = array<i64: 1, 2, 32, 32>}, {pipeline_mode = #tpu.pipeline_mode<synchronous>, transform_indices = @transform_4, window_bounds = array<i64: 32, 32>}, {pipeline_mode = #tpu.pipeline_mode<synchronous>, transform_indices = @transform_5, window_bounds = array<i64: 1, 32>}, {transform_indices = @transform_6, window_bounds = array<i64: 4, 32, 32>}]} {
    %c0 = arith.constant 0 : index
    %c0_0 = arith.constant 0 : index
    %c0_1 = arith.constant 0 : index
    %0 = vector.load %arg1[%c0, %c0_0, %c0_1] : memref<4x32x32xbf16, #tpu.memory_space<vmem>>, vector<4x32x32xbf16>
    %1 = vector.shape_cast %0 : vector<4x32x32xbf16> to vector<128x32xbf16>
    %c0_2 = arith.constant 0 : index
    %c0_3 = arith.constant 0 : index
    %2 = vector.load %arg2[%c0_2, %c0_3] : memref<32x96xbf16, #tpu.memory_space<vmem>>, vector<32x96xbf16>
    %cst = arith.constant dense<0.000000e+00> : vector<128x96xf32>
    %3 = tpu.matmul %1, %2, %cst {dimension_numbers = #tpu.dot_dimension_numbers<[1], [0], [0], [1], [0, 0, 1, 1], [], []>} : vector<128x32xbf16>, vector<32x96xbf16>, vector<128x96xf32> -> vector<128x96xf32>
    %c0_4 = arith.constant 0 : index
    %c0_5 = arith.constant 0 : index
    %4 = vector.load %arg3[%c0_4, %c0_5] : memref<1x96xf32, #tpu.memory_space<vmem>>, vector<1x96xf32>
    %5 = vector.broadcast %4 : vector<1x96xf32> to vector<128x96xf32>
    %6 = arith.addf %3, %5 : vector<128x96xf32>
    %7 = arith.truncf %6 : vector<128x96xf32> to vector<128x96xbf16>
    %8 = vector.extract_strided_slice %7 {offsets = [0, 0], sizes = [32, 96], strides = [1, 1]} : vector<128x96xbf16> to vector<32x96xbf16>
    %9 = vector.extract_strided_slice %8 {offsets = [0, 0], sizes = [32, 16], strides = [1, 1]} : vector<32x96xbf16> to vector<32x16xbf16>
    %10 = vector.extract_strided_slice %8 {offsets = [0, 32], sizes = [32, 16], strides = [1, 1]} : vector<32x96xbf16> to vector<32x16xbf16>
    %11 = vector.extract_strided_slice %8 {offsets = [0, 64], sizes = [32, 16], strides = [1, 1]} : vector<32x96xbf16> to vector<32x16xbf16>
    %c0_6 = arith.constant 0 : index
    %c0_7 = arith.constant 0 : index
    %c0_8 = arith.constant 0 : index
    %c0_9 = arith.constant 0 : index
    %12 = vector.load %arg4[%c0_6, %c0_7, %c0_8, %c0_9] : memref<1x2x32x32xf32, #tpu.memory_space<vmem>>, vector<1x1x32x32xf32>
    %13 = vector.shape_cast %12 : vector<1x1x32x32xf32> to vector<32x32xf32>
    %14 = tpu.transpose %10, [1, 0] : vector<32x16xbf16> -> vector<16x32xbf16>
    %cst_10 = arith.constant dense<0.000000e+00> : vector<32x32xf32>
    %15 = tpu.matmul %9, %14, %cst_10 {dimension_numbers = #tpu.dot_dimension_numbers<[1], [0], [0], [1], [0, 0, 1, 1], [], []>} : vector<32x16xbf16>, vector<16x32xbf16>, vector<32x32xf32> -> vector<32x32xf32>
    %cst_11 = arith.constant 2.500000e-01 : f32
    %16 = vector.broadcast %cst_11 : f32 to vector<32x32xf32>
    %17 = arith.mulf %15, %16 : vector<32x32xf32>
    %18 = arith.addf %17, %13 : vector<32x32xf32>
    %cst_12 = arith.constant dense<0xFF800000> : vector<32xf32>
    %19 = vector.multi_reduction <maximumf>, %18, %cst_12 [1] : vector<32x32xf32> to vector<32xf32>
    %20 = vector.shape_cast %19 : vector<32xf32> to vector<32x1xf32>
    %21 = vector.broadcast %20 : vector<32x1xf32> to vector<32x32xf32>
    %22 = arith.subf %18, %21 : vector<32x32xf32>
    %23 = math.exp %22 : vector<32x32xf32>
    %cst_13 = arith.constant dense<0.000000e+00> : vector<32xf32>
    %24 = vector.multi_reduction <add>, %23, %cst_13 [1] : vector<32x32xf32> to vector<32xf32>
    %25 = vector.shape_cast %24 : vector<32xf32> to vector<32x1xf32>
    %26 = arith.truncf %23 : vector<32x32xf32> to vector<32x32xbf16>
    %cst_14 = arith.constant dense<0.000000e+00> : vector<32x16xf32>
    %27 = tpu.matmul %26, %11, %cst_14 {dimension_numbers = #tpu.dot_dimension_numbers<[1], [0], [0], [1], [0, 0, 1, 1], [], []>} : vector<32x32xbf16>, vector<32x16xbf16>, vector<32x16xf32> -> vector<32x16xf32>
    %28 = tpu.reciprocal %25 {approx = true} : vector<32x1xf32> -> vector<32x1xf32>
    %29 = vector.broadcast %28 : vector<32x1xf32> to vector<32x16xf32>
    %30 = arith.mulf %27, %29 : vector<32x16xf32>
    %31 = vector.extract_strided_slice %8 {offsets = [0, 16], sizes = [32, 16], strides = [1, 1]} : vector<32x96xbf16> to vector<32x16xbf16>
    %32 = vector.extract_strided_slice %8 {offsets = [0, 48], sizes = [32, 16], strides = [1, 1]} : vector<32x96xbf16> to vector<32x16xbf16>
    %33 = vector.extract_strided_slice %8 {offsets = [0, 80], sizes = [32, 16], strides = [1, 1]} : vector<32x96xbf16> to vector<32x16xbf16>
    %c0_15 = arith.constant 0 : index
    %c1 = arith.constant 1 : index
    %c0_16 = arith.constant 0 : index
    %c0_17 = arith.constant 0 : index
    %34 = vector.load %arg4[%c0_15, %c1, %c0_16, %c0_17] : memref<1x2x32x32xf32, #tpu.memory_space<vmem>>, vector<1x1x32x32xf32>
    %35 = vector.shape_cast %34 : vector<1x1x32x32xf32> to vector<32x32xf32>
    %36 = tpu.transpose %32, [1, 0] : vector<32x16xbf16> -> vector<16x32xbf16>
    %cst_18 = arith.constant dense<0.000000e+00> : vector<32x32xf32>
    %37 = tpu.matmul %31, %36, %cst_18 {dimension_numbers = #tpu.dot_dimension_numbers<[1], [0], [0], [1], [0, 0, 1, 1], [], []>} : vector<32x16xbf16>, vector<16x32xbf16>, vector<32x32xf32> -> vector<32x32xf32>
    %cst_19 = arith.constant 2.500000e-01 : f32
    %38 = vector.broadcast %cst_19 : f32 to vector<32x32xf32>
    %39 = arith.mulf %37, %38 : vector<32x32xf32>
    %40 = arith.addf %39, %35 : vector<32x32xf32>
    %cst_20 = arith.constant dense<0xFF800000> : vector<32xf32>
    %41 = vector.multi_reduction <maximumf>, %40, %cst_20 [1] : vector<32x32xf32> to vector<32xf32>
    %42 = vector.shape_cast %41 : vector<32xf32> to vector<32x1xf32>
    %43 = vector.broadcast %42 : vector<32x1xf32> to vector<32x32xf32>
    %44 = arith.subf %40, %43 : vector<32x32xf32>
    %45 = math.exp %44 : vector<32x32xf32>
    %cst_21 = arith.constant dense<0.000000e+00> : vector<32xf32>
    %46 = vector.multi_reduction <add>, %45, %cst_21 [1] : vector<32x32xf32> to vector<32xf32>
    %47 = vector.shape_cast %46 : vector<32xf32> to vector<32x1xf32>
    %48 = arith.truncf %45 : vector<32x32xf32> to vector<32x32xbf16>
    %cst_22 = arith.constant dense<0.000000e+00> : vector<32x16xf32>
    %49 = tpu.matmul %48, %33, %cst_22 {dimension_numbers = #tpu.dot_dimension_numbers<[1], [0], [0], [1], [0, 0, 1, 1], [], []>} : vector<32x32xbf16>, vector<32x16xbf16>, vector<32x16xf32> -> vector<32x16xf32>
    %50 = tpu.reciprocal %47 {approx = true} : vector<32x1xf32> -> vector<32x1xf32>
    %51 = vector.broadcast %50 : vector<32x1xf32> to vector<32x16xf32>
    %52 = arith.mulf %49, %51 : vector<32x16xf32>
    %53 = tpu.concatenate %30, %52 in 1 : vector<32x16xf32>, vector<32x16xf32> -> vector<32x32xf32>
    %54 = vector.extract_strided_slice %7 {offsets = [32, 0], sizes = [32, 96], strides = [1, 1]} : vector<128x96xbf16> to vector<32x96xbf16>
    %55 = vector.extract_strided_slice %54 {offsets = [0, 0], sizes = [32, 16], strides = [1, 1]} : vector<32x96xbf16> to vector<32x16xbf16>
    %56 = vector.extract_strided_slice %54 {offsets = [0, 32], sizes = [32, 16], strides = [1, 1]} : vector<32x96xbf16> to vector<32x16xbf16>
    %57 = vector.extract_strided_slice %54 {offsets = [0, 64], sizes = [32, 16], strides = [1, 1]} : vector<32x96xbf16> to vector<32x16xbf16>
    %c0_23 = arith.constant 0 : index
    %c0_24 = arith.constant 0 : index
    %c0_25 = arith.constant 0 : index
    %c0_26 = arith.constant 0 : index
    %58 = vector.load %arg4[%c0_23, %c0_24, %c0_25, %c0_26] : memref<1x2x32x32xf32, #tpu.memory_space<vmem>>, vector<1x1x32x32xf32>
    %59 = vector.shape_cast %58 : vector<1x1x32x32xf32> to vector<32x32xf32>
    %60 = tpu.transpose %56, [1, 0] : vector<32x16xbf16> -> vector<16x32xbf16>
    %cst_27 = arith.constant dense<0.000000e+00> : vector<32x32xf32>
    %61 = tpu.matmul %55, %60, %cst_27 {dimension_numbers = #tpu.dot_dimension_numbers<[1], [0], [0], [1], [0, 0, 1, 1], [], []>} : vector<32x16xbf16>, vector<16x32xbf16>, vector<32x32xf32> -> vector<32x32xf32>
    %cst_28 = arith.constant 2.500000e-01 : f32
    %62 = vector.broadcast %cst_28 : f32 to vector<32x32xf32>
    %63 = arith.mulf %61, %62 : vector<32x32xf32>
    %64 = arith.addf %63, %59 : vector<32x32xf32>
    %cst_29 = arith.constant dense<0xFF800000> : vector<32xf32>
    %65 = vector.multi_reduction <maximumf>, %64, %cst_29 [1] : vector<32x32xf32> to vector<32xf32>
    %66 = vector.shape_cast %65 : vector<32xf32> to vector<32x1xf32>
    %67 = vector.broadcast %66 : vector<32x1xf32> to vector<32x32xf32>
    %68 = arith.subf %64, %67 : vector<32x32xf32>
    %69 = math.exp %68 : vector<32x32xf32>
    %cst_30 = arith.constant dense<0.000000e+00> : vector<32xf32>
    %70 = vector.multi_reduction <add>, %69, %cst_30 [1] : vector<32x32xf32> to vector<32xf32>
    %71 = vector.shape_cast %70 : vector<32xf32> to vector<32x1xf32>
    %72 = arith.truncf %69 : vector<32x32xf32> to vector<32x32xbf16>
    %cst_31 = arith.constant dense<0.000000e+00> : vector<32x16xf32>
    %73 = tpu.matmul %72, %57, %cst_31 {dimension_numbers = #tpu.dot_dimension_numbers<[1], [0], [0], [1], [0, 0, 1, 1], [], []>} : vector<32x32xbf16>, vector<32x16xbf16>, vector<32x16xf32> -> vector<32x16xf32>
    %74 = tpu.reciprocal %71 {approx = true} : vector<32x1xf32> -> vector<32x1xf32>
    %75 = vector.broadcast %74 : vector<32x1xf32> to vector<32x16xf32>
    %76 = arith.mulf %73, %75 : vector<32x16xf32>
    %77 = vector.extract_strided_slice %54 {offsets = [0, 16], sizes = [32, 16], strides = [1, 1]} : vector<32x96xbf16> to vector<32x16xbf16>
    %78 = vector.extract_strided_slice %54 {offsets = [0, 48], sizes = [32, 16], strides = [1, 1]} : vector<32x96xbf16> to vector<32x16xbf16>
    %79 = vector.extract_strided_slice %54 {offsets = [0, 80], sizes = [32, 16], strides = [1, 1]} : vector<32x96xbf16> to vector<32x16xbf16>
    %c0_32 = arith.constant 0 : index
    %c1_33 = arith.constant 1 : index
    %c0_34 = arith.constant 0 : index
    %c0_35 = arith.constant 0 : index
    %80 = vector.load %arg4[%c0_32, %c1_33, %c0_34, %c0_35] : memref<1x2x32x32xf32, #tpu.memory_space<vmem>>, vector<1x1x32x32xf32>
    %81 = vector.shape_cast %80 : vector<1x1x32x32xf32> to vector<32x32xf32>
    %82 = tpu.transpose %78, [1, 0] : vector<32x16xbf16> -> vector<16x32xbf16>
    %cst_36 = arith.constant dense<0.000000e+00> : vector<32x32xf32>
    %83 = tpu.matmul %77, %82, %cst_36 {dimension_numbers = #tpu.dot_dimension_numbers<[1], [0], [0], [1], [0, 0, 1, 1], [], []>} : vector<32x16xbf16>, vector<16x32xbf16>, vector<32x32xf32> -> vector<32x32xf32>
    %cst_37 = arith.constant 2.500000e-01 : f32
    %84 = vector.broadcast %cst_37 : f32 to vector<32x32xf32>
    %85 = arith.mulf %83, %84 : vector<32x32xf32>
    %86 = arith.addf %85, %81 : vector<32x32xf32>
    %cst_38 = arith.constant dense<0xFF800000> : vector<32xf32>
    %87 = vector.multi_reduction <maximumf>, %86, %cst_38 [1] : vector<32x32xf32> to vector<32xf32>
    %88 = vector.shape_cast %87 : vector<32xf32> to vector<32x1xf32>
    %89 = vector.broadcast %88 : vector<32x1xf32> to vector<32x32xf32>
    %90 = arith.subf %86, %89 : vector<32x32xf32>
    %91 = math.exp %90 : vector<32x32xf32>
    %cst_39 = arith.constant dense<0.000000e+00> : vector<32xf32>
    %92 = vector.multi_reduction <add>, %91, %cst_39 [1] : vector<32x32xf32> to vector<32xf32>
    %93 = vector.shape_cast %92 : vector<32xf32> to vector<32x1xf32>
    %94 = arith.truncf %91 : vector<32x32xf32> to vector<32x32xbf16>
    %cst_40 = arith.constant dense<0.000000e+00> : vector<32x16xf32>
    %95 = tpu.matmul %94, %79, %cst_40 {dimension_numbers = #tpu.dot_dimension_numbers<[1], [0], [0], [1], [0, 0, 1, 1], [], []>} : vector<32x32xbf16>, vector<32x16xbf16>, vector<32x16xf32> -> vector<32x16xf32>
    %96 = tpu.reciprocal %93 {approx = true} : vector<32x1xf32> -> vector<32x1xf32>
    %97 = vector.broadcast %96 : vector<32x1xf32> to vector<32x16xf32>
    %98 = arith.mulf %95, %97 : vector<32x16xf32>
    %99 = tpu.concatenate %76, %98 in 1 : vector<32x16xf32>, vector<32x16xf32> -> vector<32x32xf32>
    %100 = vector.extract_strided_slice %7 {offsets = [64, 0], sizes = [32, 96], strides = [1, 1]} : vector<128x96xbf16> to vector<32x96xbf16>
    %101 = vector.extract_strided_slice %100 {offsets = [0, 0], sizes = [32, 16], strides = [1, 1]} : vector<32x96xbf16> to vector<32x16xbf16>
    %102 = vector.extract_strided_slice %100 {offsets = [0, 32], sizes = [32, 16], strides = [1, 1]} : vector<32x96xbf16> to vector<32x16xbf16>
    %103 = vector.extract_strided_slice %100 {offsets = [0, 64], sizes = [32, 16], strides = [1, 1]} : vector<32x96xbf16> to vector<32x16xbf16>
    %c0_41 = arith.constant 0 : index
    %c0_42 = arith.constant 0 : index
    %c0_43 = arith.constant 0 : index
    %c0_44 = arith.constant 0 : index
    %104 = vector.load %arg4[%c0_41, %c0_42, %c0_43, %c0_44] : memref<1x2x32x32xf32, #tpu.memory_space<vmem>>, vector<1x1x32x32xf32>
    %105 = vector.shape_cast %104 : vector<1x1x32x32xf32> to vector<32x32xf32>
    %106 = tpu.transpose %102, [1, 0] : vector<32x16xbf16> -> vector<16x32xbf16>
    %cst_45 = arith.constant dense<0.000000e+00> : vector<32x32xf32>
    %107 = tpu.matmul %101, %106, %cst_45 {dimension_numbers = #tpu.dot_dimension_numbers<[1], [0], [0], [1], [0, 0, 1, 1], [], []>} : vector<32x16xbf16>, vector<16x32xbf16>, vector<32x32xf32> -> vector<32x32xf32>
    %cst_46 = arith.constant 2.500000e-01 : f32
    %108 = vector.broadcast %cst_46 : f32 to vector<32x32xf32>
    %109 = arith.mulf %107, %108 : vector<32x32xf32>
    %110 = arith.addf %109, %105 : vector<32x32xf32>
    %cst_47 = arith.constant dense<0xFF800000> : vector<32xf32>
    %111 = vector.multi_reduction <maximumf>, %110, %cst_47 [1] : vector<32x32xf32> to vector<32xf32>
    %112 = vector.shape_cast %111 : vector<32xf32> to vector<32x1xf32>
    %113 = vector.broadcast %112 : vector<32x1xf32> to vector<32x32xf32>
    %114 = arith.subf %110, %113 : vector<32x32xf32>
    %115 = math.exp %114 : vector<32x32xf32>
    %cst_48 = arith.constant dense<0.000000e+00> : vector<32xf32>
    %116 = vector.multi_reduction <add>, %115, %cst_48 [1] : vector<32x32xf32> to vector<32xf32>
    %117 = vector.shape_cast %116 : vector<32xf32> to vector<32x1xf32>
    %118 = arith.truncf %115 : vector<32x32xf32> to vector<32x32xbf16>
    %cst_49 = arith.constant dense<0.000000e+00> : vector<32x16xf32>
    %119 = tpu.matmul %118, %103, %cst_49 {dimension_numbers = #tpu.dot_dimension_numbers<[1], [0], [0], [1], [0, 0, 1, 1], [], []>} : vector<32x32xbf16>, vector<32x16xbf16>, vector<32x16xf32> -> vector<32x16xf32>
    %120 = tpu.reciprocal %117 {approx = true} : vector<32x1xf32> -> vector<32x1xf32>
    %121 = vector.broadcast %120 : vector<32x1xf32> to vector<32x16xf32>
    %122 = arith.mulf %119, %121 : vector<32x16xf32>
    %123 = vector.extract_strided_slice %100 {offsets = [0, 16], sizes = [32, 16], strides = [1, 1]} : vector<32x96xbf16> to vector<32x16xbf16>
    %124 = vector.extract_strided_slice %100 {offsets = [0, 48], sizes = [32, 16], strides = [1, 1]} : vector<32x96xbf16> to vector<32x16xbf16>
    %125 = vector.extract_strided_slice %100 {offsets = [0, 80], sizes = [32, 16], strides = [1, 1]} : vector<32x96xbf16> to vector<32x16xbf16>
    %c0_50 = arith.constant 0 : index
    %c1_51 = arith.constant 1 : index
    %c0_52 = arith.constant 0 : index
    %c0_53 = arith.constant 0 : index
    %126 = vector.load %arg4[%c0_50, %c1_51, %c0_52, %c0_53] : memref<1x2x32x32xf32, #tpu.memory_space<vmem>>, vector<1x1x32x32xf32>
    %127 = vector.shape_cast %126 : vector<1x1x32x32xf32> to vector<32x32xf32>
    %128 = tpu.transpose %124, [1, 0] : vector<32x16xbf16> -> vector<16x32xbf16>
    %cst_54 = arith.constant dense<0.000000e+00> : vector<32x32xf32>
    %129 = tpu.matmul %123, %128, %cst_54 {dimension_numbers = #tpu.dot_dimension_numbers<[1], [0], [0], [1], [0, 0, 1, 1], [], []>} : vector<32x16xbf16>, vector<16x32xbf16>, vector<32x32xf32> -> vector<32x32xf32>
    %cst_55 = arith.constant 2.500000e-01 : f32
    %130 = vector.broadcast %cst_55 : f32 to vector<32x32xf32>
    %131 = arith.mulf %129, %130 : vector<32x32xf32>
    %132 = arith.addf %131, %127 : vector<32x32xf32>
    %cst_56 = arith.constant dense<0xFF800000> : vector<32xf32>
    %133 = vector.multi_reduction <maximumf>, %132, %cst_56 [1] : vector<32x32xf32> to vector<32xf32>
    %134 = vector.shape_cast %133 : vector<32xf32> to vector<32x1xf32>
    %135 = vector.broadcast %134 : vector<32x1xf32> to vector<32x32xf32>
    %136 = arith.subf %132, %135 : vector<32x32xf32>
    %137 = math.exp %136 : vector<32x32xf32>
    %cst_57 = arith.constant dense<0.000000e+00> : vector<32xf32>
    %138 = vector.multi_reduction <add>, %137, %cst_57 [1] : vector<32x32xf32> to vector<32xf32>
    %139 = vector.shape_cast %138 : vector<32xf32> to vector<32x1xf32>
    %140 = arith.truncf %137 : vector<32x32xf32> to vector<32x32xbf16>
    %cst_58 = arith.constant dense<0.000000e+00> : vector<32x16xf32>
    %141 = tpu.matmul %140, %125, %cst_58 {dimension_numbers = #tpu.dot_dimension_numbers<[1], [0], [0], [1], [0, 0, 1, 1], [], []>} : vector<32x32xbf16>, vector<32x16xbf16>, vector<32x16xf32> -> vector<32x16xf32>
    %142 = tpu.reciprocal %139 {approx = true} : vector<32x1xf32> -> vector<32x1xf32>
    %143 = vector.broadcast %142 : vector<32x1xf32> to vector<32x16xf32>
    %144 = arith.mulf %141, %143 : vector<32x16xf32>
    %145 = tpu.concatenate %122, %144 in 1 : vector<32x16xf32>, vector<32x16xf32> -> vector<32x32xf32>
    %146 = vector.extract_strided_slice %7 {offsets = [96, 0], sizes = [32, 96], strides = [1, 1]} : vector<128x96xbf16> to vector<32x96xbf16>
    %147 = vector.extract_strided_slice %146 {offsets = [0, 0], sizes = [32, 16], strides = [1, 1]} : vector<32x96xbf16> to vector<32x16xbf16>
    %148 = vector.extract_strided_slice %146 {offsets = [0, 32], sizes = [32, 16], strides = [1, 1]} : vector<32x96xbf16> to vector<32x16xbf16>
    %149 = vector.extract_strided_slice %146 {offsets = [0, 64], sizes = [32, 16], strides = [1, 1]} : vector<32x96xbf16> to vector<32x16xbf16>
    %c0_59 = arith.constant 0 : index
    %c0_60 = arith.constant 0 : index
    %c0_61 = arith.constant 0 : index
    %c0_62 = arith.constant 0 : index
    %150 = vector.load %arg4[%c0_59, %c0_60, %c0_61, %c0_62] : memref<1x2x32x32xf32, #tpu.memory_space<vmem>>, vector<1x1x32x32xf32>
    %151 = vector.shape_cast %150 : vector<1x1x32x32xf32> to vector<32x32xf32>
    %152 = tpu.transpose %148, [1, 0] : vector<32x16xbf16> -> vector<16x32xbf16>
    %cst_63 = arith.constant dense<0.000000e+00> : vector<32x32xf32>
    %153 = tpu.matmul %147, %152, %cst_63 {dimension_numbers = #tpu.dot_dimension_numbers<[1], [0], [0], [1], [0, 0, 1, 1], [], []>} : vector<32x16xbf16>, vector<16x32xbf16>, vector<32x32xf32> -> vector<32x32xf32>
    %cst_64 = arith.constant 2.500000e-01 : f32
    %154 = vector.broadcast %cst_64 : f32 to vector<32x32xf32>
    %155 = arith.mulf %153, %154 : vector<32x32xf32>
    %156 = arith.addf %155, %151 : vector<32x32xf32>
    %cst_65 = arith.constant dense<0xFF800000> : vector<32xf32>
    %157 = vector.multi_reduction <maximumf>, %156, %cst_65 [1] : vector<32x32xf32> to vector<32xf32>
    %158 = vector.shape_cast %157 : vector<32xf32> to vector<32x1xf32>
    %159 = vector.broadcast %158 : vector<32x1xf32> to vector<32x32xf32>
    %160 = arith.subf %156, %159 : vector<32x32xf32>
    %161 = math.exp %160 : vector<32x32xf32>
    %cst_66 = arith.constant dense<0.000000e+00> : vector<32xf32>
    %162 = vector.multi_reduction <add>, %161, %cst_66 [1] : vector<32x32xf32> to vector<32xf32>
    %163 = vector.shape_cast %162 : vector<32xf32> to vector<32x1xf32>
    %164 = arith.truncf %161 : vector<32x32xf32> to vector<32x32xbf16>
    %cst_67 = arith.constant dense<0.000000e+00> : vector<32x16xf32>
    %165 = tpu.matmul %164, %149, %cst_67 {dimension_numbers = #tpu.dot_dimension_numbers<[1], [0], [0], [1], [0, 0, 1, 1], [], []>} : vector<32x32xbf16>, vector<32x16xbf16>, vector<32x16xf32> -> vector<32x16xf32>
    %166 = tpu.reciprocal %163 {approx = true} : vector<32x1xf32> -> vector<32x1xf32>
    %167 = vector.broadcast %166 : vector<32x1xf32> to vector<32x16xf32>
    %168 = arith.mulf %165, %167 : vector<32x16xf32>
    %169 = vector.extract_strided_slice %146 {offsets = [0, 16], sizes = [32, 16], strides = [1, 1]} : vector<32x96xbf16> to vector<32x16xbf16>
    %170 = vector.extract_strided_slice %146 {offsets = [0, 48], sizes = [32, 16], strides = [1, 1]} : vector<32x96xbf16> to vector<32x16xbf16>
    %171 = vector.extract_strided_slice %146 {offsets = [0, 80], sizes = [32, 16], strides = [1, 1]} : vector<32x96xbf16> to vector<32x16xbf16>
    %c0_68 = arith.constant 0 : index
    %c1_69 = arith.constant 1 : index
    %c0_70 = arith.constant 0 : index
    %c0_71 = arith.constant 0 : index
    %172 = vector.load %arg4[%c0_68, %c1_69, %c0_70, %c0_71] : memref<1x2x32x32xf32, #tpu.memory_space<vmem>>, vector<1x1x32x32xf32>
    %173 = vector.shape_cast %172 : vector<1x1x32x32xf32> to vector<32x32xf32>
    %174 = tpu.transpose %170, [1, 0] : vector<32x16xbf16> -> vector<16x32xbf16>
    %cst_72 = arith.constant dense<0.000000e+00> : vector<32x32xf32>
    %175 = tpu.matmul %169, %174, %cst_72 {dimension_numbers = #tpu.dot_dimension_numbers<[1], [0], [0], [1], [0, 0, 1, 1], [], []>} : vector<32x16xbf16>, vector<16x32xbf16>, vector<32x32xf32> -> vector<32x32xf32>
    %cst_73 = arith.constant 2.500000e-01 : f32
    %176 = vector.broadcast %cst_73 : f32 to vector<32x32xf32>
    %177 = arith.mulf %175, %176 : vector<32x32xf32>
    %178 = arith.addf %177, %173 : vector<32x32xf32>
    %cst_74 = arith.constant dense<0xFF800000> : vector<32xf32>
    %179 = vector.multi_reduction <maximumf>, %178, %cst_74 [1] : vector<32x32xf32> to vector<32xf32>
    %180 = vector.shape_cast %179 : vector<32xf32> to vector<32x1xf32>
    %181 = vector.broadcast %180 : vector<32x1xf32> to vector<32x32xf32>
    %182 = arith.subf %178, %181 : vector<32x32xf32>
    %183 = math.exp %182 : vector<32x32xf32>
    %cst_75 = arith.constant dense<0.000000e+00> : vector<32xf32>
    %184 = vector.multi_reduction <add>, %183, %cst_75 [1] : vector<32x32xf32> to vector<32xf32>
    %185 = vector.shape_cast %184 : vector<32xf32> to vector<32x1xf32>
    %186 = arith.truncf %183 : vector<32x32xf32> to vector<32x32xbf16>
    %cst_76 = arith.constant dense<0.000000e+00> : vector<32x16xf32>
    %187 = tpu.matmul %186, %171, %cst_76 {dimension_numbers = #tpu.dot_dimension_numbers<[1], [0], [0], [1], [0, 0, 1, 1], [], []>} : vector<32x32xbf16>, vector<32x16xbf16>, vector<32x16xf32> -> vector<32x16xf32>
    %188 = tpu.reciprocal %185 {approx = true} : vector<32x1xf32> -> vector<32x1xf32>
    %189 = vector.broadcast %188 : vector<32x1xf32> to vector<32x16xf32>
    %190 = arith.mulf %187, %189 : vector<32x16xf32>
    %191 = tpu.concatenate %168, %190 in 1 : vector<32x16xf32>, vector<32x16xf32> -> vector<32x32xf32>
    %192 = tpu.concatenate %53, %99, %145, %191 in 0 : vector<32x32xf32>, vector<32x32xf32>, vector<32x32xf32>, vector<32x32xf32> -> vector<128x32xf32>
    %193 = arith.truncf %192 : vector<128x32xf32> to vector<128x32xbf16>
    %c0_77 = arith.constant 0 : index
    %c0_78 = arith.constant 0 : index
    %194 = vector.load %arg5[%c0_77, %c0_78] : memref<32x32xbf16, #tpu.memory_space<vmem>>, vector<32x32xbf16>
    %cst_79 = arith.constant dense<0.000000e+00> : vector<128x32xf32>
    %195 = tpu.matmul %193, %194, %cst_79 {dimension_numbers = #tpu.dot_dimension_numbers<[1], [0], [0], [1], [0, 0, 1, 1], [], []>} : vector<128x32xbf16>, vector<32x32xbf16>, vector<128x32xf32> -> vector<128x32xf32>
    %c0_80 = arith.constant 0 : index
    %c0_81 = arith.constant 0 : index
    %196 = vector.load %arg6[%c0_80, %c0_81] : memref<1x32xf32, #tpu.memory_space<vmem>>, vector<1x32xf32>
    %197 = vector.broadcast %196 : vector<1x32xf32> to vector<128x32xf32>
    %198 = arith.addf %195, %197 : vector<128x32xf32>
    %199 = vector.shape_cast %198 : vector<128x32xf32> to vector<4x32x32xf32>
    %c0_82 = arith.constant 0 : index
    %c0_83 = arith.constant 0 : index
    %c0_84 = arith.constant 0 : index
    %200 = vector.load %arg7[%c0_82, %c0_83, %c0_84] : memref<4x32x32xf32, #tpu.memory_space<vmem>>, vector<4x32x32xf32>
    tpu.vector_store %arg7[%c0_82, %c0_83, %c0_84], %199 {strides = array<i32>} : memref<4x32x32xf32, #tpu.memory_space<vmem>>, vector<4x32x32xf32>,
    return
  }
  func.func @transform_0(%arg0: i32) -> (i32, i32, i32) {
    %c0_i32 = arith.constant 0 : i32
    %c0_i32_0 = arith.constant 0 : i32
    %c0_i32_1 = arith.constant 0 : i32
    return %arg0, %c0_i32, %c0_i32_0 : i32, i32, i32
  }
  func.func @transform_1(%arg0: i32) -> (i32, i32) {
    %c0_i32 = arith.constant 0 : i32
    %c0_i32_0 = arith.constant 0 : i32
    %c0_i32_1 = arith.constant 0 : i32
    return %c0_i32, %c0_i32_0 : i32, i32
  }
  func.func @transform_2(%arg0: i32) -> (i32, i32) {
    %c0_i32 = arith.constant 0 : i32
    %c0_i32_0 = arith.constant 0 : i32
    %c0_i32_1 = arith.constant 0 : i32
    return %c0_i32, %c0_i32_0 : i32, i32
  }
  func.func @transform_3(%arg0: i32) -> (i32, i32, i32, i32) {
    %c0_i32 = arith.constant 0 : i32
    %c0_i32_0 = arith.constant 0 : i32
    %c0_i32_1 = arith.constant 0 : i32
    %c0_i32_2 = arith.constant 0 : i32
    %c0_i32_3 = arith.constant 0 : i32
    return %c0_i32, %c0_i32_0, %c0_i32_1, %c0_i32_2 : i32, i32, i32, i32
  }
  func.func @transform_4(%arg0: i32) -> (i32, i32) {
    %c0_i32 = arith.constant 0 : i32
    %c0_i32_0 = arith.constant 0 : i32
    %c0_i32_1 = arith.constant 0 : i32
    return %c0_i32, %c0_i32_0 : i32, i32
  }
  func.func @transform_5(%arg0: i32) -> (i32, i32) {
    %c0_i32 = arith.constant 0 : i32
    %c0_i32_0 = arith.constant 0 : i32
    %c0_i32_1 = arith.constant 0 : i32
    return %c0_i32, %c0_i32_0 : i32, i32
  }
  func.func @transform_6(%arg0: i32) -> (i32, i32, i32) {
    %c0_i32 = arith.constant 0 : i32
    %c0_i32_0 = arith.constant 0 : i32
    %c0_i32_1 = arith.constant 0 : i32
    return %arg0, %c0_i32, %c0_i32_0 : i32, i32, i32
  }
}

module attributes {stable_mosaic.version = 11 : i64} {
  func.func @_mlp_kernel(%arg0: i32, %arg1: memref<128x32xf32, #tpu.memory_space<vmem>>, %arg2: memref<1x32xf32, #tpu.memory_space<vmem>>, %arg3: memref<1x32xf32, #tpu.memory_space<vmem>>, %arg4: memref<32x128xbf16, #tpu.memory_space<vmem>>, %arg5: memref<1x128xf32, #tpu.memory_space<vmem>>, %arg6: memref<128x32xbf16, #tpu.memory_space<vmem>>, %arg7: memref<1x32xf32, #tpu.memory_space<vmem>>, %arg8: memref<128x32xf32, #tpu.memory_space<vmem>>) attributes {dimension_semantics = [#tpu.dimension_semantics<parallel>], iteration_bounds = array<i64: 1>, scalar_prefetch = 0 : i64, scratch_operands = 0 : i64, tpu.core_type = #tpu.core_type<tc>, window_params = [{transform_indices = @transform_0, window_bounds = array<i64: 128, 32>}, {pipeline_mode = #tpu.pipeline_mode<synchronous>, transform_indices = @transform_1, window_bounds = array<i64: 1, 32>}, {pipeline_mode = #tpu.pipeline_mode<synchronous>, transform_indices = @transform_2, window_bounds = array<i64: 1, 32>}, {pipeline_mode = #tpu.pipeline_mode<synchronous>, transform_indices = @transform_3, window_bounds = array<i64: 32, 128>}, {pipeline_mode = #tpu.pipeline_mode<synchronous>, transform_indices = @transform_4, window_bounds = array<i64: 1, 128>}, {pipeline_mode = #tpu.pipeline_mode<synchronous>, transform_indices = @transform_5, window_bounds = array<i64: 128, 32>}, {pipeline_mode = #tpu.pipeline_mode<synchronous>, transform_indices = @transform_6, window_bounds = array<i64: 1, 32>}, {transform_indices = @transform_7, window_bounds = array<i64: 128, 32>}]} {
    %c0 = arith.constant 0 : index
    %c0_0 = arith.constant 0 : index
    %0 = vector.load %arg1[%c0, %c0_0] : memref<128x32xf32, #tpu.memory_space<vmem>>, vector<128x32xf32>
    %cst = arith.constant dense<0.000000e+00> : vector<128xf32>
    %1 = vector.multi_reduction <add>, %0, %cst [1] : vector<128x32xf32> to vector<128xf32>
    %2 = vector.shape_cast %1 : vector<128xf32> to vector<128x1xf32>
    %cst_1 = arith.constant 3.200000e+01 : f32
    %3 = vector.broadcast %cst_1 : f32 to vector<128x1xf32>
    %4 = arith.divf %2, %3 : vector<128x1xf32>
    %5 = vector.broadcast %4 : vector<128x1xf32> to vector<128x32xf32>
    %6 = arith.subf %0, %5 : vector<128x32xf32>
    %7 = arith.mulf %6, %6 : vector<128x32xf32>
    %cst_2 = arith.constant dense<0.000000e+00> : vector<128xf32>
    %8 = vector.multi_reduction <add>, %7, %cst_2 [1] : vector<128x32xf32> to vector<128xf32>
    %9 = vector.shape_cast %8 : vector<128xf32> to vector<128x1xf32>
    %cst_3 = arith.constant 3.200000e+01 : f32
    %10 = vector.broadcast %cst_3 : f32 to vector<128x1xf32>
    %11 = arith.divf %9, %10 : vector<128x1xf32>
    %12 = vector.broadcast %4 : vector<128x1xf32> to vector<128x32xf32>
    %13 = arith.subf %0, %12 : vector<128x32xf32>
    %cst_4 = arith.constant 9.99999974E-6 : f32
    %14 = vector.broadcast %cst_4 : f32 to vector<128x1xf32>
    %15 = arith.addf %11, %14 : vector<128x1xf32>
    %16 = math.rsqrt %15 : vector<128x1xf32>
    %17 = vector.broadcast %16 : vector<128x1xf32> to vector<128x32xf32>
    %18 = arith.mulf %13, %17 : vector<128x32xf32>
    %c0_5 = arith.constant 0 : index
    %c0_6 = arith.constant 0 : index
    %19 = vector.load %arg2[%c0_5, %c0_6] : memref<1x32xf32, #tpu.memory_space<vmem>>, vector<1x32xf32>
    %20 = vector.broadcast %19 : vector<1x32xf32> to vector<128x32xf32>
    %21 = arith.mulf %18, %20 : vector<128x32xf32>
    %c0_7 = arith.constant 0 : index
    %c0_8 = arith.constant 0 : index
    %22 = vector.load %arg3[%c0_7, %c0_8] : memref<1x32xf32, #tpu.memory_space<vmem>>, vector<1x32xf32>
    %23 = vector.broadcast %22 : vector<1x32xf32> to vector<128x32xf32>
    %24 = arith.addf %21, %23 : vector<128x32xf32>
    %25 = arith.truncf %24 : vector<128x32xf32> to vector<128x32xbf16>
    %c0_9 = arith.constant 0 : index
    %c0_10 = arith.constant 0 : index
    %26 = vector.load %arg4[%c0_9, %c0_10] : memref<32x128xbf16, #tpu.memory_space<vmem>>, vector<32x128xbf16>
    %cst_11 = arith.constant dense<0.000000e+00> : vector<128x128xf32>
    %27 = tpu.matmul %25, %26, %cst_11 {dimension_numbers = #tpu.dot_dimension_numbers<[1], [0], [0], [1], [0, 0, 1, 1], [], []>} : vector<128x32xbf16>, vector<32x128xbf16>, vector<128x128xf32> -> vector<128x128xf32>
    %c0_12 = arith.constant 0 : index
    %c0_13 = arith.constant 0 : index
    %28 = vector.load %arg5[%c0_12, %c0_13] : memref<1x128xf32, #tpu.memory_space<vmem>>, vector<1x128xf32>
    %29 = vector.broadcast %28 : vector<1x128xf32> to vector<128x128xf32>
    %30 = arith.addf %27, %29 : vector<128x128xf32>
    %cst_14 = arith.constant 5.000000e-01 : f32
    %31 = vector.broadcast %cst_14 : f32 to vector<128x128xf32>
    %32 = arith.mulf %31, %30 : vector<128x128xf32>
    %cst_15 = arith.constant 4.471500e-02 : f32
    %33 = vector.broadcast %cst_15 : f32 to vector<128x128xf32>
    %34 = arith.mulf %33, %30 : vector<128x128xf32>
    %35 = arith.mulf %34, %30 : vector<128x128xf32>
    %36 = arith.mulf %35, %30 : vector<128x128xf32>
    %37 = arith.addf %30, %36 : vector<128x128xf32>
    %cst_16 = arith.constant 0.797884583 : f32
    %38 = vector.broadcast %cst_16 : f32 to vector<128x128xf32>
    %39 = arith.mulf %38, %37 : vector<128x128xf32>
    %40 = math.tanh %39 : vector<128x128xf32>
    %cst_17 = arith.constant 1.000000e+00 : f32
    %41 = vector.broadcast %cst_17 : f32 to vector<128x128xf32>
    %42 = arith.addf %41, %40 : vector<128x128xf32>
    %43 = arith.mulf %32, %42 : vector<128x128xf32>
    %44 = arith.truncf %43 : vector<128x128xf32> to vector<128x128xbf16>
    %c0_18 = arith.constant 0 : index
    %c0_19 = arith.constant 0 : index
    %45 = vector.load %arg6[%c0_18, %c0_19] : memref<128x32xbf16, #tpu.memory_space<vmem>>, vector<128x32xbf16>
    %cst_20 = arith.constant dense<0.000000e+00> : vector<128x32xf32>
    %46 = tpu.matmul %44, %45, %cst_20 {dimension_numbers = #tpu.dot_dimension_numbers<[1], [0], [0], [1], [0, 0, 1, 1], [], []>} : vector<128x128xbf16>, vector<128x32xbf16>, vector<128x32xf32> -> vector<128x32xf32>
    %c0_21 = arith.constant 0 : index
    %c0_22 = arith.constant 0 : index
    %47 = vector.load %arg7[%c0_21, %c0_22] : memref<1x32xf32, #tpu.memory_space<vmem>>, vector<1x32xf32>
    %48 = vector.broadcast %47 : vector<1x32xf32> to vector<128x32xf32>
    %49 = arith.addf %46, %48 : vector<128x32xf32>
    %c0_23 = arith.constant 0 : index
    %c0_24 = arith.constant 0 : index
    %50 = vector.load %arg8[%c0_23, %c0_24] : memref<128x32xf32, #tpu.memory_space<vmem>>, vector<128x32xf32>
    tpu.vector_store %arg8[%c0_23, %c0_24], %49 {strides = array<i32>} : memref<128x32xf32, #tpu.memory_space<vmem>>, vector<128x32xf32>,
    return
  }
  func.func @transform_0(%arg0: i32) -> (i32, i32) {
    %c0_i32 = arith.constant 0 : i32
    %c0_i32_0 = arith.constant 0 : i32
    return %arg0, %c0_i32 : i32, i32
  }
  func.func @transform_1(%arg0: i32) -> (i32, i32) {
    %c0_i32 = arith.constant 0 : i32
    %c0_i32_0 = arith.constant 0 : i32
    %c0_i32_1 = arith.constant 0 : i32
    return %c0_i32, %c0_i32_0 : i32, i32
  }
  func.func @transform_2(%arg0: i32) -> (i32, i32) {
    %c0_i32 = arith.constant 0 : i32
    %c0_i32_0 = arith.constant 0 : i32
    %c0_i32_1 = arith.constant 0 : i32
    return %c0_i32, %c0_i32_0 : i32, i32
  }
  func.func @transform_3(%arg0: i32) -> (i32, i32) {
    %c0_i32 = arith.constant 0 : i32
    %c0_i32_0 = arith.constant 0 : i32
    %c0_i32_1 = arith.constant 0 : i32
    return %c0_i32, %c0_i32_0 : i32, i32
  }
  func.func @transform_4(%arg0: i32) -> (i32, i32) {
    %c0_i32 = arith.constant 0 : i32
    %c0_i32_0 = arith.constant 0 : i32
    %c0_i32_1 = arith.constant 0 : i32
    return %c0_i32, %c0_i32_0 : i32, i32
  }
  func.func @transform_5(%arg0: i32) -> (i32, i32) {
    %c0_i32 = arith.constant 0 : i32
    %c0_i32_0 = arith.constant 0 : i32
    %c0_i32_1 = arith.constant 0 : i32
    return %c0_i32, %c0_i32_0 : i32, i32
  }
  func.func @transform_6(%arg0: i32) -> (i32, i32) {
    %c0_i32 = arith.constant 0 : i32
    %c0_i32_0 = arith.constant 0 : i32
    %c0_i32_1 = arith.constant 0 : i32
    return %c0_i32, %c0_i32_0 : i32, i32
  }
  func.func @transform_7(%arg0: i32) -> (i32, i32) {
    %c0_i32 = arith.constant 0 : i32
    %c0_i32_0 = arith.constant 0 : i32
    return %arg0, %c0_i32 : i32, i32
  }
}

module attributes {stable_mosaic.version = 11 : i64} {
  func.func @_mm_kernel(%arg0: i32, %arg1: memref<32x128xbf16, #tpu.memory_space<vmem>>, %arg2: memref<128x64xbf16, #tpu.memory_space<vmem>>, %arg3: memref<1x64xf32, #tpu.memory_space<vmem>>, %arg4: memref<32x64xf32, #tpu.memory_space<vmem>>) attributes {dimension_semantics = [#tpu.dimension_semantics<parallel>], iteration_bounds = array<i64: 1>, scalar_prefetch = 0 : i64, scratch_operands = 0 : i64, tpu.core_type = #tpu.core_type<tc>, window_params = [{transform_indices = @transform_0, window_bounds = array<i64: 32, 128>}, {pipeline_mode = #tpu.pipeline_mode<synchronous>, transform_indices = @transform_1, window_bounds = array<i64: 128, 64>}, {pipeline_mode = #tpu.pipeline_mode<synchronous>, transform_indices = @transform_2, window_bounds = array<i64: 1, 64>}, {transform_indices = @transform_3, window_bounds = array<i64: 32, 64>}]} {
    %c0 = arith.constant 0 : index
    %c0_0 = arith.constant 0 : index
    %0 = vector.load %arg1[%c0, %c0_0] : memref<32x128xbf16, #tpu.memory_space<vmem>>, vector<32x128xbf16>
    %c0_1 = arith.constant 0 : index
    %c0_2 = arith.constant 0 : index
    %1 = vector.load %arg2[%c0_1, %c0_2] : memref<128x64xbf16, #tpu.memory_space<vmem>>, vector<128x64xbf16>
    %cst = arith.constant dense<0.000000e+00> : vector<32x64xf32>
    %2 = tpu.matmul %0, %1, %cst {dimension_numbers = #tpu.dot_dimension_numbers<[1], [0], [0], [1], [0, 0, 1, 1], [], []>} : vector<32x128xbf16>, vector<128x64xbf16>, vector<32x64xf32> -> vector<32x64xf32>
    %c0_3 = arith.constant 0 : index
    %c0_4 = arith.constant 0 : index
    %3 = vector.load %arg3[%c0_3, %c0_4] : memref<1x64xf32, #tpu.memory_space<vmem>>, vector<1x64xf32>
    %4 = vector.broadcast %3 : vector<1x64xf32> to vector<32x64xf32>
    %5 = arith.addf %2, %4 : vector<32x64xf32>
    %c0_5 = arith.constant 0 : index
    %c0_6 = arith.constant 0 : index
    %6 = vector.load %arg4[%c0_5, %c0_6] : memref<32x64xf32, #tpu.memory_space<vmem>>, vector<32x64xf32>
    tpu.vector_store %arg4[%c0_5, %c0_6], %5 {strides = array<i32>} : memref<32x64xf32, #tpu.memory_space<vmem>>, vector<32x64xf32>,
    return
  }
  func.func @transform_0(%arg0: i32) -> (i32, i32) {
    %c0_i32 = arith.constant 0 : i32
    %c0_i32_0 = arith.constant 0 : i32
    return %arg0, %c0_i32 : i32, i32
  }
  func.func @transform_1(%arg0: i32) -> (i32, i32) {
    %c0_i32 = arith.constant 0 : i32
    %c0_i32_0 = arith.constant 0 : i32
    %c0_i32_1 = arith.constant 0 : i32
    return %c0_i32, %c0_i32_0 : i32, i32
  }
  func.func @transform_2(%arg0: i32) -> (i32, i32) {
    %c0_i32 = arith.constant 0 : i32
    %c0_i32_0 = arith.constant 0 : i32
    %c0_i32_1 = arith.constant 0 : i32
    return %c0_i32, %c0_i32_0 : i32, i32
  }
  func.func @transform_3(%arg0: i32) -> (i32, i32) {
    %c0_i32 = arith.constant 0 : i32
    %c0_i32_0 = arith.constant 0 : i32
    return %arg0, %c0_i32 : i32, i32
  }
}

module attributes {stable_mosaic.version = 11 : i64} {
  func.func @_layernorm_kernel(%arg0: i32, %arg1: memref<32x64xf32, #tpu.memory_space<vmem>>, %arg2: memref<1x64xf32, #tpu.memory_space<vmem>>, %arg3: memref<1x64xf32, #tpu.memory_space<vmem>>, %arg4: memref<32x64xbf16, #tpu.memory_space<vmem>>) attributes {dimension_semantics = [#tpu.dimension_semantics<parallel>], iteration_bounds = array<i64: 1>, scalar_prefetch = 0 : i64, scratch_operands = 0 : i64, tpu.core_type = #tpu.core_type<tc>, window_params = [{transform_indices = @transform_0, window_bounds = array<i64: 32, 64>}, {pipeline_mode = #tpu.pipeline_mode<synchronous>, transform_indices = @transform_1, window_bounds = array<i64: 1, 64>}, {pipeline_mode = #tpu.pipeline_mode<synchronous>, transform_indices = @transform_2, window_bounds = array<i64: 1, 64>}, {transform_indices = @transform_3, window_bounds = array<i64: 32, 64>}]} {
    %c0 = arith.constant 0 : index
    %c0_0 = arith.constant 0 : index
    %0 = vector.load %arg1[%c0, %c0_0] : memref<32x64xf32, #tpu.memory_space<vmem>>, vector<32x64xf32>
    %cst = arith.constant dense<0.000000e+00> : vector<32xf32>
    %1 = vector.multi_reduction <add>, %0, %cst [1] : vector<32x64xf32> to vector<32xf32>
    %2 = vector.shape_cast %1 : vector<32xf32> to vector<32x1xf32>
    %cst_1 = arith.constant 6.400000e+01 : f32
    %3 = vector.broadcast %cst_1 : f32 to vector<32x1xf32>
    %4 = arith.divf %2, %3 : vector<32x1xf32>
    %5 = vector.broadcast %4 : vector<32x1xf32> to vector<32x64xf32>
    %6 = arith.subf %0, %5 : vector<32x64xf32>
    %7 = arith.mulf %6, %6 : vector<32x64xf32>
    %cst_2 = arith.constant dense<0.000000e+00> : vector<32xf32>
    %8 = vector.multi_reduction <add>, %7, %cst_2 [1] : vector<32x64xf32> to vector<32xf32>
    %9 = vector.shape_cast %8 : vector<32xf32> to vector<32x1xf32>
    %cst_3 = arith.constant 6.400000e+01 : f32
    %10 = vector.broadcast %cst_3 : f32 to vector<32x1xf32>
    %11 = arith.divf %9, %10 : vector<32x1xf32>
    %12 = vector.broadcast %4 : vector<32x1xf32> to vector<32x64xf32>
    %13 = arith.subf %0, %12 : vector<32x64xf32>
    %cst_4 = arith.constant 9.99999974E-6 : f32
    %14 = vector.broadcast %cst_4 : f32 to vector<32x1xf32>
    %15 = arith.addf %11, %14 : vector<32x1xf32>
    %16 = math.rsqrt %15 : vector<32x1xf32>
    %17 = vector.broadcast %16 : vector<32x1xf32> to vector<32x64xf32>
    %18 = arith.mulf %13, %17 : vector<32x64xf32>
    %c0_5 = arith.constant 0 : index
    %c0_6 = arith.constant 0 : index
    %19 = vector.load %arg2[%c0_5, %c0_6] : memref<1x64xf32, #tpu.memory_space<vmem>>, vector<1x64xf32>
    %20 = vector.broadcast %19 : vector<1x64xf32> to vector<32x64xf32>
    %21 = arith.mulf %18, %20 : vector<32x64xf32>
    %c0_7 = arith.constant 0 : index
    %c0_8 = arith.constant 0 : index
    %22 = vector.load %arg3[%c0_7, %c0_8] : memref<1x64xf32, #tpu.memory_space<vmem>>, vector<1x64xf32>
    %23 = vector.broadcast %22 : vector<1x64xf32> to vector<32x64xf32>
    %24 = arith.addf %21, %23 : vector<32x64xf32>
    %25 = arith.truncf %24 : vector<32x64xf32> to vector<32x64xbf16>
    %c0_9 = arith.constant 0 : index
    %c0_10 = arith.constant 0 : index
    %26 = vector.load %arg4[%c0_9, %c0_10] : memref<32x64xbf16, #tpu.memory_space<vmem>>, vector<32x64xbf16>
    tpu.vector_store %arg4[%c0_9, %c0_10], %25 {strides = array<i32>} : memref<32x64xbf16, #tpu.memory_space<vmem>>, vector<32x64xbf16>,
    return
  }
  func.func @transform_0(%arg0: i32) -> (i32, i32) {
    %c0_i32 = arith.constant 0 : i32
    %c0_i32_0 = arith.constant 0 : i32
    return %arg0, %c0_i32 : i32, i32
  }
  func.func @transform_1(%arg0: i32) -> (i32, i32) {
    %c0_i32 = arith.constant 0 : i32
    %c0_i32_0 = arith.constant 0 : i32
    %c0_i32_1 = arith.constant 0 : i32
    return %c0_i32, %c0_i32_0 : i32, i32
  }
  func.func @transform_2(%arg0: i32) -> (i32, i32) {
    %c0_i32 = arith.constant 0 : i32
    %c0_i32_0 = arith.constant 0 : i32
    %c0_i32_1 = arith.constant 0 : i32
    return %c0_i32, %c0_i32_0 : i32, i32
  }
  func.func @transform_3(%arg0: i32) -> (i32, i32) {
    %c0_i32 = arith.constant 0 : i32
    %c0_i32_0 = arith.constant 0 : i32
    return %arg0, %c0_i32 : i32, i32
  }
}

module attributes {stable_mosaic.version = 11 : i64} {
  func.func @_window_attn_kernel(%arg0: i32, %arg1: memref<4x32x32xbf16, #tpu.memory_space<vmem>>, %arg2: memref<32x96xbf16, #tpu.memory_space<vmem>>, %arg3: memref<1x96xf32, #tpu.memory_space<vmem>>, %arg4: memref<4x2x32x32xf32, #tpu.memory_space<vmem>>, %arg5: memref<32x32xbf16, #tpu.memory_space<vmem>>, %arg6: memref<1x32xf32, #tpu.memory_space<vmem>>, %arg7: memref<4x32x32xf32, #tpu.memory_space<vmem>>) attributes {dimension_semantics = [#tpu.dimension_semantics<parallel>], iteration_bounds = array<i64: 1>, scalar_prefetch = 0 : i64, scratch_operands = 0 : i64, tpu.core_type = #tpu.core_type<tc>, window_params = [{transform_indices = @transform_0, window_bounds = array<i64: 4, 32, 32>}, {pipeline_mode = #tpu.pipeline_mode<synchronous>, transform_indices = @transform_1, window_bounds = array<i64: 32, 96>}, {pipeline_mode = #tpu.pipeline_mode<synchronous>, transform_indices = @transform_2, window_bounds = array<i64: 1, 96>}, {pipeline_mode = #tpu.pipeline_mode<synchronous>, transform_indices = @transform_3, window_bounds = array<i64: 4, 2, 32, 32>}, {pipeline_mode = #tpu.pipeline_mode<synchronous>, transform_indices = @transform_4, window_bounds = array<i64: 32, 32>}, {pipeline_mode = #tpu.pipeline_mode<synchronous>, transform_indices = @transform_5, window_bounds = array<i64: 1, 32>}, {transform_indices = @transform_6, window_bounds = array<i64: 4, 32, 32>}]} {
    %c0 = arith.constant 0 : index
    %c0_0 = arith.constant 0 : index
    %c0_1 = arith.constant 0 : index
    %0 = vector.load %arg1[%c0, %c0_0, %c0_1] : memref<4x32x32xbf16, #tpu.memory_space<vmem>>, vector<4x32x32xbf16>
    %1 = vector.shape_cast %0 : vector<4x32x32xbf16> to vector<128x32xbf16>
    %c0_2 = arith.constant 0 : index
    %c0_3 = arith.constant 0 : index
    %2 = vector.load %arg2[%c0_2, %c0_3] : memref<32x96xbf16, #tpu.memory_space<vmem>>, vector<32x96xbf16>
    %cst = arith.constant dense<0.000000e+00> : vector<128x96xf32>
    %3 = tpu.matmul %1, %2, %cst {dimension_numbers = #tpu.dot_dimension_numbers<[1], [0], [0], [1], [0, 0, 1, 1], [], []>} : vector<128x32xbf16>, vector<32x96xbf16>, vector<128x96xf32> -> vector<128x96xf32>
    %c0_4 = arith.constant 0 : index
    %c0_5 = arith.constant 0 : index
    %4 = vector.load %arg3[%c0_4, %c0_5] : memref<1x96xf32, #tpu.memory_space<vmem>>, vector<1x96xf32>
    %5 = vector.broadcast %4 : vector<1x96xf32> to vector<128x96xf32>
    %6 = arith.addf %3, %5 : vector<128x96xf32>
    %7 = arith.truncf %6 : vector<128x96xf32> to vector<128x96xbf16>
    %8 = vector.extract_strided_slice %7 {offsets = [0, 0], sizes = [32, 96], strides = [1, 1]} : vector<128x96xbf16> to vector<32x96xbf16>
    %9 = vector.extract_strided_slice %8 {offsets = [0, 0], sizes = [32, 16], strides = [1, 1]} : vector<32x96xbf16> to vector<32x16xbf16>
    %10 = vector.extract_strided_slice %8 {offsets = [0, 32], sizes = [32, 16], strides = [1, 1]} : vector<32x96xbf16> to vector<32x16xbf16>
    %11 = vector.extract_strided_slice %8 {offsets = [0, 64], sizes = [32, 16], strides = [1, 1]} : vector<32x96xbf16> to vector<32x16xbf16>
    %c0_6 = arith.constant 0 : index
    %c0_7 = arith.constant 0 : index
    %c0_8 = arith.constant 0 : index
    %c0_9 = arith.constant 0 : index
    %12 = vector.load %arg4[%c0_6, %c0_7, %c0_8, %c0_9] : memref<4x2x32x32xf32, #tpu.memory_space<vmem>>, vector<1x1x32x32xf32>
    %13 = vector.shape_cast %12 : vector<1x1x32x32xf32> to vector<32x32xf32>
    %14 = tpu.transpose %10, [1, 0] : vector<32x16xbf16> -> vector<16x32xbf16>
    %cst_10 = arith.constant dense<0.000000e+00> : vector<32x32xf32>
    %15 = tpu.matmul %9, %14, %cst_10 {dimension_numbers = #tpu.dot_dimension_numbers<[1], [0], [0], [1], [0, 0, 1, 1], [], []>} : vector<32x16xbf16>, vector<16x32xbf16>, vector<32x32xf32> -> vector<32x32xf32>
    %cst_11 = arith.constant 2.500000e-01 : f32
    %16 = vector.broadcast %cst_11 : f32 to vector<32x32xf32>
    %17 = arith.mulf %15, %16 : vector<32x32xf32>
    %18 = arith.addf %17, %13 : vector<32x32xf32>
    %cst_12 = arith.constant dense<0xFF800000> : vector<32xf32>
    %19 = vector.multi_reduction <maximumf>, %18, %cst_12 [1] : vector<32x32xf32> to vector<32xf32>
    %20 = vector.shape_cast %19 : vector<32xf32> to vector<32x1xf32>
    %21 = vector.broadcast %20 : vector<32x1xf32> to vector<32x32xf32>
    %22 = arith.subf %18, %21 : vector<32x32xf32>
    %23 = math.exp %22 : vector<32x32xf32>
    %cst_13 = arith.constant dense<0.000000e+00> : vector<32xf32>
    %24 = vector.multi_reduction <add>, %23, %cst_13 [1] : vector<32x32xf32> to vector<32xf32>
    %25 = vector.shape_cast %24 : vector<32xf32> to vector<32x1xf32>
    %26 = arith.truncf %23 : vector<32x32xf32> to vector<32x32xbf16>
    %cst_14 = arith.constant dense<0.000000e+00> : vector<32x16xf32>
    %27 = tpu.matmul %26, %11, %cst_14 {dimension_numbers = #tpu.dot_dimension_numbers<[1], [0], [0], [1], [0, 0, 1, 1], [], []>} : vector<32x32xbf16>, vector<32x16xbf16>, vector<32x16xf32> -> vector<32x16xf32>
    %28 = tpu.reciprocal %25 {approx = true} : vector<32x1xf32> -> vector<32x1xf32>
    %29 = vector.broadcast %28 : vector<32x1xf32> to vector<32x16xf32>
    %30 = arith.mulf %27, %29 : vector<32x16xf32>
    %31 = vector.extract_strided_slice %8 {offsets = [0, 16], sizes = [32, 16], strides = [1, 1]} : vector<32x96xbf16> to vector<32x16xbf16>
    %32 = vector.extract_strided_slice %8 {offsets = [0, 48], sizes = [32, 16], strides = [1, 1]} : vector<32x96xbf16> to vector<32x16xbf16>
    %33 = vector.extract_strided_slice %8 {offsets = [0, 80], sizes = [32, 16], strides = [1, 1]} : vector<32x96xbf16> to vector<32x16xbf16>
    %c0_15 = arith.constant 0 : index
    %c1 = arith.constant 1 : index
    %c0_16 = arith.constant 0 : index
    %c0_17 = arith.constant 0 : index
    %34 = vector.load %arg4[%c0_15, %c1, %c0_16, %c0_17] : memref<4x2x32x32xf32, #tpu.memory_space<vmem>>, vector<1x1x32x32xf32>
    %35 = vector.shape_cast %34 : vector<1x1x32x32xf32> to vector<32x32xf32>
    %36 = tpu.transpose %32, [1, 0] : vector<32x16xbf16> -> vector<16x32xbf16>
    %cst_18 = arith.constant dense<0.000000e+00> : vector<32x32xf32>
    %37 = tpu.matmul %31, %36, %cst_18 {dimension_numbers = #tpu.dot_dimension_numbers<[1], [0], [0], [1], [0, 0, 1, 1], [], []>} : vector<32x16xbf16>, vector<16x32xbf16>, vector<32x32xf32> -> vector<32x32xf32>
    %cst_19 = arith.constant 2.500000e-01 : f32
    %38 = vector.broadcast %cst_19 : f32 to vector<32x32xf32>
    %39 = arith.mulf %37, %38 : vector<32x32xf32>
    %40 = arith.addf %39, %35 : vector<32x32xf32>
    %cst_20 = arith.constant dense<0xFF800000> : vector<32xf32>
    %41 = vector.multi_reduction <maximumf>, %40, %cst_20 [1] : vector<32x32xf32> to vector<32xf32>
    %42 = vector.shape_cast %41 : vector<32xf32> to vector<32x1xf32>
    %43 = vector.broadcast %42 : vector<32x1xf32> to vector<32x32xf32>
    %44 = arith.subf %40, %43 : vector<32x32xf32>
    %45 = math.exp %44 : vector<32x32xf32>
    %cst_21 = arith.constant dense<0.000000e+00> : vector<32xf32>
    %46 = vector.multi_reduction <add>, %45, %cst_21 [1] : vector<32x32xf32> to vector<32xf32>
    %47 = vector.shape_cast %46 : vector<32xf32> to vector<32x1xf32>
    %48 = arith.truncf %45 : vector<32x32xf32> to vector<32x32xbf16>
    %cst_22 = arith.constant dense<0.000000e+00> : vector<32x16xf32>
    %49 = tpu.matmul %48, %33, %cst_22 {dimension_numbers = #tpu.dot_dimension_numbers<[1], [0], [0], [1], [0, 0, 1, 1], [], []>} : vector<32x32xbf16>, vector<32x16xbf16>, vector<32x16xf32> -> vector<32x16xf32>
    %50 = tpu.reciprocal %47 {approx = true} : vector<32x1xf32> -> vector<32x1xf32>
    %51 = vector.broadcast %50 : vector<32x1xf32> to vector<32x16xf32>
    %52 = arith.mulf %49, %51 : vector<32x16xf32>
    %53 = tpu.concatenate %30, %52 in 1 : vector<32x16xf32>, vector<32x16xf32> -> vector<32x32xf32>
    %54 = vector.extract_strided_slice %7 {offsets = [32, 0], sizes = [32, 96], strides = [1, 1]} : vector<128x96xbf16> to vector<32x96xbf16>
    %55 = vector.extract_strided_slice %54 {offsets = [0, 0], sizes = [32, 16], strides = [1, 1]} : vector<32x96xbf16> to vector<32x16xbf16>
    %56 = vector.extract_strided_slice %54 {offsets = [0, 32], sizes = [32, 16], strides = [1, 1]} : vector<32x96xbf16> to vector<32x16xbf16>
    %57 = vector.extract_strided_slice %54 {offsets = [0, 64], sizes = [32, 16], strides = [1, 1]} : vector<32x96xbf16> to vector<32x16xbf16>
    %c1_23 = arith.constant 1 : index
    %c0_24 = arith.constant 0 : index
    %c0_25 = arith.constant 0 : index
    %c0_26 = arith.constant 0 : index
    %58 = vector.load %arg4[%c1_23, %c0_24, %c0_25, %c0_26] : memref<4x2x32x32xf32, #tpu.memory_space<vmem>>, vector<1x1x32x32xf32>
    %59 = vector.shape_cast %58 : vector<1x1x32x32xf32> to vector<32x32xf32>
    %60 = tpu.transpose %56, [1, 0] : vector<32x16xbf16> -> vector<16x32xbf16>
    %cst_27 = arith.constant dense<0.000000e+00> : vector<32x32xf32>
    %61 = tpu.matmul %55, %60, %cst_27 {dimension_numbers = #tpu.dot_dimension_numbers<[1], [0], [0], [1], [0, 0, 1, 1], [], []>} : vector<32x16xbf16>, vector<16x32xbf16>, vector<32x32xf32> -> vector<32x32xf32>
    %cst_28 = arith.constant 2.500000e-01 : f32
    %62 = vector.broadcast %cst_28 : f32 to vector<32x32xf32>
    %63 = arith.mulf %61, %62 : vector<32x32xf32>
    %64 = arith.addf %63, %59 : vector<32x32xf32>
    %cst_29 = arith.constant dense<0xFF800000> : vector<32xf32>
    %65 = vector.multi_reduction <maximumf>, %64, %cst_29 [1] : vector<32x32xf32> to vector<32xf32>
    %66 = vector.shape_cast %65 : vector<32xf32> to vector<32x1xf32>
    %67 = vector.broadcast %66 : vector<32x1xf32> to vector<32x32xf32>
    %68 = arith.subf %64, %67 : vector<32x32xf32>
    %69 = math.exp %68 : vector<32x32xf32>
    %cst_30 = arith.constant dense<0.000000e+00> : vector<32xf32>
    %70 = vector.multi_reduction <add>, %69, %cst_30 [1] : vector<32x32xf32> to vector<32xf32>
    %71 = vector.shape_cast %70 : vector<32xf32> to vector<32x1xf32>
    %72 = arith.truncf %69 : vector<32x32xf32> to vector<32x32xbf16>
    %cst_31 = arith.constant dense<0.000000e+00> : vector<32x16xf32>
    %73 = tpu.matmul %72, %57, %cst_31 {dimension_numbers = #tpu.dot_dimension_numbers<[1], [0], [0], [1], [0, 0, 1, 1], [], []>} : vector<32x32xbf16>, vector<32x16xbf16>, vector<32x16xf32> -> vector<32x16xf32>
    %74 = tpu.reciprocal %71 {approx = true} : vector<32x1xf32> -> vector<32x1xf32>
    %75 = vector.broadcast %74 : vector<32x1xf32> to vector<32x16xf32>
    %76 = arith.mulf %73, %75 : vector<32x16xf32>
    %77 = vector.extract_strided_slice %54 {offsets = [0, 16], sizes = [32, 16], strides = [1, 1]} : vector<32x96xbf16> to vector<32x16xbf16>
    %78 = vector.extract_strided_slice %54 {offsets = [0, 48], sizes = [32, 16], strides = [1, 1]} : vector<32x96xbf16> to vector<32x16xbf16>
    %79 = vector.extract_strided_slice %54 {offsets = [0, 80], sizes = [32, 16], strides = [1, 1]} : vector<32x96xbf16> to vector<32x16xbf16>
    %c1_32 = arith.constant 1 : index
    %c1_33 = arith.constant 1 : index
    %c0_34 = arith.constant 0 : index
    %c0_35 = arith.constant 0 : index
    %80 = vector.load %arg4[%c1_32, %c1_33, %c0_34, %c0_35] : memref<4x2x32x32xf32, #tpu.memory_space<vmem>>, vector<1x1x32x32xf32>
    %81 = vector.shape_cast %80 : vector<1x1x32x32xf32> to vector<32x32xf32>
    %82 = tpu.transpose %78, [1, 0] : vector<32x16xbf16> -> vector<16x32xbf16>
    %cst_36 = arith.constant dense<0.000000e+00> : vector<32x32xf32>
    %83 = tpu.matmul %77, %82, %cst_36 {dimension_numbers = #tpu.dot_dimension_numbers<[1], [0], [0], [1], [0, 0, 1, 1], [], []>} : vector<32x16xbf16>, vector<16x32xbf16>, vector<32x32xf32> -> vector<32x32xf32>
    %cst_37 = arith.constant 2.500000e-01 : f32
    %84 = vector.broadcast %cst_37 : f32 to vector<32x32xf32>
    %85 = arith.mulf %83, %84 : vector<32x32xf32>
    %86 = arith.addf %85, %81 : vector<32x32xf32>
    %cst_38 = arith.constant dense<0xFF800000> : vector<32xf32>
    %87 = vector.multi_reduction <maximumf>, %86, %cst_38 [1] : vector<32x32xf32> to vector<32xf32>
    %88 = vector.shape_cast %87 : vector<32xf32> to vector<32x1xf32>
    %89 = vector.broadcast %88 : vector<32x1xf32> to vector<32x32xf32>
    %90 = arith.subf %86, %89 : vector<32x32xf32>
    %91 = math.exp %90 : vector<32x32xf32>
    %cst_39 = arith.constant dense<0.000000e+00> : vector<32xf32>
    %92 = vector.multi_reduction <add>, %91, %cst_39 [1] : vector<32x32xf32> to vector<32xf32>
    %93 = vector.shape_cast %92 : vector<32xf32> to vector<32x1xf32>
    %94 = arith.truncf %91 : vector<32x32xf32> to vector<32x32xbf16>
    %cst_40 = arith.constant dense<0.000000e+00> : vector<32x16xf32>
    %95 = tpu.matmul %94, %79, %cst_40 {dimension_numbers = #tpu.dot_dimension_numbers<[1], [0], [0], [1], [0, 0, 1, 1], [], []>} : vector<32x32xbf16>, vector<32x16xbf16>, vector<32x16xf32> -> vector<32x16xf32>
    %96 = tpu.reciprocal %93 {approx = true} : vector<32x1xf32> -> vector<32x1xf32>
    %97 = vector.broadcast %96 : vector<32x1xf32> to vector<32x16xf32>
    %98 = arith.mulf %95, %97 : vector<32x16xf32>
    %99 = tpu.concatenate %76, %98 in 1 : vector<32x16xf32>, vector<32x16xf32> -> vector<32x32xf32>
    %100 = vector.extract_strided_slice %7 {offsets = [64, 0], sizes = [32, 96], strides = [1, 1]} : vector<128x96xbf16> to vector<32x96xbf16>
    %101 = vector.extract_strided_slice %100 {offsets = [0, 0], sizes = [32, 16], strides = [1, 1]} : vector<32x96xbf16> to vector<32x16xbf16>
    %102 = vector.extract_strided_slice %100 {offsets = [0, 32], sizes = [32, 16], strides = [1, 1]} : vector<32x96xbf16> to vector<32x16xbf16>
    %103 = vector.extract_strided_slice %100 {offsets = [0, 64], sizes = [32, 16], strides = [1, 1]} : vector<32x96xbf16> to vector<32x16xbf16>
    %c2 = arith.constant 2 : index
    %c0_41 = arith.constant 0 : index
    %c0_42 = arith.constant 0 : index
    %c0_43 = arith.constant 0 : index
    %104 = vector.load %arg4[%c2, %c0_41, %c0_42, %c0_43] : memref<4x2x32x32xf32, #tpu.memory_space<vmem>>, vector<1x1x32x32xf32>
    %105 = vector.shape_cast %104 : vector<1x1x32x32xf32> to vector<32x32xf32>
    %106 = tpu.transpose %102, [1, 0] : vector<32x16xbf16> -> vector<16x32xbf16>
    %cst_44 = arith.constant dense<0.000000e+00> : vector<32x32xf32>
    %107 = tpu.matmul %101, %106, %cst_44 {dimension_numbers = #tpu.dot_dimension_numbers<[1], [0], [0], [1], [0, 0, 1, 1], [], []>} : vector<32x16xbf16>, vector<16x32xbf16>, vector<32x32xf32> -> vector<32x32xf32>
    %cst_45 = arith.constant 2.500000e-01 : f32
    %108 = vector.broadcast %cst_45 : f32 to vector<32x32xf32>
    %109 = arith.mulf %107, %108 : vector<32x32xf32>
    %110 = arith.addf %109, %105 : vector<32x32xf32>
    %cst_46 = arith.constant dense<0xFF800000> : vector<32xf32>
    %111 = vector.multi_reduction <maximumf>, %110, %cst_46 [1] : vector<32x32xf32> to vector<32xf32>
    %112 = vector.shape_cast %111 : vector<32xf32> to vector<32x1xf32>
    %113 = vector.broadcast %112 : vector<32x1xf32> to vector<32x32xf32>
    %114 = arith.subf %110, %113 : vector<32x32xf32>
    %115 = math.exp %114 : vector<32x32xf32>
    %cst_47 = arith.constant dense<0.000000e+00> : vector<32xf32>
    %116 = vector.multi_reduction <add>, %115, %cst_47 [1] : vector<32x32xf32> to vector<32xf32>
    %117 = vector.shape_cast %116 : vector<32xf32> to vector<32x1xf32>
    %118 = arith.truncf %115 : vector<32x32xf32> to vector<32x32xbf16>
    %cst_48 = arith.constant dense<0.000000e+00> : vector<32x16xf32>
    %119 = tpu.matmul %118, %103, %cst_48 {dimension_numbers = #tpu.dot_dimension_numbers<[1], [0], [0], [1], [0, 0, 1, 1], [], []>} : vector<32x32xbf16>, vector<32x16xbf16>, vector<32x16xf32> -> vector<32x16xf32>
    %120 = tpu.reciprocal %117 {approx = true} : vector<32x1xf32> -> vector<32x1xf32>
    %121 = vector.broadcast %120 : vector<32x1xf32> to vector<32x16xf32>
    %122 = arith.mulf %119, %121 : vector<32x16xf32>
    %123 = vector.extract_strided_slice %100 {offsets = [0, 16], sizes = [32, 16], strides = [1, 1]} : vector<32x96xbf16> to vector<32x16xbf16>
    %124 = vector.extract_strided_slice %100 {offsets = [0, 48], sizes = [32, 16], strides = [1, 1]} : vector<32x96xbf16> to vector<32x16xbf16>
    %125 = vector.extract_strided_slice %100 {offsets = [0, 80], sizes = [32, 16], strides = [1, 1]} : vector<32x96xbf16> to vector<32x16xbf16>
    %c2_49 = arith.constant 2 : index
    %c1_50 = arith.constant 1 : index
    %c0_51 = arith.constant 0 : index
    %c0_52 = arith.constant 0 : index
    %126 = vector.load %arg4[%c2_49, %c1_50, %c0_51, %c0_52] : memref<4x2x32x32xf32, #tpu.memory_space<vmem>>, vector<1x1x32x32xf32>
    %127 = vector.shape_cast %126 : vector<1x1x32x32xf32> to vector<32x32xf32>
    %128 = tpu.transpose %124, [1, 0] : vector<32x16xbf16> -> vector<16x32xbf16>
    %cst_53 = arith.constant dense<0.000000e+00> : vector<32x32xf32>
    %129 = tpu.matmul %123, %128, %cst_53 {dimension_numbers = #tpu.dot_dimension_numbers<[1], [0], [0], [1], [0, 0, 1, 1], [], []>} : vector<32x16xbf16>, vector<16x32xbf16>, vector<32x32xf32> -> vector<32x32xf32>
    %cst_54 = arith.constant 2.500000e-01 : f32
    %130 = vector.broadcast %cst_54 : f32 to vector<32x32xf32>
    %131 = arith.mulf %129, %130 : vector<32x32xf32>
    %132 = arith.addf %131, %127 : vector<32x32xf32>
    %cst_55 = arith.constant dense<0xFF800000> : vector<32xf32>
    %133 = vector.multi_reduction <maximumf>, %132, %cst_55 [1] : vector<32x32xf32> to vector<32xf32>
    %134 = vector.shape_cast %133 : vector<32xf32> to vector<32x1xf32>
    %135 = vector.broadcast %134 : vector<32x1xf32> to vector<32x32xf32>
    %136 = arith.subf %132, %135 : vector<32x32xf32>
    %137 = math.exp %136 : vector<32x32xf32>
    %cst_56 = arith.constant dense<0.000000e+00> : vector<32xf32>
    %138 = vector.multi_reduction <add>, %137, %cst_56 [1] : vector<32x32xf32> to vector<32xf32>
    %139 = vector.shape_cast %138 : vector<32xf32> to vector<32x1xf32>
    %140 = arith.truncf %137 : vector<32x32xf32> to vector<32x32xbf16>
    %cst_57 = arith.constant dense<0.000000e+00> : vector<32x16xf32>
    %141 = tpu.matmul %140, %125, %cst_57 {dimension_numbers = #tpu.dot_dimension_numbers<[1], [0], [0], [1], [0, 0, 1, 1], [], []>} : vector<32x32xbf16>, vector<32x16xbf16>, vector<32x16xf32> -> vector<32x16xf32>
    %142 = tpu.reciprocal %139 {approx = true} : vector<32x1xf32> -> vector<32x1xf32>
    %143 = vector.broadcast %142 : vector<32x1xf32> to vector<32x16xf32>
    %144 = arith.mulf %141, %143 : vector<32x16xf32>
    %145 = tpu.concatenate %122, %144 in 1 : vector<32x16xf32>, vector<32x16xf32> -> vector<32x32xf32>
    %146 = vector.extract_strided_slice %7 {offsets = [96, 0], sizes = [32, 96], strides = [1, 1]} : vector<128x96xbf16> to vector<32x96xbf16>
    %147 = vector.extract_strided_slice %146 {offsets = [0, 0], sizes = [32, 16], strides = [1, 1]} : vector<32x96xbf16> to vector<32x16xbf16>
    %148 = vector.extract_strided_slice %146 {offsets = [0, 32], sizes = [32, 16], strides = [1, 1]} : vector<32x96xbf16> to vector<32x16xbf16>
    %149 = vector.extract_strided_slice %146 {offsets = [0, 64], sizes = [32, 16], strides = [1, 1]} : vector<32x96xbf16> to vector<32x16xbf16>
    %c3 = arith.constant 3 : index
    %c0_58 = arith.constant 0 : index
    %c0_59 = arith.constant 0 : index
    %c0_60 = arith.constant 0 : index
    %150 = vector.load %arg4[%c3, %c0_58, %c0_59, %c0_60] : memref<4x2x32x32xf32, #tpu.memory_space<vmem>>, vector<1x1x32x32xf32>
    %151 = vector.shape_cast %150 : vector<1x1x32x32xf32> to vector<32x32xf32>
    %152 = tpu.transpose %148, [1, 0] : vector<32x16xbf16> -> vector<16x32xbf16>
    %cst_61 = arith.constant dense<0.000000e+00> : vector<32x32xf32>
    %153 = tpu.matmul %147, %152, %cst_61 {dimension_numbers = #tpu.dot_dimension_numbers<[1], [0], [0], [1], [0, 0, 1, 1], [], []>} : vector<32x16xbf16>, vector<16x32xbf16>, vector<32x32xf32> -> vector<32x32xf32>
    %cst_62 = arith.constant 2.500000e-01 : f32
    %154 = vector.broadcast %cst_62 : f32 to vector<32x32xf32>
    %155 = arith.mulf %153, %154 : vector<32x32xf32>
    %156 = arith.addf %155, %151 : vector<32x32xf32>
    %cst_63 = arith.constant dense<0xFF800000> : vector<32xf32>
    %157 = vector.multi_reduction <maximumf>, %156, %cst_63 [1] : vector<32x32xf32> to vector<32xf32>
    %158 = vector.shape_cast %157 : vector<32xf32> to vector<32x1xf32>
    %159 = vector.broadcast %158 : vector<32x1xf32> to vector<32x32xf32>
    %160 = arith.subf %156, %159 : vector<32x32xf32>
    %161 = math.exp %160 : vector<32x32xf32>
    %cst_64 = arith.constant dense<0.000000e+00> : vector<32xf32>
    %162 = vector.multi_reduction <add>, %161, %cst_64 [1] : vector<32x32xf32> to vector<32xf32>
    %163 = vector.shape_cast %162 : vector<32xf32> to vector<32x1xf32>
    %164 = arith.truncf %161 : vector<32x32xf32> to vector<32x32xbf16>
    %cst_65 = arith.constant dense<0.000000e+00> : vector<32x16xf32>
    %165 = tpu.matmul %164, %149, %cst_65 {dimension_numbers = #tpu.dot_dimension_numbers<[1], [0], [0], [1], [0, 0, 1, 1], [], []>} : vector<32x32xbf16>, vector<32x16xbf16>, vector<32x16xf32> -> vector<32x16xf32>
    %166 = tpu.reciprocal %163 {approx = true} : vector<32x1xf32> -> vector<32x1xf32>
    %167 = vector.broadcast %166 : vector<32x1xf32> to vector<32x16xf32>
    %168 = arith.mulf %165, %167 : vector<32x16xf32>
    %169 = vector.extract_strided_slice %146 {offsets = [0, 16], sizes = [32, 16], strides = [1, 1]} : vector<32x96xbf16> to vector<32x16xbf16>
    %170 = vector.extract_strided_slice %146 {offsets = [0, 48], sizes = [32, 16], strides = [1, 1]} : vector<32x96xbf16> to vector<32x16xbf16>
    %171 = vector.extract_strided_slice %146 {offsets = [0, 80], sizes = [32, 16], strides = [1, 1]} : vector<32x96xbf16> to vector<32x16xbf16>
    %c3_66 = arith.constant 3 : index
    %c1_67 = arith.constant 1 : index
    %c0_68 = arith.constant 0 : index
    %c0_69 = arith.constant 0 : index
    %172 = vector.load %arg4[%c3_66, %c1_67, %c0_68, %c0_69] : memref<4x2x32x32xf32, #tpu.memory_space<vmem>>, vector<1x1x32x32xf32>
    %173 = vector.shape_cast %172 : vector<1x1x32x32xf32> to vector<32x32xf32>
    %174 = tpu.transpose %170, [1, 0] : vector<32x16xbf16> -> vector<16x32xbf16>
    %cst_70 = arith.constant dense<0.000000e+00> : vector<32x32xf32>
    %175 = tpu.matmul %169, %174, %cst_70 {dimension_numbers = #tpu.dot_dimension_numbers<[1], [0], [0], [1], [0, 0, 1, 1], [], []>} : vector<32x16xbf16>, vector<16x32xbf16>, vector<32x32xf32> -> vector<32x32xf32>
    %cst_71 = arith.constant 2.500000e-01 : f32
    %176 = vector.broadcast %cst_71 : f32 to vector<32x32xf32>
    %177 = arith.mulf %175, %176 : vector<32x32xf32>
    %178 = arith.addf %177, %173 : vector<32x32xf32>
    %cst_72 = arith.constant dense<0xFF800000> : vector<32xf32>
    %179 = vector.multi_reduction <maximumf>, %178, %cst_72 [1] : vector<32x32xf32> to vector<32xf32>
    %180 = vector.shape_cast %179 : vector<32xf32> to vector<32x1xf32>
    %181 = vector.broadcast %180 : vector<32x1xf32> to vector<32x32xf32>
    %182 = arith.subf %178, %181 : vector<32x32xf32>
    %183 = math.exp %182 : vector<32x32xf32>
    %cst_73 = arith.constant dense<0.000000e+00> : vector<32xf32>
    %184 = vector.multi_reduction <add>, %183, %cst_73 [1] : vector<32x32xf32> to vector<32xf32>
    %185 = vector.shape_cast %184 : vector<32xf32> to vector<32x1xf32>
    %186 = arith.truncf %183 : vector<32x32xf32> to vector<32x32xbf16>
    %cst_74 = arith.constant dense<0.000000e+00> : vector<32x16xf32>
    %187 = tpu.matmul %186, %171, %cst_74 {dimension_numbers = #tpu.dot_dimension_numbers<[1], [0], [0], [1], [0, 0, 1, 1], [], []>} : vector<32x32xbf16>, vector<32x16xbf16>, vector<32x16xf32> -> vector<32x16xf32>
    %188 = tpu.reciprocal %185 {approx = true} : vector<32x1xf32> -> vector<32x1xf32>
    %189 = vector.broadcast %188 : vector<32x1xf32> to vector<32x16xf32>
    %190 = arith.mulf %187, %189 : vector<32x16xf32>
    %191 = tpu.concatenate %168, %190 in 1 : vector<32x16xf32>, vector<32x16xf32> -> vector<32x32xf32>
    %192 = tpu.concatenate %53, %99, %145, %191 in 0 : vector<32x32xf32>, vector<32x32xf32>, vector<32x32xf32>, vector<32x32xf32> -> vector<128x32xf32>
    %193 = arith.truncf %192 : vector<128x32xf32> to vector<128x32xbf16>
    %c0_75 = arith.constant 0 : index
    %c0_76 = arith.constant 0 : index
    %194 = vector.load %arg5[%c0_75, %c0_76] : memref<32x32xbf16, #tpu.memory_space<vmem>>, vector<32x32xbf16>
    %cst_77 = arith.constant dense<0.000000e+00> : vector<128x32xf32>
    %195 = tpu.matmul %193, %194, %cst_77 {dimension_numbers = #tpu.dot_dimension_numbers<[1], [0], [0], [1], [0, 0, 1, 1], [], []>} : vector<128x32xbf16>, vector<32x32xbf16>, vector<128x32xf32> -> vector<128x32xf32>
    %c0_78 = arith.constant 0 : index
    %c0_79 = arith.constant 0 : index
    %196 = vector.load %arg6[%c0_78, %c0_79] : memref<1x32xf32, #tpu.memory_space<vmem>>, vector<1x32xf32>
    %197 = vector.broadcast %196 : vector<1x32xf32> to vector<128x32xf32>
    %198 = arith.addf %195, %197 : vector<128x32xf32>
    %199 = vector.shape_cast %198 : vector<128x32xf32> to vector<4x32x32xf32>
    %c0_80 = arith.constant 0 : index
    %c0_81 = arith.constant 0 : index
    %c0_82 = arith.constant 0 : index
    %200 = vector.load %arg7[%c0_80, %c0_81, %c0_82] : memref<4x32x32xf32, #tpu.memory_space<vmem>>, vector<4x32x32xf32>
    tpu.vector_store %arg7[%c0_80, %c0_81, %c0_82], %199 {strides = array<i32>} : memref<4x32x32xf32, #tpu.memory_space<vmem>>, vector<4x32x32xf32>,
    return
  }
  func.func @transform_0(%arg0: i32) -> (i32, i32, i32) {
    %c0_i32 = arith.constant 0 : i32
    %c0_i32_0 = arith.constant 0 : i32
    %c0_i32_1 = arith.constant 0 : i32
    return %arg0, %c0_i32, %c0_i32_0 : i32, i32, i32
  }
  func.func @transform_1(%arg0: i32) -> (i32, i32) {
    %c0_i32 = arith.constant 0 : i32
    %c0_i32_0 = arith.constant 0 : i32
    %c0_i32_1 = arith.constant 0 : i32
    return %c0_i32, %c0_i32_0 : i32, i32
  }
  func.func @transform_2(%arg0: i32) -> (i32, i32) {
    %c0_i32 = arith.constant 0 : i32
    %c0_i32_0 = arith.constant 0 : i32
    %c0_i32_1 = arith.constant 0 : i32
    return %c0_i32, %c0_i32_0 : i32, i32
  }
  func.func @transform_3(%arg0: i32) -> (i32, i32, i32, i32) {
    %c0_i32 = arith.constant 0 : i32
    %c0_i32_0 = arith.constant 0 : i32
    %c0_i32_1 = arith.constant 0 : i32
    %c0_i32_2 = arith.constant 0 : i32
    %c0_i32_3 = arith.constant 0 : i32
    return %c0_i32, %c0_i32_0, %c0_i32_1, %c0_i32_2 : i32, i32, i32, i32
  }
  func.func @transform_4(%arg0: i32) -> (i32, i32) {
    %c0_i32 = arith.constant 0 : i32
    %c0_i32_0 = arith.constant 0 : i32
    %c0_i32_1 = arith.constant 0 : i32
    return %c0_i32, %c0_i32_0 : i32, i32
  }
  func.func @transform_5(%arg0: i32) -> (i32, i32) {
    %c0_i32 = arith.constant 0 : i32
    %c0_i32_0 = arith.constant 0 : i32
    %c0_i32_1 = arith.constant 0 : i32
    return %c0_i32, %c0_i32_0 : i32, i32
  }
  func.func @transform_6(%arg0: i32) -> (i32, i32, i32) {
    %c0_i32 = arith.constant 0 : i32
    %c0_i32_0 = arith.constant 0 : i32
    %c0_i32_1 = arith.constant 0 : i32
    return %arg0, %c0_i32, %c0_i32_0 : i32, i32, i32
  }
}

module attributes {stable_mosaic.version = 11 : i64} {
  func.func @_layernorm_kernel(%arg0: i32, %arg1: memref<32x128xf32, #tpu.memory_space<vmem>>, %arg2: memref<1x128xf32, #tpu.memory_space<vmem>>, %arg3: memref<1x128xf32, #tpu.memory_space<vmem>>, %arg4: memref<32x128xbf16, #tpu.memory_space<vmem>>) attributes {dimension_semantics = [#tpu.dimension_semantics<parallel>], iteration_bounds = array<i64: 1>, scalar_prefetch = 0 : i64, scratch_operands = 0 : i64, tpu.core_type = #tpu.core_type<tc>, window_params = [{transform_indices = @transform_0, window_bounds = array<i64: 32, 128>}, {pipeline_mode = #tpu.pipeline_mode<synchronous>, transform_indices = @transform_1, window_bounds = array<i64: 1, 128>}, {pipeline_mode = #tpu.pipeline_mode<synchronous>, transform_indices = @transform_2, window_bounds = array<i64: 1, 128>}, {transform_indices = @transform_3, window_bounds = array<i64: 32, 128>}]} {
    %c0 = arith.constant 0 : index
    %c0_0 = arith.constant 0 : index
    %0 = vector.load %arg1[%c0, %c0_0] : memref<32x128xf32, #tpu.memory_space<vmem>>, vector<32x128xf32>
    %cst = arith.constant dense<0.000000e+00> : vector<32xf32>
    %1 = vector.multi_reduction <add>, %0, %cst [1] : vector<32x128xf32> to vector<32xf32>
    %2 = vector.shape_cast %1 : vector<32xf32> to vector<32x1xf32>
    %cst_1 = arith.constant 1.280000e+02 : f32
    %3 = vector.broadcast %cst_1 : f32 to vector<32x1xf32>
    %4 = arith.divf %2, %3 : vector<32x1xf32>
    %5 = vector.broadcast %4 : vector<32x1xf32> to vector<32x128xf32>
    %6 = arith.subf %0, %5 : vector<32x128xf32>
    %7 = arith.mulf %6, %6 : vector<32x128xf32>
    %cst_2 = arith.constant dense<0.000000e+00> : vector<32xf32>
    %8 = vector.multi_reduction <add>, %7, %cst_2 [1] : vector<32x128xf32> to vector<32xf32>
    %9 = vector.shape_cast %8 : vector<32xf32> to vector<32x1xf32>
    %cst_3 = arith.constant 1.280000e+02 : f32
    %10 = vector.broadcast %cst_3 : f32 to vector<32x1xf32>
    %11 = arith.divf %9, %10 : vector<32x1xf32>
    %12 = vector.broadcast %4 : vector<32x1xf32> to vector<32x128xf32>
    %13 = arith.subf %0, %12 : vector<32x128xf32>
    %cst_4 = arith.constant 9.99999974E-6 : f32
    %14 = vector.broadcast %cst_4 : f32 to vector<32x1xf32>
    %15 = arith.addf %11, %14 : vector<32x1xf32>
    %16 = math.rsqrt %15 : vector<32x1xf32>
    %17 = vector.broadcast %16 : vector<32x1xf32> to vector<32x128xf32>
    %18 = arith.mulf %13, %17 : vector<32x128xf32>
    %c0_5 = arith.constant 0 : index
    %c0_6 = arith.constant 0 : index
    %19 = vector.load %arg2[%c0_5, %c0_6] : memref<1x128xf32, #tpu.memory_space<vmem>>, vector<1x128xf32>
    %20 = vector.broadcast %19 : vector<1x128xf32> to vector<32x128xf32>
    %21 = arith.mulf %18, %20 : vector<32x128xf32>
    %c0_7 = arith.constant 0 : index
    %c0_8 = arith.constant 0 : index
    %22 = vector.load %arg3[%c0_7, %c0_8] : memref<1x128xf32, #tpu.memory_space<vmem>>, vector<1x128xf32>
    %23 = vector.broadcast %22 : vector<1x128xf32> to vector<32x128xf32>
    %24 = arith.addf %21, %23 : vector<32x128xf32>
    %25 = arith.truncf %24 : vector<32x128xf32> to vector<32x128xbf16>
    %c0_9 = arith.constant 0 : index
    %c0_10 = arith.constant 0 : index
    %26 = vector.load %arg4[%c0_9, %c0_10] : memref<32x128xbf16, #tpu.memory_space<vmem>>, vector<32x128xbf16>
    tpu.vector_store %arg4[%c0_9, %c0_10], %25 {strides = array<i32>} : memref<32x128xbf16, #tpu.memory_space<vmem>>, vector<32x128xbf16>,
    return
  }
  func.func @transform_0(%arg0: i32) -> (i32, i32) {
    %c0_i32 = arith.constant 0 : i32
    %c0_i32_0 = arith.constant 0 : i32
    return %arg0, %c0_i32 : i32, i32
  }
  func.func @transform_1(%arg0: i32) -> (i32, i32) {
    %c0_i32 = arith.constant 0 : i32
    %c0_i32_0 = arith.constant 0 : i32
    %c0_i32_1 = arith.constant 0 : i32
    return %c0_i32, %c0_i32_0 : i32, i32
  }
  func.func @transform_2(%arg0: i32) -> (i32, i32) {
    %c0_i32 = arith.constant 0 : i32
    %c0_i32_0 = arith.constant 0 : i32
    %c0_i32_1 = arith.constant 0 : i32
    return %c0_i32, %c0_i32_0 : i32, i32
  }
  func.func @transform_3(%arg0: i32) -> (i32, i32) {
    %c0_i32 = arith.constant 0 : i32
    %c0_i32_0 = arith.constant 0 : i32
    return %arg0, %c0_i32 : i32, i32
  }
}

module attributes {stable_mosaic.version = 11 : i64} {
  func.func @_window_attn_kernel(%arg0: i32, %arg1: memref<1x32x64xbf16, #tpu.memory_space<vmem>>, %arg2: memref<64x192xbf16, #tpu.memory_space<vmem>>, %arg3: memref<1x192xf32, #tpu.memory_space<vmem>>, %arg4: memref<1x4x32x32xf32, #tpu.memory_space<vmem>>, %arg5: memref<64x64xbf16, #tpu.memory_space<vmem>>, %arg6: memref<1x64xf32, #tpu.memory_space<vmem>>, %arg7: memref<1x32x64xf32, #tpu.memory_space<vmem>>) attributes {dimension_semantics = [#tpu.dimension_semantics<parallel>], iteration_bounds = array<i64: 1>, scalar_prefetch = 0 : i64, scratch_operands = 0 : i64, tpu.core_type = #tpu.core_type<tc>, window_params = [{transform_indices = @transform_0, window_bounds = array<i64: 1, 32, 64>}, {pipeline_mode = #tpu.pipeline_mode<synchronous>, transform_indices = @transform_1, window_bounds = array<i64: 64, 192>}, {pipeline_mode = #tpu.pipeline_mode<synchronous>, transform_indices = @transform_2, window_bounds = array<i64: 1, 192>}, {pipeline_mode = #tpu.pipeline_mode<synchronous>, transform_indices = @transform_3, window_bounds = array<i64: 1, 4, 32, 32>}, {pipeline_mode = #tpu.pipeline_mode<synchronous>, transform_indices = @transform_4, window_bounds = array<i64: 64, 64>}, {pipeline_mode = #tpu.pipeline_mode<synchronous>, transform_indices = @transform_5, window_bounds = array<i64: 1, 64>}, {transform_indices = @transform_6, window_bounds = array<i64: 1, 32, 64>}]} {
    %c0 = arith.constant 0 : index
    %c0_0 = arith.constant 0 : index
    %c0_1 = arith.constant 0 : index
    %0 = vector.load %arg1[%c0, %c0_0, %c0_1] : memref<1x32x64xbf16, #tpu.memory_space<vmem>>, vector<1x32x64xbf16>
    %1 = vector.shape_cast %0 : vector<1x32x64xbf16> to vector<32x64xbf16>
    %c0_2 = arith.constant 0 : index
    %c0_3 = arith.constant 0 : index
    %2 = vector.load %arg2[%c0_2, %c0_3] : memref<64x192xbf16, #tpu.memory_space<vmem>>, vector<64x192xbf16>
    %cst = arith.constant dense<0.000000e+00> : vector<32x192xf32>
    %3 = tpu.matmul %1, %2, %cst {dimension_numbers = #tpu.dot_dimension_numbers<[1], [0], [0], [1], [0, 0, 1, 1], [], []>} : vector<32x64xbf16>, vector<64x192xbf16>, vector<32x192xf32> -> vector<32x192xf32>
    %c0_4 = arith.constant 0 : index
    %c0_5 = arith.constant 0 : index
    %4 = vector.load %arg3[%c0_4, %c0_5] : memref<1x192xf32, #tpu.memory_space<vmem>>, vector<1x192xf32>
    %5 = vector.broadcast %4 : vector<1x192xf32> to vector<32x192xf32>
    %6 = arith.addf %3, %5 : vector<32x192xf32>
    %7 = arith.truncf %6 : vector<32x192xf32> to vector<32x192xbf16>
    %8 = vector.extract_strided_slice %7 {offsets = [0, 0], sizes = [32, 16], strides = [1, 1]} : vector<32x192xbf16> to vector<32x16xbf16>
    %9 = vector.extract_strided_slice %7 {offsets = [0, 64], sizes = [32, 16], strides = [1, 1]} : vector<32x192xbf16> to vector<32x16xbf16>
    %10 = vector.extract_strided_slice %7 {offsets = [0, 128], sizes = [32, 16], strides = [1, 1]} : vector<32x192xbf16> to vector<32x16xbf16>
    %c0_6 = arith.constant 0 : index
    %c0_7 = arith.constant 0 : index
    %c0_8 = arith.constant 0 : index
    %c0_9 = arith.constant 0 : index
    %11 = vector.load %arg4[%c0_6, %c0_7, %c0_8, %c0_9] : memref<1x4x32x32xf32, #tpu.memory_space<vmem>>, vector<1x1x32x32xf32>
    %12 = vector.shape_cast %11 : vector<1x1x32x32xf32> to vector<32x32xf32>
    %13 = tpu.transpose %9, [1, 0] : vector<32x16xbf16> -> vector<16x32xbf16>
    %cst_10 = arith.constant dense<0.000000e+00> : vector<32x32xf32>
    %14 = tpu.matmul %8, %13, %cst_10 {dimension_numbers = #tpu.dot_dimension_numbers<[1], [0], [0], [1], [0, 0, 1, 1], [], []>} : vector<32x16xbf16>, vector<16x32xbf16>, vector<32x32xf32> -> vector<32x32xf32>
    %cst_11 = arith.constant 2.500000e-01 : f32
    %15 = vector.broadcast %cst_11 : f32 to vector<32x32xf32>
    %16 = arith.mulf %14, %15 : vector<32x32xf32>
    %17 = arith.addf %16, %12 : vector<32x32xf32>
    %cst_12 = arith.constant dense<0xFF800000> : vector<32xf32>
    %18 = vector.multi_reduction <maximumf>, %17, %cst_12 [1] : vector<32x32xf32> to vector<32xf32>
    %19 = vector.shape_cast %18 : vector<32xf32> to vector<32x1xf32>
    %20 = vector.broadcast %19 : vector<32x1xf32> to vector<32x32xf32>
    %21 = arith.subf %17, %20 : vector<32x32xf32>
    %22 = math.exp %21 : vector<32x32xf32>
    %cst_13 = arith.constant dense<0.000000e+00> : vector<32xf32>
    %23 = vector.multi_reduction <add>, %22, %cst_13 [1] : vector<32x32xf32> to vector<32xf32>
    %24 = vector.shape_cast %23 : vector<32xf32> to vector<32x1xf32>
    %25 = arith.truncf %22 : vector<32x32xf32> to vector<32x32xbf16>
    %cst_14 = arith.constant dense<0.000000e+00> : vector<32x16xf32>
    %26 = tpu.matmul %25, %10, %cst_14 {dimension_numbers = #tpu.dot_dimension_numbers<[1], [0], [0], [1], [0, 0, 1, 1], [], []>} : vector<32x32xbf16>, vector<32x16xbf16>, vector<32x16xf32> -> vector<32x16xf32>
    %27 = tpu.reciprocal %24 {approx = true} : vector<32x1xf32> -> vector<32x1xf32>
    %28 = vector.broadcast %27 : vector<32x1xf32> to vector<32x16xf32>
    %29 = arith.mulf %26, %28 : vector<32x16xf32>
    %30 = vector.extract_strided_slice %7 {offsets = [0, 16], sizes = [32, 16], strides = [1, 1]} : vector<32x192xbf16> to vector<32x16xbf16>
    %31 = vector.extract_strided_slice %7 {offsets = [0, 80], sizes = [32, 16], strides = [1, 1]} : vector<32x192xbf16> to vector<32x16xbf16>
    %32 = vector.extract_strided_slice %7 {offsets = [0, 144], sizes = [32, 16], strides = [1, 1]} : vector<32x192xbf16> to vector<32x16xbf16>
    %c0_15 = arith.constant 0 : index
    %c1 = arith.constant 1 : index
    %c0_16 = arith.constant 0 : index
    %c0_17 = arith.constant 0 : index
    %33 = vector.load %arg4[%c0_15, %c1, %c0_16, %c0_17] : memref<1x4x32x32xf32, #tpu.memory_space<vmem>>, vector<1x1x32x32xf32>
    %34 = vector.shape_cast %33 : vector<1x1x32x32xf32> to vector<32x32xf32>
    %35 = tpu.transpose %31, [1, 0] : vector<32x16xbf16> -> vector<16x32xbf16>
    %cst_18 = arith.constant dense<0.000000e+00> : vector<32x32xf32>
    %36 = tpu.matmul %30, %35, %cst_18 {dimension_numbers = #tpu.dot_dimension_numbers<[1], [0], [0], [1], [0, 0, 1, 1], [], []>} : vector<32x16xbf16>, vector<16x32xbf16>, vector<32x32xf32> -> vector<32x32xf32>
    %cst_19 = arith.constant 2.500000e-01 : f32
    %37 = vector.broadcast %cst_19 : f32 to vector<32x32xf32>
    %38 = arith.mulf %36, %37 : vector<32x32xf32>
    %39 = arith.addf %38, %34 : vector<32x32xf32>
    %cst_20 = arith.constant dense<0xFF800000> : vector<32xf32>
    %40 = vector.multi_reduction <maximumf>, %39, %cst_20 [1] : vector<32x32xf32> to vector<32xf32>
    %41 = vector.shape_cast %40 : vector<32xf32> to vector<32x1xf32>
    %42 = vector.broadcast %41 : vector<32x1xf32> to vector<32x32xf32>
    %43 = arith.subf %39, %42 : vector<32x32xf32>
    %44 = math.exp %43 : vector<32x32xf32>
    %cst_21 = arith.constant dense<0.000000e+00> : vector<32xf32>
    %45 = vector.multi_reduction <add>, %44, %cst_21 [1] : vector<32x32xf32> to vector<32xf32>
    %46 = vector.shape_cast %45 : vector<32xf32> to vector<32x1xf32>
    %47 = arith.truncf %44 : vector<32x32xf32> to vector<32x32xbf16>
    %cst_22 = arith.constant dense<0.000000e+00> : vector<32x16xf32>
    %48 = tpu.matmul %47, %32, %cst_22 {dimension_numbers = #tpu.dot_dimension_numbers<[1], [0], [0], [1], [0, 0, 1, 1], [], []>} : vector<32x32xbf16>, vector<32x16xbf16>, vector<32x16xf32> -> vector<32x16xf32>
    %49 = tpu.reciprocal %46 {approx = true} : vector<32x1xf32> -> vector<32x1xf32>
    %50 = vector.broadcast %49 : vector<32x1xf32> to vector<32x16xf32>
    %51 = arith.mulf %48, %50 : vector<32x16xf32>
    %52 = vector.extract_strided_slice %7 {offsets = [0, 32], sizes = [32, 16], strides = [1, 1]} : vector<32x192xbf16> to vector<32x16xbf16>
    %53 = vector.extract_strided_slice %7 {offsets = [0, 96], sizes = [32, 16], strides = [1, 1]} : vector<32x192xbf16> to vector<32x16xbf16>
    %54 = vector.extract_strided_slice %7 {offsets = [0, 160], sizes = [32, 16], strides = [1, 1]} : vector<32x192xbf16> to vector<32x16xbf16>
    %c0_23 = arith.constant 0 : index
    %c2 = arith.constant 2 : index
    %c0_24 = arith.constant 0 : index
    %c0_25 = arith.constant 0 : index
    %55 = vector.load %arg4[%c0_23, %c2, %c0_24, %c0_25] : memref<1x4x32x32xf32, #tpu.memory_space<vmem>>, vector<1x1x32x32xf32>
    %56 = vector.shape_cast %55 : vector<1x1x32x32xf32> to vector<32x32xf32>
    %57 = tpu.transpose %53, [1, 0] : vector<32x16xbf16> -> vector<16x32xbf16>
    %cst_26 = arith.constant dense<0.000000e+00> : vector<32x32xf32>
    %58 = tpu.matmul %52, %57, %cst_26 {dimension_numbers = #tpu.dot_dimension_numbers<[1], [0], [0], [1], [0, 0, 1, 1], [], []>} : vector<32x16xbf16>, vector<16x32xbf16>, vector<32x32xf32> -> vector<32x32xf32>
    %cst_27 = arith.constant 2.500000e-01 : f32
    %59 = vector.broadcast %cst_27 : f32 to vector<32x32xf32>
    %60 = arith.mulf %58, %59 : vector<32x32xf32>
    %61 = arith.addf %60, %56 : vector<32x32xf32>
    %cst_28 = arith.constant dense<0xFF800000> : vector<32xf32>
    %62 = vector.multi_reduction <maximumf>, %61, %cst_28 [1] : vector<32x32xf32> to vector<32xf32>
    %63 = vector.shape_cast %62 : vector<32xf32> to vector<32x1xf32>
    %64 = vector.broadcast %63 : vector<32x1xf32> to vector<32x32xf32>
    %65 = arith.subf %61, %64 : vector<32x32xf32>
    %66 = math.exp %65 : vector<32x32xf32>
    %cst_29 = arith.constant dense<0.000000e+00> : vector<32xf32>
    %67 = vector.multi_reduction <add>, %66, %cst_29 [1] : vector<32x32xf32> to vector<32xf32>
    %68 = vector.shape_cast %67 : vector<32xf32> to vector<32x1xf32>
    %69 = arith.truncf %66 : vector<32x32xf32> to vector<32x32xbf16>
    %cst_30 = arith.constant dense<0.000000e+00> : vector<32x16xf32>
    %70 = tpu.matmul %69, %54, %cst_30 {dimension_numbers = #tpu.dot_dimension_numbers<[1], [0], [0], [1], [0, 0, 1, 1], [], []>} : vector<32x32xbf16>, vector<32x16xbf16>, vector<32x16xf32> -> vector<32x16xf32>
    %71 = tpu.reciprocal %68 {approx = true} : vector<32x1xf32> -> vector<32x1xf32>
    %72 = vector.broadcast %71 : vector<32x1xf32> to vector<32x16xf32>
    %73 = arith.mulf %70, %72 : vector<32x16xf32>
    %74 = vector.extract_strided_slice %7 {offsets = [0, 48], sizes = [32, 16], strides = [1, 1]} : vector<32x192xbf16> to vector<32x16xbf16>
    %75 = vector.extract_strided_slice %7 {offsets = [0, 112], sizes = [32, 16], strides = [1, 1]} : vector<32x192xbf16> to vector<32x16xbf16>
    %76 = vector.extract_strided_slice %7 {offsets = [0, 176], sizes = [32, 16], strides = [1, 1]} : vector<32x192xbf16> to vector<32x16xbf16>
    %c0_31 = arith.constant 0 : index
    %c3 = arith.constant 3 : index
    %c0_32 = arith.constant 0 : index
    %c0_33 = arith.constant 0 : index
    %77 = vector.load %arg4[%c0_31, %c3, %c0_32, %c0_33] : memref<1x4x32x32xf32, #tpu.memory_space<vmem>>, vector<1x1x32x32xf32>
    %78 = vector.shape_cast %77 : vector<1x1x32x32xf32> to vector<32x32xf32>
    %79 = tpu.transpose %75, [1, 0] : vector<32x16xbf16> -> vector<16x32xbf16>
    %cst_34 = arith.constant dense<0.000000e+00> : vector<32x32xf32>
    %80 = tpu.matmul %74, %79, %cst_34 {dimension_numbers = #tpu.dot_dimension_numbers<[1], [0], [0], [1], [0, 0, 1, 1], [], []>} : vector<32x16xbf16>, vector<16x32xbf16>, vector<32x32xf32> -> vector<32x32xf32>
    %cst_35 = arith.constant 2.500000e-01 : f32
    %81 = vector.broadcast %cst_35 : f32 to vector<32x32xf32>
    %82 = arith.mulf %80, %81 : vector<32x32xf32>
    %83 = arith.addf %82, %78 : vector<32x32xf32>
    %cst_36 = arith.constant dense<0xFF800000> : vector<32xf32>
    %84 = vector.multi_reduction <maximumf>, %83, %cst_36 [1] : vector<32x32xf32> to vector<32xf32>
    %85 = vector.shape_cast %84 : vector<32xf32> to vector<32x1xf32>
    %86 = vector.broadcast %85 : vector<32x1xf32> to vector<32x32xf32>
    %87 = arith.subf %83, %86 : vector<32x32xf32>
    %88 = math.exp %87 : vector<32x32xf32>
    %cst_37 = arith.constant dense<0.000000e+00> : vector<32xf32>
    %89 = vector.multi_reduction <add>, %88, %cst_37 [1] : vector<32x32xf32> to vector<32xf32>
    %90 = vector.shape_cast %89 : vector<32xf32> to vector<32x1xf32>
    %91 = arith.truncf %88 : vector<32x32xf32> to vector<32x32xbf16>
    %cst_38 = arith.constant dense<0.000000e+00> : vector<32x16xf32>
    %92 = tpu.matmul %91, %76, %cst_38 {dimension_numbers = #tpu.dot_dimension_numbers<[1], [0], [0], [1], [0, 0, 1, 1], [], []>} : vector<32x32xbf16>, vector<32x16xbf16>, vector<32x16xf32> -> vector<32x16xf32>
    %93 = tpu.reciprocal %90 {approx = true} : vector<32x1xf32> -> vector<32x1xf32>
    %94 = vector.broadcast %93 : vector<32x1xf32> to vector<32x16xf32>
    %95 = arith.mulf %92, %94 : vector<32x16xf32>
    %96 = tpu.concatenate %29, %51, %73, %95 in 1 : vector<32x16xf32>, vector<32x16xf32>, vector<32x16xf32>, vector<32x16xf32> -> vector<32x64xf32>
    %97 = arith.truncf %96 : vector<32x64xf32> to vector<32x64xbf16>
    %c0_39 = arith.constant 0 : index
    %c0_40 = arith.constant 0 : index
    %98 = vector.load %arg5[%c0_39, %c0_40] : memref<64x64xbf16, #tpu.memory_space<vmem>>, vector<64x64xbf16>
    %cst_41 = arith.constant dense<0.000000e+00> : vector<32x64xf32>
    %99 = tpu.matmul %97, %98, %cst_41 {dimension_numbers = #tpu.dot_dimension_numbers<[1], [0], [0], [1], [0, 0, 1, 1], [], []>} : vector<32x64xbf16>, vector<64x64xbf16>, vector<32x64xf32> -> vector<32x64xf32>
    %c0_42 = arith.constant 0 : index
    %c0_43 = arith.constant 0 : index
    %100 = vector.load %arg6[%c0_42, %c0_43] : memref<1x64xf32, #tpu.memory_space<vmem>>, vector<1x64xf32>
    %101 = vector.broadcast %100 : vector<1x64xf32> to vector<32x64xf32>
    %102 = arith.addf %99, %101 : vector<32x64xf32>
    %103 = vector.shape_cast %102 : vector<32x64xf32> to vector<1x32x64xf32>
    %c0_44 = arith.constant 0 : index
    %c0_45 = arith.constant 0 : index
    %c0_46 = arith.constant 0 : index
    %104 = vector.load %arg7[%c0_44, %c0_45, %c0_46] : memref<1x32x64xf32, #tpu.memory_space<vmem>>, vector<1x32x64xf32>
    tpu.vector_store %arg7[%c0_44, %c0_45, %c0_46], %103 {strides = array<i32>} : memref<1x32x64xf32, #tpu.memory_space<vmem>>, vector<1x32x64xf32>,
    return
  }
  func.func @transform_0(%arg0: i32) -> (i32, i32, i32) {
    %c0_i32 = arith.constant 0 : i32
    %c0_i32_0 = arith.constant 0 : i32
    %c0_i32_1 = arith.constant 0 : i32
    return %arg0, %c0_i32, %c0_i32_0 : i32, i32, i32
  }
  func.func @transform_1(%arg0: i32) -> (i32, i32) {
    %c0_i32 = arith.constant 0 : i32
    %c0_i32_0 = arith.constant 0 : i32
    %c0_i32_1 = arith.constant 0 : i32
    return %c0_i32, %c0_i32_0 : i32, i32
  }
  func.func @transform_2(%arg0: i32) -> (i32, i32) {
    %c0_i32 = arith.constant 0 : i32
    %c0_i32_0 = arith.constant 0 : i32
    %c0_i32_1 = arith.constant 0 : i32
    return %c0_i32, %c0_i32_0 : i32, i32
  }
  func.func @transform_3(%arg0: i32) -> (i32, i32, i32, i32) {
    %c0_i32 = arith.constant 0 : i32
    %c0_i32_0 = arith.constant 0 : i32
    %c0_i32_1 = arith.constant 0 : i32
    %c0_i32_2 = arith.constant 0 : i32
    %c0_i32_3 = arith.constant 0 : i32
    return %c0_i32, %c0_i32_0, %c0_i32_1, %c0_i32_2 : i32, i32, i32, i32
  }
  func.func @transform_4(%arg0: i32) -> (i32, i32) {
    %c0_i32 = arith.constant 0 : i32
    %c0_i32_0 = arith.constant 0 : i32
    %c0_i32_1 = arith.constant 0 : i32
    return %c0_i32, %c0_i32_0 : i32, i32
  }
  func.func @transform_5(%arg0: i32) -> (i32, i32) {
    %c0_i32 = arith.constant 0 : i32
    %c0_i32_0 = arith.constant 0 : i32
    %c0_i32_1 = arith.constant 0 : i32
    return %c0_i32, %c0_i32_0 : i32, i32
  }
  func.func @transform_6(%arg0: i32) -> (i32, i32, i32) {
    %c0_i32 = arith.constant 0 : i32
    %c0_i32_0 = arith.constant 0 : i32
    %c0_i32_1 = arith.constant 0 : i32
    return %arg0, %c0_i32, %c0_i32_0 : i32, i32, i32
  }
}

module attributes {stable_mosaic.version = 11 : i64} {
  func.func @_mlp_kernel(%arg0: i32, %arg1: memref<32x64xf32, #tpu.memory_space<vmem>>, %arg2: memref<1x64xf32, #tpu.memory_space<vmem>>, %arg3: memref<1x64xf32, #tpu.memory_space<vmem>>, %arg4: memref<64x256xbf16, #tpu.memory_space<vmem>>, %arg5: memref<1x256xf32, #tpu.memory_space<vmem>>, %arg6: memref<256x64xbf16, #tpu.memory_space<vmem>>, %arg7: memref<1x64xf32, #tpu.memory_space<vmem>>, %arg8: memref<32x64xf32, #tpu.memory_space<vmem>>) attributes {dimension_semantics = [#tpu.dimension_semantics<parallel>], iteration_bounds = array<i64: 1>, scalar_prefetch = 0 : i64, scratch_operands = 0 : i64, tpu.core_type = #tpu.core_type<tc>, window_params = [{transform_indices = @transform_0, window_bounds = array<i64: 32, 64>}, {pipeline_mode = #tpu.pipeline_mode<synchronous>, transform_indices = @transform_1, window_bounds = array<i64: 1, 64>}, {pipeline_mode = #tpu.pipeline_mode<synchronous>, transform_indices = @transform_2, window_bounds = array<i64: 1, 64>}, {pipeline_mode = #tpu.pipeline_mode<synchronous>, transform_indices = @transform_3, window_bounds = array<i64: 64, 256>}, {pipeline_mode = #tpu.pipeline_mode<synchronous>, transform_indices = @transform_4, window_bounds = array<i64: 1, 256>}, {pipeline_mode = #tpu.pipeline_mode<synchronous>, transform_indices = @transform_5, window_bounds = array<i64: 256, 64>}, {pipeline_mode = #tpu.pipeline_mode<synchronous>, transform_indices = @transform_6, window_bounds = array<i64: 1, 64>}, {transform_indices = @transform_7, window_bounds = array<i64: 32, 64>}]} {
    %c0 = arith.constant 0 : index
    %c0_0 = arith.constant 0 : index
    %0 = vector.load %arg1[%c0, %c0_0] : memref<32x64xf32, #tpu.memory_space<vmem>>, vector<32x64xf32>
    %cst = arith.constant dense<0.000000e+00> : vector<32xf32>
    %1 = vector.multi_reduction <add>, %0, %cst [1] : vector<32x64xf32> to vector<32xf32>
    %2 = vector.shape_cast %1 : vector<32xf32> to vector<32x1xf32>
    %cst_1 = arith.constant 6.400000e+01 : f32
    %3 = vector.broadcast %cst_1 : f32 to vector<32x1xf32>
    %4 = arith.divf %2, %3 : vector<32x1xf32>
    %5 = vector.broadcast %4 : vector<32x1xf32> to vector<32x64xf32>
    %6 = arith.subf %0, %5 : vector<32x64xf32>
    %7 = arith.mulf %6, %6 : vector<32x64xf32>
    %cst_2 = arith.constant dense<0.000000e+00> : vector<32xf32>
    %8 = vector.multi_reduction <add>, %7, %cst_2 [1] : vector<32x64xf32> to vector<32xf32>
    %9 = vector.shape_cast %8 : vector<32xf32> to vector<32x1xf32>
    %cst_3 = arith.constant 6.400000e+01 : f32
    %10 = vector.broadcast %cst_3 : f32 to vector<32x1xf32>
    %11 = arith.divf %9, %10 : vector<32x1xf32>
    %12 = vector.broadcast %4 : vector<32x1xf32> to vector<32x64xf32>
    %13 = arith.subf %0, %12 : vector<32x64xf32>
    %cst_4 = arith.constant 9.99999974E-6 : f32
    %14 = vector.broadcast %cst_4 : f32 to vector<32x1xf32>
    %15 = arith.addf %11, %14 : vector<32x1xf32>
    %16 = math.rsqrt %15 : vector<32x1xf32>
    %17 = vector.broadcast %16 : vector<32x1xf32> to vector<32x64xf32>
    %18 = arith.mulf %13, %17 : vector<32x64xf32>
    %c0_5 = arith.constant 0 : index
    %c0_6 = arith.constant 0 : index
    %19 = vector.load %arg2[%c0_5, %c0_6] : memref<1x64xf32, #tpu.memory_space<vmem>>, vector<1x64xf32>
    %20 = vector.broadcast %19 : vector<1x64xf32> to vector<32x64xf32>
    %21 = arith.mulf %18, %20 : vector<32x64xf32>
    %c0_7 = arith.constant 0 : index
    %c0_8 = arith.constant 0 : index
    %22 = vector.load %arg3[%c0_7, %c0_8] : memref<1x64xf32, #tpu.memory_space<vmem>>, vector<1x64xf32>
    %23 = vector.broadcast %22 : vector<1x64xf32> to vector<32x64xf32>
    %24 = arith.addf %21, %23 : vector<32x64xf32>
    %25 = arith.truncf %24 : vector<32x64xf32> to vector<32x64xbf16>
    %c0_9 = arith.constant 0 : index
    %c0_10 = arith.constant 0 : index
    %26 = vector.load %arg4[%c0_9, %c0_10] : memref<64x256xbf16, #tpu.memory_space<vmem>>, vector<64x256xbf16>
    %cst_11 = arith.constant dense<0.000000e+00> : vector<32x256xf32>
    %27 = tpu.matmul %25, %26, %cst_11 {dimension_numbers = #tpu.dot_dimension_numbers<[1], [0], [0], [1], [0, 0, 1, 1], [], []>} : vector<32x64xbf16>, vector<64x256xbf16>, vector<32x256xf32> -> vector<32x256xf32>
    %c0_12 = arith.constant 0 : index
    %c0_13 = arith.constant 0 : index
    %28 = vector.load %arg5[%c0_12, %c0_13] : memref<1x256xf32, #tpu.memory_space<vmem>>, vector<1x256xf32>
    %29 = vector.broadcast %28 : vector<1x256xf32> to vector<32x256xf32>
    %30 = arith.addf %27, %29 : vector<32x256xf32>
    %cst_14 = arith.constant 5.000000e-01 : f32
    %31 = vector.broadcast %cst_14 : f32 to vector<32x256xf32>
    %32 = arith.mulf %31, %30 : vector<32x256xf32>
    %cst_15 = arith.constant 4.471500e-02 : f32
    %33 = vector.broadcast %cst_15 : f32 to vector<32x256xf32>
    %34 = arith.mulf %33, %30 : vector<32x256xf32>
    %35 = arith.mulf %34, %30 : vector<32x256xf32>
    %36 = arith.mulf %35, %30 : vector<32x256xf32>
    %37 = arith.addf %30, %36 : vector<32x256xf32>
    %cst_16 = arith.constant 0.797884583 : f32
    %38 = vector.broadcast %cst_16 : f32 to vector<32x256xf32>
    %39 = arith.mulf %38, %37 : vector<32x256xf32>
    %40 = math.tanh %39 : vector<32x256xf32>
    %cst_17 = arith.constant 1.000000e+00 : f32
    %41 = vector.broadcast %cst_17 : f32 to vector<32x256xf32>
    %42 = arith.addf %41, %40 : vector<32x256xf32>
    %43 = arith.mulf %32, %42 : vector<32x256xf32>
    %44 = arith.truncf %43 : vector<32x256xf32> to vector<32x256xbf16>
    %c0_18 = arith.constant 0 : index
    %c0_19 = arith.constant 0 : index
    %45 = vector.load %arg6[%c0_18, %c0_19] : memref<256x64xbf16, #tpu.memory_space<vmem>>, vector<256x64xbf16>
    %cst_20 = arith.constant dense<0.000000e+00> : vector<32x64xf32>
    %46 = tpu.matmul %44, %45, %cst_20 {dimension_numbers = #tpu.dot_dimension_numbers<[1], [0], [0], [1], [0, 0, 1, 1], [], []>} : vector<32x256xbf16>, vector<256x64xbf16>, vector<32x64xf32> -> vector<32x64xf32>
    %c0_21 = arith.constant 0 : index
    %c0_22 = arith.constant 0 : index
    %47 = vector.load %arg7[%c0_21, %c0_22] : memref<1x64xf32, #tpu.memory_space<vmem>>, vector<1x64xf32>
    %48 = vector.broadcast %47 : vector<1x64xf32> to vector<32x64xf32>
    %49 = arith.addf %46, %48 : vector<32x64xf32>
    %c0_23 = arith.constant 0 : index
    %c0_24 = arith.constant 0 : index
    %50 = vector.load %arg8[%c0_23, %c0_24] : memref<32x64xf32, #tpu.memory_space<vmem>>, vector<32x64xf32>
    tpu.vector_store %arg8[%c0_23, %c0_24], %49 {strides = array<i32>} : memref<32x64xf32, #tpu.memory_space<vmem>>, vector<32x64xf32>,
    return
  }
  func.func @transform_0(%arg0: i32) -> (i32, i32) {
    %c0_i32 = arith.constant 0 : i32
    %c0_i32_0 = arith.constant 0 : i32
    return %arg0, %c0_i32 : i32, i32
  }
  func.func @transform_1(%arg0: i32) -> (i32, i32) {
    %c0_i32 = arith.constant 0 : i32
    %c0_i32_0 = arith.constant 0 : i32
    %c0_i32_1 = arith.constant 0 : i32
    return %c0_i32, %c0_i32_0 : i32, i32
  }
  func.func @transform_2(%arg0: i32) -> (i32, i32) {
    %c0_i32 = arith.constant 0 : i32
    %c0_i32_0 = arith.constant 0 : i32
    %c0_i32_1 = arith.constant 0 : i32
    return %c0_i32, %c0_i32_0 : i32, i32
  }
  func.func @transform_3(%arg0: i32) -> (i32, i32) {
    %c0_i32 = arith.constant 0 : i32
    %c0_i32_0 = arith.constant 0 : i32
    %c0_i32_1 = arith.constant 0 : i32
    return %c0_i32, %c0_i32_0 : i32, i32
  }
  func.func @transform_4(%arg0: i32) -> (i32, i32) {
    %c0_i32 = arith.constant 0 : i32
    %c0_i32_0 = arith.constant 0 : i32
    %c0_i32_1 = arith.constant 0 : i32
    return %c0_i32, %c0_i32_0 : i32, i32
  }
  func.func @transform_5(%arg0: i32) -> (i32, i32) {
    %c0_i32 = arith.constant 0 : i32
    %c0_i32_0 = arith.constant 0 : i32
    %c0_i32_1 = arith.constant 0 : i32
    return %c0_i32, %c0_i32_0 : i32, i32
  }
  func.func @transform_6(%arg0: i32) -> (i32, i32) {
    %c0_i32 = arith.constant 0 : i32
    %c0_i32_0 = arith.constant 0 : i32
    %c0_i32_1 = arith.constant 0 : i32
    return %c0_i32, %c0_i32_0 : i32, i32
  }
  func.func @transform_7(%arg0: i32) -> (i32, i32) {
    %c0_i32 = arith.constant 0 : i32
    %c0_i32_0 = arith.constant 0 : i32
    return %arg0, %c0_i32 : i32, i32
  }
}

module attributes {stable_mosaic.version = 11 : i64} {
  func.func @_mm_kernel(%arg0: i32, %arg1: memref<16x1024xbf16, #tpu.memory_space<vmem>>, %arg2: memref<1024x128xbf16, #tpu.memory_space<vmem>>, %arg3: memref<1x128xf32, #tpu.memory_space<vmem>>, %arg4: memref<16x128xf32, #tpu.memory_space<vmem>>) attributes {dimension_semantics = [#tpu.dimension_semantics<parallel>], iteration_bounds = array<i64: 1>, scalar_prefetch = 0 : i64, scratch_operands = 0 : i64, tpu.core_type = #tpu.core_type<tc>, window_params = [{transform_indices = @transform_0, window_bounds = array<i64: 16, 1024>}, {pipeline_mode = #tpu.pipeline_mode<synchronous>, transform_indices = @transform_1, window_bounds = array<i64: 1024, 128>}, {pipeline_mode = #tpu.pipeline_mode<synchronous>, transform_indices = @transform_2, window_bounds = array<i64: 1, 128>}, {transform_indices = @transform_3, window_bounds = array<i64: 16, 128>}]} {
    %c0 = arith.constant 0 : index
    %c0_0 = arith.constant 0 : index
    %0 = vector.load %arg1[%c0, %c0_0] : memref<16x1024xbf16, #tpu.memory_space<vmem>>, vector<16x1024xbf16>
    %c0_1 = arith.constant 0 : index
    %c0_2 = arith.constant 0 : index
    %1 = vector.load %arg2[%c0_1, %c0_2] : memref<1024x128xbf16, #tpu.memory_space<vmem>>, vector<1024x128xbf16>
    %cst = arith.constant dense<0.000000e+00> : vector<16x128xf32>
    %2 = tpu.matmul %0, %1, %cst {dimension_numbers = #tpu.dot_dimension_numbers<[1], [0], [0], [1], [0, 0, 1, 1], [], []>} : vector<16x1024xbf16>, vector<1024x128xbf16>, vector<16x128xf32> -> vector<16x128xf32>
    %c0_3 = arith.constant 0 : index
    %c0_4 = arith.constant 0 : index
    %3 = vector.load %arg3[%c0_3, %c0_4] : memref<1x128xf32, #tpu.memory_space<vmem>>, vector<1x128xf32>
    %4 = vector.broadcast %3 : vector<1x128xf32> to vector<16x128xf32>
    %5 = arith.addf %2, %4 : vector<16x128xf32>
    %6 = math.tanh %5 : vector<16x128xf32>
    %c0_5 = arith.constant 0 : index
    %c0_6 = arith.constant 0 : index
    %7 = vector.load %arg4[%c0_5, %c0_6] : memref<16x128xf32, #tpu.memory_space<vmem>>, vector<16x128xf32>
    tpu.vector_store %arg4[%c0_5, %c0_6], %6 {strides = array<i32>} : memref<16x128xf32, #tpu.memory_space<vmem>>, vector<16x128xf32>,
    return
  }
  func.func @transform_0(%arg0: i32) -> (i32, i32) {
    %c0_i32 = arith.constant 0 : i32
    %c0_i32_0 = arith.constant 0 : i32
    return %arg0, %c0_i32 : i32, i32
  }
  func.func @transform_1(%arg0: i32) -> (i32, i32) {
    %c0_i32 = arith.constant 0 : i32
    %c0_i32_0 = arith.constant 0 : i32
    %c0_i32_1 = arith.constant 0 : i32
    return %c0_i32, %c0_i32_0 : i32, i32
  }
  func.func @transform_2(%arg0: i32) -> (i32, i32) {
    %c0_i32 = arith.constant 0 : i32
    %c0_i32_0 = arith.constant 0 : i32
    %c0_i32_1 = arith.constant 0 : i32
    return %c0_i32, %c0_i32_0 : i32, i32
  }
  func.func @transform_3(%arg0: i32) -> (i32, i32) {
    %c0_i32 = arith.constant 0 : i32
    %c0_i32_0 = arith.constant 0 : i32
    return %arg0, %c0_i32 : i32, i32
  }
}

module attributes {stable_mosaic.version = 11 : i64} {
  func.func @_mm_kernel(%arg0: i32, %arg1: memref<16x128xbf16, #tpu.memory_space<vmem>>, %arg2: memref<128x4xbf16, #tpu.memory_space<vmem>>, %arg3: memref<1x4xf32, #tpu.memory_space<vmem>>, %arg4: memref<16x4xf32, #tpu.memory_space<vmem>>) attributes {dimension_semantics = [#tpu.dimension_semantics<parallel>], iteration_bounds = array<i64: 1>, scalar_prefetch = 0 : i64, scratch_operands = 0 : i64, tpu.core_type = #tpu.core_type<tc>, window_params = [{transform_indices = @transform_0, window_bounds = array<i64: 16, 128>}, {pipeline_mode = #tpu.pipeline_mode<synchronous>, transform_indices = @transform_1, window_bounds = array<i64: 128, 4>}, {pipeline_mode = #tpu.pipeline_mode<synchronous>, transform_indices = @transform_2, window_bounds = array<i64: 1, 4>}, {transform_indices = @transform_3, window_bounds = array<i64: 16, 4>}]} {
    %c0 = arith.constant 0 : index
    %c0_0 = arith.constant 0 : index
    %0 = vector.load %arg1[%c0, %c0_0] : memref<16x128xbf16, #tpu.memory_space<vmem>>, vector<16x128xbf16>
    %c0_1 = arith.constant 0 : index
    %c0_2 = arith.constant 0 : index
    %1 = vector.load %arg2[%c0_1, %c0_2] : memref<128x4xbf16, #tpu.memory_space<vmem>>, vector<128x4xbf16>
    %cst = arith.constant dense<0.000000e+00> : vector<16x4xf32>
    %2 = tpu.matmul %0, %1, %cst {dimension_numbers = #tpu.dot_dimension_numbers<[1], [0], [0], [1], [0, 0, 1, 1], [], []>} : vector<16x128xbf16>, vector<128x4xbf16>, vector<16x4xf32> -> vector<16x4xf32>
    %c0_3 = arith.constant 0 : index
    %c0_4 = arith.constant 0 : index
    %3 = vector.load %arg3[%c0_3, %c0_4] : memref<1x4xf32, #tpu.memory_space<vmem>>, vector<1x4xf32>
    %4 = vector.broadcast %3 : vector<1x4xf32> to vector<16x4xf32>
    %5 = arith.addf %2, %4 : vector<16x4xf32>
    %c0_5 = arith.constant 0 : index
    %c0_6 = arith.constant 0 : index
    %6 = vector.load %arg4[%c0_5, %c0_6] : memref<16x4xf32, #tpu.memory_space<vmem>>, vector<16x4xf32>
    tpu.vector_store %arg4[%c0_5, %c0_6], %5 {strides = array<i32>} : memref<16x4xf32, #tpu.memory_space<vmem>>, vector<16x4xf32>,
    return
  }
  func.func @transform_0(%arg0: i32) -> (i32, i32) {
    %c0_i32 = arith.constant 0 : i32
    %c0_i32_0 = arith.constant 0 : i32
    return %arg0, %c0_i32 : i32, i32
  }
  func.func @transform_1(%arg0: i32) -> (i32, i32) {
    %c0_i32 = arith.constant 0 : i32
    %c0_i32_0 = arith.constant 0 : i32
    %c0_i32_1 = arith.constant 0 : i32
    return %c0_i32, %c0_i32_0 : i32, i32
  }
  func.func @transform_2(%arg0: i32) -> (i32, i32) {
    %c0_i32 = arith.constant 0 : i32
    %c0_i32_0 = arith.constant 0 : i32
    %c0_i32_1 = arith.constant 0 : i32
    return %c0_i32, %c0_i32_0 : i32, i32
  }
  func.func @transform_3(%arg0: i32) -> (i32, i32) {
    %c0_i32 = arith.constant 0 : i32
    %c0_i32_0 = arith.constant 0 : i32
    return %arg0, %c0_i32 : i32, i32
  }
}

</mosaic_0001>

<bundles_post_ra>
// kernel: _lambda_.17
= control target key start
LH: loop header
LB: loop body
LE: loop exit
PB: predicated region body
PF: predicated region fallthrough
CT: control target
= control target key end

     0   :  { %v447_v0 = vmov 0   ;;  %vm206_vm0 = vcmask 523264   ;;  %vm328_vm1 = vcmask 261120   ;;  %s651_s1 = inlined_call_operand.vmem [shape: bf16[192,32], index: 1, kind: input, shape index: {}]   ;;  %s652_s0 = inlined_call_operand.vmem [shape: bf16[128,192], index: 0, kind: input, shape index: {}]   ;;  %s653_s2 = inlined_call_operand.vmem [shape: f32[1,32], index: 2, kind: input, shape index: {}]   ;;  %s654_s3 = inlined_call_operand.vmem [shape: f32[128,32], index: 3, kind: output, shape index: {}]  }
   0x1   :  { %231 = vmatprep.subr.bf16.mxu0 %v447_v0  ;;  %386 = vmatprep.subr.bf16.mxu1 %v447_v0  ;;  %v411_v1 = vld [vmem:[%s651_s1] sm:$0xff]   ;;  %v412_v2 = vld [vmem:[%s651_s1 + $0x8] sm:$0xff]   ;;  %v413_v3 = vld [vmem:[%s651_s1 + $0x10] sm:$0xff]  }
   0x2   :  { %232 = vmatpush1.bf16.msra.mxu0 %v411_v1  ;;  %398 = vmatpush1.bf16.msra.mxu1 %v411_v1  ;;  %v414_v4 = vld [vmem:[%s651_s1 + $0x18] sm:$0xff]   ;;  %v425_v5 = vld [vmem:[%s652_s0 + $0x4] ss:$8 sps:$4 sm:$0xff]   ;;  %v417_v9 = vld [vmem:[%s651_s1 + $0x30] sm:$0xff]  }
   0x3   :  { %233 = vmatprep.subr.bf16.mxu0 %v447_v0  ;;  %387 = vmatprep.subr.bf16.mxu1 %v447_v0  ;;  %v415_v6 = vld [vmem:[%s651_s1 + $0x20] sm:$0xff]   ;;  %v416_v8 = vld [vmem:[%s651_s1 + $0x28] sm:$0xff]   ;;  %v418_v10 = vld [vmem:[%s651_s1 + $0x38] sm:$0xff]  }
   0x4   :  { %v428_v7 = vld [vmem:[%s652_s0 + $0x44] ss:$8 sps:$4 sm:$0xff]   ;;  %378 = vmatprep.mubr.msk.bf16.mxu0 %vm206_vm0, %v425_v5  ;;  %v421_v13 = vld [vmem:[%s651_s1 + $0x50] sm:$0xff]   ;;  %v422_v14 = vld [vmem:[%s651_s1 + $0x58] sm:$0xff]  }
   0x5   :  { %382 = vmatprep.mubr.msk.bf16.mxu1 %vm206_vm0, %v428_v7  ;;  %v419_v11 = vld [vmem:[%s651_s1 + $0x40] sm:$0xff]   ;;  %v420_v12 = vld [vmem:[%s651_s1 + $0x48] sm:$0xff]   ;;  %v429_v17 = vld [vmem:[%s652_s0 + $0x14] ss:$8 sps:$4 sm:$0xff]  }
   0x6   :  { %234 = vmatpush1.bf16.msra.mxu0 %v412_v2  ;;  %399 = vmatpush1.bf16.msra.mxu1 %v412_v2  ;;  %v423_v15 = vld [vmem:[%s652_s0] ss:$8 sps:$4 sm:$0xff]   ;;  %v431_v18 = vld [vmem:[%s652_s0 + $0x54] ss:$8 sps:$4 sm:$0xff]   ;;  %v433_v19 = vld [vmem:[%s652_s0 + $0x10] ss:$8 sps:$4 sm:$0xff]  }
   0x7   :  { %235 = vmatprep.subr.bf16.mxu0 %v447_v0  ;;  %388 = vmatprep.subr.bf16.mxu1 %v447_v0  ;;  %v426_v16 = vld [vmem:[%s652_s0 + $0x40] ss:$8 sps:$4 sm:$0xff]   ;;  %v434_v20 = vld [vmem:[%s652_s0 + $0x50] ss:$8 sps:$4 sm:$0xff]   ;;  %v435_v21 = vld [vmem:[%s652_s0 + $0x24] ss:$8 sps:$4 sm:$0xff]  }
   0x8   :  { %v437_v22 = vld [vmem:[%s652_s0 + $0x64] ss:$8 sps:$4 sm:$0xff]   ;;  %v439_v23 = vld [vmem:[%s652_s0 + $0x20] ss:$8 sps:$4 sm:$0xff]   ;;  %v441_v25 = vld [vmem:[%s652_s0 + $0x34] ss:$8 sps:$4 sm:$0xff]  }
   0x9   :  { %v440_v24 = vld [vmem:[%s652_s0 + $0x60] ss:$8 sps:$4 sm:$0xff]   ;;  %v443_v26 = vld [vmem:[%s652_s0 + $0x74] ss:$8 sps:$4 sm:$0xff]   ;;  %v445_v27 = vld [vmem:[%s652_s0 + $0x30] ss:$8 sps:$4 sm:$0xff]  }
   0xa   :  { %236 = vmatpush1.bf16.msra.mxu0 %v413_v3  ;;  %400 = vmatpush1.bf16.msra.mxu1 %v413_v3  ;;  %v446_v28 = vld [vmem:[%s652_s0 + $0x70] ss:$8 sps:$4 sm:$0xff]   ;;  %v349_v29 = vld [vmem:[%s653_s2] ss:$0 sm:$0xff] }
   0xb   :  { %237 = vmatprep.subr.bf16.mxu0 %v447_v0  ;;  %389 = vmatprep.subr.bf16.mxu1 %v447_v0 }
   0xe   :  { %238 = vmatpush1.bf16.msra.mxu0 %v414_v4  ;;  %401 = vmatpush1.bf16.msra.mxu1 %v414_v4 }
   0xf   :  { %239 = vmatprep.subr.bf16.mxu0 %v447_v0  ;;  %390 = vmatprep.subr.bf16.mxu1 %v447_v0 }
  0x12   :  { %240 = vmatpush1.bf16.msra.mxu0 %v415_v6  ;;  %402 = vmatpush1.bf16.msra.mxu1 %v415_v6 }
  0x13   :  { %241 = vmatprep.subr.bf16.mxu0 %v447_v0  ;;  %391 = vmatprep.subr.bf16.mxu1 %v447_v0 }
  0x16   :  { %242 = vmatpush1.bf16.msra.mxu0 %v416_v8  ;;  %403 = vmatpush1.bf16.msra.mxu1 %v416_v8 }
  0x17   :  { %243 = vmatprep.subr.bf16.mxu0 %v447_v0  ;;  %392 = vmatprep.subr.bf16.mxu1 %v447_v0 }
  0x1a   :  { %244 = vmatpush1.bf16.msra.mxu0 %v417_v9  ;;  %404 = vmatpush1.bf16.msra.mxu1 %v417_v9 }
  0x1b   :  { %245 = vmatprep.subr.bf16.mxu0 %v447_v0  ;;  %393 = vmatprep.subr.bf16.mxu1 %v447_v0 }
  0x1e   :  { %246 = vmatpush1.bf16.msra.mxu0 %v418_v10  ;;  %405 = vmatpush1.bf16.msra.mxu1 %v418_v10 }
  0x1f   :  { %247 = vmatprep.subr.bf16.mxu0 %v447_v0  ;;  %394 = vmatprep.subr.bf16.mxu1 %v447_v0 }
  0x22   :  { %248 = vmatpush1.bf16.msra.mxu0 %v419_v11  ;;  %406 = vmatpush1.bf16.msra.mxu1 %v419_v11 }
  0x23   :  { %249 = vmatprep.subr.bf16.mxu0 %v447_v0  ;;  %395 = vmatprep.subr.bf16.mxu1 %v447_v0 }
  0x26   :  { %250 = vmatpush1.bf16.msra.mxu0 %v420_v12  ;;  %407 = vmatpush1.bf16.msra.mxu1 %v420_v12 }
  0x27   :  { %251 = vmatprep.subr.bf16.mxu0 %v447_v0  ;;  %396 = vmatprep.subr.bf16.mxu1 %v447_v0 }
  0x2a   :  { %252 = vmatpush1.bf16.msra.mxu0 %v421_v13  ;;  %408 = vmatpush1.bf16.msra.mxu1 %v421_v13 }
  0x2b   :  { %253 = vmatprep.subr.bf16.mxu0 %v447_v0  ;;  %397 = vmatprep.subr.bf16.mxu1 %v447_v0 }
  0x2e   :  { %254 = vmatpush1.bf16.msra.mxu0 %v422_v14  ;;  %409 = vmatpush1.bf16.msra.mxu1 %v422_v14 }
  0x31   :  { %264 = vmatmul.mubr.bf16.vlgmr.msra.gmra.mrb[0].mxu0 %v423_v15  ;;  %296 = vmatmul.mubr.bf16.vlgmr.msra.gmra.mrb[0].mxu1 %v426_v16 }
  0x32   :  { %379 = vmatprep.mubr.msk.bf16.mxu0 %vm206_vm0, %v429_v17  ;;  %383 = vmatprep.mubr.msk.bf16.mxu1 %vm206_vm0, %v431_v18 }
  0x39   :  { %272 = vmatmul.mubr.bf16.gmra.mrb[4].mxu0 %v433_v19  ;;  %304 = vmatmul.mubr.bf16.gmra.mrb[4].mxu1 %v434_v20 }
  0x3a   :  { %380 = vmatprep.mubr.msk.bf16.mxu0 %vm206_vm0, %v435_v21  ;;  %384 = vmatprep.mubr.msk.bf16.mxu1 %vm206_vm0, %v437_v22 }
  0x41   :  { %280 = vmatmul.mubr.bf16.gmra.mrb[8].mxu0 %v439_v23  ;;  %312 = vmatmul.mubr.bf16.gmra.mrb[8].mxu1 %v440_v24 }
  0x42   :  { %381 = vmatprep.mubr.msk.bf16.mxu0 %vm206_vm0, %v441_v25  ;;  %385 = vmatprep.mubr.msk.bf16.mxu1 %vm206_vm0, %v443_v26 }
  0x49   :  { %288 = vmatmul.mubr.bf16.gmra.mrb[12].mxu0 %v445_v27  ;;  %320 = vmatmul.mubr.bf16.gmra.mrb[12].mxu1 %v446_v28 }
 0x104   :  { %v265_v30 = vpop.f32.mrb[0].mxu0  ;;  %v297_v31 = vpop.f32.mrb[0].mxu1 }
 0x105   :  { %v266_v32 = vadd.f32 %v349_v29, %v265_v30  ;;  %v298_v33 = vadd.f32 %v349_v29, %v297_v31  ;;  %v267_v34 = vpop.f32.mrb[1].mxu0  ;;  %v299_v35 = vpop.f32.mrb[1].mxu1 }
 0x106   :  { %v268_v36 = vpop.f32.mrb[2].mxu0  ;;  %v300_v37 = vpop.f32.mrb[2].mxu1 }
 0x107   :  { %329 = vst.msk [vmem:[%s654_s3] sm:$0xff] %vm328_vm1, %v266_v32  ;;  %337 = vst.msk [vmem:[%s654_s3 + $0x40] sm:$0xff] %vm328_vm1, %v298_v33  ;;  %v269_v38 = vadd.f32 %v349_v29, %v268_v36  ;;  %v301_v39 = vadd.f32 %v349_v29, %v300_v37  ;;  %v270_v40 = vpop.f32.mrb[3].mxu0  ;;  %v302_v41 = vpop.f32.mrb[3].mxu1 }
 0x109   :  { %330 = vst.msk [vmem:[%s654_s3 + $0x8] sm:$0xff] %vm328_vm1, %v269_v38  ;;  %338 = vst.msk [vmem:[%s654_s3 + $0x48] sm:$0xff] %vm328_vm1, %v301_v39 }
 0x10c   :  { %v273_v42 = vpop.f32.mrb[4].mxu0  ;;  %v305_v43 = vpop.f32.mrb[4].mxu1 }
 0x10d   :  { %v274_v44 = vadd.f32 %v349_v29, %v273_v42  ;;  %v306_v45 = vadd.f32 %v349_v29, %v305_v43  ;;  %v275_v46 = vpop.f32.mrb[5].mxu0  ;;  %v307_v47 = vpop.f32.mrb[5].mxu1 }
 0x10e   :  { %v276_v48 = vpop.f32.mrb[6].mxu0  ;;  %v308_v49 = vpop.f32.mrb[6].mxu1 }
 0x10f   :  { %331 = vst.msk [vmem:[%s654_s3 + $0x10] sm:$0xff] %vm328_vm1, %v274_v44  ;;  %339 = vst.msk [vmem:[%s654_s3 + $0x50] sm:$0xff] %vm328_vm1, %v306_v45  ;;  %v277_v50 = vadd.f32 %v349_v29, %v276_v48  ;;  %v309_v51 = vadd.f32 %v349_v29, %v308_v49  ;;  %v278_v52 = vpop.f32.mrb[7].mxu0  ;;  %v310_v53 = vpop.f32.mrb[7].mxu1 }
 0x111   :  { %332 = vst.msk [vmem:[%s654_s3 + $0x18] sm:$0xff] %vm328_vm1, %v277_v50  ;;  %340 = vst.msk [vmem:[%s654_s3 + $0x58] sm:$0xff] %vm328_vm1, %v309_v51 }
 0x114   :  { %v281_v54 = vpop.f32.mrb[8].mxu0  ;;  %v313_v55 = vpop.f32.mrb[8].mxu1 }
 0x115   :  { %v282_v56 = vadd.f32 %v349_v29, %v281_v54  ;;  %v314_v57 = vadd.f32 %v349_v29, %v313_v55  ;;  %v283_v58 = vpop.f32.mrb[9].mxu0  ;;  %v315_v59 = vpop.f32.mrb[9].mxu1 }
 0x116   :  { %v284_v60 = vpop.f32.mrb[10].mxu0  ;;  %v316_v61 = vpop.f32.mrb[10].mxu1 }
 0x117   :  { %333 = vst.msk [vmem:[%s654_s3 + $0x20] sm:$0xff] %vm328_vm1, %v282_v56  ;;  %341 = vst.msk [vmem:[%s654_s3 + $0x60] sm:$0xff] %vm328_vm1, %v314_v57  ;;  %v285_v62 = vadd.f32 %v349_v29, %v284_v60  ;;  %v317_v63 = vadd.f32 %v349_v29, %v316_v61  ;;  %v286_v0 = vpop.f32.mrb[11].mxu0  ;;  %v318_v1 = vpop.f32.mrb[11].mxu1 }
 0x119   :  { %334 = vst.msk [vmem:[%s654_s3 + $0x28] sm:$0xff] %vm328_vm1, %v285_v62  ;;  %342 = vst.msk [vmem:[%s654_s3 + $0x68] sm:$0xff] %vm328_vm1, %v317_v63 }
 0x11c   :  { %v289_v2 = vpop.f32.mrb[12].mxu0  ;;  %v321_v3 = vpop.f32.mrb[12].mxu1 }
 0x11d   :  { %v290_v4 = vadd.f32 %v349_v29, %v289_v2  ;;  %v322_v5 = vadd.f32 %v349_v29, %v321_v3  ;;  %v291_v6 = vpop.f32.mrb[13].mxu0  ;;  %v323_v7 = vpop.f32.mrb[13].mxu1 }
 0x11e   :  { %v292_v8 = vpop.f32.mrb[14].mxu0  ;;  %v324_v9 = vpop.f32.mrb[14].mxu1 }
 0x11f   :  { %335 = vst.msk [vmem:[%s654_s3 + $0x30] sm:$0xff] %vm328_vm1, %v290_v4  ;;  %343 = vst.msk [vmem:[%s654_s3 + $0x70] sm:$0xff] %vm328_vm1, %v322_v5  ;;  %v293_v10 = vadd.f32 %v349_v29, %v292_v8  ;;  %v325_v11 = vadd.f32 %v349_v29, %v324_v9  ;;  %v294_v12 = vpop.f32.mrb[15].mxu0  ;;  %v326_v13 = vpop.f32.mrb[15].mxu1 }
 0x121   :  { %336 = vst.msk [vmem:[%s654_s3 + $0x38] sm:$0xff] %vm328_vm1, %v293_v10  ;;  %344 = vst.msk [vmem:[%s654_s3 + $0x78] sm:$0xff] %vm328_vm1, %v325_v11 }

// kernel: _lambda_.18
= control target key start
LH: loop header
LB: loop body
LE: loop exit
PB: predicated region body
PF: predicated region fallthrough
CT: control target
= control target key end

     0   :  { %vm30_vm0 = vcmask 261120   ;;  %vm350_vm1 = vcmask 257024   ;;  %s763_s0 = inlined_call_operand.vmem [shape: f32[128,32], index: 0, kind: input, shape index: {}]   ;;  %s764_s1 = inlined_call_operand.vmem [shape: f32[1,32], index: 1, kind: input, shape index: {}]   ;;  %s765_s2 = inlined_call_operand.vmem [shape: f32[1,32], index: 2, kind: input, shape index: {}]   ;;  %s766_s3 = inlined_call_operand.vmem [shape: bf16[128,32], index: 3, kind: output, shape index: {}]  }
   0x1   :  { %v14_v0 = vld [vmem:[%s763_s0] sm:$0xff]  ;;  %v16_v1 = vld [vmem:[%s763_s0 + $0x10] sm:$0xff]  ;;  %v15_v2 = vld [vmem:[%s763_s0 + $0x8] sm:$0xff] }
   0x2   :  { %v31_v3 = vsel %vm30_vm0, %v14_v0, 0.0  ;;  %v37_v4 = vsel %vm30_vm0, %v16_v1, 0.0  ;;  %v17_v5 = vld [vmem:[%s763_s0 + $0x18] sm:$0xff]  ;;  %v34_v6 = vsel %vm30_vm0, %v15_v2, 0.0  ;;  %v18_v8 = vld [vmem:[%s763_s0 + $0x20] sm:$0xff]  ;;  %v19_v9 = vld [vmem:[%s763_s0 + $0x28] sm:$0xff] }
   0x3   :  { %32 = vadd.xlane.f32.xlu0 %v31_v3  ;;  %38 = vadd.xlane.f32.xlu1 %v37_v4  ;;  %v40_v7 = vsel %vm30_vm0, %v17_v5, 0.0  ;;  %v43_v10 = vsel %vm30_vm0, %v18_v8, 0.0  ;;  %v46_v11 = vsel %vm30_vm0, %v19_v9, 0.0  ;;  %v484_v12 = vld [vmem:[%s763_s0 + $0x30] sm:$0xff]  ;;  %v489_v13 = vld [vmem:[%s763_s0 + $0x38] sm:$0xff]  ;;  %v498_v16 = vld [vmem:[%s763_s0 + $0x40] sm:$0xff] }
   0x4   :  { %v49_v14 = vsel %vm30_vm0, %v484_v12, 0.0  ;;  %v52_v15 = vsel %vm30_vm0, %v489_v13, 0.0  ;;  %v503_v17 = vld [vmem:[%s763_s0 + $0x48] sm:$0xff]  ;;  %v55_v18 = vsel %vm30_vm0, %v498_v16, 0.0  ;;  %v512_v20 = vld [vmem:[%s763_s0 + $0x50] sm:$0xff]  ;;  %v517_v21 = vld [vmem:[%s763_s0 + $0x58] sm:$0xff] }
   0x5   :  { %v58_v19 = vsel %vm30_vm0, %v503_v17, 0.0  ;;  %v61_v22 = vsel %vm30_vm0, %v512_v20, 0.0  ;;  %v64_v23 = vsel %vm30_vm0, %v517_v21, 0.0  ;;  %v526_v24 = vld [vmem:[%s763_s0 + $0x60] sm:$0xff]  ;;  %v531_v25 = vld [vmem:[%s763_s0 + $0x68] sm:$0xff]  ;;  %v540_v28 = vld [vmem:[%s763_s0 + $0x70] sm:$0xff] }
   0x6   :  { %v67_v26 = vsel %vm30_vm0, %v526_v24, 0.0  ;;  %v70_v27 = vsel %vm30_vm0, %v531_v25, 0.0  ;;  %v545_v29 = vld [vmem:[%s763_s0 + $0x78] sm:$0xff]  ;;  %v73_v30 = vsel %vm30_vm0, %v540_v28, 0.0 }
   0x7   :  { %35 = vadd.xlane.f32.xlu0 %v34_v6  ;;  %41 = vadd.xlane.f32.xlu1 %v40_v7  ;;  %v76_v31 = vsel %vm30_vm0, %v545_v29, 0.0 }
   0xb   :  { %44 = vadd.xlane.f32.xlu0 %v43_v10  ;;  %47 = vadd.xlane.f32.xlu1 %v46_v11 }
   0xf   :  { %50 = vadd.xlane.f32.xlu0 %v49_v14  ;;  %53 = vadd.xlane.f32.xlu1 %v52_v15 }
  0x13   :  { %56 = vadd.xlane.f32.xlu0 %v55_v18  ;;  %59 = vadd.xlane.f32.xlu1 %v58_v19 }
  0x17   :  { %62 = vadd.xlane.f32.xlu0 %v61_v22  ;;  %65 = vadd.xlane.f32.xlu1 %v64_v23 }
  0x1b   :  { %68 = vadd.xlane.f32.xlu0 %v67_v26  ;;  %71 = vadd.xlane.f32.xlu1 %v70_v27 }
  0x1f   :  { %74 = vadd.xlane.f32.xlu0 %v73_v30  ;;  %77 = vadd.xlane.f32.xlu1 %v76_v31 }
  0x90   :  { %v33_v32 = vpop.xlane.xlu0 %32  ;;  %v39_v33 = vpop.xlane.xlu1 %38 }
  0x91   :  { %v80_v34 = vmul.f32 0.03125, %v33_v32  ;;  %v82_v35 = vmul.f32 0.03125, %v39_v33 }
  0x93   :  { %v551_v36 = vsub.f32 %v14_v0, %v80_v34  ;;  %v553_v37 = vsub.f32 %v16_v1, %v82_v35 }
  0x94   :  { %v36_v38 = vpop.xlane.xlu0 %35  ;;  %v42_v39 = vpop.xlane.xlu1 %41 }
  0x95   :  { %v81_v40 = vmul.f32 0.03125, %v36_v38  ;;  %v83_v41 = vmul.f32 0.03125, %v42_v39  ;;  %v112_v42 = vmul.f32 %v551_v36, %v551_v36  ;;  %v114_v43 = vmul.f32 %v553_v37, %v553_v37 }
  0x97   :  { %v559_v44 = vsub.f32 %v15_v2, %v81_v40  ;;  %v561_v45 = vsub.f32 %v17_v5, %v83_v41  ;;  %v128_v46 = vsel %vm30_vm0, %v112_v42, 0.0  ;;  %v134_v49 = vsel %vm30_vm0, %v114_v43, 0.0 }
  0x98   :  { %129 = vadd.xlane.f32.xlu0 %v128_v46  ;;  %v45_v47 = vpop.xlane.xlu0 %44  ;;  %v48_v48 = vpop.xlane.xlu1 %47 }
  0x99   :  { %v84_v50 = vmul.f32 0.03125, %v45_v47  ;;  %v85_v51 = vmul.f32 0.03125, %v48_v48  ;;  %v113_v52 = vmul.f32 %v559_v44, %v559_v44  ;;  %v115_v53 = vmul.f32 %v561_v45, %v561_v45 }
  0x9b   :  { %v569_v54 = vsub.f32 %v18_v8, %v84_v50  ;;  %v571_v55 = vsub.f32 %v19_v9, %v85_v51  ;;  %v131_v56 = vsel %vm30_vm0, %v113_v52, 0.0  ;;  %v137_v59 = vsel %vm30_vm0, %v115_v53, 0.0 }
  0x9c   :  { %135 = vadd.xlane.f32.xlu0 %v134_v49  ;;  %132 = vadd.xlane.f32.xlu1 %v131_v56  ;;  %v51_v57 = vpop.xlane.xlu0 %50  ;;  %v54_v58 = vpop.xlane.xlu1 %53 }
  0x9d   :  { %v86_v60 = vmul.f32 0.03125, %v51_v57  ;;  %v87_v61 = vmul.f32 0.03125, %v54_v58  ;;  %v116_v62 = vmul.f32 %v569_v54, %v569_v54  ;;  %v117_v63 = vmul.f32 %v571_v55, %v571_v55 }
  0x9f   :  { %v580_v0 = vsub.f32 %v484_v12, %v86_v60  ;;  %v583_v1 = vsub.f32 %v489_v13, %v87_v61  ;;  %v140_v2 = vsel %vm30_vm0, %v116_v62, 0.0  ;;  %v143_v5 = vsel %vm30_vm0, %v117_v63, 0.0 }
  0xa0   :  { %138 = vadd.xlane.f32.xlu1 %v137_v59  ;;  %141 = vadd.xlane.f32.xlu0 %v140_v2  ;;  %v57_v3 = vpop.xlane.xlu0 %56  ;;  %v60_v4 = vpop.xlane.xlu1 %59 }
  0xa1   :  { %v88_v6 = vmul.f32 0.03125, %v57_v3  ;;  %v89_v7 = vmul.f32 0.03125, %v60_v4  ;;  %v118_v8 = vmul.f32 %v580_v0, %v580_v0  ;;  %v119_v9 = vmul.f32 %v583_v1, %v583_v1 }
  0xa3   :  { %v592_v10 = vsub.f32 %v498_v16, %v88_v6  ;;  %v595_v11 = vsub.f32 %v503_v17, %v89_v7  ;;  %v146_v12 = vsel %vm30_vm0, %v118_v8, 0.0  ;;  %v149_v15 = vsel %vm30_vm0, %v119_v9, 0.0 }
  0xa4   :  { %144 = vadd.xlane.f32.xlu1 %v143_v5  ;;  %147 = vadd.xlane.f32.xlu0 %v146_v12  ;;  %v63_v13 = vpop.xlane.xlu0 %62  ;;  %v66_v14 = vpop.xlane.xlu1 %65 }
  0xa5   :  { %v90_v18 = vmul.f32 0.03125, %v63_v13  ;;  %v91_v19 = vmul.f32 0.03125, %v66_v14  ;;  %v120_v22 = vmul.f32 %v592_v10, %v592_v10  ;;  %v121_v16 = vmul.f32 %v595_v11, %v595_v11  ;;  %v644_v14 = vld [vmem:[%s764_s1] ss:$0 sm:$0xff] }
  0xa7   :  { %v604_v23 = vsub.f32 %v512_v20, %v90_v18  ;;  %v607_v17 = vsub.f32 %v517_v21, %v91_v19  ;;  %v152_v26 = vsel %vm30_vm0, %v120_v22, 0.0  ;;  %v155_v31 = vsel %vm30_vm0, %v121_v16, 0.0 }
  0xa8   :  { %150 = vadd.xlane.f32.xlu1 %v149_v15  ;;  %153 = vadd.xlane.f32.xlu0 %v152_v26  ;;  %v69_v27 = vpop.xlane.xlu0 %68  ;;  %v72_v30 = vpop.xlane.xlu1 %71  ;;  %v650_v26 = vld [vmem:[%s765_s2] ss:$0 sm:$0xff] }
  0xa9   :  { %v92_v32 = vmul.f32 0.03125, %v69_v27  ;;  %v93_v33 = vmul.f32 0.03125, %v72_v30  ;;  %v122_v34 = vmul.f32 %v604_v23, %v604_v23  ;;  %v123_v20 = vmul.f32 %v607_v17, %v607_v17 }
  0xab   :  { %v616_v35 = vsub.f32 %v526_v24, %v92_v32  ;;  %v619_v21 = vsub.f32 %v531_v25, %v93_v33  ;;  %v158_v38 = vsel %vm30_vm0, %v122_v34, 0.0  ;;  %v161_v41 = vsel %vm30_vm0, %v123_v20, 0.0 }
  0xac   :  { %156 = vadd.xlane.f32.xlu1 %v155_v31  ;;  %159 = vadd.xlane.f32.xlu0 %v158_v38  ;;  %v75_v39 = vpop.xlane.xlu0 %74  ;;  %v78_v40 = vpop.xlane.xlu1 %77 }
  0xad   :  { %v94_v42 = vmul.f32 0.03125, %v75_v39  ;;  %v95_v43 = vmul.f32 0.03125, %v78_v40  ;;  %v124_v46 = vmul.f32 %v616_v35, %v616_v35  ;;  %v125_v24 = vmul.f32 %v619_v21, %v619_v21 }
  0xaf   :  { %v628_v47 = vsub.f32 %v540_v28, %v94_v42  ;;  %v631_v25 = vsub.f32 %v545_v29, %v95_v43  ;;  %v164_v48 = vsel %vm30_vm0, %v124_v46, 0.0  ;;  %v167_v49 = vsel %vm30_vm0, %v125_v24, 0.0 }
  0xb0   :  { %162 = vadd.xlane.f32.xlu1 %v161_v41  ;;  %165 = vadd.xlane.f32.xlu0 %v164_v48 }
  0xb1   :  { %v126_v50 = vmul.f32 %v628_v47, %v628_v47  ;;  %v127_v51 = vmul.f32 %v631_v25, %v631_v25 }
  0xb3   :  { %v170_v52 = vsel %vm30_vm0, %v126_v50, 0.0  ;;  %v173_v28 = vsel %vm30_vm0, %v127_v51, 0.0 }
  0xb4   :  { %168 = vadd.xlane.f32.xlu1 %v167_v49  ;;  %171 = vadd.xlane.f32.xlu0 %v170_v52 }
  0xb8   :  { %174 = vadd.xlane.f32.xlu1 %v173_v28 }
 0x125   :  { %v130_v29 = vpop.xlane.xlu0 %129 }
 0x126   :  { %v176_v53 = vmul.f32 0.03125, %v130_v29 }
 0x128   :  { %v192_v56 = vadd.f32 1e-05, %v176_v53 }
 0x129   :  { %v133_v57 = vpop.xlane.xlu1 %132  ;;  %v136_v58 = vpop.xlane.xlu0 %135 }
 0x12a   :  { %405 = vrsqrt.f32 %v192_v56  ;;  %v177_v59 = vmul.f32 0.03125, %v133_v57  ;;  %v178_v60 = vmul.f32 0.03125, %v136_v58 }
 0x12c   :  { %v193_v61 = vadd.f32 1e-05, %v177_v59  ;;  %v194_v62 = vadd.f32 1e-05, %v178_v60 }
 0x12d   :  { %v139_v63 = vpop.xlane.xlu1 %138  ;;  %v142_v2 = vpop.xlane.xlu0 %141 }
 0x12e   :  { %407 = vrsqrt.f32 %v193_v61  ;;  %v179_v3 = vmul.f32 0.03125, %v139_v63  ;;  %v180_v4 = vmul.f32 0.03125, %v142_v2 }
 0x12f   :  { %409 = vrsqrt.f32 %v194_v62 }
 0x130   :  { %v195_v5 = vadd.f32 1e-05, %v179_v3  ;;  %v196_v6 = vadd.f32 1e-05, %v180_v4 }
 0x131   :  { %v145_v7 = vpop.xlane.xlu1 %144  ;;  %v148_v8 = vpop.xlane.xlu0 %147 }
 0x132   :  { %411 = vrsqrt.f32 %v195_v5  ;;  %v181_v9 = vmul.f32 0.03125, %v145_v7  ;;  %v182_v12 = vmul.f32 0.03125, %v148_v8 }
 0x133   :  { %413 = vrsqrt.f32 %v196_v6 }
 0x134   :  { %v406_v13 = vpop.eup %405  ;;  %v197_v15 = vadd.f32 1e-05, %v181_v9  ;;  %v198_v18 = vadd.f32 1e-05, %v182_v12 }
 0x135   :  { %v224_v19 = vmul.f32 %v406_v13, %v551_v36  ;;  %v151_v22 = vpop.xlane.xlu1 %150  ;;  %v154_v16 = vpop.xlane.xlu0 %153 }
 0x136   :  { %415 = vrsqrt.f32 %v197_v15  ;;  %v183_v27 = vmul.f32 0.03125, %v151_v22  ;;  %v184_v30 = vmul.f32 0.03125, %v154_v16 }
 0x137   :  { %v247_v31 = vmul.f32 %v644_v14, %v224_v19  ;;  %417 = vrsqrt.f32 %v198_v18 }
 0x138   :  { %v408_v32 = vpop.eup %407  ;;  %v199_v33 = vadd.f32 1e-05, %v183_v27  ;;  %v200_v34 = vadd.f32 1e-05, %v184_v30 }
 0x139   :  { %v410_v20 = vpop.eup %409  ;;  %v270_v36 = vadd.f32 %v650_v26, %v247_v31  ;;  %v225_v38 = vmul.f32 %v408_v32, %v559_v44  ;;  %v157_v39 = vpop.xlane.xlu1 %156 }
 0x13a   :  { %v160_v40 = vpop.xlane.xlu0 %159  ;;  %v226_v41 = vmul.f32 %v410_v20, %v553_v37  ;;  %419 = vrsqrt.f32 %v199_v33  ;;  %v185_v42 = vmul.f32 0.03125, %v157_v39 }
 0x13b   :  { %v186_v43 = vmul.f32 0.03125, %v160_v40  ;;  %v389_v46 = vpack.c.bf16 %v270_v36, %v270_v36  ;;  %v248_v24 = vmul.f32 %v644_v14, %v225_v38  ;;  %421 = vrsqrt.f32 %v200_v34 }
 0x13c   :  { %v412_v48 = vpop.eup %411  ;;  %v249_v49 = vmul.f32 %v644_v14, %v226_v41  ;;  %v201_v50 = vadd.f32 1e-05, %v185_v42 }
 0x13d   :  { %v202_v51 = vadd.f32 1e-05, %v186_v43  ;;  %v414_v52 = vpop.eup %413  ;;  %351 = vst.msk [vmem:[%s766_s3] sm:$0xf] %vm350_vm1, %v389_v46  ;;  %v271_v37 = vadd.f32 %v650_v26, %v248_v24  ;;  %v227_v44 = vmul.f32 %v412_v48, %v561_v45  ;;  %v163_v28 = vpop.xlane.xlu1 %162 }
 0x13e   :  { %v166_v29 = vpop.xlane.xlu0 %165  ;;  %v272_v53 = vadd.f32 %v650_v26, %v249_v49  ;;  %v228_v56 = vmul.f32 %v414_v52, %v569_v54  ;;  %423 = vrsqrt.f32 %v201_v50  ;;  %v187_v57 = vmul.f32 0.03125, %v163_v28 }
 0x13f   :  { %v390_v58 = vpack.c.bf16 %v271_v37, %v271_v37  ;;  %v250_v59 = vmul.f32 %v644_v14, %v227_v44  ;;  %425 = vrsqrt.f32 %v202_v51  ;;  %v188_v60 = vmul.f32 0.03125, %v166_v29 }
 0x140   :  { %v416_v61 = vpop.eup %415  ;;  %v391_v62 = vpack.c.bf16 %v272_v53, %v272_v53  ;;  %v251_v63 = vmul.f32 %v644_v14, %v228_v56  ;;  %v203_v2 = vadd.f32 1e-05, %v187_v57 }
 0x141   :  { %v418_v3 = vpop.eup %417  ;;  %352 = vst.msk [vmem:[%s766_s3 + $0x4] sm:$0xf] %vm350_vm1, %v390_v58  ;;  %v273_v45 = vadd.f32 %v650_v26, %v250_v59  ;;  %v229_v54 = vmul.f32 %v416_v61, %v571_v55  ;;  %v204_v4 = vadd.f32 1e-05, %v188_v60  ;;  %v169_v5 = vpop.xlane.xlu1 %168 }
 0x142   :  { %v172_v6 = vpop.xlane.xlu0 %171  ;;  %353 = vst.msk [vmem:[%s766_s3 + $0x8] sm:$0xf] %vm350_vm1, %v391_v62  ;;  %v274_v7 = vadd.f32 %v650_v26, %v251_v63  ;;  %v230_v8 = vmul.f32 %v418_v3, %v580_v0  ;;  %427 = vrsqrt.f32 %v203_v2  ;;  %v189_v9 = vmul.f32 0.03125, %v169_v5 }
 0x143   :  { %v392_v12 = vpack.c.bf16 %v273_v45, %v273_v45  ;;  %v252_v13 = vmul.f32 %v644_v14, %v229_v54  ;;  %429 = vrsqrt.f32 %v204_v4  ;;  %v190_v15 = vmul.f32 0.03125, %v172_v6 }
 0x144   :  { %v420_v55 = vpop.eup %419  ;;  %v393_v18 = vpack.c.bf16 %v274_v7, %v274_v7  ;;  %v253_v19 = vmul.f32 %v644_v14, %v230_v8  ;;  %v205_v22 = vadd.f32 1e-05, %v189_v9 }
 0x145   :  { %v422_v16 = vpop.eup %421  ;;  %354 = vst.msk [vmem:[%s766_s3 + $0xc] sm:$0xf] %vm350_vm1, %v392_v12  ;;  %v275_v0 = vadd.f32 %v650_v26, %v252_v13  ;;  %v231_v27 = vmul.f32 %v420_v55, %v583_v1  ;;  %v206_v30 = vadd.f32 1e-05, %v190_v15  ;;  %v175_v31 = vpop.xlane.xlu1 %174 }
 0x146   :  { %355 = vst.msk [vmem:[%s766_s3 + $0x10] sm:$0xf] %vm350_vm1, %v393_v18  ;;  %v276_v32 = vadd.f32 %v650_v26, %v253_v19  ;;  %v232_v33 = vmul.f32 %v422_v16, %v592_v10  ;;  %431 = vrsqrt.f32 %v205_v22  ;;  %v191_v34 = vmul.f32 0.03125, %v175_v31 }
 0x147   :  { %v394_v20 = vpack.c.bf16 %v275_v0, %v275_v0  ;;  %v254_v36 = vmul.f32 %v644_v14, %v231_v27  ;;  %433 = vrsqrt.f32 %v206_v30 }
 0x148   :  { %v424_v38 = vpop.eup %423  ;;  %v395_v39 = vpack.c.bf16 %v276_v32, %v276_v32  ;;  %v255_v1 = vmul.f32 %v644_v14, %v232_v33  ;;  %v207_v40 = vadd.f32 1e-05, %v191_v34 }
 0x149   :  { %v426_v41 = vpop.eup %425  ;;  %356 = vst.msk [vmem:[%s766_s3 + $0x14] sm:$0xf] %vm350_vm1, %v394_v20  ;;  %v277_v42 = vadd.f32 %v650_v26, %v254_v36  ;;  %v233_v10 = vmul.f32 %v424_v38, %v595_v11 }
 0x14a   :  { %357 = vst.msk [vmem:[%s766_s3 + $0x18] sm:$0xf] %vm350_vm1, %v395_v39  ;;  %v278_v43 = vadd.f32 %v650_v26, %v255_v1  ;;  %v234_v46 = vmul.f32 %v426_v41, %v604_v23  ;;  %435 = vrsqrt.f32 %v207_v40 }
 0x14b   :  { %v396_v24 = vpack.c.bf16 %v277_v42, %v277_v42  ;;  %v256_v48 = vmul.f32 %v644_v14, %v233_v10 }
 0x14c   :  { %v428_v49 = vpop.eup %427  ;;  %v397_v50 = vpack.c.bf16 %v278_v43, %v278_v43  ;;  %v257_v51 = vmul.f32 %v644_v14, %v234_v46 }
 0x14d   :  { %v430_v52 = vpop.eup %429  ;;  %358 = vst.msk [vmem:[%s766_s3 + $0x1c] sm:$0xf] %vm350_vm1, %v396_v24  ;;  %v279_v11 = vadd.f32 %v650_v26, %v256_v48  ;;  %v235_v37 = vmul.f32 %v428_v49, %v607_v17 }
 0x14e   :  { %359 = vst.msk [vmem:[%s766_s3 + $0x20] sm:$0xf] %vm350_vm1, %v397_v50  ;;  %v280_v23 = vadd.f32 %v650_v26, %v257_v51  ;;  %v236_v44 = vmul.f32 %v430_v52, %v616_v35 }
 0x14f   :  { %v398_v28 = vpack.c.bf16 %v279_v11, %v279_v11  ;;  %v258_v29 = vmul.f32 %v644_v14, %v235_v37 }
 0x150   :  { %v432_v53 = vpop.eup %431  ;;  %v399_v56 = vpack.c.bf16 %v280_v23, %v280_v23  ;;  %v259_v57 = vmul.f32 %v644_v14, %v236_v44 }
 0x151   :  { %v434_v58 = vpop.eup %433  ;;  %360 = vst.msk [vmem:[%s766_s3 + $0x24] sm:$0xf] %vm350_vm1, %v398_v28  ;;  %v281_v17 = vadd.f32 %v650_v26, %v258_v29  ;;  %v237_v59 = vmul.f32 %v432_v53, %v619_v21 }
 0x152   :  { %361 = vst.msk [vmem:[%s766_s3 + $0x28] sm:$0xf] %vm350_vm1, %v399_v56  ;;  %v282_v35 = vadd.f32 %v650_v26, %v259_v57  ;;  %v238_v60 = vmul.f32 %v434_v58, %v628_v47 }
 0x153   :  { %v400_v61 = vpack.c.bf16 %v281_v17, %v281_v17  ;;  %v260_v62 = vmul.f32 %v644_v14, %v237_v59 }
 0x154   :  { %v436_v63 = vpop.eup %435  ;;  %v401_v2 = vpack.c.bf16 %v282_v35, %v282_v35  ;;  %v261_v3 = vmul.f32 %v644_v14, %v238_v60 }
 0x155   :  { %362 = vst.msk [vmem:[%s766_s3 + $0x2c] sm:$0xf] %vm350_vm1, %v400_v61  ;;  %v283_v21 = vadd.f32 %v650_v26, %v260_v62  ;;  %v239_v45 = vmul.f32 %v436_v63, %v631_v25 }
 0x156   :  { %363 = vst.msk [vmem:[%s766_s3 + $0x30] sm:$0xf] %vm350_vm1, %v401_v2  ;;  %v284_v47 = vadd.f32 %v650_v26, %v261_v3 }
 0x157   :  { %v402_v54 = vpack.c.bf16 %v283_v21, %v283_v21  ;;  %v262_v4 = vmul.f32 %v644_v14, %v239_v45 }
 0x158   :  { %v403_v5 = vpack.c.bf16 %v284_v47, %v284_v47 }
 0x159   :  { %364 = vst.msk [vmem:[%s766_s3 + $0x34] sm:$0xf] %vm350_vm1, %v402_v54  ;;  %v285_v6 = vadd.f32 %v650_v26, %v262_v4 }
 0x15a   :  { %365 = vst.msk [vmem:[%s766_s3 + $0x38] sm:$0xf] %vm350_vm1, %v403_v5 }
 0x15b   :  { %v404_v25 = vpack.c.bf16 %v285_v6, %v285_v6 }
 0x15d   :  { %366 = vst.msk [vmem:[%s766_s3 + $0x3c] sm:$0xf] %vm350_vm1, %v404_v25 }

// kernel: _lambda_.19
= control target key start
LH: loop header
LB: loop body
LE: loop exit
PB: predicated region body
PF: predicated region fallthrough
CT: control target
= control target key end

     0   :  { %vm103_vm0 = vcmask 261120   ;;  %vm243_vm1 = vcmask 130048   ;;  %s2480_s18 = smov 96   ;;  %s2482_s19 = smov 64   ;;  %s3180_s1 = inlined_call_operand.vmem [shape: bf16[32,96], index: 1, kind: input, shape index: {}]   ;;  %s3181_s0 = inlined_call_operand.vmem [shape: bf16[4,32,32], index: 0, kind: input, shape index: {}]   ;;  %s3182_s2 = inlined_call_operand.vmem [shape: f32[1,96], index: 2, kind: input, shape index: {}]   ;;  %s3183_s3 = inlined_call_operand.vmem [shape: f32[1,2,32,32], index: 3, kind: input, shape index: {}]   ;;  %s3184_s4 = inlined_call_operand.vmem [shape: bf16[32,32], index: 4, kind: input, shape index: {}]   ;;  %s3185_s5 = inlined_call_operand.vmem [shape: f32[1,32], index: 5, kind: input, shape index: {}]   ;;  %s3186_s6 = inlined_call_operand.vmem [shape: f32[4,32,32], index: 6, kind: output, shape index: {}]  }
   0x1   :  { %v2339_v0 = vld [vmem:[%s3180_s1] sm:$0xff]   ;;  %v2340_v1 = vld [vmem:[%s3180_s1 + $0x8] sm:$0xff]   ;;  %v2343_v4 = vld [vmem:[%s3181_s0 + $0x10] sm:$0xff]   ;;  %s2483_s20 = smov 48   ;;  %s2484_s13 = smov 16  }
   0x2   :  { %2109 = vmatprep.subr.bf16.mxu0 %v2339_v0  ;;  %v2341_v2 = vld [vmem:[%s3181_s0] sm:$0xff]   ;;  %v2342_v3 = vld [vmem:[%s3181_s0 + $0x8] sm:$0xff]   ;;  %v2344_v5 = vld [vmem:[%s3181_s0 + $0x18] sm:$0xff]  }
   0x3   :  { %2110 = vmatpush3.bf16.msra.mxu0 %v2339_v0  ;;  %2113 = vmatprep.mubr.msk.bf16.mxu0 %vm103_vm0, %v2341_v2  ;;  %v2345_v6 = vld [vmem:[%s3181_s0 + $0x20] sm:$0xff]   ;;  %v2346_v7 = vld [vmem:[%s3181_s0 + $0x28] sm:$0xff]   ;;  %v2347_v8 = vld [vmem:[%s3181_s0 + $0x30] sm:$0xff]  }
   0x4   :  { %2111 = vmatprep.subr.bf16.mxu0 %v2340_v1  ;;  %v2348_v9 = vld [vmem:[%s3181_s0 + $0x38] sm:$0xff]   ;;  %v1959_v11 = vld [vmem:[%s3182_s2] ss:$0 sm:$0xff]  ;;  %s2479_s0 = smov 80   ;;  %s2481_s2 = smov 112   ;;  %v2602_v63 = vld [vmem:[%s3183_s3 + $0x10] sm:$0xff] }
   0x7   :  { %2112 = vmatpush3.bf16.msra.mxu0 %v2340_v1 }
   0xa   :  { %2114 = vmatmul.mubr.msk.bf16.vlgmr.msra.gmra.mrb[0].mxu0 %vm103_vm0, %v2342_v3 }
   0xb   :  { %2117 = vmatprep.mubr.msk.bf16.mxu0 %vm103_vm0, %v2343_v4  ;;  %v2607_v4 = vld [vmem:[%s3183_s3] sm:$0xff] }
  0x12   :  { %2118 = vmatmul.mubr.msk.bf16.gmra.mrb[4].mxu0 %vm103_vm0, %v2344_v5 }
  0x13   :  { %2121 = vmatprep.mubr.msk.bf16.mxu0 %vm103_vm0, %v2345_v6 }
  0x1a   :  { %2122 = vmatmul.mubr.msk.bf16.gmra.mrb[8].mxu0 %vm103_vm0, %v2346_v7  ;;  %v2613_v7 = vld [vmem:[%s3183_s3 + $0x8] sm:$0xff] }
  0x1b   :  { %2125 = vmatprep.mubr.msk.bf16.mxu0 %vm103_vm0, %v2347_v8 }
  0x22   :  { %2126 = vmatmul.mubr.msk.bf16.gmra.mrb[12].mxu0 %vm103_vm0, %v2348_v9 }
  0xdd   :  { %v2115_v10 = vpop.f32.mrb[0].mxu0 }
  0xde   :  { %v162_v12 = vpop.f32.mrb[1].mxu0  ;;  %v171_v14 = vadd.f32 %v2115_v10, %v1959_v11 }
  0xdf   :  { %v2116_v13 = vpop.f32.mrb[2].mxu0  ;;  %v163_v17 = vadd.f32 %v1959_v11, %v162_v12 }
  0xe0   :  { %v174_v15 = vadd.f32 %v2116_v13, %v1959_v11  ;;  %v165_v16 = vpop.f32.mrb[3].mxu0  ;;  %v2621_v13 = vld [vmem:[%s3183_s3 + $0x18] sm:$0xff] }
  0xe1   :  { %v166_v18 = vadd.f32 %v1959_v11, %v165_v16 }
  0xe2   :  { %v2561_v19 = vpack.c.bf16 %v174_v15, %v171_v14 }
  0xe3   :  { %v225_v20 = vpack.c.bf16 %v166_v18, %v163_v17 }
  0xe5   :  { %429 = vrot.lane.b32.xlu1 %v225_v20, %s2479_s0  ;;  %239 = vrot.lane.b32.xlu0 %v225_v20, %s2480_s18  ;;  %v2119_v21 = vpop.f32.mrb[4].mxu0 }
  0xe6   :  { %2133 = vmatprep.mubr.msk.bf16.mxu0 %vm243_vm1, %v225_v20  ;;  %v187_v22 = vadd.f32 %v2119_v21, %v1959_v11  ;;  %v178_v23 = vpop.f32.mrb[5].mxu0 }
  0xe7   :  { %v179_v24 = vadd.f32 %v1959_v11, %v178_v23  ;;  %v2120_v25 = vpop.f32.mrb[6].mxu0 }
  0xe8   :  { %v190_v26 = vadd.f32 %v2120_v25, %v1959_v11  ;;  %v181_v27 = vpop.f32.mrb[7].mxu0  ;;  %v2635_v25 = vld [vmem:[%s3183_s3 + $0x20] sm:$0xff] }
  0xe9   :  { %431 = vrot.lane.b32.xlu1 %v2561_v19, %s2479_s0  ;;  %241 = vrot.lane.b32.xlu0 %v2561_v19, %s2480_s18  ;;  %v182_v28 = vadd.f32 %v1959_v11, %v181_v27 }
  0xea   :  { %v2575_v30 = vpack.c.bf16 %v190_v26, %v187_v22 }
  0xeb   :  { %v2577_v33 = vpack.c.bf16 %v182_v28, %v179_v24 }
  0xed   :  { %427 = vrot.lane.b32.xlu1 %v2561_v19, %s2481_s2  ;;  %425 = vrot.lane.b32.xlu0 %v225_v20, %s2481_s2  ;;  %v2123_v29 = vpop.f32.mrb[8].mxu0 }
  0xee   :  { %v203_v31 = vadd.f32 %v2123_v29, %v1959_v11  ;;  %v194_v32 = vpop.f32.mrb[9].mxu0 }
  0xef   :  { %v195_v34 = vadd.f32 %v1959_v11, %v194_v32  ;;  %v2124_v35 = vpop.f32.mrb[10].mxu0 }
  0xf0   :  { %v206_v36 = vadd.f32 %v2124_v35, %v1959_v11  ;;  %v197_v37 = vpop.f32.mrb[11].mxu0 }
  0xf1   :  { %351 = vrot.lane.b32.xlu1 %v225_v20, %s2482_s19  ;;  %v198_v38 = vadd.f32 %v1959_v11, %v197_v37  ;;  %v2661_v37 = vld [vmem:[%s3183_s3 + $0x28] sm:$0xff] }
  0xf2   :  { %v2579_v39 = vpack.c.bf16 %v206_v36, %v203_v31 }
  0xf3   :  { %v2581_v40 = vpack.c.bf16 %v198_v38, %v195_v34  ;;  %v2655_v34 = vld [vmem:[%s3183_s3 + $0x38] sm:$0xff] }
  0xf5   :  { %540 = vrot.lane.b32.xlu1 %v225_v20, %s2483_s20  ;;  %v2127_v41 = vpop.f32.mrb[12].mxu0  ;;  %v2630_v20 = vld [vmem:[%s3183_s3 + $0x30] sm:$0xff] }
  0xf6   :  { %v219_v42 = vadd.f32 %v2127_v41, %v1959_v11  ;;  %v210_v43 = vpop.f32.mrb[13].mxu0 }
  0xf7   :  { %v211_v44 = vadd.f32 %v1959_v11, %v210_v43  ;;  %v2128_v45 = vpop.f32.mrb[14].mxu0 }
  0xf8   :  { %v222_v46 = vadd.f32 %v2128_v45, %v1959_v11  ;;  %v213_v47 = vpop.f32.mrb[15].mxu0 }
  0xf9   :  { %v214_v48 = vadd.f32 %v1959_v11, %v213_v47 }
  0xfa   :  { %v2583_v49 = vpack.c.bf16 %v222_v46, %v219_v42 }
  0xfb   :  { %v2585_v50 = vpack.c.bf16 %v214_v48, %v211_v44 }
 0x157   :  { %v430_v51 = vpop.permute.xlu1 %429  ;;  %v240_v52 = vpop.permute.xlu0 %239 }
 0x158   :  { %2277 = vmatprep.subr.msk.bf16.mxu0 %vm243_vm1, %v240_v52  ;;  %v251_v53 = vsel %vm243_vm1, %v240_v52, 0  ;;  %v440_v60 = vsel %vm243_vm1, %v430_v51, 0 }
 0x159   :  { %2130 = vmatpush3.bf16.xpose.msra.mxu0 %v251_v53 }
 0x15b   :  { %v432_v54 = vpop.permute.xlu1 %431  ;;  %v242_v55 = vpop.permute.xlu0 %241 }
 0x15c   :  { %2278 = vmatprep.subr.msk.bf16.mxu0 %vm243_vm1, %v242_v55  ;;  %v254_v57 = vsel %vm243_vm1, %v242_v55, 0  ;;  %v443_v61 = vsel %vm243_vm1, %v432_v54, 0 }
 0x15f   :  { %v428_v56 = vpop.permute.xlu1 %427  ;;  %v426_v59 = vpop.permute.xlu0 %425 }
 0x161   :  { %2132 = vmatpush3.bf16.xpose.msra.mxu0 %v254_v57 }
 0x162   :  { %2279 = vmatprep.subr.msk.bf16.mxu0 %vm243_vm1, %v430_v51 }
 0x163   :  { %v352_v58 = vpop.permute.xlu1 %351 }
 0x164   :  { %2137 = vmatprep.subr.bf16.mxu1 %v352_v58 }
 0x165   :  { %2138 = vmatpush3.bf16.msra.mxu1 %v352_v58 }
 0x167   :  { %v541_v42 = vpop.permute.xlu1 %540 }
 0x168   :  { %2134 = vmatmul.mubr.msk.bf16.vlgmr.msra.gmra.mrb[16].mxu0 %vm243_vm1, %v2561_v19 }
 0x169   :  { %2146 = vmatpush3.bf16.xpose.msra.mxu0 %v440_v60  ;;  %2149 = vmatprep.mubr.msk.bf16.mxu0 %vm243_vm1, %v426_v59 }
 0x16a   :  { %2280 = vmatprep.subr.msk.bf16.mxu0 %vm243_vm1, %v432_v54 }
 0x171   :  { %2148 = vmatpush3.bf16.xpose.msra.mxu0 %v443_v61 }
 0x178   :  { %2150 = vmatmul.mubr.msk.bf16.vlgmr.msra.gmra.mrb[20].mxu0 %vm243_vm1, %v428_v56 }
 0x23b   :  { %v2135_v62 = vpop.f32.mrb[16].mxu0 }
 0x23c   :  { %v307_v0 = vmul.f32 0.25, %v2135_v62  ;;  %v290_v1 = vpop.f32.mrb[17].mxu0 }
 0x23d   :  { %v305_v2 = vmul.f32 0.25, %v290_v1  ;;  %v2136_v3 = vpop.f32.mrb[18].mxu0 }
 0x23e   :  { %v293_v5 = vpop.f32.mrb[19].mxu0  ;;  %v311_v6 = vadd.f32 %v307_v0, %v2602_v63  ;;  %v308_v9 = vmul.f32 0.25, %v2136_v3 }
 0x23f   :  { %v306_v8 = vmul.f32 0.25, %v293_v5  ;;  %v309_v11 = vadd.f32 %v305_v2, %v2607_v4 }
 0x240   :  { %v319_v10 = vsel %vm103_vm0, %v311_v6, -inf  ;;  %v312_v16 = vadd.f32 %v308_v9, %v2621_v13 }
 0x241   :  { %320 = vmax.xlane.f32.xlu0 %v319_v10  ;;  %v310_v12 = vadd.f32 %v306_v8, %v2613_v7  ;;  %v313_v15 = vsel %vm103_vm0, %v309_v11, -inf }
 0x242   :  { %v322_v17 = vsel %vm103_vm0, %v312_v16, -inf }
 0x243   :  { %v316_v14 = vsel %vm103_vm0, %v310_v12, -inf }
 0x244   :  { %317 = vmax.xlane.f32.xlu1 %v316_v14 }
 0x245   :  { %314 = vmax.xlane.f32.xlu0 %v313_v15 }
 0x249   :  { %323 = vmax.xlane.f32.xlu0 %v322_v17 }
 0x24b   :  { %v2151_v18 = vpop.f32.mrb[20].mxu0 }
 0x24c   :  { %v496_v21 = vmul.f32 0.25, %v2151_v18  ;;  %v479_v22 = vpop.f32.mrb[21].mxu0 }
 0x24d   :  { %v494_v23 = vmul.f32 0.25, %v479_v22  ;;  %v2152_v24 = vpop.f32.mrb[22].mxu0 }
 0x24e   :  { %v482_v26 = vpop.f32.mrb[23].mxu0  ;;  %v2638_v27 = vadd.f32 %v2630_v20, %v496_v21  ;;  %v497_v32 = vmul.f32 0.25, %v2152_v24 }
 0x24f   :  { %v498_v29 = vadd.f32 %v2635_v25, %v494_v23  ;;  %v495_v35 = vmul.f32 0.25, %v482_v26 }
 0x250   :  { %v508_v28 = vsel %vm103_vm0, %v2638_v27, -inf  ;;  %v501_v36 = vadd.f32 %v2655_v34, %v497_v32 }
 0x251   :  { %509 = vmax.xlane.f32.xlu1 %v508_v28  ;;  %v502_v31 = vsel %vm103_vm0, %v498_v29, -inf  ;;  %v499_v38 = vadd.f32 %v2661_v37, %v495_v35 }
 0x253   :  { %v505_v41 = vsel %vm103_vm0, %v499_v38, -inf }
 0x255   :  { %503 = vmax.xlane.f32.xlu1 %v502_v31 }
 0x25f   :  { %353 = vrot.lane.b32.xlu0 %v2561_v19, %s2482_s19 }
 0x266   :  { %542 = vrot.lane.b32.xlu1 %v2561_v19, %s2483_s20  ;;  %v511_v19 = vsel %vm103_vm0, %v501_v36, -inf }
 0x26a   :  { %633 = vrot.lane.b32.xlu1 %v2575_v30, %s2480_s18 }
 0x26e   :  { %742 = vrot.lane.b32.xlu1 %v2577_v33, %s2482_s19 }
 0x27e   :  { %512 = vmax.xlane.f32.xlu0 %v511_v19 }
 0x282   :  { %506 = vmax.xlane.f32.xlu0 %v505_v41 }
 0x298   :  { %631 = vrot.lane.b32.xlu0 %v2577_v33, %s2480_s18 }
 0x2ce   :  { %v321_v43 = vpop.xlane.xlu0 %320 }
 0x2cf   :  { %v327_v45 = vsub.f32 %v311_v6, %v321_v43 }
 0x2d1   :  { %v318_v44 = vpop.xlane.xlu1 %317  ;;  %v333_v53 = vmul.f32 1.442695, %v327_v45 }
 0x2d2   :  { %v326_v46 = vsub.f32 %v310_v12, %v318_v44  ;;  %v315_v47 = vpop.xlane.xlu0 %314 }
 0x2d3   :  { %v325_v48 = vsub.f32 %v309_v11, %v315_v47 }
 0x2d4   :  { %v331_v51 = vmul.f32 1.442695, %v326_v46 }
 0x2d5   :  { %v329_v52 = vmul.f32 1.442695, %v325_v48 }
 0x2d6   :  { %2351 = vpow2.f32 %v331_v51  ;;  %v324_v54 = vpop.xlane.xlu0 %323 }
 0x2d7   :  { %2353 = vpow2.f32 %v329_v52  ;;  %v328_v55 = vsub.f32 %v312_v16, %v324_v54 }
 0x2d8   :  { %2355 = vpow2.f32 %v333_v53 }
 0x2d9   :  { %v335_v56 = vmul.f32 1.442695, %v328_v55 }
 0x2da   :  { %v354_v57 = vpop.permute.xlu0 %353 }
 0x2db   :  { %2357 = vpow2.f32 %v335_v56  ;;  %2139 = vmatprep.subr.bf16.mxu1 %v354_v57 }
 0x2dc   :  { %2140 = vmatpush3.bf16.msra.mxu1 %v354_v57 }
 0x2dd   :  { %2153 = vmatprep.subr.bf16.mxu1 %v541_v42 }
 0x2de   :  { %v510_v58 = vpop.xlane.xlu1 %509 }
 0x2df   :  { %v516_v11 = vsub.f32 %v2638_v27, %v510_v58 }
 0x2e0   :  { %v2668_v59 = vpop.eup %2351 }
 0x2e1   :  { %v2670_v60 = vpop.eup %2353  ;;  %v522_v17 = vmul.f32 1.442695, %v516_v11 }
 0x2e2   :  { %v504_v61 = vpop.xlane.xlu1 %503  ;;  %v349_v62 = vpack.c.bf16 %v2668_v59, %v2670_v60  ;;  %v2674_v0 = vpop.eup %2355 }
 0x2e3   :  { %v514_v8 = vsub.f32 %v498_v29, %v504_v61 }
 0x2e4   :  { %2141 = vmatprep.mubr.msk.bf16.mxu1 %vm103_vm0, %v349_v62 }
 0x2e5   :  { %v2677_v1 = vpop.eup %2357  ;;  %v518_v12 = vmul.f32 1.442695, %v514_v8 }
 0x2e6   :  { %v543_v2 = vpop.permute.xlu1 %542  ;;  %v350_v3 = vpack.c.bf16 %v2677_v1, %v2674_v0 }
 0x2e7   :  { %2359 = vpow2.f32 %v518_v12 }
 0x2e8   :  { %2142 = vmatmul.mubr.msk.bf16.vlgmr.msra.gmra.mrb[0].mxu1 %vm103_vm0, %v350_v3 }
 0x2e9   :  { %2154 = vmatpush3.bf16.msra.mxu1 %v541_v42 }
 0x2ea   :  { %2155 = vmatprep.subr.bf16.mxu1 %v543_v2  ;;  %v634_v5 = vpop.permute.xlu1 %633 }
 0x2eb   :  { %v645_v31 = vsel %vm243_vm1, %v634_v5, 0 }
 0x2ed   :  { %2156 = vmatpush3.bf16.msra.mxu1 %v543_v2 }
 0x2ee   :  { %v743_v6 = vpop.permute.xlu1 %742 }
 0x2ef   :  { %2169 = vmatprep.subr.bf16.mxu0 %v743_v6 }
 0x2f0   :  { %2170 = vmatpush3.bf16.msra.mxu0 %v743_v6 }
 0x2f1   :  { %v2684_v22 = vpop.eup %2359 }
 0x30b   :  { %v513_v9 = vpop.xlane.xlu0 %512 }
 0x30c   :  { %v517_v10 = vsub.f32 %v501_v36, %v513_v9 }
 0x30e   :  { %v524_v14 = vmul.f32 1.442695, %v517_v10 }
 0x30f   :  { %v507_v15 = vpop.xlane.xlu0 %506 }
 0x310   :  { %v515_v16 = vsub.f32 %v499_v38, %v507_v15  ;;  %2361 = vpow2.f32 %v524_v14 }
 0x312   :  { %v520_v18 = vmul.f32 1.442695, %v515_v16 }
 0x313   :  { %v632_v21 = vpop.permute.xlu0 %631 }
 0x314   :  { %2363 = vpow2.f32 %v520_v18  ;;  %2281 = vmatprep.subr.msk.bf16.mxu1 %vm243_vm1, %v632_v21  ;;  %v642_v29 = vsel %vm243_vm1, %v632_v21, 0 }
 0x315   :  { %2365 = vpow2.f32 %v522_v17 }
 0x31a   :  { %v2686_v23 = vpop.eup %2361 }
 0x31e   :  { %v2688_v24 = vpop.eup %2363 }
 0x31f   :  { %v2690_v26 = vpop.eup %2365  ;;  %v538_v27 = vpack.c.bf16 %v2688_v24, %v2684_v22 }
 0x320   :  { %v539_v28 = vpack.c.bf16 %v2686_v23, %v2690_v26 }
 0x321   :  { %2157 = vmatprep.mubr.msk.bf16.mxu1 %vm103_vm0, %v538_v27 }
 0x322   :  { %2158 = vmatmul.mubr.msk.bf16.vlgmr.msra.gmra.mrb[4].mxu1 %vm103_vm0, %v539_v28 }
 0x323   :  { %2162 = vmatpush3.bf16.xpose.msra.mxu1 %v642_v29  ;;  %2165 = vmatprep.mubr.msk.bf16.mxu1 %vm243_vm1, %v2577_v33 }
 0x324   :  { %2282 = vmatprep.subr.msk.bf16.mxu1 %vm243_vm1, %v634_v5 }
 0x32b   :  { %2164 = vmatpush3.bf16.xpose.msra.mxu1 %v645_v31 }
 0x332   :  { %2166 = vmatmul.mubr.msk.bf16.vlgmr.msra.gmra.mrb[8].mxu1 %vm243_vm1, %v2575_v30 }
 0x3bb   :  { %v2705_v32 = vpop.f32.mrb[0].mxu1 }
 0x3bc   :  { %3187 = vst [vmem:[#allocation2_spill] sm:$0xff] %v2705_v32  ;;  %v2707_v35 = vpop.f32.mrb[1].mxu1 }
 0x3bd   :  { %v2709_v36 = vpop.f32.mrb[2].mxu1 }
 0x3be   :  { %3188 = vst [vmem:[#allocation3_spill] sm:$0xff] %v2709_v36  ;;  %v2711_v19 = vpop.f32.mrb[3].mxu1 }
 0x3f5   :  { %v2713_v38 = vpop.f32.mrb[4].mxu1 }
 0x3f6   :  { %v2715_v41 = vpop.f32.mrb[5].mxu1 }
 0x3f7   :  { %v2717_v42 = vpop.f32.mrb[6].mxu1 }
 0x3f8   :  { %v2719_v43 = vpop.f32.mrb[7].mxu1 }
 0x405   :  { %v2167_v44 = vpop.f32.mrb[8].mxu1 }
 0x406   :  { %v698_v45 = vmul.f32 0.25, %v2167_v44  ;;  %v681_v46 = vpop.f32.mrb[9].mxu1 }
 0x407   :  { %v696_v47 = vmul.f32 0.25, %v681_v46  ;;  %v2168_v48 = vpop.f32.mrb[10].mxu1 }
 0x408   :  { %v684_v51 = vpop.f32.mrb[11].mxu1  ;;  %v702_v52 = vadd.f32 %v698_v45, %v2602_v63  ;;  %v699_v54 = vmul.f32 0.25, %v2168_v48 }
 0x409   :  { %v697_v53 = vmul.f32 0.25, %v684_v51  ;;  %v700_v56 = vadd.f32 %v696_v47, %v2607_v4 }
 0x40a   :  { %v710_v55 = vsel %vm103_vm0, %v702_v52, -inf  ;;  %v703_v62 = vadd.f32 %v699_v54, %v2621_v13 }
 0x40b   :  { %711 = vmax.xlane.f32.xlu0 %v710_v55  ;;  %v701_v57 = vadd.f32 %v697_v53, %v2613_v7  ;;  %v704_v61 = vsel %vm103_vm0, %v700_v56, -inf }
 0x40c   :  { %v713_v2 = vsel %vm103_vm0, %v703_v62, -inf }
 0x40d   :  { %v707_v58 = vsel %vm103_vm0, %v701_v57, -inf }
 0x40e   :  { %708 = vmax.xlane.f32.xlu1 %v707_v58 }
 0x40f   :  { %705 = vmax.xlane.f32.xlu0 %v704_v61 }
 0x413   :  { %714 = vmax.xlane.f32.xlu0 %v713_v2 }
 0x41f   :  { %815 = vrot.lane.b32.xlu1 %v2577_v33, %s2479_s0 }
 0x423   :  { %817 = vrot.lane.b32.xlu1 %v2575_v30, %s2479_s0 }
 0x427   :  { %813 = vrot.lane.b32.xlu1 %v2575_v30, %s2481_s2 }
 0x429   :  { %744 = vrot.lane.b32.xlu0 %v2575_v30, %s2482_s19 }
 0x42b   :  { %926 = vrot.lane.b32.xlu1 %v2577_v33, %s2483_s20 }
 0x42d   :  { %811 = vrot.lane.b32.xlu0 %v2577_v33, %s2481_s2 }
 0x498   :  { %v712_v3 = vpop.xlane.xlu0 %711 }
 0x499   :  { %v718_v6 = vsub.f32 %v702_v52, %v712_v3 }
 0x49b   :  { %v709_v5 = vpop.xlane.xlu1 %708  ;;  %v724_v15 = vmul.f32 1.442695, %v718_v6 }
 0x49c   :  { %v717_v8 = vsub.f32 %v701_v57, %v709_v5  ;;  %v706_v9 = vpop.xlane.xlu0 %705 }
 0x49d   :  { %v716_v10 = vsub.f32 %v700_v56, %v706_v9 }
 0x49e   :  { %v722_v11 = vmul.f32 1.442695, %v717_v8 }
 0x49f   :  { %v720_v12 = vmul.f32 1.442695, %v716_v10  ;;  %v816_v14 = vpop.permute.xlu1 %815 }
 0x4a0   :  { %2367 = vpow2.f32 %v722_v11  ;;  %v715_v16 = vpop.xlane.xlu0 %714  ;;  %v826_v48 = vsel %vm243_vm1, %v816_v14, 0 }
 0x4a1   :  { %2369 = vpow2.f32 %v720_v12  ;;  %v719_v17 = vsub.f32 %v703_v62, %v715_v16 }
 0x4a2   :  { %2371 = vpow2.f32 %v724_v15 }
 0x4a3   :  { %v726_v18 = vmul.f32 1.442695, %v719_v17  ;;  %v818_v21 = vpop.permute.xlu1 %817 }
 0x4a4   :  { %v745_v27 = vpop.permute.xlu0 %744  ;;  %v829_v52 = vsel %vm243_vm1, %v818_v21, 0 }
 0x4a5   :  { %2373 = vpow2.f32 %v726_v18  ;;  %2171 = vmatprep.subr.bf16.mxu0 %v745_v27 }
 0x4a6   :  { %2172 = vmatpush3.bf16.msra.mxu0 %v745_v27 }
 0x4a7   :  { %2283 = vmatprep.subr.msk.bf16.mxu0 %vm243_vm1, %v816_v14  ;;  %v814_v33 = vpop.permute.xlu1 %813 }
 0x4a8   :  { %v812_v51 = vpop.permute.xlu0 %811 }
 0x4aa   :  { %v2742_v28 = vpop.eup %2367 }
 0x4ab   :  { %v2744_v29 = vpop.eup %2369  ;;  %v927_v31 = vpop.permute.xlu1 %926 }
 0x4ac   :  { %2185 = vmatprep.subr.bf16.mxu1 %v927_v31  ;;  %v740_v44 = vpack.c.bf16 %v2742_v28, %v2744_v29  ;;  %v2748_v45 = vpop.eup %2371 }
 0x4ad   :  { %2186 = vmatpush3.bf16.msra.mxu1 %v927_v31 }
 0x4ae   :  { %2173 = vmatprep.mubr.msk.bf16.mxu0 %vm103_vm0, %v740_v44 }
 0x4af   :  { %v2751_v46 = vpop.eup %2373 }
 0x4b0   :  { %v741_v47 = vpack.c.bf16 %v2751_v46, %v2748_v45 }
 0x4b2   :  { %2174 = vmatmul.mubr.msk.bf16.vlgmr.msra.gmra.mrb[24].mxu0 %vm103_vm0, %v741_v47 }
 0x4b3   :  { %2178 = vmatpush3.bf16.xpose.msra.mxu0 %v826_v48  ;;  %2181 = vmatprep.mubr.msk.bf16.mxu0 %vm243_vm1, %v812_v51 }
 0x4b4   :  { %2284 = vmatprep.subr.msk.bf16.mxu0 %vm243_vm1, %v818_v21 }
 0x4bb   :  { %2180 = vmatpush3.bf16.xpose.msra.mxu0 %v829_v52 }
 0x4c2   :  { %2182 = vmatmul.mubr.msk.bf16.vlgmr.msra.gmra.mrb[28].mxu0 %vm243_vm1, %v814_v33 }
 0x585   :  { %v2761_v53 = vpop.f32.mrb[24].mxu0 }
 0x586   :  { %3189 = vst [vmem:[#allocation4_spill] sm:$0xff] %v2761_v53  ;;  %v2763_v54 = vpop.f32.mrb[25].mxu0 }
 0x587   :  { %v2765_v55 = vpop.f32.mrb[26].mxu0 }
 0x588   :  { %3190 = vst [vmem:[#allocation5_spill] sm:$0xff] %v2765_v55  ;;  %v2767_v56 = vpop.f32.mrb[27].mxu0 }
 0x589   :  { %3191 = vst [vmem:[#allocation6_spill] sm:$0xff] %v2767_v56 }
 0x595   :  { %v2183_v57 = vpop.f32.mrb[28].mxu0 }
 0x596   :  { %v882_v58 = vmul.f32 0.25, %v2183_v57  ;;  %v865_v61 = vpop.f32.mrb[29].mxu0 }
 0x597   :  { %v880_v62 = vmul.f32 0.25, %v865_v61  ;;  %v2184_v2 = vpop.f32.mrb[30].mxu0 }
 0x598   :  { %v868_v3 = vpop.f32.mrb[31].mxu0  ;;  %v886_v5 = vadd.f32 %v2630_v20, %v882_v58  ;;  %v883_v8 = vmul.f32 0.25, %v2184_v2 }
 0x599   :  { %v881_v6 = vmul.f32 0.25, %v868_v3  ;;  %v884_v10 = vadd.f32 %v2635_v25, %v880_v62 }
 0x59a   :  { %v894_v9 = vsel %vm103_vm0, %v886_v5, -inf  ;;  %v887_v15 = vadd.f32 %v2655_v34, %v883_v8 }
 0x59b   :  { %895 = vmax.xlane.f32.xlu0 %v894_v9  ;;  %v885_v11 = vadd.f32 %v2661_v37, %v881_v6  ;;  %v888_v14 = vsel %vm103_vm0, %v884_v10, -inf }
 0x59c   :  { %v897_v16 = vsel %vm103_vm0, %v887_v15, -inf }
 0x59d   :  { %v891_v12 = vsel %vm103_vm0, %v885_v11, -inf }
 0x59e   :  { %892 = vmax.xlane.f32.xlu1 %v891_v12 }
 0x59f   :  { %889 = vmax.xlane.f32.xlu0 %v888_v14 }
 0x5a3   :  { %898 = vmax.xlane.f32.xlu0 %v897_v16 }
 0x5af   :  { %1017 = vrot.lane.b32.xlu1 %v2581_v40, %s2480_s18 }
 0x5b3   :  { %1019 = vrot.lane.b32.xlu1 %v2579_v39, %s2480_s18 }
 0x5b7   :  { %1128 = vrot.lane.b32.xlu1 %v2581_v40, %s2482_s19 }
 0x5b9   :  { %928 = vrot.lane.b32.xlu0 %v2575_v30, %s2483_s20 }
 0x628   :  { %v896_v17 = vpop.xlane.xlu0 %895 }
 0x629   :  { %v902_v21 = vsub.f32 %v886_v5, %v896_v17 }
 0x62b   :  { %v893_v18 = vpop.xlane.xlu1 %892  ;;  %v908_v51 = vmul.f32 1.442695, %v902_v21 }
 0x62c   :  { %v901_v27 = vsub.f32 %v885_v11, %v893_v18  ;;  %v890_v33 = vpop.xlane.xlu0 %889 }
 0x62d   :  { %v900_v31 = vsub.f32 %v884_v10, %v890_v33 }
 0x62e   :  { %v906_v44 = vmul.f32 1.442695, %v901_v27 }
 0x62f   :  { %v904_v47 = vmul.f32 1.442695, %v900_v31  ;;  %v1018_v48 = vpop.permute.xlu1 %1017 }
 0x630   :  { %2375 = vpow2.f32 %v906_v44  ;;  %v899_v52 = vpop.xlane.xlu0 %898  ;;  %v1028_v10 = vsel %vm243_vm1, %v1018_v48, 0 }
 0x631   :  { %2377 = vpow2.f32 %v904_v47  ;;  %v903_v57 = vsub.f32 %v887_v15, %v899_v52 }
 0x632   :  { %2379 = vpow2.f32 %v908_v51 }
 0x633   :  { %v910_v58 = vmul.f32 1.442695, %v903_v57  ;;  %v1020_v61 = vpop.permute.xlu1 %1019 }
 0x634   :  { %v929_v62 = vpop.permute.xlu0 %928  ;;  %v1031_v11 = vsel %vm243_vm1, %v1020_v61, 0 }
 0x635   :  { %2381 = vpow2.f32 %v910_v58  ;;  %2187 = vmatprep.subr.bf16.mxu1 %v929_v62 }
 0x636   :  { %2188 = vmatpush3.bf16.msra.mxu1 %v929_v62 }
 0x637   :  { %2285 = vmatprep.subr.msk.bf16.mxu1 %vm243_vm1, %v1018_v48  ;;  %v1129_v30 = vpop.permute.xlu1 %1128 }
 0x638   :  { %2201 = vmatprep.subr.bf16.mxu0 %v1129_v30 }
 0x639   :  { %2202 = vmatpush3.bf16.msra.mxu0 %v1129_v30 }
 0x63a   :  { %v2786_v2 = vpop.eup %2375 }
 0x63b   :  { %v2788_v3 = vpop.eup %2377 }
 0x63c   :  { %v924_v5 = vpack.c.bf16 %v2786_v2, %v2788_v3  ;;  %v2792_v6 = vpop.eup %2379 }
 0x63e   :  { %2189 = vmatprep.mubr.msk.bf16.mxu1 %vm103_vm0, %v924_v5 }
 0x63f   :  { %v2795_v8 = vpop.eup %2381 }
 0x640   :  { %v925_v9 = vpack.c.bf16 %v2795_v8, %v2792_v6 }
 0x642   :  { %2190 = vmatmul.mubr.msk.bf16.vlgmr.msra.gmra.mrb[12].mxu1 %vm103_vm0, %v925_v9 }
 0x643   :  { %2194 = vmatpush3.bf16.xpose.msra.mxu1 %v1028_v10  ;;  %2197 = vmatprep.mubr.msk.bf16.mxu1 %vm243_vm1, %v2581_v40 }
 0x644   :  { %2286 = vmatprep.subr.msk.bf16.mxu1 %vm243_vm1, %v1020_v61 }
 0x64b   :  { %2196 = vmatpush3.bf16.xpose.msra.mxu1 %v1031_v11 }
 0x652   :  { %2198 = vmatmul.mubr.msk.bf16.vlgmr.msra.gmra.mrb[16].mxu1 %vm243_vm1, %v2579_v39 }
 0x715   :  { %v2807_v12 = vpop.f32.mrb[12].mxu1 }
 0x716   :  { %v2809_v14 = vpop.f32.mrb[13].mxu1 }
 0x717   :  { %v2811_v15 = vpop.f32.mrb[14].mxu1 }
 0x718   :  { %v2813_v16 = vpop.f32.mrb[15].mxu1 }
 0x725   :  { %v2199_v17 = vpop.f32.mrb[16].mxu1 }
 0x726   :  { %v1084_v18 = vmul.f32 0.25, %v2199_v17  ;;  %v1067_v21 = vpop.f32.mrb[17].mxu1 }
 0x727   :  { %v1082_v27 = vmul.f32 0.25, %v1067_v21  ;;  %v2200_v33 = vpop.f32.mrb[18].mxu1 }
 0x728   :  { %v1070_v31 = vpop.f32.mrb[19].mxu1  ;;  %v1088_v44 = vadd.f32 %v1084_v18, %v2602_v63  ;;  %v1085_v48 = vmul.f32 0.25, %v2200_v33 }
 0x729   :  { %v1083_v47 = vmul.f32 0.25, %v1070_v31  ;;  %v1086_v52 = vadd.f32 %v1082_v27, %v2607_v4 }
 0x72a   :  { %v1096_v51 = vsel %vm103_vm0, %v1088_v44, -inf  ;;  %v1089_v62 = vadd.f32 %v1085_v48, %v2621_v13 }
 0x72b   :  { %1097 = vmax.xlane.f32.xlu0 %v1096_v51  ;;  %v1087_v57 = vadd.f32 %v1083_v47, %v2613_v7  ;;  %v1090_v61 = vsel %vm103_vm0, %v1086_v52, -inf }
 0x72c   :  { %v1099_v30 = vsel %vm103_vm0, %v1089_v62, -inf }
 0x72d   :  { %v1093_v58 = vsel %vm103_vm0, %v1087_v57, -inf }
 0x72e   :  { %1094 = vmax.xlane.f32.xlu1 %v1093_v58 }
 0x72f   :  { %1091 = vmax.xlane.f32.xlu0 %v1090_v61 }
 0x733   :  { %1100 = vmax.xlane.f32.xlu0 %v1099_v30 }
 0x73f   :  { %1201 = vrot.lane.b32.xlu1 %v2581_v40, %s2479_s0 }
 0x743   :  { %1203 = vrot.lane.b32.xlu1 %v2579_v39, %s2479_s0 }
 0x747   :  { %1199 = vrot.lane.b32.xlu1 %v2579_v39, %s2481_s2 }
 0x749   :  { %1130 = vrot.lane.b32.xlu0 %v2579_v39, %s2482_s19 }
 0x74b   :  { %1312 = vrot.lane.b32.xlu1 %v2581_v40, %s2483_s20 }
 0x74d   :  { %1197 = vrot.lane.b32.xlu0 %v2581_v40, %s2481_s2 }
 0x7b8   :  { %v1098_v5 = vpop.xlane.xlu0 %1097 }
 0x7b9   :  { %v1104_v10 = vsub.f32 %v1088_v44, %v1098_v5 }
 0x7bb   :  { %v1095_v9 = vpop.xlane.xlu1 %1094  ;;  %v1110_v31 = vmul.f32 1.442695, %v1104_v10 }
 0x7bc   :  { %v1103_v11 = vsub.f32 %v1087_v57, %v1095_v9  ;;  %v1092_v17 = vpop.xlane.xlu0 %1091 }
 0x7bd   :  { %v1102_v18 = vsub.f32 %v1086_v52, %v1092_v17 }
 0x7be   :  { %v1108_v21 = vmul.f32 1.442695, %v1103_v11 }
 0x7bf   :  { %v1106_v27 = vmul.f32 1.442695, %v1102_v18  ;;  %v1202_v33 = vpop.permute.xlu1 %1201 }
 0x7c0   :  { %2383 = vpow2.f32 %v1108_v21  ;;  %v1101_v47 = vpop.xlane.xlu0 %1100  ;;  %v1212_v10 = vsel %vm243_vm1, %v1202_v33, 0 }
 0x7c1   :  { %2385 = vpow2.f32 %v1106_v27  ;;  %v1105_v48 = vsub.f32 %v1089_v62, %v1101_v47 }
 0x7c2   :  { %2387 = vpow2.f32 %v1110_v31 }
 0x7c3   :  { %v1112_v51 = vmul.f32 1.442695, %v1105_v48  ;;  %v1204_v58 = vpop.permute.xlu1 %1203 }
 0x7c4   :  { %v1131_v61 = vpop.permute.xlu0 %1130  ;;  %v1215_v17 = vsel %vm243_vm1, %v1204_v58, 0 }
 0x7c5   :  { %2389 = vpow2.f32 %v1112_v51  ;;  %2203 = vmatprep.subr.bf16.mxu0 %v1131_v61 }
 0x7c6   :  { %2204 = vmatpush3.bf16.msra.mxu0 %v1131_v61 }
 0x7c7   :  { %2287 = vmatprep.subr.msk.bf16.mxu0 %vm243_vm1, %v1202_v33  ;;  %v1200_v40 = vpop.permute.xlu1 %1199 }
 0x7c8   :  { %v1198_v11 = vpop.permute.xlu0 %1197 }
 0x7ca   :  { %v2836_v44 = vpop.eup %2383 }
 0x7cb   :  { %v2838_v52 = vpop.eup %2385  ;;  %v1313_v57 = vpop.permute.xlu1 %1312 }
 0x7cc   :  { %2217 = vmatprep.subr.bf16.mxu1 %v1313_v57  ;;  %v1126_v30 = vpack.c.bf16 %v2836_v44, %v2838_v52  ;;  %v2842_v62 = vpop.eup %2387 }
 0x7cd   :  { %2218 = vmatpush3.bf16.msra.mxu1 %v1313_v57 }
 0x7ce   :  { %2205 = vmatprep.mubr.msk.bf16.mxu0 %vm103_vm0, %v1126_v30 }
 0x7cf   :  { %v2845_v5 = vpop.eup %2389 }
 0x7d0   :  { %v1127_v9 = vpack.c.bf16 %v2845_v5, %v2842_v62 }
 0x7d2   :  { %2206 = vmatmul.mubr.msk.bf16.vlgmr.msra.gmra.mrb[32].mxu0 %vm103_vm0, %v1127_v9 }
 0x7d3   :  { %2210 = vmatpush3.bf16.xpose.msra.mxu0 %v1212_v10  ;;  %2213 = vmatprep.mubr.msk.bf16.mxu0 %vm243_vm1, %v1198_v11 }
 0x7d4   :  { %2288 = vmatprep.subr.msk.bf16.mxu0 %vm243_vm1, %v1204_v58 }
 0x7db   :  { %2212 = vmatpush3.bf16.xpose.msra.mxu0 %v1215_v17 }
 0x7e2   :  { %2214 = vmatmul.mubr.msk.bf16.vlgmr.msra.gmra.mrb[36].mxu0 %vm243_vm1, %v1200_v40 }
 0x8a5   :  { %v2855_v18 = vpop.f32.mrb[32].mxu0 }
 0x8a6   :  { %3192 = vst [vmem:[#allocation7_spill] sm:$0xff] %v2855_v18  ;;  %v2857_v21 = vpop.f32.mrb[33].mxu0 }
 0x8a7   :  { %3193 = vst [vmem:[#allocation8_spill] sm:$0xff] %v2857_v21  ;;  %v2859_v27 = vpop.f32.mrb[34].mxu0 }
 0x8a8   :  { %3194 = vst [vmem:[#allocation9_spill] sm:$0xff] %v2859_v27  ;;  %v2861_v33 = vpop.f32.mrb[35].mxu0 }
 0x8a9   :  { %3195 = vst [vmem:[#allocation10_spill] sm:$0xff] %v2861_v33 }
 0x8b5   :  { %v2215_v31 = vpop.f32.mrb[36].mxu0 }
 0x8b6   :  { %v1268_v47 = vmul.f32 0.25, %v2215_v31  ;;  %v1251_v48 = vpop.f32.mrb[37].mxu0 }
 0x8b7   :  { %v1266_v51 = vmul.f32 0.25, %v1251_v48  ;;  %v2216_v61 = vpop.f32.mrb[38].mxu0 }
 0x8b8   :  { %v1254_v57 = vpop.f32.mrb[39].mxu0  ;;  %v1272_v30 = vadd.f32 %v2630_v20, %v1268_v47  ;;  %v1269_v9 = vmul.f32 0.25, %v2216_v61 }
 0x8b9   :  { %v1267_v58 = vmul.f32 0.25, %v1254_v57  ;;  %v1270_v10 = vadd.f32 %v2635_v25, %v1266_v51 }
 0x8ba   :  { %v1280_v40 = vsel %vm103_vm0, %v1272_v30, -inf  ;;  %v1273_v48 = vadd.f32 %v2655_v34, %v1269_v9 }
 0x8bb   :  { %1281 = vmax.xlane.f32.xlu0 %v1280_v40  ;;  %v1271_v11 = vadd.f32 %v2661_v37, %v1267_v58  ;;  %v1274_v31 = vsel %vm103_vm0, %v1270_v10, -inf }
 0x8bc   :  { %v1283_v27 = vsel %vm103_vm0, %v1273_v48, -inf }
 0x8bd   :  { %v1277_v17 = vsel %vm103_vm0, %v1271_v11, -inf }
 0x8be   :  { %1278 = vmax.xlane.f32.xlu1 %v1277_v17 }
 0x8bf   :  { %1275 = vmax.xlane.f32.xlu0 %v1274_v31 }
 0x8c3   :  { %1284 = vmax.xlane.f32.xlu0 %v1283_v27 }
 0x8cf   :  { %1403 = vrot.lane.b32.xlu1 %v2585_v50, %s2480_s18 }
 0x8d3   :  { %1405 = vrot.lane.b32.xlu1 %v2583_v49, %s2480_s18 }
 0x8d7   :  { %1514 = vrot.lane.b32.xlu1 %v2585_v50, %s2482_s19 }
 0x8d9   :  { %1314 = vrot.lane.b32.xlu0 %v2579_v39, %s2483_s20 }
 0x948   :  { %v1282_v47 = vpop.xlane.xlu0 %1281 }
 0x949   :  { %v1288_v61 = vsub.f32 %v1272_v30, %v1282_v47 }
 0x94b   :  { %v1279_v51 = vpop.xlane.xlu1 %1278  ;;  %v1294_v31 = vmul.f32 1.442695, %v1288_v61 }
 0x94c   :  { %v1287_v57 = vsub.f32 %v1271_v11, %v1279_v51  ;;  %v1276_v58 = vpop.xlane.xlu0 %1275 }
 0x94d   :  { %v1286_v9 = vsub.f32 %v1270_v10, %v1276_v58 }
 0x94e   :  { %v1292_v40 = vmul.f32 1.442695, %v1287_v57 }
 0x94f   :  { %v1290_v27 = vmul.f32 1.442695, %v1286_v9  ;;  %v1404_v17 = vpop.permute.xlu1 %1403 }
 0x950   :  { %2391 = vpow2.f32 %v1292_v40  ;;  %v1285_v18 = vpop.xlane.xlu0 %1284 }
 0x951   :  { %2393 = vpow2.f32 %v1290_v27  ;;  %v1289_v21 = vsub.f32 %v1273_v48, %v1285_v18 }
 0x952   :  { %2395 = vpow2.f32 %v1294_v31 }
 0x953   :  { %v1296_v33 = vmul.f32 1.442695, %v1289_v21  ;;  %v1406_v36 = vpop.permute.xlu1 %1405 }
 0x954   :  { %v1315_v32 = vpop.permute.xlu0 %1314  ;;  %v1417_v48 = vsel %vm243_vm1, %v1406_v36, 0 }
 0x955   :  { %2397 = vpow2.f32 %v1296_v33  ;;  %2219 = vmatprep.subr.bf16.mxu1 %v1315_v32  ;;  %v1414_v33 = vsel %vm243_vm1, %v1404_v17, 0 }
 0x956   :  { %2220 = vmatpush3.bf16.msra.mxu1 %v1315_v32 }
 0x957   :  { %2289 = vmatprep.subr.msk.bf16.mxu1 %vm243_vm1, %v1404_v17  ;;  %v1515_v39 = vpop.permute.xlu1 %1514 }
 0x958   :  { %2233 = vmatprep.subr.bf16.mxu0 %v1515_v39 }
 0x959   :  { %2234 = vmatpush3.bf16.msra.mxu0 %v1515_v39 }
 0x95a   :  { %v2880_v30 = vpop.eup %2391 }
 0x95b   :  { %v2882_v10 = vpop.eup %2393 }
 0x95c   :  { %v1310_v11 = vpack.c.bf16 %v2880_v30, %v2882_v10  ;;  %v2886_v18 = vpop.eup %2395 }
 0x95e   :  { %2221 = vmatprep.mubr.msk.bf16.mxu1 %vm103_vm0, %v1310_v11 }
 0x95f   :  { %v2889_v21 = vpop.eup %2397 }
 0x960   :  { %v1311_v32 = vpack.c.bf16 %v2889_v21, %v2886_v18 }
 0x962   :  { %2222 = vmatmul.mubr.msk.bf16.vlgmr.msra.gmra.mrb[20].mxu1 %vm103_vm0, %v1311_v32 }
 0x963   :  { %2226 = vmatpush3.bf16.xpose.msra.mxu1 %v1414_v33  ;;  %2229 = vmatprep.mubr.msk.bf16.mxu1 %vm243_vm1, %v2585_v50 }
 0x964   :  { %2290 = vmatprep.subr.msk.bf16.mxu1 %vm243_vm1, %v1406_v36 }
 0x96b   :  { %2228 = vmatpush3.bf16.xpose.msra.mxu1 %v1417_v48 }
 0x972   :  { %2230 = vmatmul.mubr.msk.bf16.vlgmr.msra.gmra.mrb[24].mxu1 %vm243_vm1, %v2583_v49 }
 0xa35   :  { %v2901_v47 = vpop.f32.mrb[20].mxu1 }
 0xa36   :  { %v2903_v51 = vpop.f32.mrb[21].mxu1 }
 0xa37   :  { %v2905_v61 = vpop.f32.mrb[22].mxu1 }
 0xa38   :  { %v2907_v57 = vpop.f32.mrb[23].mxu1 }
 0xa45   :  { %v2231_v58 = vpop.f32.mrb[24].mxu1 }
 0xa46   :  { %v1470_v9 = vmul.f32 0.25, %v2231_v58  ;;  %v1453_v40 = vpop.f32.mrb[25].mxu1 }
 0xa47   :  { %v1468_v27 = vmul.f32 0.25, %v1453_v40  ;;  %v2232_v17 = vpop.f32.mrb[26].mxu1 }
 0xa48   :  { %v1456_v31 = vpop.f32.mrb[27].mxu1  ;;  %v1474_v36 = vadd.f32 %v1470_v9, %v2602_v63  ;;  %v1471_v11 = vmul.f32 0.25, %v2232_v17 }
 0xa49   :  { %v1469_v39 = vmul.f32 0.25, %v1456_v31  ;;  %v1472_v33 = vadd.f32 %v1468_v27, %v2607_v4 }
 0xa4a   :  { %v1482_v32 = vsel %vm103_vm0, %v1474_v36, -inf  ;;  %v1475_v40 = vadd.f32 %v1471_v11, %v2621_v13 }
 0xa4b   :  { %1483 = vmax.xlane.f32.xlu0 %v1482_v32  ;;  %v1473_v48 = vadd.f32 %v1469_v39, %v2613_v7  ;;  %v1476_v58 = vsel %vm103_vm0, %v1472_v33, -inf }
 0xa4c   :  { %v1485_v53 = vsel %vm103_vm0, %v1475_v40, -inf }
 0xa4d   :  { %v1479_v55 = vsel %vm103_vm0, %v1473_v48, -inf }
 0xa4e   :  { %1480 = vmax.xlane.f32.xlu1 %v1479_v55 }
 0xa4f   :  { %1477 = vmax.xlane.f32.xlu0 %v1476_v58 }
 0xa53   :  { %1486 = vmax.xlane.f32.xlu0 %v1485_v53 }
 0xa5f   :  { %1587 = vrot.lane.b32.xlu1 %v2585_v50, %s2479_s0 }
 0xa63   :  { %1589 = vrot.lane.b32.xlu1 %v2583_v49, %s2479_s0 }
 0xa67   :  { %1585 = vrot.lane.b32.xlu1 %v2583_v49, %s2481_s2 }
 0xa69   :  { %1516 = vrot.lane.b32.xlu0 %v2583_v49, %s2482_s19 }
 0xa6d   :  { %1583 = vrot.lane.b32.xlu0 %v2585_v50, %s2481_s2 }
 0xad8   :  { %v1484_v63 = vpop.xlane.xlu0 %1483 }
 0xad9   :  { %v1490_v7 = vsub.f32 %v1474_v36, %v1484_v63 }
 0xadb   :  { %v1481_v4 = vpop.xlane.xlu1 %1480  ;;  %v1496_v17 = vmul.f32 1.442695, %v1490_v7 }
 0xadc   :  { %v1489_v13 = vsub.f32 %v1473_v48, %v1481_v4  ;;  %v1478_v53 = vpop.xlane.xlu0 %1477 }
 0xadd   :  { %v1488_v55 = vsub.f32 %v1472_v33, %v1478_v53 }
 0xade   :  { %v1494_v9 = vmul.f32 1.442695, %v1489_v13 }
 0xadf   :  { %v1492_v27 = vmul.f32 1.442695, %v1488_v55  ;;  %v1588_v58 = vpop.permute.xlu1 %1587 }
 0xae0   :  { %2399 = vpow2.f32 %v1494_v9  ;;  %v1487_v31 = vpop.xlane.xlu0 %1486  ;;  %v1598_v7 = vsel %vm243_vm1, %v1588_v58, 0 }
 0xae1   :  { %2401 = vpow2.f32 %v1492_v27  ;;  %v1491_v39 = vsub.f32 %v1475_v40, %v1487_v31 }
 0xae2   :  { %2403 = vpow2.f32 %v1496_v17 }
 0xae3   :  { %v1498_v11 = vmul.f32 1.442695, %v1491_v39  ;;  %v1590_v53 = vpop.permute.xlu1 %1589 }
 0xae4   :  { %v1517_v32 = vpop.permute.xlu0 %1516  ;;  %v1601_v55 = vsel %vm243_vm1, %v1590_v53, 0 }
 0xae5   :  { %2405 = vpow2.f32 %v1498_v11  ;;  %2235 = vmatprep.subr.bf16.mxu0 %v1517_v32 }
 0xae6   :  { %2236 = vmatpush3.bf16.msra.mxu0 %v1517_v32 }
 0xae7   :  { %2291 = vmatprep.subr.msk.bf16.mxu0 %vm243_vm1, %v1588_v58  ;;  %v1586_v9 = vpop.permute.xlu1 %1585 }
 0xae8   :  { %v1584_v13 = vpop.permute.xlu0 %1583 }
 0xaea   :  { %v2928_v36 = vpop.eup %2399 }
 0xaeb   :  { %v2930_v48 = vpop.eup %2401 }
 0xaec   :  { %v1512_v33 = vpack.c.bf16 %v2928_v36, %v2930_v48  ;;  %v2934_v63 = vpop.eup %2403 }
 0xaee   :  { %2237 = vmatprep.mubr.msk.bf16.mxu0 %vm103_vm0, %v1512_v33 }
 0xaef   :  { %v2937_v40 = vpop.eup %2405 }
 0xaf0   :  { %v1513_v4 = vpack.c.bf16 %v2937_v40, %v2934_v63 }
 0xaf2   :  { %2238 = vmatmul.mubr.msk.bf16.vlgmr.msra.gmra.mrb[40].mxu0 %vm103_vm0, %v1513_v4 }
 0xaf3   :  { %2242 = vmatpush3.bf16.xpose.msra.mxu0 %v1598_v7  ;;  %2245 = vmatprep.mubr.msk.bf16.mxu0 %vm243_vm1, %v1584_v13 }
 0xaf4   :  { %2292 = vmatprep.subr.msk.bf16.mxu0 %vm243_vm1, %v1590_v53 }
 0xafb   :  { %2244 = vmatpush3.bf16.xpose.msra.mxu0 %v1601_v55 }
 0xb02   :  { %2246 = vmatmul.mubr.msk.bf16.vlgmr.msra.gmra.mrb[44].mxu0 %vm243_vm1, %v1586_v9 }
 0xbc5   :  { %v2947_v27 = vpop.f32.mrb[40].mxu0 }
 0xbc6   :  { %3196 = vst [vmem:[#allocation11_spill] sm:$0xff] %v2947_v27  ;;  %v2949_v17 = vpop.f32.mrb[41].mxu0 }
 0xbc7   :  { %v2951_v31 = vpop.f32.mrb[42].mxu0 }
 0xbc8   :  { %3197 = vst [vmem:[#allocation12_spill] sm:$0xff] %v2951_v31  ;;  %v2953_v39 = vpop.f32.mrb[43].mxu0 }
 0xbc9   :  { %3198 = vst [vmem:[#allocation13_spill] sm:$0xff] %v2953_v39 }
 0xbd5   :  { %v2247_v11 = vpop.f32.mrb[44].mxu0 }
 0xbd6   :  { %v1654_v32 = vmul.f32 0.25, %v2247_v11  ;;  %v1637_v58 = vpop.f32.mrb[45].mxu0 }
 0xbd7   :  { %v1652_v33 = vmul.f32 0.25, %v1637_v58  ;;  %v2248_v4 = vpop.f32.mrb[46].mxu0 }
 0xbd8   :  { %v1640_v7 = vpop.f32.mrb[47].mxu0  ;;  %v1658_v13 = vadd.f32 %v2630_v20, %v1654_v32  ;;  %v1655_v55 = vmul.f32 0.25, %v2248_v4  ;;  %v526_v20 = vsel %vm103_vm0, %v2684_v22, 0.0  ;;  %v915_v22 = vsel %vm103_vm0, %v2786_v2, 0.0 }
 0xbd9   :  { %v1653_v53 = vmul.f32 0.25, %v1640_v7  ;;  %v1656_v27 = vadd.f32 %v2635_v25, %v1652_v33  ;;  %v532_v25 = vsel %vm103_vm0, %v2690_v26, 0.0  ;;  %v921_v26 = vsel %vm103_vm0, %v2795_v8, 0.0 }
 0xbda   :  { %v1666_v9 = vsel %vm103_vm0, %v1658_v13, -inf  ;;  %v1659_v58 = vadd.f32 %v2655_v34, %v1655_v55  ;;  %v529_v34 = vsel %vm103_vm0, %v2688_v24, 0.0  ;;  %v1298_v24 = vsel %vm103_vm0, %v2882_v10, 0.0 }
 0xbdb   :  { %v1657_v56 = vadd.f32 %v2661_v37, %v1653_v53  ;;  %1667 = vmax.xlane.f32.xlu0 %v1666_v9  ;;  %v1660_v11 = vsel %vm103_vm0, %v1656_v27, -inf  ;;  %v912_v37 = vsel %vm103_vm0, %v2788_v3, 0.0  ;;  %v1301_v3 = vsel %vm103_vm0, %v2880_v30, 0.0 }
 0xbdc   :  { %v1669_v39 = vsel %vm103_vm0, %v1659_v58, -inf  ;;  %v337_v2 = vsel %vm103_vm0, %v2670_v60, 0.0 }
 0xbdd   :  { %v1663_v31 = vsel %vm103_vm0, %v1657_v56, -inf }
 0xbde   :  { %1664 = vmax.xlane.f32.xlu1 %v1663_v31 }
 0xbdf   :  { %1661 = vmax.xlane.f32.xlu0 %v1660_v11 }
 0xbe3   :  { %1670 = vmax.xlane.f32.xlu0 %v1669_v39 }
 0xbef   :  { %1698 = vrot.lane.b32.xlu1 %v2585_v50, %s2483_s20  ;;  %v535_v50 = vsel %vm103_vm0, %v2686_v23, 0.0  ;;  %v1304_v23 = vsel %vm103_vm0, %v2886_v18, 0.0 }
 0xbf9   :  { %1700 = vrot.lane.b32.xlu0 %v2583_v49, %s2483_s20  ;;  %v918_v49 = vsel %vm103_vm0, %v2792_v6, 0.0  ;;  %v1307_v6 = vsel %vm103_vm0, %v2889_v21, 0.0 }
 0xc13   :  { %527 = vadd.xlane.f32.xlu1 %v526_v20 }
 0xc17   :  { %533 = vadd.xlane.f32.xlu1 %v532_v25 }
 0xc18   :  { %530 = vadd.xlane.f32.xlu0 %v529_v34  ;;  %v343_v34 = vsel %vm103_vm0, %v2674_v0, 0.0  ;;  %v1114_v0 = vsel %vm103_vm0, %v2838_v52, 0.0  ;;  %v1117_v52 = vsel %vm103_vm0, %v2836_v44, 0.0 }
 0xc1b   :  { %913 = vadd.xlane.f32.xlu1 %v912_v37 }
 0xc1c   :  { %536 = vadd.xlane.f32.xlu0 %v535_v50  ;;  %v728_v50 = vsel %vm103_vm0, %v2744_v29, 0.0  ;;  %v1120_v29 = vsel %vm103_vm0, %v2842_v62, 0.0 }
 0xc1f   :  { %919 = vadd.xlane.f32.xlu1 %v918_v49 }
 0xc20   :  { %916 = vadd.xlane.f32.xlu0 %v915_v22  ;;  %v734_v22 = vsel %vm103_vm0, %v2748_v45, 0.0  ;;  %v737_v45 = vsel %vm103_vm0, %v2751_v46, 0.0 }
 0xc23   :  { %1299 = vadd.xlane.f32.xlu1 %v1298_v24  ;;  %v340_v24 = vsel %vm103_vm0, %v2668_v59, 0.0  ;;  %v1500_v59 = vsel %vm103_vm0, %v2930_v48, 0.0  ;;  %v1503_v48 = vsel %vm103_vm0, %v2928_v36, 0.0 }
 0xc24   :  { %922 = vadd.xlane.f32.xlu0 %v921_v26  ;;  %v346_v26 = vsel %vm103_vm0, %v2677_v1, 0.0  ;;  %v1506_v1 = vsel %vm103_vm0, %v2934_v63, 0.0 }
 0xc27   :  { %1305 = vadd.xlane.f32.xlu1 %v1304_v23  ;;  %v731_v23 = vsel %vm103_vm0, %v2742_v28, 0.0  ;;  %v1123_v28 = vsel %vm103_vm0, %v2845_v5, 0.0 }
 0xc28   :  { %1302 = vadd.xlane.f32.xlu0 %v1301_v3  ;;  %v1509_v3 = vsel %vm103_vm0, %v2937_v40, 0.0 }
 0xc2b   :  { %338 = vadd.xlane.f32.xlu1 %v337_v2 }
 0xc2c   :  { %1308 = vadd.xlane.f32.xlu0 %v1307_v6 }
 0xc68   :  { %v1668_v10 = vpop.xlane.xlu0 %1667 }
 0xc69   :  { %v1674_v31 = vsub.f32 %v1658_v13, %v1668_v10 }
 0xc6b   :  { %v1680_v8 = vmul.f32 1.442695, %v1674_v31  ;;  %v1665_v39 = vpop.xlane.xlu1 %1664 }
 0xc6c   :  { %v1673_v32 = vsub.f32 %v1657_v56, %v1665_v39  ;;  %v1662_v33 = vpop.xlane.xlu0 %1661 }
 0xc6d   :  { %2407 = vpow2.f32 %v1680_v8  ;;  %v1672_v18 = vsub.f32 %v1656_v27, %v1662_v33 }
 0xc6e   :  { %v1678_v4 = vmul.f32 1.442695, %v1673_v32 }
 0xc6f   :  { %v1676_v7 = vmul.f32 1.442695, %v1672_v18  ;;  %v1699_v30 = vpop.permute.xlu1 %1698  ;;  %v2349_v18 = vld [vmem:[%s3184_s4] sm:$0xff]  }
 0xc70   :  { %2409 = vpow2.f32 %v1678_v4  ;;  %v1671_v53 = vpop.xlane.xlu0 %1670  ;;  %2249 = vmatprep.subr.bf16.mxu1 %v1699_v30 }
 0xc71   :  { %2411 = vpow2.f32 %v1676_v7  ;;  %v1675_v60 = vsub.f32 %v1659_v58, %v1671_v53  ;;  %2250 = vmatpush3.bf16.msra.mxu1 %v1699_v30 }
 0xc73   :  { %v1682_v55 = vmul.f32 1.442695, %v1675_v60 }
 0xc74   :  { %v1701_v21 = vpop.permute.xlu0 %1700 }
 0xc75   :  { %2413 = vpow2.f32 %v1682_v55  ;;  %2251 = vmatprep.subr.bf16.mxu1 %v1701_v21  ;;  %v2350_v55 = vld [vmem:[%s3184_s4 + $0x8] sm:$0xff]  }
 0xc76   :  { %2252 = vmatpush3.bf16.msra.mxu1 %v1701_v21 }
 0xc77   :  { %v2408_v13 = vpop.eup %2407  ;;  %2257 = vmatprep.subr.bf16.mxu1 %v2349_v18 }
 0xc78   :  { %v1690_v56 = vsel %vm103_vm0, %v2408_v13, 0.0 }
 0xc79   :  { %1691 = vadd.xlane.f32.xlu1 %v1690_v56 }
 0xc7a   :  { %v2410_v9 = vpop.eup %2409 }
 0xc7b   :  { %v2412_v27 = vpop.eup %2411  ;;  %v1687_v49 = vsel %vm103_vm0, %v2410_v9, 0.0 }
 0xc7c   :  { %v1684_v11 = vsel %vm103_vm0, %v2412_v27, 0.0  ;;  %v1696_v20 = vpack.c.bf16 %v2410_v9, %v2412_v27 }
 0xc7d   :  { %1685 = vadd.xlane.f32.xlu1 %v1684_v11 }
 0xc7e   :  { %2253 = vmatprep.mubr.msk.bf16.mxu1 %vm103_vm0, %v1696_v20 }
 0xc7f   :  { %v2414_v25 = vpop.eup %2413 }
 0xc80   :  { %v1693_v58 = vsel %vm103_vm0, %v2414_v25, 0.0  ;;  %v1697_v37 = vpack.c.bf16 %v2414_v25, %v2408_v13 }
 0xc81   :  { %1694 = vadd.xlane.f32.xlu0 %v1693_v58  ;;  %344 = vadd.xlane.f32.xlu1 %v343_v34 }
 0xc82   :  { %2254 = vmatmul.mubr.msk.bf16.vlgmr.msra.gmra.mrb[28].mxu1 %vm103_vm0, %v1697_v37 }
 0xc83   :  { %2258 = vmatpush3.bf16.msra.mxu1 %v2349_v18 }
 0xc84   :  { %2259 = vmatprep.subr.bf16.mxu1 %v2350_v55 }
 0xc85   :  { %729 = vadd.xlane.f32.xlu1 %v728_v50  ;;  %1688 = vadd.xlane.f32.xlu0 %v1687_v49 }
 0xc87   :  { %2260 = vmatpush3.bf16.msra.mxu1 %v2350_v55 }
 0xc89   :  { %735 = vadd.xlane.f32.xlu1 %v734_v22  ;;  %341 = vadd.xlane.f32.xlu0 %v340_v24 }
 0xc8d   :  { %1115 = vadd.xlane.f32.xlu1 %v1114_v0  ;;  %347 = vadd.xlane.f32.xlu0 %v346_v26 }
 0xc91   :  { %1121 = vadd.xlane.f32.xlu1 %v1120_v29  ;;  %732 = vadd.xlane.f32.xlu0 %v731_v23 }
 0xc95   :  { %1501 = vadd.xlane.f32.xlu1 %v1500_v59  ;;  %738 = vadd.xlane.f32.xlu0 %v737_v45 }
 0xc99   :  { %1507 = vadd.xlane.f32.xlu1 %v1506_v1  ;;  %1118 = vadd.xlane.f32.xlu0 %v1117_v52 }
 0xc9d   :  { %1124 = vadd.xlane.f32.xlu0 %v1123_v28 }
 0xca0   :  { %v528_v62 = vpop.xlane.xlu1 %527 }
 0xca1   :  { %1504 = vadd.xlane.f32.xlu0 %v1503_v48  ;;  %2415 = vrcp.f32 %v528_v62 }
 0xca4   :  { %v534_v46 = vpop.xlane.xlu1 %533 }
 0xca5   :  { %v531_v63 = vpop.xlane.xlu0 %530  ;;  %1510 = vadd.xlane.f32.xlu0 %v1509_v3 }
 0xca6   :  { %2417 = vrcp.f32 %v531_v63 }
 0xca7   :  { %2419 = vrcp.f32 %v534_v46 }
 0xca8   :  { %v914_v44 = vpop.xlane.xlu1 %913 }
 0xca9   :  { %v537_v2 = vpop.xlane.xlu0 %536 }
 0xcaa   :  { %2421 = vrcp.f32 %v537_v2 }
 0xcab   :  { %2423 = vrcp.f32 %v914_v44  ;;  %v2416_v10 = vpop.eup %2415 }
 0xcac   :  { %v920_v5 = vpop.xlane.xlu1 %919  ;;  %v605_v39 = vmul.f32 %v2416_v10, %v2715_v41 }
 0xcad   :  { %v917_v6 = vpop.xlane.xlu0 %916 }
 0xcae   :  { %2425 = vrcp.f32 %v917_v6 }
 0xcaf   :  { %2427 = vrcp.f32 %v920_v5 }
 0xcb0   :  { %v2418_v31 = vpop.eup %2417  ;;  %v1300_v36 = vpop.xlane.xlu1 %1299 }
 0xcb1   :  { %v923_v8 = vpop.xlane.xlu0 %922  ;;  %v606_v40 = vmul.f32 %v2418_v31, %v2719_v43  ;;  %v2420_v32 = vpop.eup %2419 }
 0xcb2   :  { %2429 = vrcp.f32 %v923_v8  ;;  %v607_v53 = vmul.f32 %v2420_v32, %v2713_v38 }
 0xcb3   :  { %v2299_v33 = vpack.i.bf16 %v606_v40, %v605_v39  ;;  %2431 = vrcp.f32 %v1300_v36 }
 0xcb4   :  { %v2422_v4 = vpop.eup %2421  ;;  %v1306_v7 = vpop.xlane.xlu1 %1305 }
 0xcb5   :  { %v1303_v30 = vpop.xlane.xlu0 %1302  ;;  %2300 = vrot.lane.b32.xlu1 %v2299_v33, %s2484_s13  ;;  %v608_v41 = vmul.f32 %v2422_v4, %v2717_v42  ;;  %v2424_v43 = vpop.eup %2423 }
 0xcb6   :  { %2433 = vrcp.f32 %v1303_v30  ;;  %v991_v56 = vmul.f32 %v2424_v43, %v2809_v14  ;;  %v3199_v30 = vld [vmem:[#allocation6_spill] sm:$0xff] }
 0xcb7   :  { %v2304_v60 = vpack.i.bf16 %v608_v41, %v607_v53  ;;  %2435 = vrcp.f32 %v1306_v7 }
 0xcb8   :  { %v2426_v21 = vpop.eup %2425 }
 0xcb9   :  { %v1309_v13 = vpop.xlane.xlu0 %1308  ;;  %v992_v9 = vmul.f32 %v2426_v21, %v2813_v16  ;;  %v2428_v38 = vpop.eup %2427 }
 0xcba   :  { %2437 = vrcp.f32 %v1309_v13  ;;  %v993_v11 = vmul.f32 %v2428_v38, %v2807_v12 }
 0xcbb   :  { %2305 = vrot.lane.b32.xlu0 %v2304_v60, %s2484_s13  ;;  %v2309_v42 = vpack.i.bf16 %v992_v9, %v991_v56 }
 0xcbc   :  { %v2430_v27 = vpop.eup %2429 }
 0xcbd   :  { %2310 = vrot.lane.b32.xlu1 %v2309_v42, %s2484_s13  ;;  %v994_v20 = vmul.f32 %v2430_v27, %v2811_v15  ;;  %v2432_v25 = vpop.eup %2431  ;;  %v339_v15 = vpop.xlane.xlu1 %338  ;;  %v3200_v42 = vld [vmem:[#allocation11_spill] sm:$0xff] }
 0xcbe   :  { %v1377_v14 = vmul.f32 %v2432_v25, %v2903_v51  ;;  %2439 = vrcp.f32 %v339_v15  ;;  %v3202_v25 = vld [vmem:[#allocation5_spill] sm:$0xff] }
 0xcbf   :  { %v2314_v58 = vpack.i.bf16 %v994_v20, %v993_v11  ;;  %v3201_v11 = vld [vmem:[#allocation4_spill] sm:$0xff] }
 0xcc0   :  { %v2434_v34 = vpop.eup %2433 }
 0xcc1   :  { %2315 = vrot.lane.b32.xlu1 %v2314_v58, %s2484_s13  ;;  %v1378_v16 = vmul.f32 %v2434_v34, %v2907_v57  ;;  %v2436_v37 = vpop.eup %2435 }
 0xcc2   :  { %v1379_v22 = vmul.f32 %v2436_v37, %v2901_v47 }
 0xcc3   :  { %v2319_v50 = vpack.i.bf16 %v1378_v16, %v1377_v14 }
 0xcc4   :  { %v2438_v49 = vpop.eup %2437 }
 0xcc5   :  { %2320 = vrot.lane.b32.xlu0 %v2319_v50, %s2484_s13  ;;  %v1380_v12 = vmul.f32 %v2438_v49, %v2905_v61 }
 0xcc7   :  { %v2324_v24 = vpack.i.bf16 %v1380_v12, %v1379_v22  ;;  %v3203_v12 = vld [vmem:[#allocation2_spill] sm:$0xff] }
 0xcc8   :  { %v2440_v3 = vpop.eup %2439 }
 0xcc9   :  { %2325 = vrot.lane.b32.xlu1 %v2324_v24, %s2484_s13  ;;  %v416_v2 = vmul.f32 %v2440_v3, %v2707_v35 }
 0xd06   :  { %v3053_v0 = vpop.xlane.xlu1 %1691 }
 0xd0a   :  { %v3055_v26 = vpop.xlane.xlu1 %1685 }
 0xd0e   :  { %v3057_v51 = vpop.xlane.xlu0 %1694  ;;  %v345_v57 = vpop.xlane.xlu1 %344 }
 0xd12   :  { %v3059_v29 = vpop.xlane.xlu0 %1688  ;;  %v730_v23 = vpop.xlane.xlu1 %729 }
 0xd16   :  { %v342_v59 = vpop.xlane.xlu0 %341  ;;  %v736_v45 = vpop.xlane.xlu1 %735 }
 0xd17   :  { %2441 = vrcp.f32 %v342_v59 }
 0xd18   :  { %2443 = vrcp.f32 %v730_v23  ;;  %v3204_v23 = vld [vmem:[#allocation3_spill] sm:$0xff] }
 0xd1a   :  { %v348_v1 = vpop.xlane.xlu0 %347  ;;  %v1116_v47 = vpop.xlane.xlu1 %1115 }
 0xd1e   :  { %v733_v61 = vpop.xlane.xlu0 %732  ;;  %v1122_v52 = vpop.xlane.xlu1 %1121 }
 0xd1f   :  { %2445 = vrcp.f32 %v733_v61 }
 0xd21   :  { %v2442_v63 = vpop.eup %2441 }
 0xd22   :  { %v739_v28 = vpop.xlane.xlu0 %738  ;;  %v1502_v62 = vpop.xlane.xlu1 %1501  ;;  %v417_v6 = vmul.f32 %v2442_v63, %v2711_v19  ;;  %v3206_v63 = vld [vmem:[#allocation10_spill] sm:$0xff] }
 0xd23   :  { %2447 = vrcp.f32 %v1502_v62  ;;  %v2444_v36 = vpop.eup %2443 }
 0xd24   :  { %2449 = vrcp.f32 %v736_v45  ;;  %v807_v7 = vmul.f32 %v2444_v36, %v2763_v54  ;;  %v3208_v36 = vld [vmem:[#allocation7_spill] sm:$0xff] }
 0xd25   :  { %2451 = vrcp.f32 %v739_v28 }
 0xd26   :  { %v1119_v48 = vpop.xlane.xlu0 %1118  ;;  %v1508_v46 = vpop.xlane.xlu1 %1507 }
 0xd27   :  { %2453 = vrcp.f32 %v1508_v46  ;;  %v3205_v46 = vld [vmem:[#allocation13_spill] sm:$0xff] }
 0xd28   :  { %2455 = vrcp.f32 %v345_v57 }
 0xd29   :  { %2457 = vrcp.f32 %v348_v1  ;;  %v2446_v8 = vpop.eup %2445 }
 0xd2a   :  { %v1125_v44 = vpop.xlane.xlu0 %1124  ;;  %v2301_v5 = vpop.permute.xlu1 %2300  ;;  %2459 = vrcp.f32 %v1116_v47  ;;  %v808_v53 = vmul.f32 %v2446_v8, %v3199_v30 }
 0xd2b   :  { %v2303_v10 = vunpack.i.h.bf16 %v2301_v5  ;;  %v2302_v31 = vunpack.i.l.bf16 %v2301_v5  ;;  %2461 = vrcp.f32 %v1122_v52 }
 0xd2c   :  { %2463 = vrcp.f32 %v1119_v48 }
 0xd2d   :  { %v626_v39 = vsel %vm243_vm1, %v417_v6, %v2303_v10  ;;  %v625_v40 = vsel %vm243_vm1, %v416_v2, %v2302_v31  ;;  %v2448_v32 = vpop.eup %2447  ;;  %2465 = vrcp.f32 %v1125_v44  ;;  %v3207_v6 = vld [vmem:[#allocation8_spill] sm:$0xff] }
 0xd2e   :  { %v1787_v33 = vpack.c.bf16 %v626_v39, %v625_v40  ;;  %v1505_v18 = vpop.xlane.xlu0 %1504  ;;  %v3066_v4 = vmul.f32 %v2448_v32, %v2949_v17  ;;  %v2450_v19 = vpop.eup %2449  ;;  %v3209_v39 = vld [vmem:[#allocation9_spill] sm:$0xff] }
 0xd2f   :  { %2467 = vrcp.f32 %v1505_v18  ;;  %v2311_v35 = vpop.permute.xlu1 %2310  ;;  %v2452_v60 = vpop.eup %2451  ;;  %v809_v20 = vmul.f32 %v2450_v19, %v3201_v11 }
 0xd30   :  { %v2313_v41 = vunpack.i.h.bf16 %v2311_v35  ;;  %v2312_v43 = vunpack.i.l.bf16 %v2311_v35  ;;  %2261 = vmatprep.mubr.msk.bf16.mxu1 %vm103_vm0, %v1787_v33  ;;  %v810_v58 = vmul.f32 %v2452_v60, %v3202_v25 }
 0xd31   :  { %v2454_v55 = vpop.eup %2453 }
 0xd32   :  { %v1012_v21 = vsel %vm243_vm1, %v808_v53, %v2313_v41  ;;  %v1011_v13 = vsel %vm243_vm1, %v807_v7, %v2312_v43  ;;  %v1511_v56 = vpop.xlane.xlu0 %1510  ;;  %v2456_v9 = vpop.eup %2455  ;;  %v3074_v27 = vmul.f32 %v2454_v55, %v3200_v42  ;;  %v3210_v41 = vld [vmem:[#allocation12_spill] sm:$0xff] }
 0xd33   :  { %v1789_v38 = vpack.c.bf16 %v1012_v21, %v1011_v13  ;;  %2469 = vrcp.f32 %v1511_v56  ;;  %v2316_v17 = vpop.permute.xlu1 %2315  ;;  %v2458_v54 = vpop.eup %2457  ;;  %v418_v24 = vmul.f32 %v2456_v9, %v3203_v12 }
 0xd34   :  { %v2318_v34 = vunpack.i.h.bf16 %v2316_v17  ;;  %v2317_v14 = vunpack.i.l.bf16 %v2316_v17  ;;  %v2460_v16 = vpop.eup %2459  ;;  %v419_v59 = vmul.f32 %v2458_v54, %v3204_v23  ;;  %2471 = vrcp.f32 %v3053_v0 }
 0xd35   :  { %v2462_v37 = vpop.eup %2461  ;;  %v1193_v10 = vmul.f32 %v2460_v16, %v3207_v6  ;;  %2473 = vrcp.f32 %v3055_v26 }
 0xd36   :  { %v1014_v50 = vsel %vm243_vm1, %v810_v58, %v2318_v34  ;;  %v1013_v49 = vsel %vm243_vm1, %v809_v20, %v2317_v14  ;;  %v2306_v22 = vpop.permute.xlu0 %2305  ;;  %v2464_v15 = vpop.eup %2463  ;;  %v1195_v8 = vmul.f32 %v2462_v37, %v3208_v36  ;;  %2475 = vrcp.f32 %v3057_v51 }
 0xd37   :  { %v1790_v57 = vpack.c.bf16 %v1014_v50, %v1013_v49  ;;  %v2308_v45 = vunpack.i.h.bf16 %v2306_v22  ;;  %v2307_v1 = vunpack.i.l.bf16 %v2306_v22  ;;  %v2466_v47 = vpop.eup %2465  ;;  %v1194_v44 = vmul.f32 %v2464_v15, %v3206_v63  ;;  %v2014_v15 = vld [vmem:[%s3185_s5] ss:$0 sm:$0xff] }
 0xd38   :  { %v1196_v40 = vmul.f32 %v2466_v47, %v3209_v39  ;;  %2477 = vrcp.f32 %v3059_v29 }
 0xd39   :  { %v2468_v61 = vpop.eup %2467  ;;  %v628_v52 = vsel %vm243_vm1, %v419_v59, %v2308_v45  ;;  %v627_v28 = vsel %vm243_vm1, %v418_v24, %v2307_v1 }
 0xd3a   :  { %v1788_v62 = vpack.c.bf16 %v628_v52, %v627_v28  ;;  %v2321_v48 = vpop.permute.xlu0 %2320  ;;  %v1580_v3 = vmul.f32 %v2468_v61, %v3205_v46 }
 0xd3b   :  { %v2323_v2 = vunpack.i.h.bf16 %v2321_v48  ;;  %v2322_v5 = vunpack.i.l.bf16 %v2321_v48  ;;  %v2326_v31 = vpop.permute.xlu1 %2325 }
 0xd3c   :  { %v2328_v32 = vunpack.i.h.bf16 %v2326_v31  ;;  %v2327_v33 = vunpack.i.l.bf16 %v2326_v31  ;;  %2262 = vmatmul.mubr.msk.bf16.vlgmr.msra.gmra.mrb[32].mxu1 %vm103_vm0, %v1788_v62 }
 0xd3d   :  { %v2470_v18 = vpop.eup %2469  ;;  %v1398_v35 = vsel %vm243_vm1, %v1194_v44, %v2323_v2  ;;  %v1397_v19 = vsel %vm243_vm1, %v1193_v10, %v2322_v5  ;;  %2265 = vmatprep.mubr.msk.bf16.mxu1 %vm103_vm0, %v1789_v38 }
 0xd3e   :  { %v1791_v7 = vpack.c.bf16 %v1398_v35, %v1397_v19  ;;  %v1400_v30 = vsel %vm243_vm1, %v1196_v40, %v2328_v32  ;;  %v1399_v53 = vsel %vm243_vm1, %v1195_v8, %v2327_v33  ;;  %v1582_v43 = vmul.f32 %v2470_v18, %v3210_v41  ;;  %v2472_v55 = vpop.eup %2471 }
 0xd3f   :  { %v1792_v60 = vpack.c.bf16 %v1400_v30, %v1399_v53  ;;  %v2474_v13 = vpop.eup %2473 }
 0xd40   :  { %v2476_v38 = vpop.eup %2475 }
 0xd42   :  { %v2478_v54 = vpop.eup %2477 }
 0xd44   :  { %2266 = vmatmul.mubr.msk.bf16.gmra.mrb[36].mxu1 %vm103_vm0, %v1790_v57 }
 0xd45   :  { %2269 = vmatprep.mubr.msk.bf16.mxu1 %vm103_vm0, %v1791_v7 }
 0xd4c   :  { %2270 = vmatmul.mubr.msk.bf16.gmra.mrb[40].mxu1 %vm103_vm0, %v1792_v60 }
 0xd55   :  { %v2255_v21 = vpop.f32.mrb[28].mxu1 }
 0xd56   :  { %v1765_v56 = vmul.f32 %v2472_v55, %v2255_v21  ;;  %v1744_v9 = vpop.f32.mrb[29].mxu1 }
 0xd57   :  { %v1763_v17 = vmul.f32 %v2474_v13, %v1744_v9  ;;  %v2256_v42 = vpop.f32.mrb[30].mxu1 }
 0xd58   :  { %v1766_v11 = vmul.f32 %v2476_v38, %v2256_v42  ;;  %v1747_v20 = vpop.f32.mrb[31].mxu1 }
 0xd59   :  { %v1764_v0 = vmul.f32 %v2478_v54, %v1747_v20 }
 0xd5a   :  { %v2334_v25 = vpack.i.bf16 %v1766_v11, %v1765_v56 }
 0xd5b   :  { %v2329_v26 = vpack.i.bf16 %v1764_v0, %v1763_v17 }
 0xd5c   :  { %2335 = vrot.lane.b32.xlu1 %v2334_v25, %s2484_s13 }
 0xd5d   :  { %2330 = vrot.lane.b32.xlu0 %v2329_v26, %s2484_s13 }
 0xdce   :  { %v2336_v51 = vpop.permute.xlu1 %2335 }
 0xdcf   :  { %v2338_v29 = vunpack.i.h.bf16 %v2336_v51  ;;  %v2337_v58 = vunpack.i.l.bf16 %v2336_v51  ;;  %v2331_v34 = vpop.permute.xlu0 %2330 }
 0xdd0   :  { %v2333_v14 = vunpack.i.h.bf16 %v2331_v34  ;;  %v2332_v16 = vunpack.i.l.bf16 %v2331_v34 }
 0xdd1   :  { %v1786_v37 = vsel %vm243_vm1, %v1582_v43, %v2338_v29  ;;  %v1785_v50 = vsel %vm243_vm1, %v3074_v27, %v2337_v58 }
 0xdd2   :  { %v1794_v49 = vpack.c.bf16 %v1786_v37, %v1785_v50  ;;  %v1784_v22 = vsel %vm243_vm1, %v1580_v3, %v2333_v14  ;;  %v1783_v12 = vsel %vm243_vm1, %v3066_v4, %v2332_v16 }
 0xdd3   :  { %v1793_v24 = vpack.c.bf16 %v1784_v22, %v1783_v12 }
 0xdd5   :  { %2273 = vmatprep.mubr.msk.bf16.mxu1 %vm103_vm0, %v1793_v24 }
 0xdd6   :  { %2274 = vmatmul.mubr.msk.bf16.gmra.mrb[44].mxu1 %vm103_vm0, %v1794_v49 }
 0xe0f   :  { %v2263_v57 = vpop.f32.mrb[32].mxu1 }
 0xe10   :  { %v1885_v23 = vadd.f32 %v2263_v57, %v2014_v15  ;;  %v1876_v59 = vpop.f32.mrb[33].mxu1 }
 0xe11   :  { %v1877_v45 = vadd.f32 %v2014_v15, %v1876_v59  ;;  %v2264_v27 = vpop.f32.mrb[34].mxu1 }
 0xe12   :  { %1941 = vst.msk [vmem:[%s3186_s6 + $0x10] sm:$0xff] %vm103_vm0, %v1885_v23  ;;  %v1888_v4 = vadd.f32 %v2264_v27, %v2014_v15  ;;  %v1879_v1 = vpop.f32.mrb[35].mxu1 }
 0xe13   :  { %1939 = vst.msk [vmem:[%s3186_s6] sm:$0xff] %vm103_vm0, %v1877_v45  ;;  %v1880_v47 = vadd.f32 %v2014_v15, %v1879_v1 }
 0xe14   :  { %1942 = vst.msk [vmem:[%s3186_s6 + $0x18] sm:$0xff] %vm103_vm0, %v1888_v4 }
 0xe15   :  { %1940 = vst.msk [vmem:[%s3186_s6 + $0x8] sm:$0xff] %vm103_vm0, %v1880_v47 }
 0xe17   :  { %v2267_v61 = vpop.f32.mrb[36].mxu1 }
 0xe18   :  { %v1901_v52 = vadd.f32 %v2267_v61, %v2014_v15  ;;  %v1892_v28 = vpop.f32.mrb[37].mxu1 }
 0xe19   :  { %v1893_v62 = vadd.f32 %v2014_v15, %v1892_v28  ;;  %v2268_v48 = vpop.f32.mrb[38].mxu1 }
 0xe1a   :  { %1945 = vst.msk [vmem:[%s3186_s6 + $0x30] sm:$0xff] %vm103_vm0, %v1901_v52  ;;  %v1904_v46 = vadd.f32 %v2268_v48, %v2014_v15  ;;  %v1895_v3 = vpop.f32.mrb[39].mxu1 }
 0xe1b   :  { %1943 = vst.msk [vmem:[%s3186_s6 + $0x20] sm:$0xff] %vm103_vm0, %v1893_v62  ;;  %v1896_v63 = vadd.f32 %v2014_v15, %v1895_v3 }
 0xe1c   :  { %1946 = vst.msk [vmem:[%s3186_s6 + $0x38] sm:$0xff] %vm103_vm0, %v1904_v46 }
 0xe1d   :  { %1944 = vst.msk [vmem:[%s3186_s6 + $0x28] sm:$0xff] %vm103_vm0, %v1896_v63 }
 0xe1f   :  { %v2271_v44 = vpop.f32.mrb[40].mxu1 }
 0xe20   :  { %v1917_v2 = vadd.f32 %v2271_v44, %v2014_v15  ;;  %v1908_v5 = vpop.f32.mrb[41].mxu1 }
 0xe21   :  { %v1909_v6 = vadd.f32 %v2014_v15, %v1908_v5  ;;  %v2272_v10 = vpop.f32.mrb[42].mxu1 }
 0xe22   :  { %1949 = vst.msk [vmem:[%s3186_s6 + $0x50] sm:$0xff] %vm103_vm0, %v1917_v2  ;;  %v1920_v31 = vadd.f32 %v2272_v10, %v2014_v15  ;;  %v1911_v36 = vpop.f32.mrb[43].mxu1 }
 0xe23   :  { %1947 = vst.msk [vmem:[%s3186_s6 + $0x40] sm:$0xff] %vm103_vm0, %v1909_v6  ;;  %v1912_v8 = vadd.f32 %v2014_v15, %v1911_v36 }
 0xe24   :  { %1950 = vst.msk [vmem:[%s3186_s6 + $0x58] sm:$0xff] %vm103_vm0, %v1920_v31 }
 0xe25   :  { %1948 = vst.msk [vmem:[%s3186_s6 + $0x48] sm:$0xff] %vm103_vm0, %v1912_v8 }
 0xea9   :  { %v2275_v39 = vpop.f32.mrb[44].mxu1 }
 0xeaa   :  { %v1933_v40 = vadd.f32 %v2275_v39, %v2014_v15  ;;  %v1924_v32 = vpop.f32.mrb[45].mxu1 }
 0xeab   :  { %v1925_v33 = vadd.f32 %v2014_v15, %v1924_v32  ;;  %v2276_v18 = vpop.f32.mrb[46].mxu1 }
 0xeac   :  { %1953 = vst.msk [vmem:[%s3186_s6 + $0x70] sm:$0xff] %vm103_vm0, %v1933_v40  ;;  %v1936_v35 = vadd.f32 %v2276_v18, %v2014_v15  ;;  %v1927_v19 = vpop.f32.mrb[47].mxu1 }
 0xead   :  { %1951 = vst.msk [vmem:[%s3186_s6 + $0x60] sm:$0xff] %vm103_vm0, %v1925_v33  ;;  %v1928_v7 = vadd.f32 %v2014_v15, %v1927_v19 }
 0xeae   :  { %1954 = vst.msk [vmem:[%s3186_s6 + $0x78] sm:$0xff] %vm103_vm0, %v1936_v35 }
 0xeaf   :  { %1952 = vst.msk [vmem:[%s3186_s6 + $0x68] sm:$0xff] %vm103_vm0, %v1928_v7 }

// kernel: _lambda_.20
= control target key start
LH: loop header
LB: loop body
LE: loop exit
PB: predicated region body
PF: predicated region fallthrough
CT: control target
= control target key end

     0   :  { %vm43_vm0 = vcmask 261120   ;;  %s1483_s0 = inlined_call_operand.vmem [shape: f32[128,32], index: 0, kind: input, shape index: {}]   ;;  %s1484_s3 = inlined_call_operand.vmem [shape: bf16[32,128], index: 3, kind: input, shape index: {}]   ;;  %s1485_s1 = inlined_call_operand.vmem [shape: f32[1,32], index: 1, kind: input, shape index: {}]   ;;  %s1486_s2 = inlined_call_operand.vmem [shape: f32[1,32], index: 2, kind: input, shape index: {}]   ;;  %s1487_s5 = inlined_call_operand.vmem [shape: bf16[128,32], index: 5, kind: input, shape index: {}]   ;;  %s1488_s4 = inlined_call_operand.vmem [shape: f32[1,128], index: 4, kind: input, shape index: {}]   ;;  %s1489_s6 = inlined_call_operand.vmem [shape: f32[1,32], index: 6, kind: input, shape index: {}]   ;;  %s1490_s7 = inlined_call_operand.vmem [shape: f32[128,32], index: 7, kind: output, shape index: {}]  }
   0x1   :  { %v27_v0 = vld [vmem:[%s1483_s0] sm:$0xff]  ;;  %v29_v1 = vld [vmem:[%s1483_s0 + $0x10] sm:$0xff]  ;;  %v28_v2 = vld [vmem:[%s1483_s0 + $0x8] sm:$0xff] }
   0x2   :  { %v44_v3 = vsel %vm43_vm0, %v27_v0, 0.0  ;;  %v50_v4 = vsel %vm43_vm0, %v29_v1, 0.0  ;;  %v30_v5 = vld [vmem:[%s1483_s0 + $0x18] sm:$0xff]  ;;  %v47_v6 = vsel %vm43_vm0, %v28_v2, 0.0  ;;  %v31_v8 = vld [vmem:[%s1483_s0 + $0x20] sm:$0xff]  ;;  %v32_v9 = vld [vmem:[%s1483_s0 + $0x28] sm:$0xff] }
   0x3   :  { %45 = vadd.xlane.f32.xlu0 %v44_v3  ;;  %51 = vadd.xlane.f32.xlu1 %v50_v4  ;;  %v53_v7 = vsel %vm43_vm0, %v30_v5, 0.0  ;;  %v56_v10 = vsel %vm43_vm0, %v31_v8, 0.0  ;;  %v59_v11 = vsel %vm43_vm0, %v32_v9, 0.0  ;;  %v1048_v12 = vld [vmem:[%s1483_s0 + $0x30] sm:$0xff]  ;;  %v1053_v13 = vld [vmem:[%s1483_s0 + $0x38] sm:$0xff]  ;;  %v1062_v16 = vld [vmem:[%s1483_s0 + $0x40] sm:$0xff] }
   0x4   :  { %v62_v14 = vsel %vm43_vm0, %v1048_v12, 0.0  ;;  %v65_v15 = vsel %vm43_vm0, %v1053_v13, 0.0  ;;  %v1067_v17 = vld [vmem:[%s1483_s0 + $0x48] sm:$0xff]  ;;  %v68_v18 = vsel %vm43_vm0, %v1062_v16, 0.0  ;;  %v1076_v20 = vld [vmem:[%s1483_s0 + $0x50] sm:$0xff]  ;;  %v1081_v21 = vld [vmem:[%s1483_s0 + $0x58] sm:$0xff] }
   0x5   :  { %v71_v19 = vsel %vm43_vm0, %v1067_v17, 0.0  ;;  %v74_v22 = vsel %vm43_vm0, %v1076_v20, 0.0  ;;  %v77_v23 = vsel %vm43_vm0, %v1081_v21, 0.0  ;;  %v1090_v24 = vld [vmem:[%s1483_s0 + $0x60] sm:$0xff]  ;;  %v1095_v25 = vld [vmem:[%s1483_s0 + $0x68] sm:$0xff]  ;;  %v1104_v28 = vld [vmem:[%s1483_s0 + $0x70] sm:$0xff] }
   0x6   :  { %v80_v26 = vsel %vm43_vm0, %v1090_v24, 0.0  ;;  %v83_v27 = vsel %vm43_vm0, %v1095_v25, 0.0  ;;  %v1109_v29 = vld [vmem:[%s1483_s0 + $0x78] sm:$0xff]  ;;  %v86_v30 = vsel %vm43_vm0, %v1104_v28, 0.0 }
   0x7   :  { %48 = vadd.xlane.f32.xlu0 %v47_v6  ;;  %54 = vadd.xlane.f32.xlu1 %v53_v7  ;;  %v89_v31 = vsel %vm43_vm0, %v1109_v29, 0.0 }
   0xb   :  { %57 = vadd.xlane.f32.xlu0 %v56_v10  ;;  %60 = vadd.xlane.f32.xlu1 %v59_v11 }
   0xf   :  { %63 = vadd.xlane.f32.xlu0 %v62_v14  ;;  %66 = vadd.xlane.f32.xlu1 %v65_v15 }
  0x13   :  { %69 = vadd.xlane.f32.xlu0 %v68_v18  ;;  %72 = vadd.xlane.f32.xlu1 %v71_v19 }
  0x17   :  { %75 = vadd.xlane.f32.xlu0 %v74_v22  ;;  %78 = vadd.xlane.f32.xlu1 %v77_v23 }
  0x1b   :  { %81 = vadd.xlane.f32.xlu0 %v80_v26  ;;  %84 = vadd.xlane.f32.xlu1 %v83_v27 }
  0x1f   :  { %87 = vadd.xlane.f32.xlu0 %v86_v30  ;;  %90 = vadd.xlane.f32.xlu1 %v89_v31 }
  0x90   :  { %v46_v32 = vpop.xlane.xlu0 %45  ;;  %v52_v33 = vpop.xlane.xlu1 %51 }
  0x91   :  { %v93_v34 = vmul.f32 0.03125, %v46_v32  ;;  %v95_v35 = vmul.f32 0.03125, %v52_v33 }
  0x93   :  { %v1115_v36 = vsub.f32 %v27_v0, %v93_v34  ;;  %v1117_v37 = vsub.f32 %v29_v1, %v95_v35 }
  0x94   :  { %v49_v38 = vpop.xlane.xlu0 %48  ;;  %v55_v39 = vpop.xlane.xlu1 %54 }
  0x95   :  { %v94_v40 = vmul.f32 0.03125, %v49_v38  ;;  %v96_v41 = vmul.f32 0.03125, %v55_v39  ;;  %v125_v42 = vmul.f32 %v1115_v36, %v1115_v36  ;;  %v127_v43 = vmul.f32 %v1117_v37, %v1117_v37 }
  0x97   :  { %v1123_v44 = vsub.f32 %v28_v2, %v94_v40  ;;  %v1125_v45 = vsub.f32 %v30_v5, %v96_v41  ;;  %v141_v46 = vsel %vm43_vm0, %v125_v42, 0.0  ;;  %v147_v49 = vsel %vm43_vm0, %v127_v43, 0.0 }
  0x98   :  { %142 = vadd.xlane.f32.xlu0 %v141_v46  ;;  %v58_v47 = vpop.xlane.xlu0 %57  ;;  %v61_v48 = vpop.xlane.xlu1 %60 }
  0x99   :  { %v97_v50 = vmul.f32 0.03125, %v58_v47  ;;  %v98_v51 = vmul.f32 0.03125, %v61_v48  ;;  %v126_v52 = vmul.f32 %v1123_v44, %v1123_v44  ;;  %v128_v53 = vmul.f32 %v1125_v45, %v1125_v45 }
  0x9b   :  { %v1133_v54 = vsub.f32 %v31_v8, %v97_v50  ;;  %v1135_v55 = vsub.f32 %v32_v9, %v98_v51  ;;  %v144_v56 = vsel %vm43_vm0, %v126_v52, 0.0  ;;  %v150_v59 = vsel %vm43_vm0, %v128_v53, 0.0  ;;  %v908_v53 = vld [vmem:[%s1484_s3 + $0x8] sm:$0xff]  }
  0x9c   :  { %148 = vadd.xlane.f32.xlu0 %v147_v49  ;;  %145 = vadd.xlane.f32.xlu1 %v144_v56  ;;  %v64_v57 = vpop.xlane.xlu0 %63  ;;  %v67_v58 = vpop.xlane.xlu1 %66 }
  0x9d   :  { %v99_v60 = vmul.f32 0.03125, %v64_v57  ;;  %v100_v61 = vmul.f32 0.03125, %v67_v58  ;;  %v129_v62 = vmul.f32 %v1133_v54, %v1133_v54  ;;  %v130_v63 = vmul.f32 %v1135_v55, %v1135_v55 }
  0x9f   :  { %v1144_v0 = vsub.f32 %v1048_v12, %v99_v60  ;;  %v1147_v1 = vsub.f32 %v1053_v13, %v100_v61  ;;  %v153_v2 = vsel %vm43_vm0, %v129_v62, 0.0  ;;  %v156_v5 = vsel %vm43_vm0, %v130_v63, 0.0 }
  0xa0   :  { %151 = vadd.xlane.f32.xlu1 %v150_v59  ;;  %154 = vadd.xlane.f32.xlu0 %v153_v2  ;;  %v70_v3 = vpop.xlane.xlu0 %69  ;;  %v73_v4 = vpop.xlane.xlu1 %72 }
  0xa1   :  { %v101_v6 = vmul.f32 0.03125, %v70_v3  ;;  %v102_v7 = vmul.f32 0.03125, %v73_v4  ;;  %v131_v8 = vmul.f32 %v1144_v0, %v1144_v0  ;;  %v132_v9 = vmul.f32 %v1147_v1, %v1147_v1 }
  0xa3   :  { %v1156_v10 = vsub.f32 %v1062_v16, %v101_v6  ;;  %v1159_v11 = vsub.f32 %v1067_v17, %v102_v7  ;;  %v159_v12 = vsel %vm43_vm0, %v131_v8, 0.0  ;;  %v162_v15 = vsel %vm43_vm0, %v132_v9, 0.0 }
  0xa4   :  { %157 = vadd.xlane.f32.xlu1 %v156_v5  ;;  %160 = vadd.xlane.f32.xlu0 %v159_v12  ;;  %v76_v13 = vpop.xlane.xlu0 %75  ;;  %v79_v14 = vpop.xlane.xlu1 %78 }
  0xa5   :  { %v103_v18 = vmul.f32 0.03125, %v76_v13  ;;  %v104_v19 = vmul.f32 0.03125, %v79_v14  ;;  %v133_v22 = vmul.f32 %v1156_v10, %v1156_v10  ;;  %v134_v16 = vmul.f32 %v1159_v11, %v1159_v11 }
  0xa7   :  { %v1168_v23 = vsub.f32 %v1076_v20, %v103_v18  ;;  %v1171_v17 = vsub.f32 %v1081_v21, %v104_v19  ;;  %v165_v26 = vsel %vm43_vm0, %v133_v22, 0.0  ;;  %v168_v31 = vsel %vm43_vm0, %v134_v16, 0.0 }
  0xa8   :  { %163 = vadd.xlane.f32.xlu1 %v162_v15  ;;  %166 = vadd.xlane.f32.xlu0 %v165_v26  ;;  %v82_v27 = vpop.xlane.xlu0 %81  ;;  %v85_v30 = vpop.xlane.xlu1 %84 }
  0xa9   :  { %v105_v32 = vmul.f32 0.03125, %v82_v27  ;;  %v106_v33 = vmul.f32 0.03125, %v85_v30  ;;  %v135_v34 = vmul.f32 %v1168_v23, %v1168_v23  ;;  %v136_v20 = vmul.f32 %v1171_v17, %v1171_v17 }
  0xab   :  { %v1180_v35 = vsub.f32 %v1090_v24, %v105_v32  ;;  %v1183_v21 = vsub.f32 %v1095_v25, %v106_v33  ;;  %v171_v38 = vsel %vm43_vm0, %v135_v34, 0.0  ;;  %v174_v41 = vsel %vm43_vm0, %v136_v20, 0.0 }
  0xac   :  { %169 = vadd.xlane.f32.xlu1 %v168_v31  ;;  %172 = vadd.xlane.f32.xlu0 %v171_v38  ;;  %v88_v39 = vpop.xlane.xlu0 %87  ;;  %v91_v40 = vpop.xlane.xlu1 %90  ;;  %v1215_v31 = vld [vmem:[%s1485_s1] ss:$0 sm:$0xff] }
  0xad   :  { %v107_v42 = vmul.f32 0.03125, %v88_v39  ;;  %v108_v43 = vmul.f32 0.03125, %v91_v40  ;;  %v137_v46 = vmul.f32 %v1180_v35, %v1180_v35  ;;  %v138_v24 = vmul.f32 %v1183_v21, %v1183_v21 }
  0xaf   :  { %v1192_v47 = vsub.f32 %v1104_v28, %v107_v42  ;;  %v1195_v25 = vsub.f32 %v1109_v29, %v108_v43  ;;  %v177_v48 = vsel %vm43_vm0, %v137_v46, 0.0  ;;  %v180_v49 = vsel %vm43_vm0, %v138_v24, 0.0  ;;  %v907_v29 = vld [vmem:[%s1484_s3] sm:$0xff]  }
  0xb0   :  { %175 = vadd.xlane.f32.xlu1 %v174_v41  ;;  %178 = vadd.xlane.f32.xlu0 %v177_v48  ;;  %v1223_v46 = vld [vmem:[%s1486_s2] ss:$0 sm:$0xff] }
  0xb1   :  { %v139_v50 = vmul.f32 %v1192_v47, %v1192_v47  ;;  %v140_v51 = vmul.f32 %v1195_v25, %v1195_v25  ;;  %839 = vmatprep.subr.bf16.mxu0 %v907_v29 }
  0xb2   :  { %840 = vmatpush3.bf16.msra.mxu0 %v907_v29 }
  0xb3   :  { %v183_v52 = vsel %vm43_vm0, %v139_v50, 0.0  ;;  %v186_v28 = vsel %vm43_vm0, %v140_v51, 0.0  ;;  %841 = vmatprep.subr.bf16.mxu0 %v908_v53 }
  0xb4   :  { %181 = vadd.xlane.f32.xlu1 %v180_v49  ;;  %184 = vadd.xlane.f32.xlu0 %v183_v52 }
  0xb6   :  { %842 = vmatpush3.bf16.msra.mxu0 %v908_v53 }
  0xb8   :  { %187 = vadd.xlane.f32.xlu1 %v186_v28 }
 0x125   :  { %v143_v56 = vpop.xlane.xlu0 %142 }
 0x126   :  { %v189_v57 = vmul.f32 0.03125, %v143_v56 }
 0x128   :  { %v205_v58 = vadd.f32 1e-05, %v189_v57 }
 0x129   :  { %v146_v59 = vpop.xlane.xlu1 %145  ;;  %v149_v60 = vpop.xlane.xlu0 %148 }
 0x12a   :  { %917 = vrsqrt.f32 %v205_v58  ;;  %v190_v61 = vmul.f32 0.03125, %v146_v59  ;;  %v191_v62 = vmul.f32 0.03125, %v149_v60 }
 0x12c   :  { %v206_v63 = vadd.f32 1e-05, %v190_v61  ;;  %v207_v2 = vadd.f32 1e-05, %v191_v62 }
 0x12d   :  { %v152_v3 = vpop.xlane.xlu1 %151  ;;  %v155_v4 = vpop.xlane.xlu0 %154 }
 0x12e   :  { %919 = vrsqrt.f32 %v206_v63  ;;  %v192_v5 = vmul.f32 0.03125, %v152_v3  ;;  %v193_v6 = vmul.f32 0.03125, %v155_v4 }
 0x12f   :  { %921 = vrsqrt.f32 %v207_v2 }
 0x130   :  { %v208_v7 = vadd.f32 1e-05, %v192_v5  ;;  %v209_v8 = vadd.f32 1e-05, %v193_v6 }
 0x131   :  { %v158_v9 = vpop.xlane.xlu1 %157  ;;  %v161_v12 = vpop.xlane.xlu0 %160 }
 0x132   :  { %923 = vrsqrt.f32 %v208_v7  ;;  %v194_v13 = vmul.f32 0.03125, %v158_v9  ;;  %v195_v14 = vmul.f32 0.03125, %v161_v12 }
 0x133   :  { %925 = vrsqrt.f32 %v209_v8 }
 0x134   :  { %v918_v15 = vpop.eup %917  ;;  %v210_v18 = vadd.f32 1e-05, %v194_v13  ;;  %v211_v19 = vadd.f32 1e-05, %v195_v14 }
 0x135   :  { %v164_v22 = vpop.xlane.xlu1 %163  ;;  %v167_v16 = vpop.xlane.xlu0 %166  ;;  %v237_v26 = vmul.f32 %v918_v15, %v1115_v36 }
 0x136   :  { %927 = vrsqrt.f32 %v210_v18  ;;  %v196_v27 = vmul.f32 0.03125, %v164_v22  ;;  %v197_v30 = vmul.f32 0.03125, %v167_v16 }
 0x137   :  { %929 = vrsqrt.f32 %v211_v19  ;;  %v260_v41 = vmul.f32 %v1215_v31, %v237_v26 }
 0x138   :  { %v920_v32 = vpop.eup %919  ;;  %v212_v33 = vadd.f32 1e-05, %v196_v27  ;;  %v213_v34 = vadd.f32 1e-05, %v197_v30 }
 0x139   :  { %v922_v20 = vpop.eup %921  ;;  %v170_v38 = vpop.xlane.xlu1 %169  ;;  %v238_v40 = vmul.f32 %v920_v32, %v1123_v44 }
 0x13a   :  { %v173_v39 = vpop.xlane.xlu0 %172  ;;  %v239_v36 = vmul.f32 %v922_v20, %v1117_v37  ;;  %931 = vrsqrt.f32 %v212_v33  ;;  %v198_v42 = vmul.f32 0.03125, %v170_v38  ;;  %v283_v37 = vadd.f32 %v1223_v46, %v260_v41 }
 0x13b   :  { %v199_v43 = vmul.f32 0.03125, %v173_v39  ;;  %933 = vrsqrt.f32 %v213_v34  ;;  %v261_v24 = vmul.f32 %v1215_v31, %v238_v40 }
 0x13c   :  { %v924_v48 = vpop.eup %923  ;;  %v214_v49 = vadd.f32 1e-05, %v198_v42  ;;  %v262_v53 = vmul.f32 %v1215_v31, %v239_v36 }
 0x13d   :  { %v215_v50 = vadd.f32 1e-05, %v199_v43  ;;  %v926_v51 = vpop.eup %925  ;;  %v240_v44 = vmul.f32 %v924_v48, %v1125_v45  ;;  %v176_v52 = vpop.xlane.xlu1 %175  ;;  %v284_v29 = vadd.f32 %v1223_v46, %v261_v24 }
 0x13e   :  { %v179_v28 = vpop.xlane.xlu0 %178  ;;  %v241_v56 = vmul.f32 %v926_v51, %v1133_v54  ;;  %935 = vrsqrt.f32 %v214_v49  ;;  %v200_v57 = vmul.f32 0.03125, %v176_v52  ;;  %v285_v5 = vadd.f32 %v1223_v46, %v262_v53 }
 0x13f   :  { %v201_v58 = vmul.f32 0.03125, %v179_v28  ;;  %937 = vrsqrt.f32 %v215_v50  ;;  %v299_v59 = vpack.c.bf16 %v284_v29, %v283_v37  ;;  %v263_v60 = vmul.f32 %v1215_v31, %v240_v44 }
 0x140   :  { %v928_v61 = vpop.eup %927  ;;  %v216_v62 = vadd.f32 1e-05, %v200_v57  ;;  %v264_v6 = vmul.f32 %v1215_v31, %v241_v56 }
 0x141   :  { %v217_v45 = vadd.f32 1e-05, %v201_v58  ;;  %v930_v63 = vpop.eup %929  ;;  %v242_v2 = vmul.f32 %v928_v61, %v1135_v55  ;;  %v182_v3 = vpop.xlane.xlu1 %181  ;;  %843 = vmatprep.mubr.msk.bf16.mxu0 %vm43_vm0, %v299_v59  ;;  %v286_v54 = vadd.f32 %v1223_v46, %v263_v60 }
 0x142   :  { %v185_v4 = vpop.xlane.xlu0 %184  ;;  %v243_v7 = vmul.f32 %v930_v63, %v1144_v0  ;;  %939 = vrsqrt.f32 %v216_v62  ;;  %v202_v8 = vmul.f32 0.03125, %v182_v3  ;;  %v287_v16 = vadd.f32 %v1223_v46, %v264_v6  ;;  %v912_v3 = vld [vmem:[%s1487_s5 + $0x18] sm:$0xff]  }
 0x143   :  { %v203_v9 = vmul.f32 0.03125, %v185_v4  ;;  %941 = vrsqrt.f32 %v217_v45  ;;  %v300_v12 = vpack.c.bf16 %v286_v54, %v285_v5  ;;  %v265_v13 = vmul.f32 %v1215_v31, %v242_v2  ;;  %v913_v4 = vld [vmem:[%s1487_s5 + $0x20] sm:$0xff]   ;;  %v914_v5 = vld [vmem:[%s1487_s5 + $0x28] sm:$0xff]   ;;  %v915_v54 = vld [vmem:[%s1487_s5 + $0x30] sm:$0xff]  }
 0x144   :  { %v932_v55 = vpop.eup %931  ;;  %v218_v14 = vadd.f32 1e-05, %v202_v8  ;;  %v266_v26 = vmul.f32 %v1215_v31, %v243_v7  ;;  %v916_v6 = vld [vmem:[%s1487_s5 + $0x38] sm:$0xff]   ;;  %v1304_v7 = vld [vmem:[%s1488_s4] ss:$0 sm:$0xff] }
 0x145   :  { %v219_v15 = vadd.f32 1e-05, %v203_v9  ;;  %v934_v18 = vpop.eup %933  ;;  %v244_v19 = vmul.f32 %v932_v55, %v1147_v1  ;;  %v188_v22 = vpop.xlane.xlu1 %187  ;;  %844 = vmatmul.mubr.msk.bf16.vlgmr.msra.gmra.mrb[0].mxu0 %vm43_vm0, %v300_v12  ;;  %v288_v0 = vadd.f32 %v1223_v46, %v265_v13 }
 0x146   :  { %v245_v27 = vmul.f32 %v934_v18, %v1156_v10  ;;  %943 = vrsqrt.f32 %v218_v14  ;;  %v204_v30 = vmul.f32 0.03125, %v188_v22  ;;  %v289_v39 = vadd.f32 %v1223_v46, %v266_v26 }
 0x147   :  { %945 = vrsqrt.f32 %v219_v15  ;;  %v301_v32 = vpack.c.bf16 %v288_v0, %v287_v16  ;;  %v267_v33 = vmul.f32 %v1215_v31, %v244_v19 }
 0x148   :  { %v936_v34 = vpop.eup %935  ;;  %v220_v20 = vadd.f32 1e-05, %v204_v30  ;;  %v268_v41 = vmul.f32 %v1215_v31, %v245_v27 }
 0x149   :  { %v938_v1 = vpop.eup %937  ;;  %v246_v38 = vmul.f32 %v936_v34, %v1159_v11  ;;  %847 = vmatprep.mubr.msk.bf16.mxu0 %vm43_vm0, %v301_v32  ;;  %v290_v40 = vadd.f32 %v1223_v46, %v267_v33 }
 0x14a   :  { %v247_v10 = vmul.f32 %v938_v1, %v1168_v23  ;;  %947 = vrsqrt.f32 %v220_v20  ;;  %v291_v11 = vadd.f32 %v1223_v46, %v268_v41 }
 0x14b   :  { %v302_v36 = vpack.c.bf16 %v290_v40, %v289_v39  ;;  %v269_v42 = vmul.f32 %v1215_v31, %v246_v38 }
 0x14c   :  { %v940_v43 = vpop.eup %939  ;;  %v270_v50 = vmul.f32 %v1215_v31, %v247_v10 }
 0x14d   :  { %v942_v24 = vpop.eup %941  ;;  %v248_v48 = vmul.f32 %v940_v43, %v1171_v17  ;;  %848 = vmatmul.mubr.msk.bf16.gmra.mrb[4].mxu0 %vm43_vm0, %v302_v36  ;;  %v292_v49 = vadd.f32 %v1223_v46, %v269_v42 }
 0x14e   :  { %v249_v51 = vmul.f32 %v942_v24, %v1180_v35  ;;  %v293_v17 = vadd.f32 %v1223_v46, %v270_v50 }
 0x14f   :  { %v303_v44 = vpack.c.bf16 %v292_v49, %v291_v11  ;;  %v271_v23 = vmul.f32 %v1215_v31, %v248_v48 }
 0x150   :  { %v944_v52 = vpop.eup %943  ;;  %v272_v53 = vmul.f32 %v1215_v31, %v249_v51 }
 0x151   :  { %v946_v28 = vpop.eup %945  ;;  %v250_v37 = vmul.f32 %v944_v52, %v1183_v21  ;;  %851 = vmatprep.mubr.msk.bf16.mxu0 %vm43_vm0, %v303_v44  ;;  %v294_v29 = vadd.f32 %v1223_v46, %v271_v23 }
 0x152   :  { %v251_v56 = vmul.f32 %v946_v28, %v1192_v47  ;;  %v295_v21 = vadd.f32 %v1223_v46, %v272_v53 }
 0x153   :  { %v304_v57 = vpack.c.bf16 %v294_v29, %v293_v17  ;;  %v273_v35 = vmul.f32 %v1215_v31, %v250_v37 }
 0x154   :  { %v948_v58 = vpop.eup %947  ;;  %v274_v61 = vmul.f32 %v1215_v31, %v251_v56 }
 0x155   :  { %v252_v59 = vmul.f32 %v948_v58, %v1195_v25  ;;  %852 = vmatmul.mubr.msk.bf16.gmra.mrb[8].mxu0 %vm43_vm0, %v304_v57  ;;  %v296_v60 = vadd.f32 %v1223_v46, %v273_v35  ;;  %v909_v25 = vld [vmem:[%s1487_s5] sm:$0xff]  }
 0x156   :  { %v297_v47 = vadd.f32 %v1223_v46, %v274_v61  ;;  %859 = vmatprep.subr.bf16.mxu0 %v909_v25  ;;  %891 = vmatprep.subr.bf16.mxu1 %v909_v25 }
 0x157   :  { %v305_v62 = vpack.c.bf16 %v296_v60, %v295_v21  ;;  %v275_v45 = vmul.f32 %v1215_v31, %v252_v59  ;;  %860 = vmatpush3.bf16.msra.mxu0 %v909_v25  ;;  %899 = vmatpush3.bf16.msra.mxu1 %v909_v25  ;;  %v910_v31 = vld [vmem:[%s1487_s5 + $0x8] sm:$0xff]  }
 0x158   :  { %861 = vmatprep.subr.bf16.mxu0 %v910_v31  ;;  %892 = vmatprep.subr.bf16.mxu1 %v910_v31 }
 0x159   :  { %855 = vmatprep.mubr.msk.bf16.mxu0 %vm43_vm0, %v305_v62  ;;  %v298_v63 = vadd.f32 %v1223_v46, %v275_v45  ;;  %v911_v46 = vld [vmem:[%s1487_s5 + $0x10] sm:$0xff]  }
 0x15b   :  { %v306_v2 = vpack.c.bf16 %v298_v63, %v297_v47  ;;  %862 = vmatpush3.bf16.msra.mxu0 %v910_v31  ;;  %900 = vmatpush3.bf16.msra.mxu1 %v910_v31 }
 0x15c   :  { %863 = vmatprep.subr.bf16.mxu0 %v911_v46  ;;  %893 = vmatprep.subr.bf16.mxu1 %v911_v46 }
 0x15d   :  { %856 = vmatmul.mubr.msk.bf16.gmra.mrb[12].mxu0 %vm43_vm0, %v306_v2 }
 0x15f   :  { %864 = vmatpush3.bf16.msra.mxu0 %v911_v46  ;;  %901 = vmatpush3.bf16.msra.mxu1 %v911_v46 }
 0x160   :  { %865 = vmatprep.subr.bf16.mxu0 %v912_v3  ;;  %894 = vmatprep.subr.bf16.mxu1 %v912_v3 }
 0x163   :  { %866 = vmatpush3.bf16.msra.mxu0 %v912_v3  ;;  %902 = vmatpush3.bf16.msra.mxu1 %v912_v3 }
 0x164   :  { %867 = vmatprep.subr.bf16.mxu0 %v913_v4  ;;  %895 = vmatprep.subr.bf16.mxu1 %v913_v4 }
 0x167   :  { %868 = vmatpush3.bf16.msra.mxu0 %v913_v4  ;;  %903 = vmatpush3.bf16.msra.mxu1 %v913_v4 }
 0x168   :  { %869 = vmatprep.subr.bf16.mxu0 %v914_v5  ;;  %896 = vmatprep.subr.bf16.mxu1 %v914_v5 }
 0x16b   :  { %870 = vmatpush3.bf16.msra.mxu0 %v914_v5  ;;  %904 = vmatpush3.bf16.msra.mxu1 %v914_v5 }
 0x16c   :  { %871 = vmatprep.subr.bf16.mxu0 %v915_v54  ;;  %897 = vmatprep.subr.bf16.mxu1 %v915_v54 }
 0x16f   :  { %872 = vmatpush3.bf16.msra.mxu0 %v915_v54  ;;  %905 = vmatpush3.bf16.msra.mxu1 %v915_v54 }
 0x170   :  { %873 = vmatprep.subr.bf16.mxu0 %v916_v6  ;;  %898 = vmatprep.subr.bf16.mxu1 %v916_v6 }
 0x173   :  { %874 = vmatpush3.bf16.msra.mxu0 %v916_v6  ;;  %906 = vmatpush3.bf16.msra.mxu1 %v916_v6 }
 0x218   :  { %v845_v8 = vpop.f32.mrb[0].mxu0 }
 0x219   :  { %v397_v9 = vadd.f32 %v845_v8, %v1304_v7  ;;  %v388_v12 = vpop.f32.mrb[1].mxu0 }
 0x21a   :  { %v389_v13 = vadd.f32 %v1304_v7, %v388_v12  ;;  %v846_v55 = vpop.f32.mrb[2].mxu0 }
 0x21b   :  { %v469_v14 = vmul.f32 0.044715, %v397_v9  ;;  %v1309_v15 = vadd.f32 %v846_v55, %v1304_v7  ;;  %v391_v18 = vpop.f32.mrb[3].mxu0  ;;  %v453_v59 = vmul.f32 0.5, %v397_v9 }
 0x21c   :  { %v467_v19 = vmul.f32 0.044715, %v389_v13  ;;  %v1312_v22 = vadd.f32 %v1304_v7, %v391_v18  ;;  %v451_v63 = vmul.f32 0.5, %v389_v13 }
 0x21d   :  { %v485_v16 = vmul.f32 %v469_v14, %v397_v9  ;;  %v470_v0 = vmul.f32 0.044715, %v1309_v15 }
 0x21e   :  { %v483_v26 = vmul.f32 %v467_v19, %v389_v13  ;;  %v468_v27 = vmul.f32 0.044715, %v1312_v22 }
 0x21f   :  { %v501_v30 = vmul.f32 %v485_v16, %v397_v9  ;;  %v486_v32 = vmul.f32 %v470_v0, %v1309_v15 }
 0x220   :  { %v499_v33 = vmul.f32 %v483_v26, %v389_v13  ;;  %v484_v34 = vmul.f32 %v468_v27, %v1312_v22  ;;  %v849_v20 = vpop.f32.mrb[4].mxu0  ;;  %v454_v26 = vmul.f32 0.5, %v1309_v15  ;;  %v452_v27 = vmul.f32 0.5, %v1312_v22 }
 0x221   :  { %v517_v1 = vadd.f32 %v501_v30, %v397_v9  ;;  %v502_v38 = vmul.f32 %v486_v32, %v1309_v15  ;;  %v1320_v39 = vadd.f32 %v849_v20, %v1304_v7  ;;  %v404_v40 = vpop.f32.mrb[5].mxu0 }
 0x222   :  { %v500_v41 = vmul.f32 %v484_v34, %v1312_v22  ;;  %v405_v10 = vadd.f32 %v1304_v7, %v404_v40  ;;  %v850_v36 = vpop.f32.mrb[6].mxu0  ;;  %v515_v42 = vadd.f32 %v499_v33, %v389_v13 }
 0x223   :  { %v533_v43 = vmul.f32 0.7978846, %v517_v1  ;;  %v518_v24 = vadd.f32 %v502_v38, %v1309_v15  ;;  %v473_v48 = vmul.f32 0.044715, %v1320_v39  ;;  %v1327_v11 = vadd.f32 %v850_v36, %v1304_v7  ;;  %v407_v49 = vpop.f32.mrb[7].mxu0 }
 0x224   :  { %v471_v50 = vmul.f32 0.044715, %v405_v10  ;;  %v1330_v51 = vadd.f32 %v1304_v7, %v407_v49  ;;  %v516_v44 = vadd.f32 %v500_v41, %v1312_v22  ;;  %v531_v23 = vmul.f32 0.7978846, %v515_v42 }
 0x225   :  { %949 = vtanh.f32 %v533_v43  ;;  %v534_v52 = vmul.f32 0.7978846, %v518_v24  ;;  %v489_v28 = vmul.f32 %v473_v48, %v1320_v39  ;;  %v474_v37 = vmul.f32 0.044715, %v1327_v11 }
 0x226   :  { %v472_v17 = vmul.f32 0.044715, %v1330_v51  ;;  %v532_v29 = vmul.f32 0.7978846, %v516_v44  ;;  %951 = vtanh.f32 %v531_v23  ;;  %v487_v35 = vmul.f32 %v471_v50, %v405_v10 }
 0x227   :  { %953 = vtanh.f32 %v534_v52  ;;  %v505_v53 = vmul.f32 %v489_v28, %v1320_v39  ;;  %v490_v56 = vmul.f32 %v474_v37, %v1327_v11  ;;  %v1364_v30 = vmul.f32 0.5, %v405_v10 }
 0x228   :  { %v853_v57 = vpop.f32.mrb[8].mxu0  ;;  %955 = vtanh.f32 %v532_v29  ;;  %v488_v58 = vmul.f32 %v472_v17, %v1330_v51  ;;  %v503_v2 = vmul.f32 %v487_v35, %v405_v10 }
 0x229   :  { %v506_v21 = vmul.f32 %v490_v56, %v1327_v11  ;;  %v1341_v60 = vadd.f32 %v853_v57, %v1304_v7  ;;  %v420_v61 = vpop.f32.mrb[9].mxu0  ;;  %v521_v62 = vadd.f32 %v505_v53, %v1320_v39 }
 0x22a   :  { %v1345_v45 = vadd.f32 %v1304_v7, %v420_v61  ;;  %v854_v47 = vpop.f32.mrb[10].mxu0  ;;  %v504_v25 = vmul.f32 %v488_v58, %v1330_v51  ;;  %v519_v8 = vadd.f32 %v503_v2, %v405_v10 }
 0x22b   :  { %v477_v31 = vmul.f32 0.044715, %v1341_v60  ;;  %v1350_v46 = vadd.f32 %v854_v47, %v1304_v7  ;;  %v423_v3 = vpop.f32.mrb[11].mxu0  ;;  %v522_v4 = vadd.f32 %v506_v21, %v1327_v11  ;;  %v537_v5 = vmul.f32 0.7978846, %v521_v62 }
 0x22c   :  { %v475_v54 = vmul.f32 0.044715, %v1345_v45  ;;  %v1355_v6 = vadd.f32 %v1304_v7, %v423_v3  ;;  %v520_v9 = vadd.f32 %v504_v25, %v1330_v51  ;;  %v535_v19 = vmul.f32 0.7978846, %v519_v8 }
 0x22d   :  { %v493_v12 = vmul.f32 %v477_v31, %v1341_v60  ;;  %v478_v13 = vmul.f32 0.044715, %v1350_v46  ;;  %v538_v55 = vmul.f32 0.7978846, %v522_v4  ;;  %957 = vtanh.f32 %v537_v5 }
 0x22e   :  { %v491_v14 = vmul.f32 %v475_v54, %v1345_v45  ;;  %v476_v18 = vmul.f32 0.044715, %v1355_v6  ;;  %v536_v16 = vmul.f32 0.7978846, %v520_v9  ;;  %v456_v54 = vmul.f32 0.5, %v1330_v51 }
 0x22f   :  { %v950_v0 = vpop.eup %949  ;;  %959 = vtanh.f32 %v538_v55  ;;  %v509_v33 = vmul.f32 %v493_v12, %v1341_v60  ;;  %v494_v10 = vmul.f32 %v478_v13, %v1350_v46  ;;  %v457_v8 = vmul.f32 0.5, %v1320_v39 }
 0x230   :  { %v952_v32 = vpop.eup %951  ;;  %v492_v34 = vmul.f32 %v476_v18, %v1355_v6  ;;  %v857_v20 = vpop.f32.mrb[12].mxu0  ;;  %v565_v1 = vadd.f32 1.0, %v950_v0  ;;  %961 = vtanh.f32 %v535_v19  ;;  %v507_v40 = vmul.f32 %v491_v14, %v1345_v45 }
 0x231   :  { %v954_v38 = vpop.eup %953  ;;  %v1370_v41 = vadd.f32 %v857_v20, %v1304_v7  ;;  %v436_v15 = vpop.f32.mrb[13].mxu0  ;;  %v563_v36 = vadd.f32 1.0, %v952_v32  ;;  %963 = vtanh.f32 %v536_v16  ;;  %v458_v9 = vmul.f32 0.5, %v1327_v11 }
 0x232   :  { %v956_v22 = vpop.eup %955  ;;  %v508_v42 = vmul.f32 %v492_v34, %v1355_v6  ;;  %v1375_v43 = vadd.f32 %v1304_v7, %v436_v15  ;;  %v858_v24 = vpop.f32.mrb[14].mxu0  ;;  %v566_v48 = vadd.f32 1.0, %v954_v38  ;;  %v581_v52 = vmul.f32 %v565_v1, %v453_v59 }
 0x233   :  { %v481_v49 = vmul.f32 0.044715, %v1370_v41  ;;  %v1379_v50 = vadd.f32 %v858_v24, %v1304_v7  ;;  %v439_v44 = vpop.f32.mrb[15].mxu0  ;;  %v564_v23 = vadd.f32 1.0, %v956_v22  ;;  %v579_v17 = vmul.f32 %v563_v36, %v451_v63 }
 0x234   :  { %v479_v28 = vmul.f32 0.044715, %v1375_v43  ;;  %v1383_v37 = vadd.f32 %v1304_v7, %v439_v44  ;;  %v582_v29 = vmul.f32 %v566_v48, %v454_v26  ;;  %v523_v35 = vadd.f32 %v507_v40, %v1345_v45 }
 0x235   :  { %v497_v53 = vmul.f32 %v481_v49, %v1370_v41  ;;  %v482_v56 = vmul.f32 0.044715, %v1379_v50  ;;  %v580_v57 = vmul.f32 %v564_v23, %v452_v27  ;;  %v524_v59 = vadd.f32 %v508_v42, %v1355_v6 }
 0x236   :  { %v495_v58 = vmul.f32 %v479_v28, %v1375_v43  ;;  %v480_v21 = vmul.f32 0.044715, %v1383_v37  ;;  %v596_v61 = vpack.c.bf16 %v582_v29, %v581_v52  ;;  %v510_v7 = vmul.f32 %v494_v10, %v1350_v46 }
 0x237   :  { %v958_v62 = vpop.eup %957  ;;  %v498_v47 = vmul.f32 %v482_v56, %v1379_v50  ;;  %v595_v63 = vpack.c.bf16 %v580_v57, %v579_v17  ;;  %v539_v2 = vmul.f32 0.7978846, %v523_v35  ;;  %v540_v4 = vmul.f32 0.7978846, %v524_v59 }
 0x238   :  { %v511_v25 = vmul.f32 %v495_v58, %v1375_v43  ;;  %v496_v31 = vmul.f32 %v480_v21, %v1383_v37  ;;  %v569_v3 = vadd.f32 1.0, %v958_v62  ;;  %v513_v13 = vmul.f32 %v497_v53, %v1370_v41 }
 0x239   :  { %v960_v5 = vpop.eup %959  ;;  %875 = vmatprep.mubr.bf16.mxu0 %v595_v63  ;;  %965 = vtanh.f32 %v539_v2  ;;  %v514_v19 = vmul.f32 %v498_v47, %v1379_v50  ;;  %v525_v0 = vadd.f32 %v509_v33, %v1341_v60  ;;  %v526_v51 = vadd.f32 %v510_v7, %v1350_v46 }
 0x23a   :  { %v962_v12 = vpop.eup %961  ;;  %v512_v55 = vmul.f32 %v496_v31, %v1383_v37  ;;  %876 = vmatmul.mubr.bf16.vlgmr.msra.gmra.mrb[16].mxu0 %v596_v61  ;;  %v570_v14 = vadd.f32 1.0, %v960_v5  ;;  %967 = vtanh.f32 %v540_v4  ;;  %v585_v26 = vmul.f32 %v569_v3, %v457_v8 }
 0x23b   :  { %v964_v18 = vpop.eup %963  ;;  %v567_v16 = vadd.f32 1.0, %v962_v12  ;;  %v527_v27 = vadd.f32 %v511_v25, %v1375_v43  ;;  %v541_v32 = vmul.f32 0.7978846, %v525_v0  ;;  %v542_v34 = vmul.f32 0.7978846, %v526_v51 }
 0x23c   :  { %v568_v39 = vadd.f32 1.0, %v964_v18  ;;  %v586_v11 = vmul.f32 %v570_v14, %v458_v9  ;;  %v528_v20 = vadd.f32 %v512_v55, %v1383_v37  ;;  %v529_v33 = vadd.f32 %v513_v13, %v1370_v41 }
 0x23d   :  { %v583_v1 = vmul.f32 %v567_v16, %v1364_v30  ;;  %v543_v15 = vmul.f32 0.7978846, %v527_v27  ;;  %969 = vtanh.f32 %v541_v32  ;;  %v530_v10 = vadd.f32 %v514_v19, %v1379_v50 }
 0x23e   :  { %v584_v38 = vmul.f32 %v568_v39, %v456_v54  ;;  %v598_v40 = vpack.c.bf16 %v586_v11, %v585_v26  ;;  %v544_v36 = vmul.f32 0.7978846, %v528_v20  ;;  %971 = vtanh.f32 %v542_v34 }
 0x23f   :  { %973 = vtanh.f32 %v543_v15  ;;  %v545_v42 = vmul.f32 0.7978846, %v529_v33  ;;  %v546_v24 = vmul.f32 0.7978846, %v530_v10  ;;  %v459_v44 = vmul.f32 0.5, %v1345_v45 }
 0x240   :  { %v597_v22 = vpack.c.bf16 %v584_v38, %v583_v1  ;;  %975 = vtanh.f32 %v544_v36  ;;  %v460_v23 = vmul.f32 0.5, %v1355_v6  ;;  %v461_v58 = vmul.f32 0.5, %v1341_v60 }
 0x241   :  { %977 = vtanh.f32 %v545_v42  ;;  %v462_v21 = vmul.f32 0.5, %v1350_v46  ;;  %v463_v62 = vmul.f32 0.5, %v1375_v43  ;;  %v464_v63 = vmul.f32 0.5, %v1383_v37  ;;  %v804_v37 = vld [vmem:[%s1489_s6] ss:$0 sm:$0xff] }
 0x242   :  { %879 = vmatprep.mubr.bf16.mxu1 %v597_v22  ;;  %979 = vtanh.f32 %v546_v24  ;;  %v465_v31 = vmul.f32 0.5, %v1370_v41  ;;  %v466_v3 = vmul.f32 0.5, %v1379_v50 }
 0x243   :  { %v966_v48 = vpop.eup %965  ;;  %880 = vmatmul.mubr.bf16.vlgmr.msra.gmra.mrb[0].mxu1 %v598_v40 }
 0x244   :  { %v968_v30 = vpop.eup %967  ;;  %v571_v49 = vadd.f32 1.0, %v966_v48 }
 0x245   :  { %v572_v52 = vadd.f32 1.0, %v968_v30 }
 0x246   :  { %v587_v28 = vmul.f32 %v571_v49, %v459_v44 }
 0x247   :  { %v588_v17 = vmul.f32 %v572_v52, %v460_v23  ;;  %v970_v29 = vpop.eup %969 }
 0x248   :  { %v972_v56 = vpop.eup %971  ;;  %v573_v57 = vadd.f32 1.0, %v970_v29 }
 0x249   :  { %v599_v53 = vpack.c.bf16 %v588_v17, %v587_v28  ;;  %v974_v35 = vpop.eup %973  ;;  %v574_v61 = vadd.f32 1.0, %v972_v56 }
 0x24a   :  { %v976_v59 = vpop.eup %975  ;;  %v575_v45 = vadd.f32 1.0, %v974_v35  ;;  %v589_v6 = vmul.f32 %v573_v57, %v461_v58 }
 0x24b   :  { %883 = vmatprep.mubr.bf16.mxu1 %v599_v53  ;;  %v978_v7 = vpop.eup %977  ;;  %v590_v47 = vmul.f32 %v574_v61, %v462_v21  ;;  %v576_v2 = vadd.f32 1.0, %v976_v59 }
 0x24c   :  { %v980_v25 = vpop.eup %979  ;;  %v577_v4 = vadd.f32 1.0, %v978_v7  ;;  %v591_v5 = vmul.f32 %v575_v45, %v463_v62 }
 0x24d   :  { %v600_v60 = vpack.c.bf16 %v590_v47, %v589_v6  ;;  %v592_v46 = vmul.f32 %v576_v2, %v464_v63  ;;  %v578_v54 = vadd.f32 1.0, %v980_v25 }
 0x24e   :  { %v593_v43 = vmul.f32 %v577_v4, %v465_v31 }
 0x24f   :  { %884 = vmatmul.mubr.bf16.gmra.mrb[4].mxu1 %v600_v60  ;;  %v601_v8 = vpack.c.bf16 %v592_v46, %v591_v5  ;;  %v594_v9 = vmul.f32 %v578_v54, %v466_v3 }
 0x251   :  { %887 = vmatprep.mubr.bf16.mxu1 %v601_v8  ;;  %v602_v12 = vpack.c.bf16 %v594_v9, %v593_v43 }
 0x257   :  { %888 = vmatmul.mubr.bf16.gmra.mrb[8].mxu1 %v602_v12 }
 0x30d   :  { %v877_v13 = vpop.f32.mrb[16].mxu0 }
 0x30e   :  { %v717_v41 = vadd.f32 %v877_v13, %v804_v37  ;;  %v708_v55 = vpop.f32.mrb[17].mxu0 }
 0x30f   :  { %v709_v50 = vadd.f32 %v804_v37, %v708_v55  ;;  %v878_v14 = vpop.f32.mrb[18].mxu0 }
 0x310   :  { %773 = vst.msk [vmem:[%s1490_s7 + $0x10] sm:$0xff] %vm43_vm0, %v717_v41  ;;  %v720_v18 = vadd.f32 %v878_v14, %v804_v37  ;;  %v711_v19 = vpop.f32.mrb[19].mxu0 }
 0x311   :  { %771 = vst.msk [vmem:[%s1490_s7] sm:$0xff] %vm43_vm0, %v709_v50  ;;  %v712_v16 = vadd.f32 %v804_v37, %v711_v19 }
 0x312   :  { %774 = vst.msk [vmem:[%s1490_s7 + $0x18] sm:$0xff] %vm43_vm0, %v720_v18 }
 0x313   :  { %772 = vst.msk [vmem:[%s1490_s7 + $0x8] sm:$0xff] %vm43_vm0, %v712_v16 }
 0x316   :  { %v881_v0 = vpop.f32.mrb[0].mxu1 }
 0x317   :  { %v733_v51 = vadd.f32 %v881_v0, %v804_v37  ;;  %v724_v39 = vpop.f32.mrb[1].mxu1 }
 0x318   :  { %v725_v26 = vadd.f32 %v804_v37, %v724_v39  ;;  %v882_v11 = vpop.f32.mrb[2].mxu1 }
 0x319   :  { %777 = vst.msk [vmem:[%s1490_s7 + $0x30] sm:$0xff] %vm43_vm0, %v733_v51  ;;  %v736_v27 = vadd.f32 %v882_v11, %v804_v37  ;;  %v727_v32 = vpop.f32.mrb[3].mxu1 }
 0x31a   :  { %775 = vst.msk [vmem:[%s1490_s7 + $0x20] sm:$0xff] %vm43_vm0, %v725_v26  ;;  %v728_v34 = vadd.f32 %v804_v37, %v727_v32 }
 0x31b   :  { %778 = vst.msk [vmem:[%s1490_s7 + $0x38] sm:$0xff] %vm43_vm0, %v736_v27 }
 0x31c   :  { %776 = vst.msk [vmem:[%s1490_s7 + $0x28] sm:$0xff] %vm43_vm0, %v728_v34 }
 0x322   :  { %v885_v20 = vpop.f32.mrb[4].mxu1 }
 0x323   :  { %v749_v1 = vadd.f32 %v885_v20, %v804_v37  ;;  %v740_v38 = vpop.f32.mrb[5].mxu1 }
 0x324   :  { %v741_v40 = vadd.f32 %v804_v37, %v740_v38  ;;  %v886_v15 = vpop.f32.mrb[6].mxu1 }
 0x325   :  { %781 = vst.msk [vmem:[%s1490_s7 + $0x50] sm:$0xff] %vm43_vm0, %v749_v1  ;;  %v752_v36 = vadd.f32 %v886_v15, %v804_v37  ;;  %v743_v33 = vpop.f32.mrb[7].mxu1 }
 0x326   :  { %779 = vst.msk [vmem:[%s1490_s7 + $0x40] sm:$0xff] %vm43_vm0, %v741_v40  ;;  %v744_v22 = vadd.f32 %v804_v37, %v743_v33 }
 0x327   :  { %782 = vst.msk [vmem:[%s1490_s7 + $0x58] sm:$0xff] %vm43_vm0, %v752_v36 }
 0x328   :  { %780 = vst.msk [vmem:[%s1490_s7 + $0x48] sm:$0xff] %vm43_vm0, %v744_v22 }
 0x32a   :  { %v889_v10 = vpop.f32.mrb[8].mxu1 }
 0x32b   :  { %v765_v42 = vadd.f32 %v889_v10, %v804_v37  ;;  %v756_v24 = vpop.f32.mrb[9].mxu1 }
 0x32c   :  { %v757_v48 = vadd.f32 %v804_v37, %v756_v24  ;;  %v890_v30 = vpop.f32.mrb[10].mxu1 }
 0x32d   :  { %785 = vst.msk [vmem:[%s1490_s7 + $0x70] sm:$0xff] %vm43_vm0, %v765_v42  ;;  %v768_v49 = vadd.f32 %v890_v30, %v804_v37  ;;  %v759_v44 = vpop.f32.mrb[11].mxu1 }
 0x32e   :  { %783 = vst.msk [vmem:[%s1490_s7 + $0x60] sm:$0xff] %vm43_vm0, %v757_v48  ;;  %v760_v23 = vadd.f32 %v804_v37, %v759_v44 }
 0x32f   :  { %786 = vst.msk [vmem:[%s1490_s7 + $0x78] sm:$0xff] %vm43_vm0, %v768_v49 }
 0x330   :  { %784 = vst.msk [vmem:[%s1490_s7 + $0x68] sm:$0xff] %vm43_vm0, %v760_v23 }

// kernel: _lambda_.26
= control target key start
LH: loop header
LB: loop body
LE: loop exit
PB: predicated region body
PF: predicated region fallthrough
CT: control target
= control target key end

     0   :  { %vm18_vm0 = vcmask 523264   ;;  %vm110_vm1 = vcmask 519168   ;;  %s199_s0 = inlined_call_operand.vmem [shape: f32[32,64], index: 0, kind: input, shape index: {}]   ;;  %s200_s1 = inlined_call_operand.vmem [shape: f32[1,64], index: 1, kind: input, shape index: {}]   ;;  %s201_s2 = inlined_call_operand.vmem [shape: f32[1,64], index: 2, kind: input, shape index: {}]   ;;  %s202_s3 = inlined_call_operand.vmem [shape: bf16[32,64], index: 3, kind: output, shape index: {}]  }
   0x1   :  { %v14_v0 = vld [vmem:[%s199_s0] sm:$0xff]  ;;  %v16_v1 = vld [vmem:[%s199_s0 + $0x10] sm:$0xff]  ;;  %v15_v2 = vld [vmem:[%s199_s0 + $0x8] sm:$0xff] }
   0x2   :  { %v19_v3 = vsel %vm18_vm0, %v14_v0, 0.0  ;;  %v25_v4 = vsel %vm18_vm0, %v16_v1, 0.0  ;;  %v17_v5 = vld [vmem:[%s199_s0 + $0x18] sm:$0xff]  ;;  %v22_v6 = vsel %vm18_vm0, %v15_v2, 0.0  ;;  %v119_v41 = vld [vmem:[%s200_s1] ss:$0 sm:$0xff] }
   0x3   :  { %20 = vadd.xlane.f32.xlu0 %v19_v3  ;;  %26 = vadd.xlane.f32.xlu1 %v25_v4  ;;  %v28_v7 = vsel %vm18_vm0, %v17_v5, 0.0  ;;  %v120_v43 = vld [vmem:[%s201_s2] ss:$0 sm:$0xff] }
   0x7   :  { %23 = vadd.xlane.f32.xlu0 %v22_v6  ;;  %29 = vadd.xlane.f32.xlu1 %v28_v7 }
  0x90   :  { %v21_v8 = vpop.xlane.xlu0 %20  ;;  %v27_v9 = vpop.xlane.xlu1 %26 }
  0x91   :  { %v32_v10 = vmul.f32 0.015625, %v21_v8  ;;  %v34_v11 = vmul.f32 0.015625, %v27_v9 }
  0x93   :  { %v36_v12 = vsub.f32 %v14_v0, %v32_v10  ;;  %v38_v13 = vsub.f32 %v16_v1, %v34_v11 }
  0x94   :  { %v24_v14 = vpop.xlane.xlu0 %23  ;;  %v30_v15 = vpop.xlane.xlu1 %29 }
  0x95   :  { %v33_v16 = vmul.f32 0.015625, %v24_v14  ;;  %v35_v17 = vmul.f32 0.015625, %v30_v15  ;;  %v40_v18 = vmul.f32 %v36_v12, %v36_v12  ;;  %v42_v19 = vmul.f32 %v38_v13, %v38_v13 }
  0x97   :  { %v37_v20 = vsub.f32 %v15_v2, %v33_v16  ;;  %v39_v21 = vsub.f32 %v17_v5, %v35_v17  ;;  %v44_v22 = vsel %vm18_vm0, %v40_v18, 0.0  ;;  %v50_v23 = vsel %vm18_vm0, %v42_v19, 0.0 }
  0x98   :  { %45 = vadd.xlane.f32.xlu0 %v44_v22 }
  0x99   :  { %v41_v24 = vmul.f32 %v37_v20, %v37_v20  ;;  %v43_v25 = vmul.f32 %v39_v21, %v39_v21 }
  0x9b   :  { %v47_v26 = vsel %vm18_vm0, %v41_v24, 0.0  ;;  %v53_v27 = vsel %vm18_vm0, %v43_v25, 0.0 }
  0x9c   :  { %51 = vadd.xlane.f32.xlu0 %v50_v23  ;;  %48 = vadd.xlane.f32.xlu1 %v47_v26 }
  0xa0   :  { %54 = vadd.xlane.f32.xlu1 %v53_v27 }
 0x125   :  { %v46_v28 = vpop.xlane.xlu0 %45 }
 0x126   :  { %v56_v29 = vmul.f32 0.015625, %v46_v28 }
 0x128   :  { %v60_v30 = vadd.f32 1e-05, %v56_v29 }
 0x129   :  { %v49_v31 = vpop.xlane.xlu1 %48  ;;  %v52_v32 = vpop.xlane.xlu0 %51 }
 0x12a   :  { %129 = vrsqrt.f32 %v60_v30  ;;  %v57_v33 = vmul.f32 0.015625, %v49_v31  ;;  %v58_v34 = vmul.f32 0.015625, %v52_v32 }
 0x12c   :  { %v61_v35 = vadd.f32 1e-05, %v57_v33  ;;  %v62_v36 = vadd.f32 1e-05, %v58_v34 }
 0x12d   :  { %v55_v37 = vpop.xlane.xlu1 %54 }
 0x12e   :  { %131 = vrsqrt.f32 %v61_v35  ;;  %v59_v38 = vmul.f32 0.015625, %v55_v37 }
 0x12f   :  { %133 = vrsqrt.f32 %v62_v36 }
 0x130   :  { %v63_v39 = vadd.f32 1e-05, %v59_v38 }
 0x132   :  { %135 = vrsqrt.f32 %v63_v39 }
 0x134   :  { %v130_v40 = vpop.eup %129 }
 0x135   :  { %v68_v42 = vmul.f32 %v130_v40, %v36_v12 }
 0x137   :  { %v79_v44 = vmul.f32 %v119_v41, %v68_v42 }
 0x138   :  { %v132_v45 = vpop.eup %131 }
 0x139   :  { %v134_v46 = vpop.eup %133  ;;  %v90_v47 = vadd.f32 %v120_v43, %v79_v44  ;;  %v69_v48 = vmul.f32 %v132_v45, %v37_v20 }
 0x13a   :  { %v70_v49 = vmul.f32 %v134_v46, %v38_v13 }
 0x13b   :  { %v125_v50 = vpack.c.bf16 %v90_v47, %v90_v47  ;;  %v80_v51 = vmul.f32 %v119_v41, %v69_v48 }
 0x13c   :  { %v136_v52 = vpop.eup %135  ;;  %v81_v53 = vmul.f32 %v119_v41, %v70_v49 }
 0x13d   :  { %111 = vst.msk [vmem:[%s202_s3] sm:$0xf] %vm110_vm1, %v125_v50  ;;  %v91_v54 = vadd.f32 %v120_v43, %v80_v51  ;;  %v71_v55 = vmul.f32 %v136_v52, %v39_v21 }
 0x13e   :  { %v92_v56 = vadd.f32 %v120_v43, %v81_v53 }
 0x13f   :  { %v126_v57 = vpack.c.bf16 %v91_v54, %v91_v54  ;;  %v82_v58 = vmul.f32 %v119_v41, %v71_v55 }
 0x140   :  { %v127_v59 = vpack.c.bf16 %v92_v56, %v92_v56 }
 0x141   :  { %112 = vst.msk [vmem:[%s202_s3 + $0x4] sm:$0xf] %vm110_vm1, %v126_v57  ;;  %v93_v60 = vadd.f32 %v120_v43, %v82_v58 }
 0x142   :  { %113 = vst.msk [vmem:[%s202_s3 + $0x8] sm:$0xf] %vm110_vm1, %v127_v59 }
 0x143   :  { %v128_v61 = vpack.c.bf16 %v93_v60, %v93_v60 }
 0x145   :  { %114 = vst.msk [vmem:[%s202_s3 + $0xc] sm:$0xf] %vm110_vm1, %v128_v61 }

// kernel: _lambda_.25
= control target key start
LH: loop header
LB: loop body
LE: loop exit
PB: predicated region body
PF: predicated region fallthrough
CT: control target
= control target key end

     0   :  { %vm151_vm0 = vcmask 523264   ;;  %s276_s1 = inlined_call_operand.vmem [shape: bf16[128,64], index: 1, kind: input, shape index: {}]   ;;  %s277_s0 = inlined_call_operand.vmem [shape: bf16[32,128], index: 0, kind: input, shape index: {}]   ;;  %s278_s2 = inlined_call_operand.vmem [shape: f32[1,64], index: 2, kind: input, shape index: {}]   ;;  %s279_s3 = inlined_call_operand.vmem [shape: f32[32,64], index: 3, kind: output, shape index: {}]  }
   0x1   :  { %v201_v0 = vld [vmem:[%s276_s1] sm:$0xff]   ;;  %v202_v1 = vld [vmem:[%s276_s1 + $0x8] sm:$0xff]   ;;  %v203_v2 = vld [vmem:[%s276_s1 + $0x10] sm:$0xff]  }
   0x2   :  { %181 = vmatprep.subr.bf16.mxu0 %v201_v0  ;;  %v204_v3 = vld [vmem:[%s276_s1 + $0x18] sm:$0xff]   ;;  %v209_v4 = vld [vmem:[%s277_s0] sm:$0xff]   ;;  %v206_v6 = vld [vmem:[%s276_s1 + $0x28] sm:$0xff]  }
   0x3   :  { %182 = vmatpush3.bf16.msra.mxu0 %v201_v0  ;;  %197 = vmatprep.mubr.bf16.mxu0 %v209_v4  ;;  %v205_v5 = vld [vmem:[%s276_s1 + $0x20] sm:$0xff]   ;;  %v207_v7 = vld [vmem:[%s276_s1 + $0x30] sm:$0xff]   ;;  %v208_v8 = vld [vmem:[%s276_s1 + $0x38] sm:$0xff]  }
   0x4   :  { %183 = vmatprep.subr.bf16.mxu0 %v202_v1  ;;  %v210_v9 = vld [vmem:[%s277_s0 + $0x8] sm:$0xff]   ;;  %v160_v10 = vld [vmem:[%s278_s2] ss:$0 sm:$0xff] }
   0x7   :  { %184 = vmatpush3.bf16.msra.mxu0 %v202_v1 }
   0x8   :  { %185 = vmatprep.subr.bf16.mxu0 %v203_v2 }
   0xb   :  { %186 = vmatpush3.bf16.msra.mxu0 %v203_v2 }
   0xc   :  { %187 = vmatprep.subr.bf16.mxu0 %v204_v3 }
   0xf   :  { %188 = vmatpush3.bf16.msra.mxu0 %v204_v3 }
  0x10   :  { %189 = vmatprep.subr.bf16.mxu0 %v205_v5 }
  0x13   :  { %190 = vmatpush3.bf16.msra.mxu0 %v205_v5 }
  0x14   :  { %191 = vmatprep.subr.bf16.mxu0 %v206_v6 }
  0x17   :  { %192 = vmatpush3.bf16.msra.mxu0 %v206_v6 }
  0x18   :  { %193 = vmatprep.subr.bf16.mxu0 %v207_v7 }
  0x1b   :  { %194 = vmatpush3.bf16.msra.mxu0 %v207_v7 }
  0x1c   :  { %195 = vmatprep.subr.bf16.mxu0 %v208_v8 }
  0x1f   :  { %196 = vmatpush3.bf16.msra.mxu0 %v208_v8 }
  0x22   :  { %198 = vmatmul.mubr.bf16.vlgmr.msra.gmra.mrb[0].mxu0 %v210_v9 }
  0xf5   :  { %v199_v11 = vpop.f32.mrb[0].mxu0 }
  0xf6   :  { %v145_v12 = vadd.f32 %v199_v11, %v160_v10  ;;  %v136_v13 = vpop.f32.mrb[1].mxu0 }
  0xf7   :  { %v137_v14 = vadd.f32 %v160_v10, %v136_v13  ;;  %v200_v15 = vpop.f32.mrb[2].mxu0 }
  0xf8   :  { %154 = vst.msk [vmem:[%s279_s3 + $0x10] sm:$0xff] %vm151_vm0, %v145_v12  ;;  %v148_v16 = vadd.f32 %v200_v15, %v160_v10  ;;  %v139_v17 = vpop.f32.mrb[3].mxu0 }
  0xf9   :  { %152 = vst.msk [vmem:[%s279_s3] sm:$0xff] %vm151_vm0, %v137_v14  ;;  %v140_v18 = vadd.f32 %v160_v10, %v139_v17 }
  0xfa   :  { %155 = vst.msk [vmem:[%s279_s3 + $0x18] sm:$0xff] %vm151_vm0, %v148_v16 }
  0xfb   :  { %153 = vst.msk [vmem:[%s279_s3 + $0x8] sm:$0xff] %vm151_vm0, %v140_v18 }

// kernel: _lambda_.24
= control target key start
LH: loop header
LB: loop body
LE: loop exit
PB: predicated region body
PF: predicated region fallthrough
CT: control target
= control target key end

     0   :  { %s182_s0 = inlined_call_operand.vmem [shape: f32[32,128], index: 0, kind: input, shape index: {}]   ;;  %s183_s1 = inlined_call_operand.vmem [shape: f32[1,128], index: 1, kind: input, shape index: {}]   ;;  %s184_s2 = inlined_call_operand.vmem [shape: f32[1,128], index: 2, kind: input, shape index: {}]   ;;  %s185_s3 = inlined_call_operand.vmem [shape: bf16[32,128], index: 3, kind: output, shape index: {}]  }
   0x1   :  { %v14_v0 = vld [vmem:[%s182_s0] sm:$0xff]  ;;  %v16_v1 = vld [vmem:[%s182_s0 + $0x10] sm:$0xff]  ;;  %v15_v2 = vld [vmem:[%s182_s0 + $0x8] sm:$0xff] }
   0x2   :  { %18 = vadd.xlane.f32.xlu0 %v14_v0  ;;  %22 = vadd.xlane.f32.xlu1 %v16_v1  ;;  %v17_v3 = vld [vmem:[%s182_s0 + $0x18] sm:$0xff]  ;;  %v109_v34 = vld [vmem:[%s183_s1] ss:$0 sm:$0xff] }
   0x3   :  { %v110_v39 = vld [vmem:[%s184_s2] ss:$0 sm:$0xff] }
   0x6   :  { %20 = vadd.xlane.f32.xlu0 %v15_v2  ;;  %24 = vadd.xlane.f32.xlu1 %v17_v3 }
  0x8f   :  { %v19_v4 = vpop.xlane.xlu0 %18  ;;  %v23_v5 = vpop.xlane.xlu1 %22 }
  0x90   :  { %v27_v6 = vmul.f32 0.0078125, %v19_v4  ;;  %v29_v7 = vmul.f32 0.0078125, %v23_v5 }
  0x92   :  { %v31_v8 = vsub.f32 %v14_v0, %v27_v6  ;;  %v33_v9 = vsub.f32 %v16_v1, %v29_v7 }
  0x93   :  { %v21_v10 = vpop.xlane.xlu0 %20  ;;  %v25_v11 = vpop.xlane.xlu1 %24 }
  0x94   :  { %v28_v12 = vmul.f32 0.0078125, %v21_v10  ;;  %v35_v13 = vmul.f32 %v31_v8, %v31_v8  ;;  %v30_v14 = vmul.f32 0.0078125, %v25_v11  ;;  %v37_v17 = vmul.f32 %v33_v9, %v33_v9 }
  0x96   :  { %v32_v15 = vsub.f32 %v15_v2, %v28_v12  ;;  %39 = vadd.xlane.f32.xlu0 %v35_v13  ;;  %v34_v16 = vsub.f32 %v17_v3, %v30_v14 }
  0x98   :  { %v36_v18 = vmul.f32 %v32_v15, %v32_v15  ;;  %v38_v19 = vmul.f32 %v34_v16, %v34_v16 }
  0x9a   :  { %43 = vadd.xlane.f32.xlu0 %v37_v17  ;;  %41 = vadd.xlane.f32.xlu1 %v36_v18 }
  0x9e   :  { %45 = vadd.xlane.f32.xlu1 %v38_v19 }
 0x123   :  { %v40_v20 = vpop.xlane.xlu0 %39 }
 0x124   :  { %v47_v21 = vmul.f32 0.0078125, %v40_v20 }
 0x126   :  { %v51_v22 = vadd.f32 1e-05, %v47_v21 }
 0x127   :  { %v42_v23 = vpop.xlane.xlu1 %41  ;;  %v44_v24 = vpop.xlane.xlu0 %43 }
 0x128   :  { %130 = vrsqrt.f32 %v51_v22  ;;  %v48_v25 = vmul.f32 0.0078125, %v42_v23  ;;  %v49_v26 = vmul.f32 0.0078125, %v44_v24 }
 0x12a   :  { %v52_v27 = vadd.f32 1e-05, %v48_v25  ;;  %v53_v28 = vadd.f32 1e-05, %v49_v26 }
 0x12b   :  { %v46_v29 = vpop.xlane.xlu1 %45 }
 0x12c   :  { %132 = vrsqrt.f32 %v52_v27  ;;  %v50_v30 = vmul.f32 0.0078125, %v46_v29 }
 0x12d   :  { %134 = vrsqrt.f32 %v53_v28 }
 0x12e   :  { %v54_v31 = vadd.f32 1e-05, %v50_v30 }
 0x130   :  { %136 = vrsqrt.f32 %v54_v31 }
 0x132   :  { %v131_v32 = vpop.eup %130 }
 0x133   :  { %v59_v33 = vmul.f32 %v131_v32, %v31_v8 }
 0x135   :  { %v70_v37 = vmul.f32 %v109_v34, %v59_v33 }
 0x136   :  { %v133_v35 = vpop.eup %132 }
 0x137   :  { %v135_v36 = vpop.eup %134  ;;  %v60_v38 = vmul.f32 %v133_v35, %v32_v15  ;;  %v81_v43 = vadd.f32 %v110_v39, %v70_v37 }
 0x138   :  { %v61_v40 = vmul.f32 %v135_v36, %v33_v9 }
 0x139   :  { %v71_v41 = vmul.f32 %v109_v34, %v60_v38 }
 0x13a   :  { %v137_v42 = vpop.eup %136  ;;  %v72_v45 = vmul.f32 %v109_v34, %v61_v40 }
 0x13b   :  { %v82_v44 = vadd.f32 %v110_v39, %v71_v41  ;;  %v62_v46 = vmul.f32 %v137_v42, %v34_v16 }
 0x13c   :  { %v83_v49 = vadd.f32 %v110_v39, %v72_v45 }
 0x13d   :  { %v122_v47 = vpack.c.bf16 %v82_v44, %v81_v43  ;;  %v73_v48 = vmul.f32 %v109_v34, %v62_v46 }
 0x13f   :  { %123 = vst [vmem:[%s185_s3] sm:$0xff] %v122_v47   ;;  %v84_v50 = vadd.f32 %v110_v39, %v73_v48 }
 0x141   :  { %v127_v51 = vpack.c.bf16 %v84_v50, %v83_v49 }
 0x143   :  { %129 = vst [vmem:[%s185_s3 + $0x8] sm:$0xff] %v127_v51  }

// kernel: _lambda_.22
= control target key start
LH: loop header
LB: loop body
LE: loop exit
PB: predicated region body
PF: predicated region fallthrough
CT: control target
= control target key end

     0   :  { %vm103_vm0 = vcmask 261120   ;;  %vm243_vm1 = vcmask 130048   ;;  %s2534_s18 = smov 96   ;;  %s2536_s19 = smov 64   ;;  %s3258_s1 = inlined_call_operand.vmem [shape: bf16[32,96], index: 1, kind: input, shape index: {}]   ;;  %s3259_s0 = inlined_call_operand.vmem [shape: bf16[4,32,32], index: 0, kind: input, shape index: {}]   ;;  %s3260_s2 = inlined_call_operand.vmem [shape: f32[1,96], index: 2, kind: input, shape index: {}]   ;;  %s3261_s3 = inlined_call_operand.vmem [shape: f32[4,2,32,32], index: 3, kind: input, shape index: {}]   ;;  %s3262_s4 = inlined_call_operand.vmem [shape: bf16[32,32], index: 4, kind: input, shape index: {}]   ;;  %s3263_s5 = inlined_call_operand.vmem [shape: f32[1,32], index: 5, kind: input, shape index: {}]   ;;  %s3264_s6 = inlined_call_operand.vmem [shape: f32[4,32,32], index: 6, kind: output, shape index: {}]  }
   0x1   :  { %v2393_v0 = vld [vmem:[%s3258_s1] sm:$0xff]   ;;  %v2394_v1 = vld [vmem:[%s3258_s1 + $0x8] sm:$0xff]   ;;  %v2397_v4 = vld [vmem:[%s3259_s0 + $0x10] sm:$0xff]   ;;  %s2537_s20 = smov 48   ;;  %s2538_s12 = smov 16  }
   0x2   :  { %2163 = vmatprep.subr.bf16.mxu0 %v2393_v0  ;;  %v2395_v2 = vld [vmem:[%s3259_s0] sm:$0xff]   ;;  %v2396_v3 = vld [vmem:[%s3259_s0 + $0x8] sm:$0xff]   ;;  %v2398_v5 = vld [vmem:[%s3259_s0 + $0x18] sm:$0xff]  }
   0x3   :  { %2164 = vmatpush3.bf16.msra.mxu0 %v2393_v0  ;;  %2167 = vmatprep.mubr.msk.bf16.mxu0 %vm103_vm0, %v2395_v2  ;;  %v2399_v6 = vld [vmem:[%s3259_s0 + $0x20] sm:$0xff]   ;;  %v2400_v7 = vld [vmem:[%s3259_s0 + $0x28] sm:$0xff]   ;;  %v2401_v8 = vld [vmem:[%s3259_s0 + $0x30] sm:$0xff]  }
   0x4   :  { %2165 = vmatprep.subr.bf16.mxu0 %v2394_v1  ;;  %v2402_v9 = vld [vmem:[%s3259_s0 + $0x38] sm:$0xff]   ;;  %v1989_v11 = vld [vmem:[%s3260_s2] ss:$0 sm:$0xff]  ;;  %s2533_s0 = smov 80   ;;  %s2535_s2 = smov 112   ;;  %v235_v63 = vld [vmem:[%s3261_s3 + $0x10] sm:$0xff] }
   0x7   :  { %2166 = vmatpush3.bf16.msra.mxu0 %v2394_v1 }
   0xa   :  { %2168 = vmatmul.mubr.msk.bf16.vlgmr.msra.gmra.mrb[0].mxu0 %vm103_vm0, %v2396_v3 }
   0xb   :  { %2171 = vmatprep.mubr.msk.bf16.mxu0 %vm103_vm0, %v2397_v4  ;;  %v233_v4 = vld [vmem:[%s3261_s3] sm:$0xff] }
  0x12   :  { %2172 = vmatmul.mubr.msk.bf16.gmra.mrb[4].mxu0 %vm103_vm0, %v2398_v5 }
  0x13   :  { %2175 = vmatprep.mubr.msk.bf16.mxu0 %vm103_vm0, %v2399_v6 }
  0x1a   :  { %2176 = vmatmul.mubr.msk.bf16.gmra.mrb[8].mxu0 %vm103_vm0, %v2400_v7  ;;  %v234_v7 = vld [vmem:[%s3261_s3 + $0x8] sm:$0xff] }
  0x1b   :  { %2179 = vmatprep.mubr.msk.bf16.mxu0 %vm103_vm0, %v2401_v8 }
  0x22   :  { %2180 = vmatmul.mubr.msk.bf16.gmra.mrb[12].mxu0 %vm103_vm0, %v2402_v9 }
  0xdd   :  { %v2169_v10 = vpop.f32.mrb[0].mxu0 }
  0xde   :  { %v162_v12 = vpop.f32.mrb[1].mxu0  ;;  %v171_v14 = vadd.f32 %v2169_v10, %v1989_v11 }
  0xdf   :  { %v2170_v13 = vpop.f32.mrb[2].mxu0  ;;  %v163_v17 = vadd.f32 %v1989_v11, %v162_v12 }
  0xe0   :  { %v174_v15 = vadd.f32 %v2170_v13, %v1989_v11  ;;  %v165_v16 = vpop.f32.mrb[3].mxu0  ;;  %v236_v13 = vld [vmem:[%s3261_s3 + $0x18] sm:$0xff] }
  0xe1   :  { %v166_v18 = vadd.f32 %v1989_v11, %v165_v16 }
  0xe2   :  { %v2615_v19 = vpack.c.bf16 %v174_v15, %v171_v14 }
  0xe3   :  { %v225_v20 = vpack.c.bf16 %v166_v18, %v163_v17 }
  0xe5   :  { %429 = vrot.lane.b32.xlu1 %v225_v20, %s2533_s0  ;;  %239 = vrot.lane.b32.xlu0 %v225_v20, %s2534_s18  ;;  %v2173_v21 = vpop.f32.mrb[4].mxu0 }
  0xe6   :  { %2187 = vmatprep.mubr.msk.bf16.mxu0 %vm243_vm1, %v225_v20  ;;  %v187_v22 = vadd.f32 %v2173_v21, %v1989_v11  ;;  %v178_v23 = vpop.f32.mrb[5].mxu0 }
  0xe7   :  { %v179_v24 = vadd.f32 %v1989_v11, %v178_v23  ;;  %v2174_v25 = vpop.f32.mrb[6].mxu0 }
  0xe8   :  { %v190_v26 = vadd.f32 %v2174_v25, %v1989_v11  ;;  %v181_v27 = vpop.f32.mrb[7].mxu0  ;;  %v2012_v25 = vld [vmem:[%s3261_s3 + $0x20] sm:$0xff] }
  0xe9   :  { %431 = vrot.lane.b32.xlu1 %v2615_v19, %s2533_s0  ;;  %241 = vrot.lane.b32.xlu0 %v2615_v19, %s2534_s18  ;;  %v182_v28 = vadd.f32 %v1989_v11, %v181_v27 }
  0xea   :  { %v2629_v30 = vpack.c.bf16 %v190_v26, %v187_v22 }
  0xeb   :  { %v2631_v33 = vpack.c.bf16 %v182_v28, %v179_v24 }
  0xed   :  { %427 = vrot.lane.b32.xlu1 %v2615_v19, %s2535_s2  ;;  %425 = vrot.lane.b32.xlu0 %v225_v20, %s2535_s2  ;;  %v2177_v29 = vpop.f32.mrb[8].mxu0 }
  0xee   :  { %v203_v31 = vadd.f32 %v2177_v29, %v1989_v11  ;;  %v194_v32 = vpop.f32.mrb[9].mxu0 }
  0xef   :  { %v195_v34 = vadd.f32 %v1989_v11, %v194_v32  ;;  %v2178_v35 = vpop.f32.mrb[10].mxu0 }
  0xf0   :  { %v206_v36 = vadd.f32 %v2178_v35, %v1989_v11  ;;  %v197_v37 = vpop.f32.mrb[11].mxu0 }
  0xf1   :  { %351 = vrot.lane.b32.xlu1 %v225_v20, %s2536_s19  ;;  %v198_v38 = vadd.f32 %v1989_v11, %v197_v37  ;;  %v2013_v37 = vld [vmem:[%s3261_s3 + $0x28] sm:$0xff] }
  0xf2   :  { %v2633_v39 = vpack.c.bf16 %v206_v36, %v203_v31 }
  0xf3   :  { %v2635_v40 = vpack.c.bf16 %v198_v38, %v195_v34  ;;  %v2015_v34 = vld [vmem:[%s3261_s3 + $0x38] sm:$0xff] }
  0xf5   :  { %540 = vrot.lane.b32.xlu1 %v225_v20, %s2537_s20  ;;  %v2181_v41 = vpop.f32.mrb[12].mxu0  ;;  %v2014_v20 = vld [vmem:[%s3261_s3 + $0x30] sm:$0xff] }
  0xf6   :  { %v219_v42 = vadd.f32 %v2181_v41, %v1989_v11  ;;  %v210_v43 = vpop.f32.mrb[13].mxu0 }
  0xf7   :  { %v211_v44 = vadd.f32 %v1989_v11, %v210_v43  ;;  %v2182_v45 = vpop.f32.mrb[14].mxu0 }
  0xf8   :  { %v222_v46 = vadd.f32 %v2182_v45, %v1989_v11  ;;  %v213_v47 = vpop.f32.mrb[15].mxu0 }
  0xf9   :  { %v214_v48 = vadd.f32 %v1989_v11, %v213_v47 }
  0xfa   :  { %v2637_v49 = vpack.c.bf16 %v222_v46, %v219_v42 }
  0xfb   :  { %v2639_v50 = vpack.c.bf16 %v214_v48, %v211_v44 }
 0x157   :  { %v430_v51 = vpop.permute.xlu1 %429  ;;  %v240_v52 = vpop.permute.xlu0 %239 }
 0x158   :  { %2331 = vmatprep.subr.msk.bf16.mxu0 %vm243_vm1, %v240_v52  ;;  %v251_v53 = vsel %vm243_vm1, %v240_v52, 0  ;;  %v440_v60 = vsel %vm243_vm1, %v430_v51, 0 }
 0x159   :  { %2184 = vmatpush3.bf16.xpose.msra.mxu0 %v251_v53 }
 0x15b   :  { %v432_v54 = vpop.permute.xlu1 %431  ;;  %v242_v55 = vpop.permute.xlu0 %241 }
 0x15c   :  { %2332 = vmatprep.subr.msk.bf16.mxu0 %vm243_vm1, %v242_v55  ;;  %v254_v57 = vsel %vm243_vm1, %v242_v55, 0  ;;  %v443_v61 = vsel %vm243_vm1, %v432_v54, 0 }
 0x15f   :  { %v428_v56 = vpop.permute.xlu1 %427  ;;  %v426_v59 = vpop.permute.xlu0 %425 }
 0x161   :  { %2186 = vmatpush3.bf16.xpose.msra.mxu0 %v254_v57 }
 0x162   :  { %2333 = vmatprep.subr.msk.bf16.mxu0 %vm243_vm1, %v430_v51 }
 0x163   :  { %v352_v58 = vpop.permute.xlu1 %351 }
 0x164   :  { %2191 = vmatprep.subr.bf16.mxu1 %v352_v58 }
 0x165   :  { %2192 = vmatpush3.bf16.msra.mxu1 %v352_v58 }
 0x167   :  { %v541_v42 = vpop.permute.xlu1 %540 }
 0x168   :  { %2188 = vmatmul.mubr.msk.bf16.vlgmr.msra.gmra.mrb[16].mxu0 %vm243_vm1, %v2615_v19 }
 0x169   :  { %2200 = vmatpush3.bf16.xpose.msra.mxu0 %v440_v60  ;;  %2203 = vmatprep.mubr.msk.bf16.mxu0 %vm243_vm1, %v426_v59 }
 0x16a   :  { %2334 = vmatprep.subr.msk.bf16.mxu0 %vm243_vm1, %v432_v54 }
 0x171   :  { %2202 = vmatpush3.bf16.xpose.msra.mxu0 %v443_v61 }
 0x178   :  { %2204 = vmatmul.mubr.msk.bf16.vlgmr.msra.gmra.mrb[20].mxu0 %vm243_vm1, %v428_v56 }
 0x23b   :  { %v2189_v62 = vpop.f32.mrb[16].mxu0 }
 0x23c   :  { %v307_v0 = vmul.f32 0.25, %v2189_v62  ;;  %v290_v1 = vpop.f32.mrb[17].mxu0 }
 0x23d   :  { %v305_v2 = vmul.f32 0.25, %v290_v1  ;;  %v2190_v3 = vpop.f32.mrb[18].mxu0 }
 0x23e   :  { %v293_v5 = vpop.f32.mrb[19].mxu0  ;;  %v311_v6 = vadd.f32 %v307_v0, %v235_v63  ;;  %v308_v9 = vmul.f32 0.25, %v2190_v3 }
 0x23f   :  { %v306_v8 = vmul.f32 0.25, %v293_v5  ;;  %v309_v11 = vadd.f32 %v305_v2, %v233_v4 }
 0x240   :  { %v319_v10 = vsel %vm103_vm0, %v311_v6, -inf  ;;  %v312_v16 = vadd.f32 %v308_v9, %v236_v13 }
 0x241   :  { %320 = vmax.xlane.f32.xlu0 %v319_v10  ;;  %v310_v12 = vadd.f32 %v306_v8, %v234_v7  ;;  %v313_v15 = vsel %vm103_vm0, %v309_v11, -inf }
 0x242   :  { %v322_v17 = vsel %vm103_vm0, %v312_v16, -inf }
 0x243   :  { %v316_v14 = vsel %vm103_vm0, %v310_v12, -inf }
 0x244   :  { %317 = vmax.xlane.f32.xlu1 %v316_v14 }
 0x245   :  { %314 = vmax.xlane.f32.xlu0 %v313_v15 }
 0x249   :  { %323 = vmax.xlane.f32.xlu0 %v322_v17 }
 0x24b   :  { %v2205_v18 = vpop.f32.mrb[20].mxu0 }
 0x24c   :  { %v496_v21 = vmul.f32 0.25, %v2205_v18  ;;  %v479_v22 = vpop.f32.mrb[21].mxu0 }
 0x24d   :  { %v494_v23 = vmul.f32 0.25, %v479_v22  ;;  %v2206_v24 = vpop.f32.mrb[22].mxu0 }
 0x24e   :  { %v482_v26 = vpop.f32.mrb[23].mxu0  ;;  %v2675_v27 = vadd.f32 %v2014_v20, %v496_v21  ;;  %v497_v32 = vmul.f32 0.25, %v2206_v24 }
 0x24f   :  { %v498_v29 = vadd.f32 %v2012_v25, %v494_v23  ;;  %v495_v35 = vmul.f32 0.25, %v482_v26 }
 0x250   :  { %v508_v28 = vsel %vm103_vm0, %v2675_v27, -inf  ;;  %v501_v36 = vadd.f32 %v2015_v34, %v497_v32 }
 0x251   :  { %509 = vmax.xlane.f32.xlu1 %v508_v28  ;;  %v502_v31 = vsel %vm103_vm0, %v498_v29, -inf }
 0x252   :  { %v511_v38 = vsel %vm103_vm0, %v501_v36, -inf }
 0x255   :  { %503 = vmax.xlane.f32.xlu1 %v502_v31 }
 0x25f   :  { %353 = vrot.lane.b32.xlu0 %v2615_v19, %s2536_s19 }
 0x266   :  { %542 = vrot.lane.b32.xlu1 %v2615_v19, %s2537_s20  ;;  %v499_v19 = vadd.f32 %v2013_v37, %v495_v35 }
 0x268   :  { %v505_v41 = vsel %vm103_vm0, %v499_v19, -inf }
 0x26a   :  { %638 = vrot.lane.b32.xlu1 %v2629_v30, %s2534_s18 }
 0x26e   :  { %747 = vrot.lane.b32.xlu1 %v2631_v33, %s2536_s19 }
 0x27e   :  { %512 = vmax.xlane.f32.xlu0 %v511_v38 }
 0x282   :  { %506 = vmax.xlane.f32.xlu0 %v505_v41 }
 0x298   :  { %636 = vrot.lane.b32.xlu0 %v2631_v33, %s2534_s18 }
 0x2ce   :  { %v321_v43 = vpop.xlane.xlu0 %320 }
 0x2cf   :  { %v327_v45 = vsub.f32 %v311_v6, %v321_v43 }
 0x2d1   :  { %v318_v44 = vpop.xlane.xlu1 %317  ;;  %v333_v53 = vmul.f32 1.442695, %v327_v45  ;;  %v2021_v45 = vld [vmem:[%s3261_s3 + $0x48] sm:$0xff] }
 0x2d2   :  { %v326_v46 = vsub.f32 %v310_v12, %v318_v44  ;;  %v315_v47 = vpop.xlane.xlu0 %314 }
 0x2d3   :  { %v325_v48 = vsub.f32 %v309_v11, %v315_v47 }
 0x2d4   :  { %v331_v51 = vmul.f32 1.442695, %v326_v46 }
 0x2d5   :  { %v329_v52 = vmul.f32 1.442695, %v325_v48 }
 0x2d6   :  { %2405 = vpow2.f32 %v331_v51  ;;  %v324_v54 = vpop.xlane.xlu0 %323 }
 0x2d7   :  { %2407 = vpow2.f32 %v329_v52  ;;  %v328_v55 = vsub.f32 %v312_v16, %v324_v54 }
 0x2d8   :  { %2409 = vpow2.f32 %v333_v53  ;;  %v2023_v53 = vld [vmem:[%s3261_s3 + $0x58] sm:$0xff] }
 0x2d9   :  { %v335_v56 = vmul.f32 1.442695, %v328_v55 }
 0x2da   :  { %v354_v57 = vpop.permute.xlu0 %353 }
 0x2db   :  { %2411 = vpow2.f32 %v335_v56  ;;  %2193 = vmatprep.subr.bf16.mxu1 %v354_v57 }
 0x2dc   :  { %2194 = vmatpush3.bf16.msra.mxu1 %v354_v57 }
 0x2dd   :  { %2207 = vmatprep.subr.bf16.mxu1 %v541_v42 }
 0x2de   :  { %v510_v58 = vpop.xlane.xlu1 %509 }
 0x2df   :  { %v516_v8 = vsub.f32 %v2675_v27, %v510_v58 }
 0x2e0   :  { %v2698_v59 = vpop.eup %2405 }
 0x2e1   :  { %v2700_v60 = vpop.eup %2407  ;;  %v522_v13 = vmul.f32 1.442695, %v516_v8 }
 0x2e2   :  { %v504_v61 = vpop.xlane.xlu1 %503  ;;  %v349_v62 = vpack.c.bf16 %v2698_v59, %v2700_v60  ;;  %v2704_v63 = vpop.eup %2409 }
 0x2e3   :  { %v514_v5 = vsub.f32 %v498_v29, %v504_v61 }
 0x2e4   :  { %2195 = vmatprep.mubr.msk.bf16.mxu1 %vm103_vm0, %v349_v62 }
 0x2e5   :  { %v2707_v0 = vpop.eup %2411  ;;  %v518_v9 = vmul.f32 1.442695, %v514_v5 }
 0x2e6   :  { %v543_v1 = vpop.permute.xlu1 %542  ;;  %v350_v2 = vpack.c.bf16 %v2707_v0, %v2704_v63 }
 0x2e7   :  { %2413 = vpow2.f32 %v518_v9 }
 0x2e8   :  { %2196 = vmatmul.mubr.msk.bf16.vlgmr.msra.gmra.mrb[0].mxu1 %vm103_vm0, %v350_v2 }
 0x2e9   :  { %2208 = vmatpush3.bf16.msra.mxu1 %v541_v42  ;;  %v2020_v42 = vld [vmem:[%s3261_s3 + $0x40] sm:$0xff] }
 0x2ea   :  { %2209 = vmatprep.subr.bf16.mxu1 %v543_v1  ;;  %v639_v3 = vpop.permute.xlu1 %638 }
 0x2eb   :  { %v650_v24 = vsel %vm243_vm1, %v639_v3, 0 }
 0x2ed   :  { %2210 = vmatpush3.bf16.msra.mxu1 %v543_v1 }
 0x2ee   :  { %v748_v4 = vpop.permute.xlu1 %747 }
 0x2ef   :  { %2223 = vmatprep.subr.bf16.mxu0 %v748_v4 }
 0x2f0   :  { %2224 = vmatpush3.bf16.msra.mxu0 %v748_v4 }
 0x2f1   :  { %v2714_v16 = vpop.eup %2413 }
 0x30b   :  { %v513_v6 = vpop.xlane.xlu0 %512 }
 0x30c   :  { %v517_v7 = vsub.f32 %v501_v36, %v513_v6  ;;  %v2022_v36 = vld [vmem:[%s3261_s3 + $0x50] sm:$0xff] }
 0x30e   :  { %v524_v10 = vmul.f32 1.442695, %v517_v7 }
 0x30f   :  { %v507_v11 = vpop.xlane.xlu0 %506 }
 0x310   :  { %v515_v12 = vsub.f32 %v499_v19, %v507_v11  ;;  %2415 = vpow2.f32 %v524_v10 }
 0x312   :  { %v520_v14 = vmul.f32 1.442695, %v515_v12 }
 0x313   :  { %v637_v15 = vpop.permute.xlu0 %636 }
 0x314   :  { %2417 = vpow2.f32 %v520_v14  ;;  %2335 = vmatprep.subr.msk.bf16.mxu1 %vm243_vm1, %v637_v15  ;;  %v647_v23 = vsel %vm243_vm1, %v637_v15, 0 }
 0x315   :  { %2419 = vpow2.f32 %v522_v13 }
 0x31a   :  { %v2716_v17 = vpop.eup %2415 }
 0x31e   :  { %v2718_v18 = vpop.eup %2417 }
 0x31f   :  { %v2720_v20 = vpop.eup %2419  ;;  %v538_v21 = vpack.c.bf16 %v2718_v18, %v2714_v16 }
 0x320   :  { %v539_v22 = vpack.c.bf16 %v2716_v17, %v2720_v20 }
 0x321   :  { %2211 = vmatprep.mubr.msk.bf16.mxu1 %vm103_vm0, %v538_v21 }
 0x322   :  { %2212 = vmatmul.mubr.msk.bf16.vlgmr.msra.gmra.mrb[4].mxu1 %vm103_vm0, %v539_v22 }
 0x323   :  { %2216 = vmatpush3.bf16.xpose.msra.mxu1 %v647_v23  ;;  %2219 = vmatprep.mubr.msk.bf16.mxu1 %vm243_vm1, %v2631_v33 }
 0x324   :  { %2336 = vmatprep.subr.msk.bf16.mxu1 %vm243_vm1, %v639_v3 }
 0x32b   :  { %2218 = vmatpush3.bf16.xpose.msra.mxu1 %v650_v24 }
 0x332   :  { %2220 = vmatmul.mubr.msk.bf16.vlgmr.msra.gmra.mrb[8].mxu1 %vm243_vm1, %v2629_v30 }
 0x3bb   :  { %v2735_v25 = vpop.f32.mrb[0].mxu1 }
 0x3bc   :  { %3265 = vst [vmem:[#allocation2_spill] sm:$0xff] %v2735_v25  ;;  %v2737_v26 = vpop.f32.mrb[1].mxu1 }
 0x3bd   :  { %v2739_v27 = vpop.f32.mrb[2].mxu1 }
 0x3be   :  { %3266 = vst [vmem:[#allocation3_spill] sm:$0xff] %v2739_v27  ;;  %v2741_v28 = vpop.f32.mrb[3].mxu1 }
 0x3f5   :  { %v2743_v29 = vpop.f32.mrb[4].mxu1 }
 0x3f6   :  { %v2745_v31 = vpop.f32.mrb[5].mxu1 }
 0x3f7   :  { %v2747_v32 = vpop.f32.mrb[6].mxu1 }
 0x3f8   :  { %v2749_v34 = vpop.f32.mrb[7].mxu1 }
 0x405   :  { %v2221_v35 = vpop.f32.mrb[8].mxu1 }
 0x406   :  { %v703_v37 = vmul.f32 0.25, %v2221_v35  ;;  %v686_v38 = vpop.f32.mrb[9].mxu1 }
 0x407   :  { %v701_v19 = vmul.f32 0.25, %v686_v38  ;;  %v2222_v41 = vpop.f32.mrb[10].mxu1 }
 0x408   :  { %v689_v43 = vpop.f32.mrb[11].mxu1  ;;  %v707_v44 = vadd.f32 %v2022_v36, %v703_v37  ;;  %v704_v47 = vmul.f32 0.25, %v2222_v41 }
 0x409   :  { %v702_v46 = vmul.f32 0.25, %v689_v43  ;;  %v705_v51 = vadd.f32 %v2020_v42, %v701_v19 }
 0x40a   :  { %v715_v48 = vsel %vm103_vm0, %v707_v44, -inf  ;;  %v708_v56 = vadd.f32 %v2023_v53, %v704_v47 }
 0x40b   :  { %716 = vmax.xlane.f32.xlu0 %v715_v48  ;;  %v706_v52 = vadd.f32 %v2021_v45, %v702_v46  ;;  %v709_v55 = vsel %vm103_vm0, %v705_v51, -inf }
 0x40c   :  { %v718_v57 = vsel %vm103_vm0, %v708_v56, -inf }
 0x40d   :  { %v712_v54 = vsel %vm103_vm0, %v706_v52, -inf }
 0x40e   :  { %713 = vmax.xlane.f32.xlu1 %v712_v54  ;;  %v2029_v54 = vld [vmem:[%s3261_s3 + $0x68] sm:$0xff] }
 0x40f   :  { %710 = vmax.xlane.f32.xlu0 %v709_v55 }
 0x413   :  { %719 = vmax.xlane.f32.xlu0 %v718_v57 }
 0x41f   :  { %825 = vrot.lane.b32.xlu1 %v2631_v33, %s2533_s0 }
 0x423   :  { %827 = vrot.lane.b32.xlu1 %v2629_v30, %s2533_s0 }
 0x427   :  { %823 = vrot.lane.b32.xlu1 %v2629_v30, %s2535_s2 }
 0x429   :  { %749 = vrot.lane.b32.xlu0 %v2629_v30, %s2536_s19 }
 0x42b   :  { %936 = vrot.lane.b32.xlu1 %v2631_v33, %s2537_s20 }
 0x42d   :  { %821 = vrot.lane.b32.xlu0 %v2631_v33, %s2535_s2 }
 0x498   :  { %v717_v58 = vpop.xlane.xlu0 %716 }
 0x499   :  { %v723_v62 = vsub.f32 %v707_v44, %v717_v58  ;;  %v2030_v44 = vld [vmem:[%s3261_s3 + $0x70] sm:$0xff] }
 0x49b   :  { %v714_v61 = vpop.xlane.xlu1 %713  ;;  %v729_v7 = vmul.f32 1.442695, %v723_v62  ;;  %v2031_v62 = vld [vmem:[%s3261_s3 + $0x78] sm:$0xff] }
 0x49c   :  { %v722_v1 = vsub.f32 %v706_v52, %v714_v61  ;;  %v711_v2 = vpop.xlane.xlu0 %710 }
 0x49d   :  { %v721_v3 = vsub.f32 %v705_v51, %v711_v2  ;;  %v2028_v51 = vld [vmem:[%s3261_s3 + $0x60] sm:$0xff] }
 0x49e   :  { %v727_v4 = vmul.f32 1.442695, %v722_v1 }
 0x49f   :  { %v725_v5 = vmul.f32 1.442695, %v721_v3  ;;  %v826_v6 = vpop.permute.xlu1 %825 }
 0x4a0   :  { %2421 = vpow2.f32 %v727_v4  ;;  %v720_v8 = vpop.xlane.xlu0 %719  ;;  %v836_v35 = vsel %vm243_vm1, %v826_v6, 0 }
 0x4a1   :  { %2423 = vpow2.f32 %v725_v5  ;;  %v724_v9 = vsub.f32 %v708_v56, %v720_v8 }
 0x4a2   :  { %2425 = vpow2.f32 %v729_v7 }
 0x4a3   :  { %v731_v10 = vmul.f32 1.442695, %v724_v9  ;;  %v828_v11 = vpop.permute.xlu1 %827 }
 0x4a4   :  { %v750_v12 = vpop.permute.xlu0 %749  ;;  %v839_v37 = vsel %vm243_vm1, %v828_v11, 0 }
 0x4a5   :  { %2427 = vpow2.f32 %v731_v10  ;;  %2225 = vmatprep.subr.bf16.mxu0 %v750_v12 }
 0x4a6   :  { %2226 = vmatpush3.bf16.msra.mxu0 %v750_v12 }
 0x4a7   :  { %2337 = vmatprep.subr.msk.bf16.mxu0 %vm243_vm1, %v826_v6  ;;  %v824_v33 = vpop.permute.xlu1 %823 }
 0x4a8   :  { %v822_v36 = vpop.permute.xlu0 %821 }
 0x4aa   :  { %v2780_v13 = vpop.eup %2421 }
 0x4ab   :  { %v2782_v14 = vpop.eup %2423  ;;  %v937_v15 = vpop.permute.xlu1 %936 }
 0x4ac   :  { %2239 = vmatprep.subr.bf16.mxu1 %v937_v15  ;;  %v745_v21 = vpack.c.bf16 %v2780_v13, %v2782_v14  ;;  %v2786_v22 = vpop.eup %2425 }
 0x4ad   :  { %2240 = vmatpush3.bf16.msra.mxu1 %v937_v15 }
 0x4ae   :  { %2227 = vmatprep.mubr.msk.bf16.mxu0 %vm103_vm0, %v745_v21 }
 0x4af   :  { %v2789_v23 = vpop.eup %2427 }
 0x4b0   :  { %v746_v24 = vpack.c.bf16 %v2789_v23, %v2786_v22 }
 0x4b2   :  { %2228 = vmatmul.mubr.msk.bf16.vlgmr.msra.gmra.mrb[24].mxu0 %vm103_vm0, %v746_v24 }
 0x4b3   :  { %2232 = vmatpush3.bf16.xpose.msra.mxu0 %v836_v35  ;;  %2235 = vmatprep.mubr.msk.bf16.mxu0 %vm243_vm1, %v822_v36 }
 0x4b4   :  { %2338 = vmatprep.subr.msk.bf16.mxu0 %vm243_vm1, %v828_v11 }
 0x4bb   :  { %2234 = vmatpush3.bf16.xpose.msra.mxu0 %v839_v37 }
 0x4c2   :  { %2236 = vmatmul.mubr.msk.bf16.vlgmr.msra.gmra.mrb[28].mxu0 %vm243_vm1, %v824_v33 }
 0x585   :  { %v2799_v38 = vpop.f32.mrb[24].mxu0 }
 0x586   :  { %3267 = vst [vmem:[#allocation4_spill] sm:$0xff] %v2799_v38  ;;  %v2801_v19 = vpop.f32.mrb[25].mxu0 }
 0x587   :  { %v2803_v41 = vpop.f32.mrb[26].mxu0 }
 0x588   :  { %3268 = vst [vmem:[#allocation5_spill] sm:$0xff] %v2803_v41  ;;  %v2805_v42 = vpop.f32.mrb[27].mxu0 }
 0x595   :  { %v2237_v43 = vpop.f32.mrb[28].mxu0 }
 0x596   :  { %v892_v45 = vmul.f32 0.25, %v2237_v43  ;;  %v875_v46 = vpop.f32.mrb[29].mxu0 }
 0x597   :  { %v890_v47 = vmul.f32 0.25, %v875_v46  ;;  %v2238_v48 = vpop.f32.mrb[30].mxu0 }
 0x598   :  { %v878_v52 = vpop.f32.mrb[31].mxu0  ;;  %v896_v53 = vadd.f32 %v2030_v44, %v892_v45  ;;  %v893_v56 = vmul.f32 0.25, %v2238_v48 }
 0x599   :  { %v891_v55 = vmul.f32 0.25, %v878_v52  ;;  %v894_v58 = vadd.f32 %v2028_v51, %v890_v47 }
 0x59a   :  { %v904_v57 = vsel %vm103_vm0, %v896_v53, -inf  ;;  %v897_v3 = vadd.f32 %v2031_v62, %v893_v56 }
 0x59b   :  { %905 = vmax.xlane.f32.xlu0 %v904_v57  ;;  %v895_v61 = vadd.f32 %v2029_v54, %v891_v55  ;;  %v898_v2 = vsel %vm103_vm0, %v894_v58, -inf }
 0x59c   :  { %v907_v4 = vsel %vm103_vm0, %v897_v3, -inf }
 0x59d   :  { %v901_v1 = vsel %vm103_vm0, %v895_v61, -inf }
 0x59e   :  { %902 = vmax.xlane.f32.xlu1 %v901_v1 }
 0x59f   :  { %899 = vmax.xlane.f32.xlu0 %v898_v2 }
 0x5a3   :  { %908 = vmax.xlane.f32.xlu0 %v907_v4 }
 0x5af   :  { %1032 = vrot.lane.b32.xlu1 %v2635_v40, %s2534_s18 }
 0x5b3   :  { %1034 = vrot.lane.b32.xlu1 %v2633_v39, %s2534_s18 }
 0x5b7   :  { %1143 = vrot.lane.b32.xlu1 %v2635_v40, %s2536_s19 }
 0x5b9   :  { %938 = vrot.lane.b32.xlu0 %v2629_v30, %s2537_s20 }
 0x628   :  { %v906_v5 = vpop.xlane.xlu0 %905 }
 0x629   :  { %v912_v7 = vsub.f32 %v896_v53, %v906_v5 }
 0x62b   :  { %v903_v6 = vpop.xlane.xlu1 %902  ;;  %v918_v15 = vmul.f32 1.442695, %v912_v7 }
 0x62c   :  { %v911_v8 = vsub.f32 %v895_v61, %v903_v6  ;;  %v900_v9 = vpop.xlane.xlu0 %899  ;;  %v2037_v6 = vld [vmem:[%s3261_s3 + $0x88] sm:$0xff] }
 0x62d   :  { %v910_v10 = vsub.f32 %v894_v58, %v900_v9  ;;  %v2038_v58 = vld [vmem:[%s3261_s3 + $0x90] sm:$0xff] }
 0x62e   :  { %v916_v11 = vmul.f32 1.442695, %v911_v8 }
 0x62f   :  { %v914_v12 = vmul.f32 1.442695, %v910_v10  ;;  %v1033_v33 = vpop.permute.xlu1 %1032 }
 0x630   :  { %2429 = vpow2.f32 %v916_v11  ;;  %v909_v21 = vpop.xlane.xlu0 %908  ;;  %v1043_v51 = vsel %vm243_vm1, %v1033_v33, 0 }
 0x631   :  { %2431 = vpow2.f32 %v914_v12  ;;  %v913_v24 = vsub.f32 %v897_v3, %v909_v21  ;;  %v2036_v3 = vld [vmem:[%s3261_s3 + $0x80] sm:$0xff]  ;;  %v2039_v12 = vld [vmem:[%s3261_s3 + $0x98] sm:$0xff] }
 0x632   :  { %2433 = vpow2.f32 %v918_v15 }
 0x633   :  { %v920_v35 = vmul.f32 1.442695, %v913_v24  ;;  %v1035_v36 = vpop.permute.xlu1 %1034 }
 0x634   :  { %v939_v37 = vpop.permute.xlu0 %938  ;;  %v1046_v52 = vsel %vm243_vm1, %v1035_v36, 0 }
 0x635   :  { %2435 = vpow2.f32 %v920_v35  ;;  %2241 = vmatprep.subr.bf16.mxu1 %v939_v37 }
 0x636   :  { %2242 = vmatpush3.bf16.msra.mxu1 %v939_v37 }
 0x637   :  { %2339 = vmatprep.subr.msk.bf16.mxu1 %vm243_vm1, %v1033_v33  ;;  %v1144_v30 = vpop.permute.xlu1 %1143 }
 0x638   :  { %2255 = vmatprep.subr.bf16.mxu0 %v1144_v30 }
 0x639   :  { %2256 = vmatpush3.bf16.msra.mxu0 %v1144_v30 }
 0x63a   :  { %v2832_v43 = vpop.eup %2429 }
 0x63b   :  { %v2834_v44 = vpop.eup %2431 }
 0x63c   :  { %v934_v45 = vpack.c.bf16 %v2832_v43, %v2834_v44  ;;  %v2838_v46 = vpop.eup %2433 }
 0x63e   :  { %2243 = vmatprep.mubr.msk.bf16.mxu1 %vm103_vm0, %v934_v45 }
 0x63f   :  { %v2841_v47 = vpop.eup %2435 }
 0x640   :  { %v935_v48 = vpack.c.bf16 %v2841_v47, %v2838_v46 }
 0x642   :  { %2244 = vmatmul.mubr.msk.bf16.vlgmr.msra.gmra.mrb[12].mxu1 %vm103_vm0, %v935_v48 }
 0x643   :  { %2248 = vmatpush3.bf16.xpose.msra.mxu1 %v1043_v51  ;;  %2251 = vmatprep.mubr.msk.bf16.mxu1 %vm243_vm1, %v2635_v40 }
 0x644   :  { %2340 = vmatprep.subr.msk.bf16.mxu1 %vm243_vm1, %v1035_v36 }
 0x64b   :  { %2250 = vmatpush3.bf16.xpose.msra.mxu1 %v1046_v52 }
 0x652   :  { %2252 = vmatmul.mubr.msk.bf16.vlgmr.msra.gmra.mrb[16].mxu1 %vm243_vm1, %v2633_v39 }
 0x715   :  { %v2853_v53 = vpop.f32.mrb[12].mxu1 }
 0x716   :  { %v2855_v54 = vpop.f32.mrb[13].mxu1 }
 0x717   :  { %v2857_v55 = vpop.f32.mrb[14].mxu1 }
 0x718   :  { %v2859_v56 = vpop.f32.mrb[15].mxu1 }
 0x725   :  { %v2253_v57 = vpop.f32.mrb[16].mxu1 }
 0x726   :  { %v1099_v61 = vmul.f32 0.25, %v2253_v57  ;;  %v1082_v62 = vpop.f32.mrb[17].mxu1 }
 0x727   :  { %v1097_v1 = vmul.f32 0.25, %v1082_v62  ;;  %v2254_v2 = vpop.f32.mrb[18].mxu1 }
 0x728   :  { %v1085_v4 = vpop.f32.mrb[19].mxu1  ;;  %v1103_v5 = vadd.f32 %v2038_v58, %v1099_v61  ;;  %v1100_v8 = vmul.f32 0.25, %v2254_v2 }
 0x729   :  { %v1098_v7 = vmul.f32 0.25, %v1085_v4  ;;  %v1101_v10 = vadd.f32 %v2036_v3, %v1097_v1 }
 0x72a   :  { %v1111_v9 = vsel %vm103_vm0, %v1103_v5, -inf  ;;  %v1104_v21 = vadd.f32 %v2039_v12, %v1100_v8 }
 0x72b   :  { %1112 = vmax.xlane.f32.xlu0 %v1111_v9  ;;  %v1102_v11 = vadd.f32 %v2037_v6, %v1098_v7  ;;  %v1105_v15 = vsel %vm103_vm0, %v1101_v10, -inf }
 0x72c   :  { %v1114_v24 = vsel %vm103_vm0, %v1104_v21, -inf }
 0x72d   :  { %v1108_v33 = vsel %vm103_vm0, %v1102_v11, -inf }
 0x72e   :  { %1109 = vmax.xlane.f32.xlu1 %v1108_v33 }
 0x72f   :  { %1106 = vmax.xlane.f32.xlu0 %v1105_v15 }
 0x733   :  { %1115 = vmax.xlane.f32.xlu0 %v1114_v24 }
 0x73f   :  { %1221 = vrot.lane.b32.xlu1 %v2635_v40, %s2533_s0 }
 0x743   :  { %1223 = vrot.lane.b32.xlu1 %v2633_v39, %s2533_s0 }
 0x747   :  { %1219 = vrot.lane.b32.xlu1 %v2633_v39, %s2535_s2 }
 0x749   :  { %1145 = vrot.lane.b32.xlu0 %v2633_v39, %s2536_s19 }
 0x74b   :  { %1332 = vrot.lane.b32.xlu1 %v2635_v40, %s2537_s20 }
 0x74d   :  { %1217 = vrot.lane.b32.xlu0 %v2635_v40, %s2535_s2 }
 0x7b8   :  { %v1113_v35 = vpop.xlane.xlu0 %1112 }
 0x7b9   :  { %v1119_v37 = vsub.f32 %v1103_v5, %v1113_v35 }
 0x7bb   :  { %v1110_v36 = vpop.xlane.xlu1 %1109  ;;  %v1125_v58 = vmul.f32 1.442695, %v1119_v37  ;;  %v2046_v37 = vld [vmem:[%s3261_s3 + $0xb0] sm:$0xff] }
 0x7bc   :  { %v1118_v30 = vsub.f32 %v1102_v11, %v1110_v36  ;;  %v1107_v45 = vpop.xlane.xlu0 %1106 }
 0x7bd   :  { %v1117_v48 = vsub.f32 %v1101_v10, %v1107_v45 }
 0x7be   :  { %v1123_v51 = vmul.f32 1.442695, %v1118_v30 }
 0x7bf   :  { %v1121_v52 = vmul.f32 1.442695, %v1117_v48  ;;  %v1222_v57 = vpop.permute.xlu1 %1221 }
 0x7c0   :  { %2437 = vpow2.f32 %v1123_v51  ;;  %v1116_v61 = vpop.xlane.xlu0 %1115  ;;  %v1232_v11 = vsel %vm243_vm1, %v1222_v57, 0 }
 0x7c1   :  { %2439 = vpow2.f32 %v1121_v52  ;;  %v1120_v62 = vsub.f32 %v1104_v21, %v1116_v61  ;;  %v2044_v52 = vld [vmem:[%s3261_s3 + $0xa0] sm:$0xff]  ;;  %v2045_v61 = vld [vmem:[%s3261_s3 + $0xa8] sm:$0xff] }
 0x7c2   :  { %2441 = vpow2.f32 %v1125_v58 }
 0x7c3   :  { %v1127_v1 = vmul.f32 1.442695, %v1120_v62  ;;  %v1224_v2 = vpop.permute.xlu1 %1223 }
 0x7c4   :  { %v1146_v3 = vpop.permute.xlu0 %1145  ;;  %v1235_v33 = vsel %vm243_vm1, %v1224_v2, 0 }
 0x7c5   :  { %2443 = vpow2.f32 %v1127_v1  ;;  %2257 = vmatprep.subr.bf16.mxu0 %v1146_v3 }
 0x7c6   :  { %2258 = vmatpush3.bf16.msra.mxu0 %v1146_v3 }
 0x7c7   :  { %2341 = vmatprep.subr.msk.bf16.mxu0 %vm243_vm1, %v1222_v57  ;;  %v1220_v40 = vpop.permute.xlu1 %1219 }
 0x7c8   :  { %v1218_v12 = vpop.permute.xlu0 %1217 }
 0x7ca   :  { %v2890_v4 = vpop.eup %2437 }
 0x7cb   :  { %v2892_v5 = vpop.eup %2439  ;;  %v1333_v6 = vpop.permute.xlu1 %1332 }
 0x7cc   :  { %2271 = vmatprep.subr.bf16.mxu1 %v1333_v6  ;;  %v1141_v7 = vpack.c.bf16 %v2890_v4, %v2892_v5  ;;  %v2896_v8 = vpop.eup %2441 }
 0x7cd   :  { %2272 = vmatpush3.bf16.msra.mxu1 %v1333_v6  ;;  %v2047_v6 = vld [vmem:[%s3261_s3 + $0xb8] sm:$0xff] }
 0x7ce   :  { %2259 = vmatprep.mubr.msk.bf16.mxu0 %vm103_vm0, %v1141_v7 }
 0x7cf   :  { %v2899_v9 = vpop.eup %2443 }
 0x7d0   :  { %v1142_v10 = vpack.c.bf16 %v2899_v9, %v2896_v8 }
 0x7d2   :  { %2260 = vmatmul.mubr.msk.bf16.vlgmr.msra.gmra.mrb[32].mxu0 %vm103_vm0, %v1142_v10 }
 0x7d3   :  { %2264 = vmatpush3.bf16.xpose.msra.mxu0 %v1232_v11  ;;  %2267 = vmatprep.mubr.msk.bf16.mxu0 %vm243_vm1, %v1218_v12 }
 0x7d4   :  { %2342 = vmatprep.subr.msk.bf16.mxu0 %vm243_vm1, %v1224_v2 }
 0x7db   :  { %2266 = vmatpush3.bf16.xpose.msra.mxu0 %v1235_v33 }
 0x7e2   :  { %2268 = vmatmul.mubr.msk.bf16.vlgmr.msra.gmra.mrb[36].mxu0 %vm243_vm1, %v1220_v40 }
 0x8a5   :  { %v2909_v15 = vpop.f32.mrb[32].mxu0 }
 0x8a6   :  { %3269 = vst [vmem:[#allocation6_spill] sm:$0xff] %v2909_v15  ;;  %v2911_v21 = vpop.f32.mrb[33].mxu0 }
 0x8a7   :  { %3270 = vst [vmem:[#allocation7_spill] sm:$0xff] %v2911_v21  ;;  %v2913_v24 = vpop.f32.mrb[34].mxu0 }
 0x8a8   :  { %3271 = vst [vmem:[#allocation8_spill] sm:$0xff] %v2913_v24  ;;  %v2915_v35 = vpop.f32.mrb[35].mxu0 }
 0x8a9   :  { %3272 = vst [vmem:[#allocation9_spill] sm:$0xff] %v2915_v35 }
 0x8b5   :  { %v2269_v36 = vpop.f32.mrb[36].mxu0 }
 0x8b6   :  { %v1288_v30 = vmul.f32 0.25, %v2269_v36  ;;  %v1271_v45 = vpop.f32.mrb[37].mxu0 }
 0x8b7   :  { %v1286_v48 = vmul.f32 0.25, %v1271_v45  ;;  %v2270_v51 = vpop.f32.mrb[38].mxu0 }
 0x8b8   :  { %v1274_v57 = vpop.f32.mrb[39].mxu0  ;;  %v1292_v58 = vadd.f32 %v2046_v37, %v1288_v30  ;;  %v1289_v1 = vmul.f32 0.25, %v2270_v51 }
 0x8b9   :  { %v1287_v62 = vmul.f32 0.25, %v1274_v57  ;;  %v1290_v3 = vadd.f32 %v2044_v52, %v1286_v48 }
 0x8ba   :  { %v1300_v2 = vsel %vm103_vm0, %v1292_v58, -inf  ;;  %v1293_v11 = vadd.f32 %v2047_v6, %v1289_v1 }
 0x8bb   :  { %1301 = vmax.xlane.f32.xlu0 %v1300_v2  ;;  %v1291_v40 = vadd.f32 %v2045_v61, %v1287_v62  ;;  %v1294_v10 = vsel %vm103_vm0, %v1290_v3, -inf }
 0x8bc   :  { %v1303_v12 = vsel %vm103_vm0, %v1293_v11, -inf }
 0x8bd   :  { %v1297_v7 = vsel %vm103_vm0, %v1291_v40, -inf }
 0x8be   :  { %1298 = vmax.xlane.f32.xlu1 %v1297_v7 }
 0x8bf   :  { %1295 = vmax.xlane.f32.xlu0 %v1294_v10 }
 0x8c3   :  { %1304 = vmax.xlane.f32.xlu0 %v1303_v12 }
 0x8cf   :  { %1428 = vrot.lane.b32.xlu1 %v2639_v50, %s2534_s18 }
 0x8d3   :  { %1430 = vrot.lane.b32.xlu1 %v2637_v49, %s2534_s18 }
 0x8d7   :  { %1539 = vrot.lane.b32.xlu1 %v2639_v50, %s2536_s19 }
 0x8d9   :  { %1334 = vrot.lane.b32.xlu0 %v2633_v39, %s2537_s20 }
 0x948   :  { %v1302_v33 = vpop.xlane.xlu0 %1301 }
 0x949   :  { %v1308_v37 = vsub.f32 %v1292_v58, %v1302_v33 }
 0x94b   :  { %v1299_v36 = vpop.xlane.xlu1 %1298  ;;  %v1314_v61 = vmul.f32 1.442695, %v1308_v37 }
 0x94c   :  { %v1307_v30 = vsub.f32 %v1291_v40, %v1299_v36  ;;  %v1296_v45 = vpop.xlane.xlu0 %1295 }
 0x94d   :  { %v1306_v48 = vsub.f32 %v1290_v3, %v1296_v45 }
 0x94e   :  { %v1312_v51 = vmul.f32 1.442695, %v1307_v30 }
 0x94f   :  { %v1310_v52 = vmul.f32 1.442695, %v1306_v48  ;;  %v1429_v57 = vpop.permute.xlu1 %1428 }
 0x950   :  { %2445 = vpow2.f32 %v1312_v51  ;;  %v1305_v62 = vpop.xlane.xlu0 %1304  ;;  %v1439_v33 = vsel %vm243_vm1, %v1429_v57, 0 }
 0x951   :  { %2447 = vpow2.f32 %v1310_v52  ;;  %v1309_v1 = vsub.f32 %v1293_v11, %v1305_v62  ;;  %v2054_v52 = vld [vmem:[%s3261_s3 + $0xd0] sm:$0xff] }
 0x952   :  { %2449 = vpow2.f32 %v1314_v61 }
 0x953   :  { %v1316_v2 = vmul.f32 1.442695, %v1309_v1  ;;  %v1431_v6 = vpop.permute.xlu1 %1430 }
 0x954   :  { %v1335_v7 = vpop.permute.xlu0 %1334  ;;  %v1442_v36 = vsel %vm243_vm1, %v1431_v6, 0 }
 0x955   :  { %2451 = vpow2.f32 %v1316_v2  ;;  %2273 = vmatprep.subr.bf16.mxu1 %v1335_v7  ;;  %v2052_v2 = vld [vmem:[%s3261_s3 + $0xc0] sm:$0xff] }
 0x956   :  { %2274 = vmatpush3.bf16.msra.mxu1 %v1335_v7 }
 0x957   :  { %2343 = vmatprep.subr.msk.bf16.mxu1 %vm243_vm1, %v1429_v57  ;;  %v1540_v39 = vpop.permute.xlu1 %1539 }
 0x958   :  { %2287 = vmatprep.subr.bf16.mxu0 %v1540_v39 }
 0x959   :  { %2288 = vmatpush3.bf16.msra.mxu0 %v1540_v39  ;;  %v2053_v39 = vld [vmem:[%s3261_s3 + $0xc8] sm:$0xff] }
 0x95a   :  { %v2942_v58 = vpop.eup %2445 }
 0x95b   :  { %v2944_v3 = vpop.eup %2447 }
 0x95c   :  { %v1330_v40 = vpack.c.bf16 %v2942_v58, %v2944_v3  ;;  %v2948_v10 = vpop.eup %2449 }
 0x95e   :  { %2275 = vmatprep.mubr.msk.bf16.mxu1 %vm103_vm0, %v1330_v40 }
 0x95f   :  { %v2951_v11 = vpop.eup %2451 }
 0x960   :  { %v1331_v12 = vpack.c.bf16 %v2951_v11, %v2948_v10 }
 0x962   :  { %2276 = vmatmul.mubr.msk.bf16.vlgmr.msra.gmra.mrb[20].mxu1 %vm103_vm0, %v1331_v12 }
 0x963   :  { %2280 = vmatpush3.bf16.xpose.msra.mxu1 %v1439_v33  ;;  %2283 = vmatprep.mubr.msk.bf16.mxu1 %vm243_vm1, %v2639_v50 }
 0x964   :  { %2344 = vmatprep.subr.msk.bf16.mxu1 %vm243_vm1, %v1431_v6 }
 0x96b   :  { %2282 = vmatpush3.bf16.xpose.msra.mxu1 %v1442_v36 }
 0x972   :  { %2284 = vmatmul.mubr.msk.bf16.vlgmr.msra.gmra.mrb[24].mxu1 %vm243_vm1, %v2637_v49 }
 0xa35   :  { %v2963_v37 = vpop.f32.mrb[20].mxu1 }
 0xa36   :  { %v2965_v30 = vpop.f32.mrb[21].mxu1 }
 0xa37   :  { %v2967_v45 = vpop.f32.mrb[22].mxu1 }
 0xa38   :  { %v2969_v48 = vpop.f32.mrb[23].mxu1 }
 0xa45   :  { %v2285_v51 = vpop.f32.mrb[24].mxu1 }
 0xa46   :  { %v1495_v57 = vmul.f32 0.25, %v2285_v51  ;;  %v1478_v61 = vpop.f32.mrb[25].mxu1 }
 0xa47   :  { %v1493_v62 = vmul.f32 0.25, %v1478_v61  ;;  %v2286_v1 = vpop.f32.mrb[26].mxu1  ;;  %v2055_v61 = vld [vmem:[%s3261_s3 + $0xd8] sm:$0xff] }
 0xa48   :  { %v1481_v6 = vpop.f32.mrb[27].mxu1  ;;  %v1499_v7 = vadd.f32 %v2054_v52, %v1495_v57  ;;  %v1496_v12 = vmul.f32 0.25, %v2286_v1 }
 0xa49   :  { %v1494_v40 = vmul.f32 0.25, %v1481_v6  ;;  %v1497_v36 = vadd.f32 %v2052_v2, %v1493_v62 }
 0xa4a   :  { %v1507_v33 = vsel %vm103_vm0, %v1499_v7, -inf  ;;  %v1500_v57 = vadd.f32 %v2055_v61, %v1496_v12 }
 0xa4b   :  { %1508 = vmax.xlane.f32.xlu0 %v1507_v33  ;;  %v1498_v51 = vadd.f32 %v2053_v39, %v1494_v40  ;;  %v1501_v52 = vsel %vm103_vm0, %v1497_v36, -inf }
 0xa4c   :  { %v1510_v15 = vsel %vm103_vm0, %v1500_v57, -inf }
 0xa4d   :  { %v1504_v24 = vsel %vm103_vm0, %v1498_v51, -inf }
 0xa4e   :  { %1505 = vmax.xlane.f32.xlu1 %v1504_v24 }
 0xa4f   :  { %1502 = vmax.xlane.f32.xlu0 %v1501_v52 }
 0xa53   :  { %1511 = vmax.xlane.f32.xlu0 %v1510_v15 }
 0xa5f   :  { %1617 = vrot.lane.b32.xlu1 %v2639_v50, %s2533_s0 }
 0xa63   :  { %1619 = vrot.lane.b32.xlu1 %v2637_v49, %s2533_s0 }
 0xa67   :  { %1615 = vrot.lane.b32.xlu1 %v2637_v49, %s2535_s2 }
 0xa69   :  { %1541 = vrot.lane.b32.xlu0 %v2637_v49, %s2536_s19 }
 0xa6d   :  { %1613 = vrot.lane.b32.xlu0 %v2639_v50, %s2535_s2 }
 0xad8   :  { %v1509_v24 = vpop.xlane.xlu0 %1508 }
 0xad9   :  { %v1515_v1 = vsub.f32 %v1499_v7, %v1509_v24 }
 0xadb   :  { %v1506_v62 = vpop.xlane.xlu1 %1505  ;;  %v1521_v12 = vmul.f32 1.442695, %v1515_v1 }
 0xadc   :  { %v1514_v2 = vsub.f32 %v1498_v51, %v1506_v62  ;;  %v1503_v15 = vpop.xlane.xlu0 %1502 }
 0xadd   :  { %v1513_v6 = vsub.f32 %v1497_v36, %v1503_v15 }
 0xade   :  { %v1519_v39 = vmul.f32 1.442695, %v1514_v2 }
 0xadf   :  { %v1517_v40 = vmul.f32 1.442695, %v1513_v6  ;;  %v1618_v35 = vpop.permute.xlu1 %1617 }
 0xae0   :  { %2453 = vpow2.f32 %v1519_v39  ;;  %v1512_v33 = vpop.xlane.xlu0 %1511 }
 0xae1   :  { %2455 = vpow2.f32 %v1517_v40  ;;  %v1516_v61 = vsub.f32 %v1500_v57, %v1512_v33 }
 0xae2   :  { %2457 = vpow2.f32 %v1521_v12 }
 0xae3   :  { %v1523_v52 = vmul.f32 1.442695, %v1516_v61  ;;  %v1620_v2 = vpop.permute.xlu1 %1619  ;;  %v2062_v61 = vld [vmem:[%s3261_s3 + $0xf0] sm:$0xff] }
 0xae4   :  { %v1542_v21 = vpop.permute.xlu0 %1541  ;;  %v1631_v15 = vsel %vm243_vm1, %v1620_v2, 0 }
 0xae5   :  { %2459 = vpow2.f32 %v1523_v52  ;;  %2289 = vmatprep.subr.bf16.mxu0 %v1542_v21 }
 0xae6   :  { %2290 = vmatpush3.bf16.msra.mxu0 %v1542_v21  ;;  %v1628_v21 = vsel %vm243_vm1, %v1618_v35, 0 }
 0xae7   :  { %2345 = vmatprep.subr.msk.bf16.mxu0 %vm243_vm1, %v1618_v35  ;;  %v1616_v6 = vpop.permute.xlu1 %1615 }
 0xae8   :  { %v1614_v1 = vpop.permute.xlu0 %1613 }
 0xaea   :  { %v2998_v7 = vpop.eup %2453 }
 0xaeb   :  { %v3000_v51 = vpop.eup %2455 }
 0xaec   :  { %v1537_v36 = vpack.c.bf16 %v2998_v7, %v3000_v51  ;;  %v3004_v24 = vpop.eup %2457 }
 0xaee   :  { %2291 = vmatprep.mubr.msk.bf16.mxu0 %vm103_vm0, %v1537_v36 }
 0xaef   :  { %v3007_v57 = vpop.eup %2459 }
 0xaf0   :  { %v1538_v62 = vpack.c.bf16 %v3007_v57, %v3004_v24 }
 0xaf2   :  { %2292 = vmatmul.mubr.msk.bf16.vlgmr.msra.gmra.mrb[40].mxu0 %vm103_vm0, %v1538_v62 }
 0xaf3   :  { %2296 = vmatpush3.bf16.xpose.msra.mxu0 %v1628_v21  ;;  %2299 = vmatprep.mubr.msk.bf16.mxu0 %vm243_vm1, %v1614_v1  ;;  %v2060_v1 = vld [vmem:[%s3261_s3 + $0xe0] sm:$0xff] }
 0xaf4   :  { %2346 = vmatprep.subr.msk.bf16.mxu0 %vm243_vm1, %v1620_v2  ;;  %v2061_v2 = vld [vmem:[%s3261_s3 + $0xe8] sm:$0xff] }
 0xafb   :  { %2298 = vmatpush3.bf16.xpose.msra.mxu0 %v1631_v15 }
 0xb02   :  { %2300 = vmatmul.mubr.msk.bf16.vlgmr.msra.gmra.mrb[44].mxu0 %vm243_vm1, %v1616_v6 }
 0xbc5   :  { %v3017_v39 = vpop.f32.mrb[40].mxu0 }
 0xbc6   :  { %3273 = vst [vmem:[#allocation10_spill] sm:$0xff] %v3017_v39  ;;  %v3019_v40 = vpop.f32.mrb[41].mxu0 }
 0xbc7   :  { %v3021_v35 = vpop.f32.mrb[42].mxu0 }
 0xbc8   :  { %3274 = vst [vmem:[#allocation11_spill] sm:$0xff] %v3021_v35  ;;  %v3023_v12 = vpop.f32.mrb[43].mxu0 }
 0xbc9   :  { %3275 = vst [vmem:[#allocation12_spill] sm:$0xff] %v3023_v12 }
 0xbd5   :  { %v2301_v33 = vpop.f32.mrb[44].mxu0 }
 0xbd6   :  { %v1684_v52 = vmul.f32 0.25, %v2301_v33  ;;  %v1667_v36 = vpop.f32.mrb[45].mxu0  ;;  %v2063_v33 = vld [vmem:[%s3261_s3 + $0xf8] sm:$0xff] }
 0xbd7   :  { %v1682_v62 = vmul.f32 0.25, %v1667_v36  ;;  %v2302_v21 = vpop.f32.mrb[46].mxu0 }
 0xbd8   :  { %v1670_v15 = vpop.f32.mrb[47].mxu0  ;;  %v1688_v6 = vadd.f32 %v2062_v61, %v1684_v52  ;;  %v1685_v12 = vmul.f32 0.25, %v2302_v21 }
 0xbd9   :  { %v1683_v35 = vmul.f32 0.25, %v1670_v15  ;;  %v1686_v25 = vadd.f32 %v2060_v1, %v1682_v62 }
 0xbda   :  { %v1696_v27 = vsel %vm103_vm0, %v1688_v6, -inf  ;;  %v1689_v39 = vadd.f32 %v2063_v33, %v1685_v12  ;;  %v922_v12 = vsel %vm103_vm0, %v2834_v44, 0.0  ;;  %v1321_v44 = vsel %vm103_vm0, %v2942_v58, 0.0 }
 0xbdb   :  { %v1687_v41 = vadd.f32 %v2061_v2, %v1683_v35  ;;  %1697 = vmax.xlane.f32.xlu0 %v1696_v27  ;;  %v1690_v38 = vsel %vm103_vm0, %v1686_v25, -inf  ;;  %v526_v27 = vsel %vm103_vm0, %v2714_v16, 0.0  ;;  %v532_v35 = vsel %vm103_vm0, %v2720_v20, 0.0 }
 0xbdc   :  { %v1699_v61 = vsel %vm103_vm0, %v1689_v39, -inf  ;;  %v925_v16 = vsel %vm103_vm0, %v2832_v43, 0.0  ;;  %v931_v20 = vsel %vm103_vm0, %v2841_v47, 0.0  ;;  %v337_v43 = vsel %vm103_vm0, %v2700_v60, 0.0 }
 0xbdd   :  { %v1693_v36 = vsel %vm103_vm0, %v1687_v41, -inf }
 0xbde   :  { %1694 = vmax.xlane.f32.xlu1 %v1693_v36 }
 0xbdf   :  { %1691 = vmax.xlane.f32.xlu0 %v1690_v38  ;;  %v529_v38 = vsel %vm103_vm0, %v2718_v18, 0.0  ;;  %v1318_v18 = vsel %vm103_vm0, %v2944_v3, 0.0 }
 0xbe3   :  { %1700 = vmax.xlane.f32.xlu0 %v1699_v61 }
 0xbef   :  { %1728 = vrot.lane.b32.xlu1 %v2639_v50, %s2537_s20  ;;  %v535_v50 = vsel %vm103_vm0, %v2716_v17, 0.0  ;;  %v1324_v17 = vsel %vm103_vm0, %v2948_v10, 0.0 }
 0xbf9   :  { %1730 = vrot.lane.b32.xlu0 %v2637_v49, %s2537_s20  ;;  %v928_v49 = vsel %vm103_vm0, %v2838_v46, 0.0  ;;  %v1327_v46 = vsel %vm103_vm0, %v2951_v11, 0.0 }
 0xc13   :  { %527 = vadd.xlane.f32.xlu1 %v526_v27 }
 0xc17   :  { %533 = vadd.xlane.f32.xlu1 %v532_v35 }
 0xc18   :  { %530 = vadd.xlane.f32.xlu0 %v529_v38 }
 0xc1b   :  { %923 = vadd.xlane.f32.xlu1 %v922_v12  ;;  %v343_v12 = vsel %vm103_vm0, %v2704_v63, 0.0  ;;  %v1129_v63 = vsel %vm103_vm0, %v2892_v5, 0.0  ;;  %v1132_v5 = vsel %vm103_vm0, %v2890_v4, 0.0 }
 0xc1c   :  { %536 = vadd.xlane.f32.xlu0 %v535_v50 }
 0xc1f   :  { %929 = vadd.xlane.f32.xlu1 %v928_v49  ;;  %v733_v49 = vsel %vm103_vm0, %v2782_v14, 0.0  ;;  %v1135_v14 = vsel %vm103_vm0, %v2896_v8, 0.0 }
 0xc20   :  { %926 = vadd.xlane.f32.xlu0 %v925_v16 }
 0xc23   :  { %1319 = vadd.xlane.f32.xlu1 %v1318_v18  ;;  %v739_v18 = vsel %vm103_vm0, %v2786_v22, 0.0  ;;  %v742_v22 = vsel %vm103_vm0, %v2789_v23, 0.0 }
 0xc24   :  { %932 = vadd.xlane.f32.xlu0 %v931_v20  ;;  %v340_v20 = vsel %vm103_vm0, %v2698_v59, 0.0  ;;  %v1525_v59 = vsel %vm103_vm0, %v3000_v51, 0.0  ;;  %v1528_v51 = vsel %vm103_vm0, %v2998_v7, 0.0 }
 0xc27   :  { %1325 = vadd.xlane.f32.xlu1 %v1324_v17  ;;  %v346_v17 = vsel %vm103_vm0, %v2707_v0, 0.0  ;;  %v1531_v0 = vsel %vm103_vm0, %v3004_v24, 0.0 }
 0xc28   :  { %1322 = vadd.xlane.f32.xlu0 %v1321_v44  ;;  %v736_v44 = vsel %vm103_vm0, %v2780_v13, 0.0  ;;  %v1138_v13 = vsel %vm103_vm0, %v2899_v9, 0.0 }
 0xc2b   :  { %338 = vadd.xlane.f32.xlu1 %v337_v43  ;;  %v1534_v43 = vsel %vm103_vm0, %v3007_v57, 0.0 }
 0xc2c   :  { %1328 = vadd.xlane.f32.xlu0 %v1327_v46 }
 0xc68   :  { %v1698_v3 = vpop.xlane.xlu0 %1697 }
 0xc69   :  { %v1704_v52 = vsub.f32 %v1688_v6, %v1698_v3 }
 0xc6b   :  { %v1710_v47 = vmul.f32 1.442695, %v1704_v52  ;;  %v1695_v62 = vpop.xlane.xlu1 %1694 }
 0xc6c   :  { %v1703_v21 = vsub.f32 %v1687_v41, %v1695_v62  ;;  %v1692_v1 = vpop.xlane.xlu0 %1691 }
 0xc6d   :  { %2461 = vpow2.f32 %v1710_v47  ;;  %v1702_v10 = vsub.f32 %v1686_v25, %v1692_v1 }
 0xc6e   :  { %v1708_v2 = vmul.f32 1.442695, %v1703_v21 }
 0xc6f   :  { %v1706_v15 = vmul.f32 1.442695, %v1702_v10  ;;  %v1729_v58 = vpop.permute.xlu1 %1728 }
 0xc70   :  { %2463 = vpow2.f32 %v1708_v2  ;;  %v1701_v33 = vpop.xlane.xlu0 %1700  ;;  %2303 = vmatprep.subr.bf16.mxu1 %v1729_v58  ;;  %v2403_v2 = vld [vmem:[%s3262_s4] sm:$0xff]  }
 0xc71   :  { %2465 = vpow2.f32 %v1706_v15  ;;  %v1705_v60 = vsub.f32 %v1689_v39, %v1701_v33  ;;  %2304 = vmatpush3.bf16.msra.mxu1 %v1729_v58 }
 0xc73   :  { %v1712_v36 = vmul.f32 1.442695, %v1705_v60 }
 0xc74   :  { %v1731_v11 = vpop.permute.xlu0 %1730 }
 0xc75   :  { %2467 = vpow2.f32 %v1712_v36  ;;  %2305 = vmatprep.subr.bf16.mxu1 %v1731_v11 }
 0xc76   :  { %2306 = vmatpush3.bf16.msra.mxu1 %v1731_v11  ;;  %v2404_v11 = vld [vmem:[%s3262_s4 + $0x8] sm:$0xff]  }
 0xc77   :  { %v2462_v6 = vpop.eup %2461  ;;  %2311 = vmatprep.subr.bf16.mxu1 %v2403_v2 }
 0xc78   :  { %v1720_v41 = vsel %vm103_vm0, %v2462_v6, 0.0 }
 0xc79   :  { %1721 = vadd.xlane.f32.xlu1 %v1720_v41 }
 0xc7a   :  { %v2464_v61 = vpop.eup %2463 }
 0xc7b   :  { %v2466_v25 = vpop.eup %2465  ;;  %v1717_v16 = vsel %vm103_vm0, %v2464_v61, 0.0 }
 0xc7c   :  { %v1714_v27 = vsel %vm103_vm0, %v2466_v25, 0.0  ;;  %v1726_v35 = vpack.c.bf16 %v2464_v61, %v2466_v25 }
 0xc7d   :  { %1715 = vadd.xlane.f32.xlu1 %v1714_v27 }
 0xc7e   :  { %2307 = vmatprep.mubr.msk.bf16.mxu1 %vm103_vm0, %v1726_v35 }
 0xc7f   :  { %v2468_v38 = vpop.eup %2467 }
 0xc80   :  { %v1723_v39 = vsel %vm103_vm0, %v2468_v38, 0.0  ;;  %v1727_v50 = vpack.c.bf16 %v2468_v38, %v2462_v6 }
 0xc81   :  { %1724 = vadd.xlane.f32.xlu0 %v1723_v39  ;;  %344 = vadd.xlane.f32.xlu1 %v343_v12 }
 0xc82   :  { %2308 = vmatmul.mubr.msk.bf16.vlgmr.msra.gmra.mrb[28].mxu1 %vm103_vm0, %v1727_v50 }
 0xc83   :  { %2312 = vmatpush3.bf16.msra.mxu1 %v2403_v2 }
 0xc84   :  { %2313 = vmatprep.subr.bf16.mxu1 %v2404_v11 }
 0xc85   :  { %734 = vadd.xlane.f32.xlu1 %v733_v49  ;;  %1718 = vadd.xlane.f32.xlu0 %v1717_v16 }
 0xc87   :  { %2314 = vmatpush3.bf16.msra.mxu1 %v2404_v11 }
 0xc89   :  { %740 = vadd.xlane.f32.xlu1 %v739_v18  ;;  %341 = vadd.xlane.f32.xlu0 %v340_v20 }
 0xc8d   :  { %1130 = vadd.xlane.f32.xlu1 %v1129_v63  ;;  %347 = vadd.xlane.f32.xlu0 %v346_v17 }
 0xc91   :  { %1136 = vadd.xlane.f32.xlu1 %v1135_v14  ;;  %737 = vadd.xlane.f32.xlu0 %v736_v44 }
 0xc95   :  { %1526 = vadd.xlane.f32.xlu1 %v1525_v59  ;;  %743 = vadd.xlane.f32.xlu0 %v742_v22 }
 0xc99   :  { %1532 = vadd.xlane.f32.xlu1 %v1531_v0  ;;  %1133 = vadd.xlane.f32.xlu0 %v1132_v5 }
 0xc9d   :  { %1139 = vadd.xlane.f32.xlu0 %v1138_v13 }
 0xca0   :  { %v528_v8 = vpop.xlane.xlu1 %527 }
 0xca1   :  { %1529 = vadd.xlane.f32.xlu0 %v1528_v51  ;;  %2469 = vrcp.f32 %v528_v8 }
 0xca4   :  { %v534_v23 = vpop.xlane.xlu1 %533 }
 0xca5   :  { %v531_v24 = vpop.xlane.xlu0 %530  ;;  %1535 = vadd.xlane.f32.xlu0 %v1534_v43 }
 0xca6   :  { %2471 = vrcp.f32 %v531_v24 }
 0xca7   :  { %2473 = vrcp.f32 %v534_v23 }
 0xca8   :  { %v924_v4 = vpop.xlane.xlu1 %923 }
 0xca9   :  { %v537_v46 = vpop.xlane.xlu0 %536 }
 0xcaa   :  { %2475 = vrcp.f32 %v537_v46 }
 0xcab   :  { %2477 = vrcp.f32 %v924_v4  ;;  %v2470_v52 = vpop.eup %2469 }
 0xcac   :  { %v930_v9 = vpop.xlane.xlu1 %929  ;;  %v605_v21 = vmul.f32 %v2470_v52, %v2745_v31 }
 0xcad   :  { %v927_v3 = vpop.xlane.xlu0 %926 }
 0xcae   :  { %2479 = vrcp.f32 %v927_v3 }
 0xcaf   :  { %2481 = vrcp.f32 %v930_v9 }
 0xcb0   :  { %v2472_v47 = vpop.eup %2471  ;;  %v1320_v7 = vpop.xlane.xlu1 %1319 }
 0xcb1   :  { %v933_v62 = vpop.xlane.xlu0 %932  ;;  %v606_v57 = vmul.f32 %v2472_v47, %v2749_v34  ;;  %v2474_v1 = vpop.eup %2473 }
 0xcb2   :  { %2483 = vrcp.f32 %v933_v62  ;;  %v607_v60 = vmul.f32 %v2474_v1, %v2743_v29 }
 0xcb3   :  { %v2353_v10 = vpack.i.bf16 %v606_v57, %v605_v21  ;;  %2485 = vrcp.f32 %v1320_v7 }
 0xcb4   :  { %v2476_v15 = vpop.eup %2475  ;;  %v1326_v58 = vpop.xlane.xlu1 %1325 }
 0xcb5   :  { %v1323_v33 = vpop.xlane.xlu0 %1322  ;;  %2354 = vrot.lane.b32.xlu1 %v2353_v10, %s2538_s12  ;;  %v608_v31 = vmul.f32 %v2476_v15, %v2747_v32  ;;  %v2478_v34 = vpop.eup %2477 }
 0xcb6   :  { %2487 = vrcp.f32 %v1323_v33  ;;  %v1001_v61 = vmul.f32 %v2478_v34, %v2855_v54 }
 0xcb7   :  { %v2358_v36 = vpack.i.bf16 %v608_v31, %v607_v60  ;;  %2489 = vrcp.f32 %v1326_v58 }
 0xcb8   :  { %v2480_v6 = vpop.eup %2479 }
 0xcb9   :  { %v1329_v41 = vpop.xlane.xlu0 %1328  ;;  %v1002_v25 = vmul.f32 %v2480_v6, %v2859_v56  ;;  %v2482_v29 = vpop.eup %2481 }
 0xcba   :  { %2491 = vrcp.f32 %v1329_v41  ;;  %v1003_v35 = vmul.f32 %v2482_v29, %v2853_v53 }
 0xcbb   :  { %2359 = vrot.lane.b32.xlu0 %v2358_v36, %s2538_s12  ;;  %v2363_v32 = vpack.i.bf16 %v1002_v25, %v1001_v61 }
 0xcbc   :  { %v2484_v27 = vpop.eup %2483 }
 0xcbd   :  { %2364 = vrot.lane.b32.xlu1 %v2363_v32, %s2538_s12  ;;  %v1004_v38 = vmul.f32 %v2484_v27, %v2857_v55  ;;  %v2486_v39 = vpop.eup %2485  ;;  %v339_v55 = vpop.xlane.xlu1 %338  ;;  %v3276_v32 = vld [vmem:[#allocation10_spill] sm:$0xff] }
 0xcbe   :  { %v1397_v54 = vmul.f32 %v2486_v39, %v2965_v30  ;;  %2493 = vrcp.f32 %v339_v55 }
 0xcbf   :  { %v2368_v12 = vpack.i.bf16 %v1004_v38, %v1003_v35  ;;  %v3278_v38 = vld [vmem:[#allocation5_spill] sm:$0xff] }
 0xcc0   :  { %v2488_v50 = vpop.eup %2487 }
 0xcc1   :  { %2369 = vrot.lane.b32.xlu1 %v2368_v12, %s2538_s12  ;;  %v1398_v56 = vmul.f32 %v2488_v50, %v2969_v48  ;;  %v2490_v49 = vpop.eup %2489 }
 0xcc2   :  { %v1399_v20 = vmul.f32 %v2490_v49, %v2963_v37 }
 0xcc3   :  { %v2373_v16 = vpack.i.bf16 %v1398_v56, %v1397_v54 }
 0xcc4   :  { %v2492_v18 = vpop.eup %2491 }
 0xcc5   :  { %2374 = vrot.lane.b32.xlu0 %v2373_v16, %s2538_s12  ;;  %v1400_v53 = vmul.f32 %v2492_v18, %v2967_v45 }
 0xcc7   :  { %v2378_v63 = vpack.i.bf16 %v1400_v53, %v1399_v20  ;;  %v3279_v20 = vld [vmem:[#allocation2_spill] sm:$0xff] }
 0xcc8   :  { %v2494_v24 = vpop.eup %2493 }
 0xcc9   :  { %2379 = vrot.lane.b32.xlu1 %v2378_v63, %s2538_s12  ;;  %v416_v9 = vmul.f32 %v2494_v24, %v2737_v26  ;;  %v3282_v24 = vld [vmem:[#allocation9_spill] sm:$0xff] }
 0xd06   :  { %v3131_v17 = vpop.xlane.xlu1 %1721 }
 0xd0a   :  { %v3133_v14 = vpop.xlane.xlu1 %1715 }
 0xd0e   :  { %v3135_v30 = vpop.xlane.xlu0 %1724  ;;  %v345_v48 = vpop.xlane.xlu1 %344 }
 0xd12   :  { %v3137_v44 = vpop.xlane.xlu0 %1718  ;;  %v735_v59 = vpop.xlane.xlu1 %734 }
 0xd16   :  { %v342_v22 = vpop.xlane.xlu0 %341  ;;  %v741_v0 = vpop.xlane.xlu1 %740 }
 0xd17   :  { %2495 = vrcp.f32 %v342_v22 }
 0xd18   :  { %2497 = vrcp.f32 %v735_v59 }
 0xd1a   :  { %v348_v5 = vpop.xlane.xlu0 %347  ;;  %v1131_v37 = vpop.xlane.xlu1 %1130 }
 0xd1e   :  { %v738_v45 = vpop.xlane.xlu0 %737  ;;  %v1137_v13 = vpop.xlane.xlu1 %1136 }
 0xd1f   :  { %2499 = vrcp.f32 %v738_v45 }
 0xd21   :  { %v2496_v4 = vpop.eup %2495 }
 0xd22   :  { %v744_v8 = vpop.xlane.xlu0 %743  ;;  %v1527_v51 = vpop.xlane.xlu1 %1526  ;;  %v417_v52 = vmul.f32 %v2496_v4, %v2741_v28 }
 0xd23   :  { %2501 = vrcp.f32 %v1527_v51  ;;  %v2498_v62 = vpop.eup %2497 }
 0xd24   :  { %2503 = vrcp.f32 %v741_v0  ;;  %v812_v33 = vmul.f32 %v2498_v62, %v2801_v19 }
 0xd25   :  { %2505 = vrcp.f32 %v744_v8 }
 0xd26   :  { %v1134_v23 = vpop.xlane.xlu0 %1133  ;;  %v1533_v43 = vpop.xlane.xlu1 %1532 }
 0xd27   :  { %2507 = vrcp.f32 %v1533_v43 }
 0xd28   :  { %2509 = vrcp.f32 %v345_v48  ;;  %v3280_v48 = vld [vmem:[#allocation3_spill] sm:$0xff] }
 0xd29   :  { %2511 = vrcp.f32 %v348_v5  ;;  %v2500_v21 = vpop.eup %2499 }
 0xd2a   :  { %v1140_v46 = vpop.xlane.xlu0 %1139  ;;  %v2355_v3 = vpop.permute.xlu1 %2354  ;;  %2513 = vrcp.f32 %v1131_v37  ;;  %v813_v60 = vmul.f32 %v2500_v21, %v2805_v42  ;;  %v3277_v42 = vld [vmem:[#allocation4_spill] sm:$0xff] }
 0xd2b   :  { %v2357_v47 = vunpack.i.h.bf16 %v2355_v3  ;;  %v2356_v7 = vunpack.i.l.bf16 %v2355_v3  ;;  %2515 = vrcp.f32 %v1137_v13  ;;  %v3283_v3 = vld [vmem:[#allocation7_spill] sm:$0xff]  ;;  %v3285_v21 = vld [vmem:[#allocation8_spill] sm:$0xff] }
 0xd2c   :  { %2517 = vrcp.f32 %v1134_v23  ;;  %v3281_v23 = vld [vmem:[#allocation12_spill] sm:$0xff] }
 0xd2d   :  { %v626_v57 = vsel %vm243_vm1, %v417_v52, %v2357_v47  ;;  %v625_v1 = vsel %vm243_vm1, %v416_v9, %v2356_v7  ;;  %v2502_v10 = vpop.eup %2501  ;;  %2519 = vrcp.f32 %v1140_v46  ;;  %v3284_v7 = vld [vmem:[#allocation6_spill] sm:$0xff] }
 0xd2e   :  { %v1817_v2 = vpack.c.bf16 %v626_v57, %v625_v1  ;;  %v1530_v15 = vpop.xlane.xlu0 %1529  ;;  %v3144_v58 = vmul.f32 %v2502_v10, %v3019_v40  ;;  %v2504_v28 = vpop.eup %2503 }
 0xd2f   :  { %2521 = vrcp.f32 %v1530_v15  ;;  %v2365_v26 = vpop.permute.xlu1 %2364  ;;  %v2506_v36 = vpop.eup %2505  ;;  %v814_v35 = vmul.f32 %v2504_v28, %v3277_v42 }
 0xd30   :  { %v2367_v31 = vunpack.i.h.bf16 %v2365_v26  ;;  %v2366_v34 = vunpack.i.l.bf16 %v2365_v26  ;;  %2315 = vmatprep.mubr.msk.bf16.mxu1 %vm103_vm0, %v1817_v2  ;;  %v815_v39 = vmul.f32 %v2506_v36, %v3278_v38 }
 0xd31   :  { %v2508_v11 = vpop.eup %2507 }
 0xd32   :  { %v1022_v6 = vsel %vm243_vm1, %v813_v60, %v2367_v31  ;;  %v1021_v41 = vsel %vm243_vm1, %v812_v33, %v2366_v34  ;;  %v1536_v61 = vpop.xlane.xlu0 %1535  ;;  %v2510_v25 = vpop.eup %2509  ;;  %v3152_v27 = vmul.f32 %v2508_v11, %v3276_v32  ;;  %v3286_v31 = vld [vmem:[#allocation11_spill] sm:$0xff] }
 0xd33   :  { %v1819_v29 = vpack.c.bf16 %v1022_v6, %v1021_v41  ;;  %2523 = vrcp.f32 %v1536_v61  ;;  %v2370_v40 = vpop.permute.xlu1 %2369  ;;  %v2512_v19 = vpop.eup %2511  ;;  %v418_v53 = vmul.f32 %v2510_v25, %v3279_v20 }
 0xd34   :  { %v2372_v12 = vunpack.i.h.bf16 %v2370_v40  ;;  %v2371_v50 = vunpack.i.l.bf16 %v2370_v40  ;;  %v2514_v54 = vpop.eup %2513  ;;  %v419_v59 = vmul.f32 %v2512_v19, %v3280_v48  ;;  %2525 = vrcp.f32 %v3131_v17 }
 0xd35   :  { %v2516_v56 = vpop.eup %2515  ;;  %v1208_v52 = vmul.f32 %v2514_v54, %v3283_v3  ;;  %2527 = vrcp.f32 %v3133_v14 }
 0xd36   :  { %v1024_v49 = vsel %vm243_vm1, %v815_v39, %v2372_v12  ;;  %v1023_v16 = vsel %vm243_vm1, %v814_v35, %v2371_v50  ;;  %v2360_v18 = vpop.permute.xlu0 %2359  ;;  %v2518_v63 = vpop.eup %2517  ;;  %v1210_v62 = vmul.f32 %v2516_v56, %v3284_v7  ;;  %2529 = vrcp.f32 %v3135_v30 }
 0xd37   :  { %v1820_v55 = vpack.c.bf16 %v1024_v49, %v1023_v16  ;;  %v2362_v22 = vunpack.i.h.bf16 %v2360_v18  ;;  %v2361_v0 = vunpack.i.l.bf16 %v2360_v18  ;;  %v2520_v5 = vpop.eup %2519  ;;  %v1209_v4 = vmul.f32 %v2518_v63, %v3282_v24  ;;  %v2068_v63 = vld [vmem:[%s3263_s5] ss:$0 sm:$0xff] }
 0xd38   :  { %v1211_v57 = vmul.f32 %v2520_v5, %v3285_v21  ;;  %2531 = vrcp.f32 %v3137_v44 }
 0xd39   :  { %v2522_v37 = vpop.eup %2521  ;;  %v628_v45 = vsel %vm243_vm1, %v419_v59, %v2362_v22  ;;  %v627_v13 = vsel %vm243_vm1, %v418_v53, %v2361_v0 }
 0xd3a   :  { %v1818_v8 = vpack.c.bf16 %v628_v45, %v627_v13  ;;  %v2375_v51 = vpop.permute.xlu0 %2374  ;;  %v1605_v43 = vmul.f32 %v2522_v37, %v3281_v23 }
 0xd3b   :  { %v2377_v46 = vunpack.i.h.bf16 %v2375_v51  ;;  %v2376_v9 = vunpack.i.l.bf16 %v2375_v51  ;;  %v2380_v47 = vpop.permute.xlu1 %2379 }
 0xd3c   :  { %v2382_v1 = vunpack.i.h.bf16 %v2380_v47  ;;  %v2381_v10 = vunpack.i.l.bf16 %v2380_v47  ;;  %2316 = vmatmul.mubr.msk.bf16.vlgmr.msra.gmra.mrb[32].mxu1 %vm103_vm0, %v1818_v8 }
 0xd3d   :  { %v2524_v2 = vpop.eup %2523  ;;  %v1418_v15 = vsel %vm243_vm1, %v1209_v4, %v2377_v46  ;;  %v1417_v26 = vsel %vm243_vm1, %v1208_v52, %v2376_v9  ;;  %2319 = vmatprep.mubr.msk.bf16.mxu1 %vm103_vm0, %v1819_v29 }
 0xd3e   :  { %v1821_v28 = vpack.c.bf16 %v1418_v15, %v1417_v26  ;;  %v1420_v33 = vsel %vm243_vm1, %v1211_v57, %v2382_v1  ;;  %v1419_v60 = vsel %vm243_vm1, %v1210_v62, %v2381_v10  ;;  %v1607_v34 = vmul.f32 %v2524_v2, %v3286_v31  ;;  %v2526_v11 = vpop.eup %2525 }
 0xd3f   :  { %v1822_v36 = vpack.c.bf16 %v1420_v33, %v1419_v60  ;;  %v2528_v41 = vpop.eup %2527 }
 0xd40   :  { %v2530_v29 = vpop.eup %2529 }
 0xd42   :  { %v2532_v19 = vpop.eup %2531 }
 0xd44   :  { %2320 = vmatmul.mubr.msk.bf16.gmra.mrb[36].mxu1 %vm103_vm0, %v1820_v55 }
 0xd45   :  { %2323 = vmatprep.mubr.msk.bf16.mxu1 %vm103_vm0, %v1821_v28 }
 0xd4c   :  { %2324 = vmatmul.mubr.msk.bf16.gmra.mrb[40].mxu1 %vm103_vm0, %v1822_v36 }
 0xd55   :  { %v2309_v6 = vpop.f32.mrb[28].mxu1 }
 0xd56   :  { %v1795_v61 = vmul.f32 %v2526_v11, %v2309_v6  ;;  %v1774_v25 = vpop.f32.mrb[29].mxu1 }
 0xd57   :  { %v1793_v40 = vmul.f32 %v2528_v41, %v1774_v25  ;;  %v2310_v32 = vpop.f32.mrb[30].mxu1 }
 0xd58   :  { %v1796_v42 = vmul.f32 %v2530_v29, %v2310_v32  ;;  %v1777_v35 = vpop.f32.mrb[31].mxu1 }
 0xd59   :  { %v1794_v17 = vmul.f32 %v2532_v19, %v1777_v35 }
 0xd5a   :  { %v2388_v38 = vpack.i.bf16 %v1796_v42, %v1795_v61 }
 0xd5b   :  { %v2383_v14 = vpack.i.bf16 %v1794_v17, %v1793_v40 }
 0xd5c   :  { %2389 = vrot.lane.b32.xlu1 %v2388_v38, %s2538_s12 }
 0xd5d   :  { %2384 = vrot.lane.b32.xlu0 %v2383_v14, %s2538_s12 }
 0xdce   :  { %v2390_v30 = vpop.permute.xlu1 %2389 }
 0xdcf   :  { %v2392_v44 = vunpack.i.h.bf16 %v2390_v30  ;;  %v2391_v39 = vunpack.i.l.bf16 %v2390_v30  ;;  %v2385_v12 = vpop.permute.xlu0 %2384 }
 0xdd0   :  { %v2387_v50 = vunpack.i.h.bf16 %v2385_v12  ;;  %v2386_v54 = vunpack.i.l.bf16 %v2385_v12 }
 0xdd1   :  { %v1816_v56 = vsel %vm243_vm1, %v1607_v34, %v2392_v44  ;;  %v1815_v49 = vsel %vm243_vm1, %v3152_v27, %v2391_v39 }
 0xdd2   :  { %v1824_v16 = vpack.c.bf16 %v1816_v56, %v1815_v49  ;;  %v1814_v18 = vsel %vm243_vm1, %v1605_v43, %v2387_v50  ;;  %v1813_v20 = vsel %vm243_vm1, %v3144_v58, %v2386_v54 }
 0xdd3   :  { %v1823_v53 = vpack.c.bf16 %v1814_v18, %v1813_v20 }
 0xdd5   :  { %2327 = vmatprep.mubr.msk.bf16.mxu1 %vm103_vm0, %v1823_v53 }
 0xdd6   :  { %2328 = vmatmul.mubr.msk.bf16.gmra.mrb[44].mxu1 %vm103_vm0, %v1824_v16 }
 0xe0f   :  { %v2317_v55 = vpop.f32.mrb[32].mxu1 }
 0xe10   :  { %v1915_v48 = vadd.f32 %v2317_v55, %v2068_v63  ;;  %v1906_v59 = vpop.f32.mrb[33].mxu1 }
 0xe11   :  { %v1907_v22 = vadd.f32 %v2068_v63, %v1906_v59  ;;  %v2318_v27 = vpop.f32.mrb[34].mxu1 }
 0xe12   :  { %1971 = vst.msk [vmem:[%s3264_s6 + $0x10] sm:$0xff] %vm103_vm0, %v1915_v48  ;;  %v1918_v58 = vadd.f32 %v2318_v27, %v2068_v63  ;;  %v1909_v0 = vpop.f32.mrb[35].mxu1 }
 0xe13   :  { %1969 = vst.msk [vmem:[%s3264_s6] sm:$0xff] %vm103_vm0, %v1907_v22  ;;  %v1910_v5 = vadd.f32 %v2068_v63, %v1909_v0 }
 0xe14   :  { %1972 = vst.msk [vmem:[%s3264_s6 + $0x18] sm:$0xff] %vm103_vm0, %v1918_v58 }
 0xe15   :  { %1970 = vst.msk [vmem:[%s3264_s6 + $0x8] sm:$0xff] %vm103_vm0, %v1910_v5 }
 0xe17   :  { %v2321_v37 = vpop.f32.mrb[36].mxu1 }
 0xe18   :  { %v1931_v45 = vadd.f32 %v2321_v37, %v2068_v63  ;;  %v1922_v13 = vpop.f32.mrb[37].mxu1 }
 0xe19   :  { %v1923_v8 = vadd.f32 %v2068_v63, %v1922_v13  ;;  %v2322_v51 = vpop.f32.mrb[38].mxu1 }
 0xe1a   :  { %1975 = vst.msk [vmem:[%s3264_s6 + $0x30] sm:$0xff] %vm103_vm0, %v1931_v45  ;;  %v1934_v23 = vadd.f32 %v2322_v51, %v2068_v63  ;;  %v1925_v43 = vpop.f32.mrb[39].mxu1 }
 0xe1b   :  { %1973 = vst.msk [vmem:[%s3264_s6 + $0x20] sm:$0xff] %vm103_vm0, %v1923_v8  ;;  %v1926_v24 = vadd.f32 %v2068_v63, %v1925_v43 }
 0xe1c   :  { %1976 = vst.msk [vmem:[%s3264_s6 + $0x38] sm:$0xff] %vm103_vm0, %v1934_v23 }
 0xe1d   :  { %1974 = vst.msk [vmem:[%s3264_s6 + $0x28] sm:$0xff] %vm103_vm0, %v1926_v24 }
 0xe1f   :  { %v2325_v4 = vpop.f32.mrb[40].mxu1 }
 0xe20   :  { %v1947_v46 = vadd.f32 %v2325_v4, %v2068_v63  ;;  %v1938_v9 = vpop.f32.mrb[41].mxu1 }
 0xe21   :  { %v1939_v3 = vadd.f32 %v2068_v63, %v1938_v9  ;;  %v2326_v52 = vpop.f32.mrb[42].mxu1 }
 0xe22   :  { %1979 = vst.msk [vmem:[%s3264_s6 + $0x50] sm:$0xff] %vm103_vm0, %v1947_v46  ;;  %v1950_v47 = vadd.f32 %v2326_v52, %v2068_v63  ;;  %v1941_v7 = vpop.f32.mrb[43].mxu1 }
 0xe23   :  { %1977 = vst.msk [vmem:[%s3264_s6 + $0x40] sm:$0xff] %vm103_vm0, %v1939_v3  ;;  %v1942_v62 = vadd.f32 %v2068_v63, %v1941_v7 }
 0xe24   :  { %1980 = vst.msk [vmem:[%s3264_s6 + $0x58] sm:$0xff] %vm103_vm0, %v1950_v47 }
 0xe25   :  { %1978 = vst.msk [vmem:[%s3264_s6 + $0x48] sm:$0xff] %vm103_vm0, %v1942_v62 }
 0xea9   :  { %v2329_v21 = vpop.f32.mrb[44].mxu1 }
 0xeaa   :  { %v1963_v57 = vadd.f32 %v2329_v21, %v2068_v63  ;;  %v1954_v1 = vpop.f32.mrb[45].mxu1 }
 0xeab   :  { %v1955_v10 = vadd.f32 %v2068_v63, %v1954_v1  ;;  %v2330_v2 = vpop.f32.mrb[46].mxu1 }
 0xeac   :  { %1983 = vst.msk [vmem:[%s3264_s6 + $0x70] sm:$0xff] %vm103_vm0, %v1963_v57  ;;  %v1966_v15 = vadd.f32 %v2330_v2, %v2068_v63  ;;  %v1957_v26 = vpop.f32.mrb[47].mxu1 }
 0xead   :  { %1981 = vst.msk [vmem:[%s3264_s6 + $0x60] sm:$0xff] %vm103_vm0, %v1955_v10  ;;  %v1958_v28 = vadd.f32 %v2068_v63, %v1957_v26 }
 0xeae   :  { %1984 = vst.msk [vmem:[%s3264_s6 + $0x78] sm:$0xff] %vm103_vm0, %v1966_v15 }
 0xeaf   :  { %1982 = vst.msk [vmem:[%s3264_s6 + $0x68] sm:$0xff] %vm103_vm0, %v1958_v28 }

// kernel: _lambda_.28
= control target key start
LH: loop header
LB: loop body
LE: loop exit
PB: predicated region body
PF: predicated region fallthrough
CT: control target
= control target key end

     0   :  { %vm31_vm0 = vcmask 523264   ;;  %v606_v36 = vmov 0   ;;  %s816_s0 = inlined_call_operand.vmem [shape: f32[32,64], index: 0, kind: input, shape index: {}]   ;;  %s817_s3 = inlined_call_operand.vmem [shape: bf16[64,256], index: 3, kind: input, shape index: {}]   ;;  %s818_s1 = inlined_call_operand.vmem [shape: f32[1,64], index: 1, kind: input, shape index: {}]   ;;  %s819_s2 = inlined_call_operand.vmem [shape: f32[1,64], index: 2, kind: input, shape index: {}]   ;;  %s820_s5 = inlined_call_operand.vmem [shape: bf16[256,64], index: 5, kind: input, shape index: {}]   ;;  %s821_s4 = inlined_call_operand.vmem [shape: f32[1,256], index: 4, kind: input, shape index: {}]   ;;  %s822_s6 = inlined_call_operand.vmem [shape: f32[1,64], index: 6, kind: input, shape index: {}]   ;;  %s823_s7 = inlined_call_operand.vmem [shape: f32[32,64], index: 7, kind: output, shape index: {}]  }
   0x1   :  { %v27_v0 = vld [vmem:[%s816_s0] sm:$0xff]  ;;  %v29_v1 = vld [vmem:[%s816_s0 + $0x10] sm:$0xff]  ;;  %v28_v2 = vld [vmem:[%s816_s0 + $0x8] sm:$0xff]  ;;  %207 = vmatprep.mubr.bf16.mxu0 %v606_v36 }
   0x2   :  { %v32_v3 = vsel %vm31_vm0, %v27_v0, 0.0  ;;  %v38_v4 = vsel %vm31_vm0, %v29_v1, 0.0  ;;  %v30_v5 = vld [vmem:[%s816_s0 + $0x18] sm:$0xff]  ;;  %v35_v6 = vsel %vm31_vm0, %v28_v2, 0.0  ;;  %v554_v28 = vld [vmem:[%s817_s3 + $0x4] ss:$8 sps:$4 sm:$0xff]  }
   0x3   :  { %33 = vadd.xlane.f32.xlu0 %v32_v3  ;;  %39 = vadd.xlane.f32.xlu1 %v38_v4  ;;  %v41_v7 = vsel %vm31_vm0, %v30_v5, 0.0  ;;  %v556_v29 = vld [vmem:[%s817_s3] ss:$8 sps:$4 sm:$0xff]   ;;  %v557_v30 = vld [vmem:[%s817_s3 + $0x14] ss:$8 sps:$4 sm:$0xff]  }
   0x4   :  { %175 = vmatprep.subr.bf16.mxu0 %v554_v28  ;;  %v559_v31 = vld [vmem:[%s817_s3 + $0x10] ss:$8 sps:$4 sm:$0xff]   ;;  %v560_v32 = vld [vmem:[%s817_s3 + $0x24] ss:$8 sps:$4 sm:$0xff]   ;;  %v562_v33 = vld [vmem:[%s817_s3 + $0x20] ss:$8 sps:$4 sm:$0xff]  }
   0x5   :  { %176 = vmatpush1.bf16.msra.mxu0 %v556_v29  ;;  %v563_v34 = vld [vmem:[%s817_s3 + $0x34] ss:$8 sps:$4 sm:$0xff]   ;;  %v565_v35 = vld [vmem:[%s817_s3 + $0x30] ss:$8 sps:$4 sm:$0xff]   ;;  %v496_v51 = vld [vmem:[%s818_s1] ss:$0 sm:$0xff] }
   0x6   :  { %177 = vmatprep.subr.bf16.mxu0 %v557_v30  ;;  %v497_v56 = vld [vmem:[%s819_s2] ss:$0 sm:$0xff] }
   0x7   :  { %36 = vadd.xlane.f32.xlu0 %v35_v6  ;;  %42 = vadd.xlane.f32.xlu1 %v41_v7  ;;  %v567_v6 = vld [vmem:[%s820_s5] sm:$0xff]   ;;  %v568_v7 = vld [vmem:[%s820_s5 + $0x48] sm:$0xff]  }
   0x9   :  { %178 = vmatpush1.bf16.msra.mxu0 %v559_v31 }
   0xa   :  { %179 = vmatprep.subr.bf16.mxu0 %v560_v32 }
   0xd   :  { %180 = vmatpush1.bf16.msra.mxu0 %v562_v33 }
   0xe   :  { %181 = vmatprep.subr.bf16.mxu0 %v563_v34 }
  0x11   :  { %182 = vmatpush1.bf16.msra.mxu0 %v565_v35 }
  0x90   :  { %v34_v8 = vpop.xlane.xlu0 %33  ;;  %v40_v9 = vpop.xlane.xlu1 %39 }
  0x91   :  { %v45_v10 = vmul.f32 0.015625, %v34_v8  ;;  %v47_v11 = vmul.f32 0.015625, %v40_v9  ;;  %v569_v8 = vld [vmem:[%s820_s5 + $0x8] sm:$0xff]   ;;  %v570_v9 = vld [vmem:[%s820_s5 + $0x50] sm:$0xff]  }
  0x93   :  { %v49_v12 = vsub.f32 %v27_v0, %v45_v10  ;;  %v663_v13 = vsub.f32 %v29_v1, %v47_v11  ;;  %v571_v10 = vld [vmem:[%s820_s5 + $0x10] sm:$0xff]   ;;  %v572_v11 = vld [vmem:[%s820_s5 + $0x58] sm:$0xff]  }
  0x94   :  { %v37_v14 = vpop.xlane.xlu0 %36  ;;  %v43_v15 = vpop.xlane.xlu1 %42 }
  0x95   :  { %v46_v16 = vmul.f32 0.015625, %v37_v14  ;;  %v48_v17 = vmul.f32 0.015625, %v43_v15  ;;  %v53_v18 = vmul.f32 %v49_v12, %v49_v12  ;;  %v55_v19 = vmul.f32 %v663_v13, %v663_v13  ;;  %v575_v14 = vld [vmem:[%s820_s5 + $0x20] sm:$0xff]   ;;  %v576_v15 = vld [vmem:[%s820_s5 + $0x68] sm:$0xff]  }
  0x97   :  { %v50_v20 = vsub.f32 %v28_v2, %v46_v16  ;;  %v52_v21 = vsub.f32 %v30_v5, %v48_v17  ;;  %v57_v22 = vsel %vm31_vm0, %v53_v18, 0.0  ;;  %v63_v23 = vsel %vm31_vm0, %v55_v19, 0.0  ;;  %v566_v5 = vld [vmem:[%s820_s5 + $0x40] sm:$0xff]   ;;  %v577_v16 = vld [vmem:[%s820_s5 + $0x28] sm:$0xff]   ;;  %v578_v17 = vld [vmem:[%s820_s5 + $0x70] sm:$0xff]  }
  0x98   :  { %58 = vadd.xlane.f32.xlu0 %v57_v22  ;;  %525 = vmatprep.subr.bf16.mxu1 %v566_v5  ;;  %v579_v18 = vld [vmem:[%s820_s5 + $0x30] sm:$0xff]   ;;  %v580_v19 = vld [vmem:[%s820_s5 + $0x78] sm:$0xff]  }
  0x99   :  { %v54_v24 = vmul.f32 %v50_v20, %v50_v20  ;;  %v56_v25 = vmul.f32 %v52_v21, %v52_v21  ;;  %526 = vmatpush3.bf16.msra.mxu1 %v567_v6 }
  0x9a   :  { %527 = vmatprep.subr.bf16.mxu1 %v568_v7 }
  0x9b   :  { %v60_v26 = vsel %vm31_vm0, %v54_v24, 0.0  ;;  %v66_v27 = vsel %vm31_vm0, %v56_v25, 0.0  ;;  %v117_v24 = vld [vmem:[%s821_s4] sm:$0x3] }
  0x9c   :  { %64 = vadd.xlane.f32.xlu0 %v63_v23  ;;  %61 = vadd.xlane.f32.xlu1 %v60_v26 }
  0x9d   :  { %528 = vmatpush3.bf16.msra.mxu1 %v569_v8 }
  0x9e   :  { %529 = vmatprep.subr.bf16.mxu1 %v570_v9 }
  0xa0   :  { %67 = vadd.xlane.f32.xlu1 %v66_v27 }
  0xa1   :  { %530 = vmatpush3.bf16.msra.mxu1 %v571_v10 }
  0xa2   :  { %531 = vmatprep.subr.bf16.mxu1 %v572_v11 }
 0x125   :  { %v59_v37 = vpop.xlane.xlu0 %58 }
 0x126   :  { %v69_v38 = vmul.f32 0.015625, %v59_v37 }
 0x128   :  { %v73_v39 = vadd.f32 1e-05, %v69_v38 }
 0x129   :  { %v62_v40 = vpop.xlane.xlu1 %61  ;;  %v65_v41 = vpop.xlane.xlu0 %64 }
 0x12a   :  { %582 = vrsqrt.f32 %v73_v39  ;;  %v70_v42 = vmul.f32 0.015625, %v62_v40  ;;  %v71_v43 = vmul.f32 0.015625, %v65_v41 }
 0x12c   :  { %v74_v44 = vadd.f32 1e-05, %v70_v42  ;;  %v75_v45 = vadd.f32 1e-05, %v71_v43 }
 0x12d   :  { %v68_v46 = vpop.xlane.xlu1 %67 }
 0x12e   :  { %584 = vrsqrt.f32 %v74_v44  ;;  %v72_v47 = vmul.f32 0.015625, %v68_v46 }
 0x12f   :  { %586 = vrsqrt.f32 %v75_v45 }
 0x130   :  { %v76_v48 = vadd.f32 1e-05, %v72_v47 }
 0x132   :  { %588 = vrsqrt.f32 %v76_v48 }
 0x134   :  { %v583_v49 = vpop.eup %582 }
 0x135   :  { %v81_v50 = vmul.f32 %v583_v49, %v49_v12  ;;  %v573_v12 = vld [vmem:[%s820_s5 + $0x18] sm:$0xff]  }
 0x136   :  { %532 = vmatpush3.bf16.msra.mxu1 %v573_v12 }
 0x137   :  { %v92_v54 = vmul.f32 %v496_v51, %v81_v50 }
 0x138   :  { %v585_v52 = vpop.eup %584 }
 0x139   :  { %v82_v53 = vmul.f32 %v585_v52, %v50_v20  ;;  %v587_v55 = vpop.eup %586  ;;  %v103_v61 = vadd.f32 %v497_v56, %v92_v54  ;;  %v581_v20 = vld [vmem:[%s820_s5 + $0x38] sm:$0xff]  }
 0x13a   :  { %v83_v59 = vmul.f32 %v587_v55, %v663_v13  ;;  %v574_v13 = vld [vmem:[%s820_s5 + $0x60] sm:$0xff]  }
 0x13b   :  { %v93_v57 = vmul.f32 %v496_v51, %v82_v53  ;;  %533 = vmatprep.subr.bf16.mxu1 %v574_v13 }
 0x13c   :  { %v589_v58 = vpop.eup %588  ;;  %v94_v1 = vmul.f32 %v496_v51, %v83_v59  ;;  %534 = vmatpush3.bf16.msra.mxu1 %v575_v14 }
 0x13d   :  { %v84_v60 = vmul.f32 %v589_v58, %v52_v21  ;;  %v104_v62 = vadd.f32 %v497_v56, %v93_v57  ;;  %535 = vmatprep.subr.bf16.mxu1 %v576_v15  ;;  %v119_v21 = vlaneseq }
 0x13e   :  { %v105_v3 = vadd.f32 %v497_v56, %v94_v1 }
 0x13f   :  { %v107_v63 = vpack.c.bf16 %v104_v62, %v103_v61  ;;  %v95_v0 = vmul.f32 %v496_v51, %v84_v60  ;;  %v120_v22 = vshrl.u32 %v119_v21, 7 }
 0x140   :  { %536 = vmatpush3.bf16.msra.mxu1 %v577_v16 }
 0x141   :  { %506 = vmatmul.mubr.msk.bf16.vlgmr.msra.gmra.mrb[0].mxu0 %vm31_vm0, %v107_v63  ;;  %v106_v2 = vadd.f32 %v497_v56, %v95_v0  ;;  %537 = vmatprep.subr.bf16.mxu1 %v578_v17  ;;  %v121_v23 = vsub.s32 0, %v120_v22  ;;  %v125_v25 = vsub.s32 1, %v120_v22 }
 0x142   :  { %217 = vmatprep.mubr.bf16.mxu0 %v606_v36 }
 0x143   :  { %v108_v4 = vpack.c.bf16 %v106_v2, %v105_v3  ;;  %v122_v26 = vrot.slane %v117_v24, %v121_v23  ;;  %v126_v27 = vrot.slane %v117_v24, %v125_v25 }
 0x144   :  { %538 = vmatpush3.bf16.msra.mxu1 %v579_v18 }
 0x145   :  { %539 = vmatprep.subr.bf16.mxu1 %v580_v19 }
 0x148   :  { %540 = vmatpush3.bf16.msra.mxu1 %v581_v20 }
 0x149   :  { %507 = vmatmul.mubr.msk.bf16.gmra.mrb[4].mxu0 %vm31_vm0, %v108_v4 }
 0x214   :  { %v209_v28 = vpop.f32.mrb[0].mxu0 }
 0x215   :  { %v755_v29 = vadd.f32 %v209_v28, %v122_v26  ;;  %v211_v30 = vpop.f32.mrb[1].mxu0 }
 0x216   :  { %v757_v31 = vadd.f32 %v211_v30, %v126_v27  ;;  %v213_v32 = vpop.f32.mrb[2].mxu0 }
 0x217   :  { %v236_v33 = vmul.f32 0.044715, %v755_v29  ;;  %v760_v34 = vadd.f32 %v213_v32, %v122_v26  ;;  %v215_v35 = vpop.f32.mrb[3].mxu0 }
 0x218   :  { %v237_v36 = vmul.f32 0.044715, %v757_v31  ;;  %v763_v37 = vadd.f32 %v215_v35, %v126_v27  ;;  %v229_v30 = vmul.f32 0.5, %v757_v31 }
 0x219   :  { %v244_v38 = vmul.f32 %v236_v33, %v755_v29  ;;  %v238_v39 = vmul.f32 0.044715, %v760_v34 }
 0x21a   :  { %v239_v40 = vmul.f32 0.044715, %v763_v37  ;;  %v245_v41 = vmul.f32 %v237_v36, %v757_v31  ;;  %v231_v32 = vmul.f32 0.5, %v763_v37 }
 0x21b   :  { %v252_v42 = vmul.f32 %v244_v38, %v755_v29  ;;  %v246_v43 = vmul.f32 %v238_v39, %v760_v34 }
 0x21c   :  { %v219_v44 = vpop.f32.mrb[4].mxu0  ;;  %v247_v45 = vmul.f32 %v239_v40, %v763_v37  ;;  %v253_v46 = vmul.f32 %v245_v41, %v757_v31 }
 0x21d   :  { %v254_v47 = vmul.f32 %v246_v43, %v760_v34  ;;  %v774_v48 = vadd.f32 %v219_v44, %v122_v26  ;;  %v221_v49 = vpop.f32.mrb[5].mxu0  ;;  %v260_v50 = vadd.f32 %v252_v42, %v755_v29 }
 0x21e   :  { %v777_v51 = vadd.f32 %v221_v49, %v126_v27  ;;  %v223_v52 = vpop.f32.mrb[6].mxu0  ;;  %v255_v53 = vmul.f32 %v247_v45, %v763_v37  ;;  %v261_v54 = vadd.f32 %v253_v46, %v757_v31 }
 0x21f   :  { %v240_v55 = vmul.f32 0.044715, %v774_v48  ;;  %v224_v56 = vadd.f32 %v223_v52, %v122_v26  ;;  %v225_v57 = vpop.f32.mrb[7].mxu0  ;;  %v262_v58 = vadd.f32 %v254_v47, %v760_v34  ;;  %v268_v59 = vmul.f32 0.7978846, %v260_v50 }
 0x220   :  { %v241_v60 = vmul.f32 0.044715, %v777_v51  ;;  %v226_v61 = vadd.f32 %v225_v57, %v126_v27  ;;  %v263_v62 = vadd.f32 %v255_v53, %v763_v37  ;;  %v269_v63 = vmul.f32 0.7978846, %v261_v54 }
 0x221   :  { %v248_v0 = vmul.f32 %v240_v55, %v774_v48  ;;  %v242_v1 = vmul.f32 0.044715, %v224_v56  ;;  %v270_v2 = vmul.f32 0.7978846, %v262_v58  ;;  %590 = vtanh.f32 %v268_v59 }
 0x222   :  { %v249_v3 = vmul.f32 %v241_v60, %v777_v51  ;;  %v243_v4 = vmul.f32 0.044715, %v226_v61  ;;  %v271_v5 = vmul.f32 0.7978846, %v263_v62  ;;  %592 = vtanh.f32 %v269_v63  ;;  %v508_v60 = vld [vmem:[%s822_s6] ss:$0 sm:$0xff] }
 0x223   :  { %v256_v6 = vmul.f32 %v248_v0, %v774_v48  ;;  %v250_v7 = vmul.f32 %v242_v1, %v224_v56  ;;  %594 = vtanh.f32 %v270_v2  ;;  %v228_v26 = vmul.f32 0.5, %v755_v29 }
 0x224   :  { %v257_v8 = vmul.f32 %v249_v3, %v777_v51  ;;  %v251_v9 = vmul.f32 %v243_v4, %v226_v61  ;;  %596 = vtanh.f32 %v271_v5  ;;  %v230_v27 = vmul.f32 0.5, %v760_v34 }
 0x225   :  { %v258_v10 = vmul.f32 %v250_v7, %v224_v56  ;;  %v264_v11 = vadd.f32 %v256_v6, %v774_v48  ;;  %v232_v34 = vmul.f32 0.5, %v774_v48  ;;  %v234_v31 = vmul.f32 0.5, %v224_v56 }
 0x226   :  { %v259_v12 = vmul.f32 %v251_v9, %v226_v61  ;;  %v265_v13 = vadd.f32 %v257_v8, %v777_v51  ;;  %v233_v37 = vmul.f32 0.5, %v777_v51  ;;  %v235_v49 = vmul.f32 0.5, %v226_v61 }
 0x227   :  { %v266_v14 = vadd.f32 %v258_v10, %v224_v56  ;;  %v272_v15 = vmul.f32 0.7978846, %v264_v11 }
 0x228   :  { %v267_v16 = vadd.f32 %v259_v12, %v226_v61  ;;  %v273_v17 = vmul.f32 0.7978846, %v265_v13 }
 0x229   :  { %v274_v18 = vmul.f32 0.7978846, %v266_v14  ;;  %598 = vtanh.f32 %v272_v15 }
 0x22a   :  { %v275_v19 = vmul.f32 0.7978846, %v267_v16  ;;  %600 = vtanh.f32 %v273_v17 }
 0x22b   :  { %v591_v20 = vpop.eup %590  ;;  %602 = vtanh.f32 %v274_v18 }
 0x22c   :  { %v593_v21 = vpop.eup %592  ;;  %v284_v22 = vadd.f32 1.0, %v591_v20  ;;  %604 = vtanh.f32 %v275_v19 }
 0x22d   :  { %v595_v23 = vpop.eup %594  ;;  %v285_v24 = vadd.f32 1.0, %v593_v21 }
 0x22e   :  { %v597_v25 = vpop.eup %596  ;;  %v286_v28 = vadd.f32 1.0, %v595_v23  ;;  %v292_v35 = vmul.f32 %v284_v22, %v228_v26 }
 0x22f   :  { %v287_v33 = vadd.f32 1.0, %v597_v25  ;;  %v293_v38 = vmul.f32 %v285_v24, %v229_v30 }
 0x230   :  { %v294_v36 = vmul.f32 %v286_v28, %v230_v27 }
 0x231   :  { %v295_v39 = vmul.f32 %v287_v33, %v231_v32 }
 0x232   :  { %v300_v40 = vpack.c.bf16 %v294_v36, %v292_v35 }
 0x233   :  { %v599_v41 = vpop.eup %598  ;;  %v301_v42 = vpack.c.bf16 %v295_v39, %v293_v38 }
 0x234   :  { %v601_v43 = vpop.eup %600  ;;  %v288_v44 = vadd.f32 1.0, %v599_v41 }
 0x235   :  { %v603_v45 = vpop.eup %602  ;;  %471 = vmatprep.mubr.bf16.mxu1 %v301_v42  ;;  %v289_v29 = vadd.f32 1.0, %v601_v43 }
 0x236   :  { %v605_v46 = vpop.eup %604  ;;  %472 = vmatmul.mubr.bf16.vlgmr.msra.gmra.mrb[0].mxu1 %v300_v40  ;;  %v290_v47 = vadd.f32 1.0, %v603_v45  ;;  %v296_v52 = vmul.f32 %v288_v44, %v232_v34 }
 0x237   :  { %v291_v50 = vadd.f32 1.0, %v605_v46  ;;  %v297_v54 = vmul.f32 %v289_v29, %v233_v37 }
 0x238   :  { %v298_v53 = vmul.f32 %v290_v47, %v234_v31 }
 0x239   :  { %v299_v55 = vmul.f32 %v291_v50, %v235_v49 }
 0x23a   :  { %v302_v57 = vpack.c.bf16 %v298_v53, %v296_v52 }
 0x23b   :  { %v303_v58 = vpack.c.bf16 %v299_v55, %v297_v54 }
 0x23d   :  { %479 = vmatprep.mubr.bf16.mxu1 %v303_v58 }
 0x23e   :  { %480 = vmatmul.mubr.bf16.gmra.mrb[4].mxu1 %v302_v57 }
 0x309   :  { %v541_v59 = vpop.f32.mrb[0].mxu1 }
 0x30a   :  { %v542_v48 = vpop.f32.mrb[1].mxu1 }
 0x30b   :  { %v543_v56 = vadd.f32 %v542_v48, %v541_v59  ;;  %v544_v62 = vpop.f32.mrb[2].mxu1 }
 0x30c   :  { %v545_v63 = vpop.f32.mrb[3].mxu1 }
 0x30d   :  { %v474_v51 = vadd.f32 %v543_v56, %v508_v60  ;;  %v546_v61 = vadd.f32 %v545_v63, %v544_v62 }
 0x30f   :  { %488 = vst.msk [vmem:[%s823_s7] sm:$0xff] %vm31_vm0, %v474_v51  ;;  %v477_v0 = vadd.f32 %v546_v61, %v508_v60 }
 0x311   :  { %489 = vst.msk [vmem:[%s823_s7 + $0x8] sm:$0xff] %vm31_vm0, %v477_v0  ;;  %v547_v1 = vpop.f32.mrb[4].mxu1 }
 0x312   :  { %v548_v2 = vpop.f32.mrb[5].mxu1 }
 0x313   :  { %v549_v3 = vadd.f32 %v548_v2, %v547_v1  ;;  %v550_v4 = vpop.f32.mrb[6].mxu1 }
 0x314   :  { %v551_v5 = vpop.f32.mrb[7].mxu1 }
 0x315   :  { %v482_v6 = vadd.f32 %v549_v3, %v508_v60  ;;  %v552_v7 = vadd.f32 %v551_v5, %v550_v4 }
 0x317   :  { %490 = vst.msk [vmem:[%s823_s7 + $0x10] sm:$0xff] %vm31_vm0, %v482_v6  ;;  %v485_v8 = vadd.f32 %v552_v7, %v508_v60 }
 0x319   :  { %491 = vst.msk [vmem:[%s823_s7 + $0x18] sm:$0xff] %vm31_vm0, %v485_v8 }

// kernel: _lambda_.27
= control target key start
LH: loop header
LB: loop body
LE: loop exit
PB: predicated region body
PF: predicated region fallthrough
CT: control target
= control target key end

     0   :  { %v1367_v1 = vmov 0   ;;  %vm98_vm0 = vcmask 523264   ;;  %v38_v11 = vlaneseq  ;;  %vm172_vm1 = vcmask 130048   ;;  %s1370_s18 = smov 112   ;;  %s1371_s19 = smov 32   ;;  %s1792_s1 = inlined_call_operand.vmem [shape: bf16[64,192], index: 1, kind: input, shape index: {}]   ;;  %s1793_s0 = inlined_call_operand.vmem [shape: bf16[1,32,64], index: 0, kind: input, shape index: {}]   ;;  %s1794_s2 = inlined_call_operand.vmem [shape: f32[1,192], index: 2, kind: input, shape index: {}]   ;;  %s1795_s3 = inlined_call_operand.vmem [shape: f32[1,4,32,32], index: 3, kind: input, shape index: {}]   ;;  %s1796_s4 = inlined_call_operand.vmem [shape: bf16[64,64], index: 4, kind: input, shape index: {}]   ;;  %s1797_s5 = inlined_call_operand.vmem [shape: f32[1,64], index: 5, kind: input, shape index: {}]   ;;  %s1798_s6 = inlined_call_operand.vmem [shape: f32[1,32,64], index: 6, kind: output, shape index: {}]  }
   0x1   :  { %v1285_v0 = vld [vmem:[%s1792_s1 + $0x4] ss:$8 sps:$4 sm:$0xff]   ;;  %137 = vmatprep.mubr.bf16.mxu0 %v1367_v1  ;;  %v1287_v2 = vld [vmem:[%s1792_s1] ss:$8 sps:$4 sm:$0xff]   ;;  %v1288_v3 = vld [vmem:[%s1792_s1 + $0x14] ss:$8 sps:$4 sm:$0xff]  }
   0x2   :  { %105 = vmatprep.subr.bf16.mxu0 %v1285_v0  ;;  %v1290_v4 = vld [vmem:[%s1792_s1 + $0x10] ss:$8 sps:$4 sm:$0xff]   ;;  %v1291_v5 = vld [vmem:[%s1792_s1 + $0x24] ss:$8 sps:$4 sm:$0xff]   ;;  %v1293_v6 = vld [vmem:[%s1792_s1 + $0x20] ss:$8 sps:$4 sm:$0xff]  }
   0x3   :  { %106 = vmatpush1.bf16.msra.mxu0 %v1287_v2  ;;  %v1294_v7 = vld [vmem:[%s1792_s1 + $0x34] ss:$8 sps:$4 sm:$0xff]   ;;  %v1296_v8 = vld [vmem:[%s1792_s1 + $0x30] ss:$8 sps:$4 sm:$0xff]   ;;  %v1297_v9 = vld [vmem:[%s1793_s0] sm:$0xff]   ;;  %v39_v12 = vshrl.u32 %v38_v11, 7 }
   0x4   :  { %107 = vmatprep.subr.bf16.mxu0 %v1288_v3  ;;  %v1298_v10 = vld [vmem:[%s1793_s0 + $0x8] sm:$0xff]   ;;  %v36_v14 = vld [vmem:[%s1794_s2] sm:$0x3]  ;;  %s1368_s0 = smov 64   ;;  %s1369_s2 = smov 48   ;;  %v164_v56 = vld [vmem:[%s1795_s3 + $0x10] sm:$0xff] }
   0x5   :  { %v40_v13 = vsub.s32 0, %v39_v12  ;;  %v44_v15 = vsub.s32 1, %v39_v12  ;;  %s1372_s20 = smov 96   ;;  %vm242_vm2 = vcmask 261120   ;;  %v162_v61 = vld [vmem:[%s1795_s3] sm:$0xff]  ;;  %v1096_v2 = vld [vmem:[%s1795_s3 + $0x30] sm:$0xff] }
   0x6   :  { %s1373_s21 = smov 16   ;;  %s1374_s22 = smov 80   ;;  %vm969_vm3 = vcmask 392192  }
   0x7   :  { %108 = vmatpush1.bf16.msra.mxu0 %v1290_v4  ;;  %v41_v16 = vrot.slane %v36_v14, %v40_v13  ;;  %v45_v18 = vrot.slane %v36_v14, %v44_v15 }
   0x8   :  { %109 = vmatprep.subr.bf16.mxu0 %v1291_v5 }
   0xb   :  { %110 = vmatpush1.bf16.msra.mxu0 %v1293_v6 }
   0xc   :  { %111 = vmatprep.subr.bf16.mxu0 %v1294_v7  ;;  %v165_v7 = vld [vmem:[%s1795_s3 + $0x18] sm:$0xff] }
   0xf   :  { %112 = vmatpush1.bf16.msra.mxu0 %v1296_v8 }
  0x12   :  { %1088 = vmatmul.mubr.msk.bf16.vlgmr.msra.gmra.mrb[0].mxu0 %vm98_vm0, %v1297_v9 }
  0x13   :  { %147 = vmatprep.mubr.bf16.mxu0 %v1367_v1 }
  0x1a   :  { %1089 = vmatmul.mubr.msk.bf16.gmra.mrb[4].mxu0 %vm98_vm0, %v1298_v10  ;;  %v1094_v10 = vld [vmem:[%s1795_s3 + $0x20] sm:$0xff] }
  0xe5   :  { %v139_v17 = vpop.f32.mrb[0].mxu0 }
  0xe6   :  { %v141_v19 = vpop.f32.mrb[1].mxu0  ;;  %v140_v21 = vadd.f32 %v139_v17, %v41_v16 }
  0xe7   :  { %v143_v20 = vpop.f32.mrb[2].mxu0  ;;  %v142_v24 = vadd.f32 %v141_v19, %v45_v18  ;;  %v163_v19 = vld [vmem:[%s1795_s3 + $0x8] sm:$0xff] }
  0xe8   :  { %v144_v22 = vadd.f32 %v143_v20, %v41_v16  ;;  %v145_v23 = vpop.f32.mrb[3].mxu0  ;;  %v1097_v20 = vld [vmem:[%s1795_s3 + $0x38] sm:$0xff] }
  0xe9   :  { %v146_v25 = vadd.f32 %v145_v23, %v45_v18 }
  0xea   :  { %v1445_v26 = vpack.c.bf16 %v144_v22, %v140_v21 }
  0xeb   :  { %v1447_v27 = vpack.c.bf16 %v146_v25, %v142_v24 }
  0xec   :  { %168 = vrot.lane.b32.xlu0 %v1445_v26, %s1368_s0  ;;  %1167 = vmatprep.mubr.msk.bf16.mxu1 %vm172_vm1, %v1445_v26 }
  0xed   :  { %v149_v28 = vpop.f32.mrb[4].mxu0 }
  0xee   :  { %v151_v29 = vpop.f32.mrb[5].mxu0  ;;  %v150_v32 = vadd.f32 %v149_v28, %v41_v16  ;;  %v1095_v28 = vld [vmem:[%s1795_s3 + $0x28] sm:$0xff] }
  0xef   :  { %v152_v30 = vadd.f32 %v151_v29, %v45_v18  ;;  %v153_v31 = vpop.f32.mrb[6].mxu0 }
  0xf0   :  { %v154_v33 = vadd.f32 %v153_v31, %v41_v16  ;;  %v155_v34 = vpop.f32.mrb[7].mxu0  ;;  %353 = vrot.lane.b32.xlu0 %v1445_v26, %s1369_s2 }
  0xf1   :  { %v156_v35 = vadd.f32 %v155_v34, %v45_v18 }
  0xf2   :  { %v1454_v36 = vpack.c.bf16 %v154_v33, %v150_v32 }
  0xf3   :  { %v1456_v37 = vpack.c.bf16 %v156_v35, %v152_v30 }
  0xf4   :  { %170 = vrot.lane.b32.xlu1 %v1454_v36, %s1368_s0  ;;  %349 = vrot.lane.b32.xlu0 %v1445_v26, %s1370_s18 }
  0xf8   :  { %355 = vrot.lane.b32.xlu1 %v1454_v36, %s1369_s2  ;;  %351 = vrot.lane.b32.xlu0 %v1454_v36, %s1370_s18 }
  0xfc   :  { %544 = vrot.lane.b32.xlu1 %v1445_v26, %s1371_s19  ;;  %540 = vrot.lane.b32.xlu0 %v1445_v26, %s1372_s20 }
 0x100   :  { %546 = vrot.lane.b32.xlu1 %v1454_v36, %s1371_s19 }
 0x104   :  { %542 = vrot.lane.b32.xlu1 %v1454_v36, %s1372_s20 }
 0x108   :  { %466 = vrot.lane.b32.xlu1 %v1447_v27, %s1370_s18 }
 0x15e   :  { %v169_v38 = vpop.permute.xlu0 %168 }
 0x15f   :  { %1239 = vmatprep.subr.msk.bf16.mxu1 %vm172_vm1, %v169_v38  ;;  %v180_v39 = vsel %vm172_vm1, %v169_v38, 0 }
 0x160   :  { %1164 = vmatpush3.bf16.xpose.msra.mxu1 %v180_v39 }
 0x162   :  { %v354_v40 = vpop.permute.xlu0 %353 }
 0x163   :  { %v364_v41 = vsel %vm172_vm1, %v354_v40, 0  ;;  %1241 = vmatprep.subr.msk.bf16.mxu0 %vm172_vm1, %v354_v40  ;;  %v1104_v40 = vld [vmem:[%s1795_s3 + $0x50] sm:$0xff] }
 0x164   :  { %1180 = vmatpush3.bf16.xpose.msra.mxu0 %v364_v41 }
 0x166   :  { %v171_v42 = vpop.permute.xlu1 %170  ;;  %v350_v43 = vpop.permute.xlu0 %349 }
 0x167   :  { %1240 = vmatprep.subr.msk.bf16.mxu1 %vm172_vm1, %v171_v42  ;;  %1183 = vmatprep.mubr.msk.bf16.mxu0 %vm172_vm1, %v350_v43  ;;  %v183_v44 = vsel %vm172_vm1, %v171_v42, 0 }
 0x168   :  { %1166 = vmatpush3.bf16.xpose.msra.mxu1 %v183_v44  ;;  %v1105_v44 = vld [vmem:[%s1795_s3 + $0x58] sm:$0xff] }
 0x169   :  { %1171 = vmatprep.subr.bf16.mxu1 %v1447_v27 }
 0x16a   :  { %v356_v45 = vpop.permute.xlu1 %355  ;;  %v352_v47 = vpop.permute.xlu0 %351 }
 0x16b   :  { %v367_v46 = vsel %vm172_vm1, %v356_v45, 0  ;;  %1242 = vmatprep.subr.msk.bf16.mxu0 %vm172_vm1, %v356_v45  ;;  %v1102_v45 = vld [vmem:[%s1795_s3 + $0x40] sm:$0xff] }
 0x16c   :  { %1182 = vmatpush3.bf16.xpose.msra.mxu0 %v367_v46 }
 0x16e   :  { %v545_v48 = vpop.permute.xlu1 %544  ;;  %v541_v51 = vpop.permute.xlu0 %540 }
 0x16f   :  { %1168 = vmatmul.mubr.msk.bf16.vlgmr.msra.gmra.mrb[0].mxu1 %vm172_vm1, %v1454_v36  ;;  %1243 = vmatprep.subr.msk.bf16.mxu0 %vm172_vm1, %v545_v48  ;;  %v555_v50 = vsel %vm172_vm1, %v545_v48, 0 }
 0x170   :  { %1172 = vmatpush3.bf16.msra.mxu1 %v1447_v27 }
 0x171   :  { %1173 = vmatprep.subr.bf16.mxu1 %v1456_v37 }
 0x172   :  { %v547_v49 = vpop.permute.xlu1 %546 }
 0x173   :  { %1184 = vmatmul.mubr.msk.bf16.vlgmr.msra.gmra.mrb[8].mxu0 %vm172_vm1, %v352_v47  ;;  %v558_v54 = vsel %vm172_vm1, %v547_v49, 0 }
 0x174   :  { %1174 = vmatpush3.bf16.msra.mxu1 %v1456_v37  ;;  %1196 = vmatpush3.bf16.xpose.msra.mxu0 %v555_v50  ;;  %v1103_v50 = vld [vmem:[%s1795_s3 + $0x48] sm:$0xff] }
 0x175   :  { %1199 = vmatprep.mubr.msk.bf16.mxu0 %vm172_vm1, %v541_v51  ;;  %1244 = vmatprep.subr.msk.bf16.mxu0 %vm172_vm1, %v547_v49 }
 0x176   :  { %v543_v52 = vpop.permute.xlu1 %542 }
 0x17a   :  { %v1495_v53 = vpop.permute.xlu1 %466 }
 0x17b   :  { %1187 = vmatprep.subr.bf16.mxu1 %v1495_v53 }
 0x17c   :  { %1198 = vmatpush3.bf16.xpose.msra.mxu0 %v558_v54 }
 0x183   :  { %1200 = vmatmul.mubr.msk.bf16.vlgmr.msra.gmra.mrb[12].mxu0 %vm172_vm1, %v543_v52 }
 0x242   :  { %v1169_v55 = vpop.f32.mrb[0].mxu1 }
 0x243   :  { %v236_v57 = vmul.f32 0.25, %v1169_v55  ;;  %v219_v58 = vpop.f32.mrb[1].mxu1 }
 0x244   :  { %v234_v59 = vmul.f32 0.25, %v219_v58  ;;  %v1170_v60 = vpop.f32.mrb[2].mxu1 }
 0x245   :  { %v222_v62 = vpop.f32.mrb[3].mxu1  ;;  %v1506_v63 = vadd.f32 %v236_v57, %v164_v56  ;;  %v237_v0 = vmul.f32 0.25, %v1170_v60 }
 0x246   :  { %v1185_v1 = vpop.f32.mrb[8].mxu0  ;;  %v1513_v6 = vadd.f32 %v234_v59, %v162_v61  ;;  %v235_v13 = vmul.f32 0.25, %v222_v62 }
 0x247   :  { %v420_v3 = vmul.f32 0.25, %v1185_v1  ;;  %v403_v4 = vpop.f32.mrb[9].mxu0  ;;  %v249_v5 = vsel %vm242_vm2, %v1506_v63, -inf  ;;  %v1523_v14 = vadd.f32 %v237_v0, %v165_v7 }
 0x248   :  { %v418_v8 = vmul.f32 0.25, %v403_v4  ;;  %v1186_v9 = vpop.f32.mrb[10].mxu0  ;;  %250 = vmax.xlane.f32.xlu0 %v249_v5  ;;  %v243_v17 = vsel %vm242_vm2, %v1513_v6, -inf  ;;  %v1537_v21 = vadd.f32 %v235_v13, %v163_v19 }
 0x249   :  { %v406_v11 = vpop.f32.mrb[11].mxu0  ;;  %v1521_v12 = vadd.f32 %v1096_v2, %v420_v3  ;;  %v421_v15 = vmul.f32 0.25, %v1186_v9  ;;  %v252_v24 = vsel %vm242_vm2, %v1523_v14, -inf }
 0x24a   :  { %v1529_v18 = vadd.f32 %v1094_v10, %v418_v8  ;;  %v419_v22 = vmul.f32 0.25, %v406_v11  ;;  %v246_v30 = vsel %vm242_vm2, %v1537_v21, -inf }
 0x24b   :  { %v432_v16 = vsel %vm242_vm2, %v1521_v12, -inf  ;;  %v1543_v25 = vadd.f32 %v1097_v20, %v421_v15 }
 0x24c   :  { %433 = vmax.xlane.f32.xlu1 %v432_v16  ;;  %244 = vmax.xlane.f32.xlu0 %v243_v17  ;;  %v426_v23 = vsel %vm242_vm2, %v1529_v18, -inf  ;;  %v1552_v31 = vadd.f32 %v1095_v28, %v419_v22 }
 0x24d   :  { %v435_v29 = vsel %vm242_vm2, %v1543_v25, -inf }
 0x24e   :  { %v429_v34 = vsel %vm242_vm2, %v1552_v31, -inf }
 0x250   :  { %427 = vmax.xlane.f32.xlu1 %v426_v23  ;;  %253 = vmax.xlane.f32.xlu0 %v252_v24 }
 0x254   :  { %436 = vmax.xlane.f32.xlu0 %v435_v29  ;;  %247 = vmax.xlane.f32.xlu1 %v246_v30 }
 0x256   :  { %v1201_v32 = vpop.f32.mrb[12].mxu0 }
 0x257   :  { %v594_v33 = vpop.f32.mrb[13].mxu0  ;;  %v611_v39 = vmul.f32 0.25, %v1201_v32 }
 0x258   :  { %v1202_v35 = vpop.f32.mrb[14].mxu0  ;;  %430 = vmax.xlane.f32.xlu0 %v429_v34  ;;  %v609_v41 = vmul.f32 0.25, %v594_v33 }
 0x259   :  { %v597_v38 = vpop.f32.mrb[15].mxu0  ;;  %v612_v42 = vmul.f32 0.25, %v1202_v35  ;;  %v1563_v43 = vadd.f32 %v1104_v40, %v611_v39 }
 0x25a   :  { %v610_v46 = vmul.f32 0.25, %v597_v38  ;;  %v1575_v49 = vadd.f32 %v1102_v45, %v609_v41 }
 0x25b   :  { %v623_v47 = vsel %vm242_vm2, %v1563_v43, -inf  ;;  %v1573_v48 = vadd.f32 %v1105_v44, %v612_v42 }
 0x25c   :  { %v617_v52 = vsel %vm242_vm2, %v1575_v49, -inf  ;;  %v1584_v54 = vadd.f32 %v1103_v50, %v610_v46 }
 0x25d   :  { %v626_v51 = vsel %vm242_vm2, %v1573_v48, -inf }
 0x25e   :  { %v620_v55 = vsel %vm242_vm2, %v1584_v54, -inf }
 0x265   :  { %655 = vrot.lane.b32.xlu1 %v1447_v27, %s1372_s20 }
 0x26e   :  { %468 = vrot.lane.b32.xlu0 %v1456_v37, %s1370_s18 }
 0x289   :  { %624 = vmax.xlane.f32.xlu1 %v623_v47 }
 0x28d   :  { %627 = vmax.xlane.f32.xlu0 %v626_v51  ;;  %618 = vmax.xlane.f32.xlu1 %v617_v52 }
 0x291   :  { %621 = vmax.xlane.f32.xlu0 %v620_v55 }
 0x29e   :  { %657 = vrot.lane.b32.xlu1 %v1456_v37, %s1372_s20 }
 0x2a2   :  { %735 = vrot.lane.b32.xlu1 %v1454_v36, %s1373_s21 }
 0x2a6   :  { %731 = vrot.lane.b32.xlu1 %v1454_v36, %s1374_s22 }
 0x2a7   :  { %733 = vrot.lane.b32.xlu0 %v1445_v26, %s1373_s21 }
 0x2ab   :  { %729 = vrot.lane.b32.xlu0 %v1445_v26, %s1374_s22 }
 0x2d5   :  { %v251_v56 = vpop.xlane.xlu0 %250 }
 0x2d6   :  { %v257_v0 = vsub.f32 %v1506_v63, %v251_v56 }
 0x2d8   :  { %v263_v26 = vmul.f32 1.442695, %v257_v0 }
 0x2d9   :  { %v434_v57 = vpop.xlane.xlu1 %433  ;;  %v245_v58 = vpop.xlane.xlu0 %244 }
 0x2da   :  { %v255_v59 = vsub.f32 %v1513_v6, %v245_v58  ;;  %v440_v63 = vsub.f32 %v1521_v12, %v434_v57 }
 0x2dc   :  { %v259_v1 = vmul.f32 1.442695, %v255_v59 }
 0x2dd   :  { %v428_v60 = vpop.xlane.xlu1 %427  ;;  %v254_v61 = vpop.xlane.xlu0 %253 }
 0x2de   :  { %v258_v62 = vsub.f32 %v1523_v14, %v254_v61  ;;  %v438_v36 = vsub.f32 %v1529_v18, %v428_v60  ;;  %1303 = vpow2.f32 %v259_v1  ;;  %v446_v14 = vmul.f32 1.442695, %v440_v63 }
 0x2e0   :  { %v265_v4 = vmul.f32 1.442695, %v258_v62  ;;  %v442_v8 = vmul.f32 1.442695, %v438_v36 }
 0x2e1   :  { %v437_v2 = vpop.xlane.xlu0 %436  ;;  %v248_v3 = vpop.xlane.xlu1 %247 }
 0x2e2   :  { %v256_v5 = vsub.f32 %v1537_v21, %v248_v3  ;;  %1305 = vpow2.f32 %v265_v4  ;;  %v441_v6 = vsub.f32 %v1543_v25, %v437_v2 }
 0x2e4   :  { %v261_v7 = vmul.f32 1.442695, %v256_v5  ;;  %v448_v13 = vmul.f32 1.442695, %v441_v6 }
 0x2e5   :  { %v431_v9 = vpop.xlane.xlu0 %430  ;;  %v656_v28 = vpop.permute.xlu1 %655 }
 0x2e6   :  { %v439_v10 = vsub.f32 %v1552_v31, %v431_v9  ;;  %1307 = vpow2.f32 %v261_v7 }
 0x2e7   :  { %1309 = vpow2.f32 %v263_v26  ;;  %v1112_v26 = vld [vmem:[%s1795_s3 + $0x70] sm:$0xff] }
 0x2e8   :  { %v444_v11 = vmul.f32 1.442695, %v439_v10  ;;  %1311 = vpow2.f32 %v442_v8  ;;  %v1606_v15 = vpop.eup %1303  ;;  %v1110_v10 = vld [vmem:[%s1795_s3 + $0x60] sm:$0xff] }
 0x2e9   :  { %v469_v23 = vpop.permute.xlu0 %468 }
 0x2ea   :  { %1313 = vpow2.f32 %v444_v11 }
 0x2eb   :  { %1315 = vpow2.f32 %v448_v13  ;;  %v1111_v13 = vld [vmem:[%s1795_s3 + $0x68] sm:$0xff] }
 0x2ec   :  { %v1608_v16 = vpop.eup %1305  ;;  %1317 = vpow2.f32 %v446_v14 }
 0x2f0   :  { %v1610_v17 = vpop.eup %1307 }
 0x2f1   :  { %v1612_v18 = vpop.eup %1309  ;;  %v279_v19 = vpack.c.bf16 %v1610_v17, %v1606_v15 }
 0x2f2   :  { %v1616_v20 = vpop.eup %1311  ;;  %v280_v12 = vpack.c.bf16 %v1608_v16, %v1612_v18 }
 0x2f3   :  { %1175 = vmatprep.mubr.msk.bf16.mxu1 %vm242_vm2, %v279_v19 }
 0x2f4   :  { %v1620_v21 = vpop.eup %1313  ;;  %1176 = vmatmul.mubr.msk.bf16.vlgmr.msra.gmra.mrb[4].mxu1 %vm242_vm2, %v280_v12 }
 0x2f5   :  { %v462_v22 = vpack.c.bf16 %v1620_v21, %v1616_v20  ;;  %1188 = vmatpush3.bf16.msra.mxu1 %v1495_v53  ;;  %v1628_v24 = vpop.eup %1315 }
 0x2f6   :  { %1189 = vmatprep.subr.bf16.mxu1 %v469_v23  ;;  %v1630_v25 = vpop.eup %1317 }
 0x2f7   :  { %1191 = vmatprep.mubr.msk.bf16.mxu1 %vm242_vm2, %v462_v22  ;;  %v463_v29 = vpack.c.bf16 %v1628_v24, %v1630_v25 }
 0x2f9   :  { %1190 = vmatpush3.bf16.msra.mxu1 %v469_v23 }
 0x2fa   :  { %1203 = vmatprep.subr.bf16.mxu1 %v656_v28 }
 0x2fc   :  { %1192 = vmatmul.mubr.msk.bf16.vlgmr.msra.gmra.mrb[8].mxu1 %vm242_vm2, %v463_v29 }
 0x2fd   :  { %1204 = vmatpush3.bf16.msra.mxu1 %v656_v28  ;;  %v1113_v28 = vld [vmem:[%s1795_s3 + $0x78] sm:$0xff] }
 0x316   :  { %v625_v30 = vpop.xlane.xlu1 %624 }
 0x317   :  { %v631_v34 = vsub.f32 %v1563_v43, %v625_v30 }
 0x319   :  { %v637_v42 = vmul.f32 1.442695, %v631_v34  ;;  %v453_v34 = vsel %vm242_vm2, %v1620_v21, 0.0 }
 0x31a   :  { %v628_v31 = vpop.xlane.xlu0 %627  ;;  %v619_v32 = vpop.xlane.xlu1 %618 }
 0x31b   :  { %v632_v53 = vsub.f32 %v1573_v48, %v628_v31  ;;  %v629_v33 = vsub.f32 %v1575_v49, %v619_v32 }
 0x31d   :  { %v639_v35 = vmul.f32 1.442695, %v632_v53  ;;  %v633_v38 = vmul.f32 1.442695, %v629_v33  ;;  %v450_v53 = vsel %vm242_vm2, %v1616_v20, 0.0  ;;  %v456_v33 = vsel %vm242_vm2, %v1630_v25, 0.0 }
 0x31e   :  { %v622_v39 = vpop.xlane.xlu0 %621  ;;  %v658_v40 = vpop.permute.xlu1 %657 }
 0x31f   :  { %v630_v41 = vsub.f32 %v1584_v54, %v622_v39  ;;  %1205 = vmatprep.subr.bf16.mxu1 %v658_v40  ;;  %1319 = vpow2.f32 %v639_v35 }
 0x320   :  { %1206 = vmatpush3.bf16.msra.mxu1 %v658_v40  ;;  %1321 = vpow2.f32 %v633_v38 }
 0x321   :  { %v635_v44 = vmul.f32 1.442695, %v630_v41 }
 0x322   :  { %v734_v45 = vpop.permute.xlu0 %733  ;;  %v736_v54 = vpop.permute.xlu1 %735 }
 0x323   :  { %1323 = vpow2.f32 %v635_v44  ;;  %1245 = vmatprep.subr.msk.bf16.mxu1 %vm172_vm1, %v734_v45  ;;  %v744_v51 = vsel %vm172_vm1, %v734_v45, 0  ;;  %v747_v55 = vsel %vm172_vm1, %v736_v54, 0 }
 0x324   :  { %1325 = vpow2.f32 %v637_v42 }
 0x326   :  { %v730_v52 = vpop.permute.xlu0 %729  ;;  %v732_v56 = vpop.permute.xlu1 %731 }
 0x329   :  { %v1640_v46 = vpop.eup %1319 }
 0x32a   :  { %v1322_v43 = vpop.eup %1321  ;;  %v650_v25 = vsel %vm242_vm2, %v1640_v46, 0.0 }
 0x32b   :  { %v641_v35 = vsel %vm242_vm2, %v1322_v43, 0.0 }
 0x32d   :  { %v1642_v47 = vpop.eup %1323 }
 0x32e   :  { %v1644_v48 = vpop.eup %1325  ;;  %v653_v49 = vpack.c.bf16 %v1642_v47, %v1322_v43  ;;  %v644_v20 = vsel %vm242_vm2, %v1642_v47, 0.0 }
 0x32f   :  { %v654_v50 = vpack.c.bf16 %v1640_v46, %v1644_v48 }
 0x330   :  { %1207 = vmatprep.mubr.msk.bf16.mxu1 %vm242_vm2, %v653_v49 }
 0x331   :  { %1208 = vmatmul.mubr.msk.bf16.vlgmr.msra.gmra.mrb[12].mxu1 %vm242_vm2, %v654_v50 }
 0x332   :  { %1212 = vmatpush3.bf16.xpose.msra.mxu1 %v744_v51  ;;  %1215 = vmatprep.mubr.msk.bf16.mxu1 %vm172_vm1, %v730_v52 }
 0x333   :  { %1246 = vmatprep.subr.msk.bf16.mxu1 %vm172_vm1, %v736_v54 }
 0x33a   :  { %1214 = vmatpush3.bf16.xpose.msra.mxu1 %v747_v55 }
 0x341   :  { %1216 = vmatmul.mubr.msk.bf16.vlgmr.msra.gmra.mrb[16].mxu1 %vm172_vm1, %v732_v56 }
 0x3c7   :  { %v1656_v57 = vpop.f32.mrb[4].mxu1 }
 0x3c8   :  { %v1658_v58 = vpop.f32.mrb[5].mxu1 }
 0x3c9   :  { %v1660_v59 = vpop.f32.mrb[6].mxu1 }
 0x3ca   :  { %v1662_v60 = vpop.f32.mrb[7].mxu1 }
 0x3cf   :  { %v1664_v61 = vpop.f32.mrb[8].mxu1 }
 0x3d0   :  { %v1666_v62 = vpop.f32.mrb[9].mxu1 }
 0x3d1   :  { %v1668_v0 = vpop.f32.mrb[10].mxu1 }
 0x3d2   :  { %v1670_v1 = vpop.f32.mrb[11].mxu1 }
 0x404   :  { %v1672_v36 = vpop.f32.mrb[12].mxu1 }
 0x405   :  { %v1674_v2 = vpop.f32.mrb[13].mxu1 }
 0x406   :  { %v1676_v3 = vpop.f32.mrb[14].mxu1 }
 0x407   :  { %v1678_v4 = vpop.f32.mrb[15].mxu1 }
 0x414   :  { %v1217_v5 = vpop.f32.mrb[16].mxu1 }
 0x415   :  { %v800_v7 = vmul.f32 0.25, %v1217_v5  ;;  %v783_v8 = vpop.f32.mrb[17].mxu1 }
 0x416   :  { %v798_v9 = vmul.f32 0.25, %v783_v8  ;;  %v1218_v6 = vpop.f32.mrb[18].mxu1 }
 0x417   :  { %v786_v63 = vpop.f32.mrb[19].mxu1  ;;  %v804_v11 = vadd.f32 %v1112_v26, %v800_v7  ;;  %v801_v19 = vmul.f32 0.25, %v1218_v6  ;;  %v270_v6 = vsel %vm242_vm2, %v1610_v17, 0.0 }
 0x418   :  { %v799_v14 = vmul.f32 0.25, %v786_v63  ;;  %v802_v22 = vadd.f32 %v1110_v10, %v798_v9  ;;  %v267_v9 = vsel %vm242_vm2, %v1606_v15, 0.0  ;;  %v273_v10 = vsel %vm242_vm2, %v1612_v18, 0.0 }
 0x419   :  { %v812_v12 = vsel %vm242_vm2, %v804_v11, -inf  ;;  %v805_v31 = vadd.f32 %v1113_v28, %v801_v19  ;;  %v276_v63 = vsel %vm242_vm2, %v1608_v16, 0.0 }
 0x41a   :  { %813 = vmax.xlane.f32.xlu0 %v812_v12  ;;  %v803_v23 = vadd.f32 %v1111_v13, %v799_v14  ;;  %v806_v30 = vsel %vm242_vm2, %v802_v22, -inf }
 0x41b   :  { %v815_v32 = vsel %vm242_vm2, %v805_v31, -inf }
 0x41c   :  { %v809_v29 = vsel %vm242_vm2, %v803_v23, -inf }
 0x41d   :  { %810 = vmax.xlane.f32.xlu1 %v809_v29 }
 0x41e   :  { %807 = vmax.xlane.f32.xlu0 %v806_v30 }
 0x422   :  { %816 = vmax.xlane.f32.xlu0 %v815_v32 }
 0x42e   :  { %844 = vrot.lane.b32.xlu1 %v1447_v27, %s1374_s22  ;;  %v459_v27 = vsel %vm242_vm2, %v1628_v24, 0.0 }
 0x438   :  { %846 = vrot.lane.b32.xlu0 %v1456_v37, %s1374_s22  ;;  %v647_v37 = vsel %vm242_vm2, %v1644_v48, 0.0 }
 0x452   :  { %451 = vadd.xlane.f32.xlu1 %v450_v53 }
 0x456   :  { %457 = vadd.xlane.f32.xlu1 %v456_v33 }
 0x457   :  { %454 = vadd.xlane.f32.xlu0 %v453_v34 }
 0x45a   :  { %642 = vadd.xlane.f32.xlu1 %v641_v35 }
 0x45b   :  { %460 = vadd.xlane.f32.xlu0 %v459_v27 }
 0x45e   :  { %648 = vadd.xlane.f32.xlu1 %v647_v37 }
 0x45f   :  { %645 = vadd.xlane.f32.xlu0 %v644_v20 }
 0x463   :  { %651 = vadd.xlane.f32.xlu0 %v650_v25 }
 0x4a7   :  { %v814_v21 = vpop.xlane.xlu0 %813 }
 0x4a8   :  { %v820_v38 = vsub.f32 %v804_v11, %v814_v21 }
 0x4aa   :  { %v811_v39 = vpop.xlane.xlu1 %810  ;;  %v826_v44 = vmul.f32 1.442695, %v820_v38 }
 0x4ab   :  { %v819_v40 = vsub.f32 %v803_v23, %v811_v39  ;;  %v808_v41 = vpop.xlane.xlu0 %807 }
 0x4ac   :  { %v818_v42 = vsub.f32 %v802_v22, %v808_v41 }
 0x4ad   :  { %v824_v24 = vmul.f32 1.442695, %v819_v40  ;;  %v1302_v40 = vld [vmem:[%s1796_s4 + $0x18] sm:$0xff]  }
 0x4ae   :  { %v822_v45 = vmul.f32 1.442695, %v818_v42  ;;  %v845_v43 = vpop.permute.xlu1 %844 }
 0x4af   :  { %1327 = vpow2.f32 %v824_v24  ;;  %v817_v48 = vpop.xlane.xlu0 %816  ;;  %1219 = vmatprep.subr.bf16.mxu1 %v845_v43 }
 0x4b0   :  { %1329 = vpow2.f32 %v822_v45  ;;  %v821_v47 = vsub.f32 %v805_v31, %v817_v48  ;;  %1220 = vmatpush3.bf16.msra.mxu1 %v845_v43 }
 0x4b1   :  { %1331 = vpow2.f32 %v826_v44 }
 0x4b2   :  { %v828_v49 = vmul.f32 1.442695, %v821_v47 }
 0x4b3   :  { %v847_v46 = vpop.permute.xlu0 %846 }
 0x4b4   :  { %1333 = vpow2.f32 %v828_v49  ;;  %1221 = vmatprep.subr.bf16.mxu1 %v847_v46 }
 0x4b5   :  { %1222 = vmatpush3.bf16.msra.mxu1 %v847_v46 }
 0x4b9   :  { %v1328_v50 = vpop.eup %1327 }
 0x4ba   :  { %v1330_v51 = vpop.eup %1329  ;;  %v833_v52 = vsel %vm242_vm2, %v1328_v50, 0.0 }
 0x4bb   :  { %834 = vadd.xlane.f32.xlu0 %v833_v52  ;;  %v830_v54 = vsel %vm242_vm2, %v1330_v51, 0.0  ;;  %v842_v55 = vpack.c.bf16 %v1328_v50, %v1330_v51  ;;  %v1332_v56 = vpop.eup %1331 }
 0x4bc   :  { %831 = vadd.xlane.f32.xlu1 %v830_v54  ;;  %v836_v26 = vsel %vm242_vm2, %v1332_v56, 0.0 }
 0x4bd   :  { %1223 = vmatprep.mubr.msk.bf16.mxu1 %vm242_vm2, %v842_v55 }
 0x4be   :  { %v1334_v5 = vpop.eup %1333 }
 0x4bf   :  { %v839_v7 = vsel %vm242_vm2, %v1334_v5, 0.0  ;;  %v843_v8 = vpack.c.bf16 %v1334_v5, %v1332_v56 }
 0x4c0   :  { %837 = vadd.xlane.f32.xlu1 %v836_v26  ;;  %840 = vadd.xlane.f32.xlu0 %v839_v7 }
 0x4c1   :  { %1224 = vmatmul.mubr.msk.bf16.vlgmr.msra.gmra.mrb[20].mxu1 %vm242_vm2, %v843_v8 }
 0x4c4   :  { %268 = vadd.xlane.f32.xlu1 %v267_v9  ;;  %271 = vadd.xlane.f32.xlu0 %v270_v6 }
 0x4c8   :  { %274 = vadd.xlane.f32.xlu1 %v273_v10  ;;  %277 = vadd.xlane.f32.xlu0 %v276_v63 }
 0x4df   :  { %v452_v11 = vpop.xlane.xlu1 %451 }
 0x4e0   :  { %1335 = vrcp.f32 %v452_v11 }
 0x4e3   :  { %v458_v13 = vpop.xlane.xlu1 %457 }
 0x4e4   :  { %v455_v14 = vpop.xlane.xlu0 %454 }
 0x4e5   :  { %1337 = vrcp.f32 %v455_v14 }
 0x4e6   :  { %1339 = vrcp.f32 %v458_v13 }
 0x4e7   :  { %v643_v15 = vpop.xlane.xlu1 %642 }
 0x4e8   :  { %v461_v19 = vpop.xlane.xlu0 %460 }
 0x4e9   :  { %1341 = vrcp.f32 %v461_v19 }
 0x4ea   :  { %1343 = vrcp.f32 %v643_v15  ;;  %v1336_v22 = vpop.eup %1335 }
 0x4eb   :  { %v649_v17 = vpop.xlane.xlu1 %648  ;;  %v531_v16 = vmul.f32 %v1336_v22, %v1666_v62 }
 0x4ec   :  { %v646_v12 = vpop.xlane.xlu0 %645 }
 0x4ed   :  { %1345 = vrcp.f32 %v646_v12 }
 0x4ee   :  { %1347 = vrcp.f32 %v649_v17 }
 0x4ef   :  { %v1338_v18 = vpop.eup %1337 }
 0x4f0   :  { %v652_v23 = vpop.xlane.xlu0 %651  ;;  %v532_v28 = vmul.f32 %v1338_v18, %v1670_v1  ;;  %v1340_v29 = vpop.eup %1339 }
 0x4f1   :  { %1349 = vrcp.f32 %v652_v23  ;;  %v533_v32 = vmul.f32 %v1340_v29, %v1664_v61 }
 0x4f2   :  { %v1255_v30 = vpack.i.bf16 %v532_v28, %v531_v16 }
 0x4f3   :  { %v1342_v31 = vpop.eup %1341 }
 0x4f4   :  { %1256 = vrot.lane.b32.xlu1 %v1255_v30, %s1373_s21  ;;  %v534_v53 = vmul.f32 %v1342_v31, %v1668_v0  ;;  %v1344_v33 = vpop.eup %1343  ;;  %v1299_v0 = vld [vmem:[%s1796_s4] sm:$0xff]  }
 0x4f5   :  { %v720_v27 = vmul.f32 %v1344_v33, %v1674_v2  ;;  %v1300_v2 = vld [vmem:[%s1796_s4 + $0x8] sm:$0xff]   ;;  %1227 = vmatprep.subr.bf16.mxu0 %v1299_v0 }
 0x4f6   :  { %v1260_v34 = vpack.i.bf16 %v534_v53, %v533_v32  ;;  %1228 = vmatpush3.bf16.msra.mxu0 %v1299_v0 }
 0x4f7   :  { %v1346_v35 = vpop.eup %1345  ;;  %1229 = vmatprep.subr.bf16.mxu0 %v1300_v2 }
 0x4f8   :  { %1261 = vrot.lane.b32.xlu0 %v1260_v34, %s1373_s21  ;;  %v721_v62 = vmul.f32 %v1346_v35, %v1678_v4  ;;  %v1348_v1 = vpop.eup %1347 }
 0x4f9   :  { %v722_v25 = vmul.f32 %v1348_v1, %v1672_v36  ;;  %v1301_v36 = vld [vmem:[%s1796_s4 + $0x10] sm:$0xff]  }
 0x4fa   :  { %v1265_v37 = vpack.i.bf16 %v721_v62, %v720_v27  ;;  %1230 = vmatpush3.bf16.msra.mxu0 %v1300_v2 }
 0x4fb   :  { %v1350_v20 = vpop.eup %1349  ;;  %1231 = vmatprep.subr.bf16.mxu0 %v1301_v36 }
 0x4fc   :  { %1266 = vrot.lane.b32.xlu1 %v1265_v37, %s1371_s19  ;;  %v723_v61 = vmul.f32 %v1350_v20, %v1676_v3 }
 0x4fe   :  { %v1270_v21 = vpack.i.bf16 %v723_v61, %v722_v25  ;;  %1232 = vmatpush3.bf16.msra.mxu0 %v1301_v36  ;;  %v1118_v36 = vld [vmem:[%s1797_s5] ss:$0 sm:$0xff] }
 0x4ff   :  { %1233 = vmatprep.subr.bf16.mxu0 %v1302_v40 }
 0x500   :  { %1271 = vrot.lane.b32.xlu1 %v1270_v21, %s1371_s19 }
 0x502   :  { %1234 = vmatpush3.bf16.msra.mxu0 %v1302_v40 }
 0x548   :  { %v835_v3 = vpop.xlane.xlu0 %834 }
 0x549   :  { %v832_v4 = vpop.xlane.xlu1 %831  ;;  %1351 = vrcp.f32 %v835_v3 }
 0x54d   :  { %v841_v38 = vpop.xlane.xlu0 %840  ;;  %v838_v39 = vpop.xlane.xlu1 %837 }
 0x54e   :  { %1353 = vrcp.f32 %v841_v38 }
 0x54f   :  { %1355 = vrcp.f32 %v838_v39 }
 0x550   :  { %1357 = vrcp.f32 %v832_v4 }
 0x551   :  { %v269_v55 = vpop.xlane.xlu1 %268  ;;  %v272_v56 = vpop.xlane.xlu0 %271 }
 0x552   :  { %1359 = vrcp.f32 %v272_v56 }
 0x553   :  { %v1352_v41 = vpop.eup %1351  ;;  %1361 = vrcp.f32 %v269_v55 }
 0x555   :  { %v275_v5 = vpop.xlane.xlu1 %274  ;;  %v278_v26 = vpop.xlane.xlu0 %277 }
 0x556   :  { %1363 = vrcp.f32 %v278_v26 }
 0x557   :  { %1365 = vrcp.f32 %v275_v5 }
 0x558   :  { %v1354_v24 = vpop.eup %1353 }
 0x559   :  { %v1356_v45 = vpop.eup %1355 }
 0x55a   :  { %v1358_v48 = vpop.eup %1357 }
 0x55c   :  { %v1360_v9 = vpop.eup %1359 }
 0x55d   :  { %v1362_v6 = vpop.eup %1361  ;;  %v341_v22 = vmul.f32 %v1360_v9, %v1662_v60 }
 0x55e   :  { %v340_v12 = vmul.f32 %v1362_v6, %v1658_v58 }
 0x560   :  { %v1364_v63 = vpop.eup %1363 }
 0x561   :  { %v1366_v13 = vpop.eup %1365  ;;  %v343_v16 = vmul.f32 %v1364_v63, %v1660_v59 }
 0x562   :  { %v342_v28 = vmul.f32 %v1366_v13, %v1656_v57 }
 0x566   :  { %v1257_v7 = vpop.permute.xlu1 %1256 }
 0x567   :  { %v1259_v14 = vunpack.i.h.bf16 %v1257_v7  ;;  %v1258_v15 = vunpack.i.l.bf16 %v1257_v7 }
 0x569   :  { %v962_v31 = vsel %vm172_vm1, %v341_v22, %v1259_v14  ;;  %v961_v32 = vsel %vm172_vm1, %v340_v12, %v1258_v15 }
 0x56a   :  { %v1262_v10 = vpop.permute.xlu0 %1261 }
 0x56b   :  { %v1264_v19 = vunpack.i.h.bf16 %v1262_v10  ;;  %v1263_v17 = vunpack.i.l.bf16 %v1262_v10 }
 0x56d   :  { %v964_v33 = vsel %vm172_vm1, %v343_v16, %v1264_v19  ;;  %v963_v58 = vsel %vm172_vm1, %v342_v28, %v1263_v17 }
 0x56e   :  { %v1267_v8 = vpop.permute.xlu1 %1266 }
 0x56f   :  { %v1269_v29 = vunpack.i.h.bf16 %v1267_v8  ;;  %v1268_v30 = vunpack.i.l.bf16 %v1267_v8 }
 0x571   :  { %v965_v1 = vsel %vm242_vm2, %v961_v32, %v1268_v30  ;;  %v966_v37 = vsel %vm242_vm2, %v962_v31, %v1269_v29 }
 0x572   :  { %v1272_v11 = vpop.permute.xlu1 %1271 }
 0x573   :  { %v1274_v18 = vunpack.i.h.bf16 %v1272_v11  ;;  %v1273_v23 = vunpack.i.l.bf16 %v1272_v11 }
 0x575   :  { %v968_v27 = vsel %vm242_vm2, %v964_v33, %v1274_v18  ;;  %v967_v59 = vsel %vm242_vm2, %v963_v58, %v1273_v23 }
 0x594   :  { %v1225_v42 = vpop.f32.mrb[20].mxu1 }
 0x595   :  { %v890_v44 = vpop.f32.mrb[21].mxu1  ;;  %v911_v47 = vmul.f32 %v1356_v45, %v1225_v42 }
 0x596   :  { %v1226_v43 = vpop.f32.mrb[22].mxu1  ;;  %v909_v50 = vmul.f32 %v1358_v48, %v890_v44 }
 0x597   :  { %v912_v49 = vmul.f32 %v1354_v24, %v1226_v43  ;;  %v893_v46 = vpop.f32.mrb[23].mxu1 }
 0x598   :  { %v910_v51 = vmul.f32 %v1352_v41, %v893_v46 }
 0x599   :  { %v1280_v52 = vpack.i.bf16 %v912_v49, %v911_v47 }
 0x59a   :  { %v1275_v54 = vpack.i.bf16 %v910_v51, %v909_v50 }
 0x59b   :  { %1281 = vrot.lane.b32.xlu1 %v1280_v52, %s1369_s2 }
 0x59c   :  { %1276 = vrot.lane.b32.xlu0 %v1275_v54, %s1369_s2 }
 0x60d   :  { %v1282_v53 = vpop.permute.xlu1 %1281 }
 0x60e   :  { %v1284_v34 = vunpack.i.h.bf16 %v1282_v53  ;;  %v1283_v60 = vunpack.i.l.bf16 %v1282_v53  ;;  %v1277_v35 = vpop.permute.xlu0 %1276 }
 0x60f   :  { %v1279_v57 = vunpack.i.h.bf16 %v1277_v35  ;;  %v1278_v62 = vunpack.i.l.bf16 %v1277_v35 }
 0x610   :  { %v972_v20 = vsel %vm969_vm3, %v967_v59, %v1283_v60  ;;  %v973_v25 = vsel %vm969_vm3, %v968_v27, %v1284_v34 }
 0x611   :  { %v975_v61 = vpack.c.bf16 %v973_v25, %v972_v20  ;;  %v970_v21 = vsel %vm969_vm3, %v965_v1, %v1278_v62  ;;  %v971_v0 = vsel %vm969_vm3, %v966_v37, %v1279_v57 }
 0x612   :  { %v974_v2 = vpack.c.bf16 %v971_v0, %v970_v21 }
 0x614   :  { %1235 = vmatprep.mubr.msk.bf16.mxu0 %vm98_vm0, %v974_v2 }
 0x615   :  { %1236 = vmatmul.mubr.msk.bf16.vlgmr.msra.gmra.mrb[16].mxu0 %vm98_vm0, %v975_v61 }
 0x6e8   :  { %v1237_v3 = vpop.f32.mrb[16].mxu0 }
 0x6e9   :  { %v1064_v4 = vadd.f32 %v1237_v3, %v1118_v36  ;;  %v1055_v38 = vpop.f32.mrb[17].mxu0 }
 0x6ea   :  { %v1056_v39 = vadd.f32 %v1118_v36, %v1055_v38  ;;  %v1238_v40 = vpop.f32.mrb[18].mxu0 }
 0x6eb   :  { %1072 = vst.msk [vmem:[%s1798_s6 + $0x10] sm:$0xff] %vm98_vm0, %v1064_v4  ;;  %v1067_v41 = vadd.f32 %v1238_v40, %v1118_v36  ;;  %v1058_v42 = vpop.f32.mrb[19].mxu0 }
 0x6ec   :  { %1070 = vst.msk [vmem:[%s1798_s6] sm:$0xff] %vm98_vm0, %v1056_v39  ;;  %v1059_v24 = vadd.f32 %v1118_v36, %v1058_v42 }
 0x6ed   :  { %1073 = vst.msk [vmem:[%s1798_s6 + $0x18] sm:$0xff] %vm98_vm0, %v1067_v41 }
 0x6ee   :  { %1071 = vst.msk [vmem:[%s1798_s6 + $0x8] sm:$0xff] %vm98_vm0, %v1059_v24 }

// kernel: _lambda_.33
= control target key start
LH: loop header
LB: loop body
LE: loop exit
PB: predicated region body
PF: predicated region fallthrough
CT: control target
= control target key end

     0   :  { %v192_v0 = vmov 0.0   ;;  %vm193_vm0 = vmmov 0   ;;  %vm135_vm1 = vcmask 31744   ;;  %s250_s1 = inlined_call_operand.vmem [shape: bf16[128,4], index: 1, kind: input, shape index: {}]   ;;  %s251_s0 = inlined_call_operand.vmem [shape: bf16[16,128], index: 0, kind: input, shape index: {}]   ;;  %s252_s2 = inlined_call_operand.vmem [shape: f32[1,4], index: 2, kind: input, shape index: {}]   ;;  %s253_s3 = inlined_call_operand.vmem [shape: f32[16,4], index: 3, kind: output, shape index: {}]  }
   0x1   :  { %161 = vmatprep.subr.bf16.mxu0 %v192_v0  ;;  %v183_v1 = vld [vmem:[%s250_s1] sm:$0xff]   ;;  %177 = vmatprep.mubr.msk.bf16.mxu0 %vm193_vm0, %v192_v0  ;;  %v184_v2 = vld [vmem:[%s250_s1 + $0x8] sm:$0xff]   ;;  %v185_v3 = vld [vmem:[%s250_s1 + $0x10] sm:$0xff]  }
   0x2   :  { %162 = vmatpush3.bf16.msra.mxu0 %v183_v1  ;;  %v186_v4 = vld [vmem:[%s250_s1 + $0x18] sm:$0xff]   ;;  %v187_v5 = vld [vmem:[%s250_s1 + $0x20] sm:$0xff]   ;;  %v188_v6 = vld [vmem:[%s250_s1 + $0x28] sm:$0xff]  }
   0x3   :  { %163 = vmatprep.subr.bf16.mxu0 %v192_v0  ;;  %v189_v7 = vld [vmem:[%s250_s1 + $0x30] sm:$0xff]   ;;  %v190_v8 = vld [vmem:[%s250_s1 + $0x38] sm:$0xff]   ;;  %v191_v9 = vld [vmem:[%s251_s0] sm:$0xff]  }
   0x4   :  { %v142_v10 = vld [vmem:[%s252_s2] ss:$0 sm:$0xff] }
   0x6   :  { %164 = vmatpush3.bf16.msra.mxu0 %v184_v2 }
   0x7   :  { %165 = vmatprep.subr.bf16.mxu0 %v192_v0 }
   0xa   :  { %166 = vmatpush3.bf16.msra.mxu0 %v185_v3 }
   0xb   :  { %167 = vmatprep.subr.bf16.mxu0 %v192_v0 }
   0xe   :  { %168 = vmatpush3.bf16.msra.mxu0 %v186_v4 }
   0xf   :  { %169 = vmatprep.subr.bf16.mxu0 %v192_v0 }
  0x12   :  { %170 = vmatpush3.bf16.msra.mxu0 %v187_v5 }
  0x13   :  { %171 = vmatprep.subr.bf16.mxu0 %v192_v0 }
  0x16   :  { %172 = vmatpush3.bf16.msra.mxu0 %v188_v6 }
  0x17   :  { %173 = vmatprep.subr.bf16.mxu0 %v192_v0 }
  0x1a   :  { %174 = vmatpush3.bf16.msra.mxu0 %v189_v7 }
  0x1b   :  { %175 = vmatprep.subr.bf16.mxu0 %v192_v0 }
  0x1e   :  { %176 = vmatpush3.bf16.msra.mxu0 %v190_v8 }
  0x21   :  { %178 = vmatmul.mubr.bf16.vlgmr.msra.gmra.mrb[0].mxu0 %v191_v9 }
  0xf4   :  { %v128_v11 = vpop.f32.mrb[0].mxu0 }
  0xf5   :  { %v129_v12 = vadd.f32 %v142_v10, %v128_v11  ;;  %v179_v13 = vpop.f32.mrb[1].mxu0 }
  0xf6   :  { %v131_v14 = vpop.f32.mrb[2].mxu0 }
  0xf7   :  { %136 = vst.msk [vmem:[%s253_s3] sm:$0xff] %vm135_vm1, %v129_v12  ;;  %v132_v15 = vadd.f32 %v142_v10, %v131_v14  ;;  %v180_v16 = vpop.f32.mrb[3].mxu0 }
  0xf9   :  { %137 = vst.msk [vmem:[%s253_s3 + $0x8] sm:$0xff] %vm135_vm1, %v132_v15 }

// kernel: _lambda_.32
= control target key start
LH: loop header
LB: loop body
LE: loop exit
PB: predicated region body
PF: predicated region fallthrough
CT: control target
= control target key end

     0   :  { %s1228_s1 = inlined_call_operand.vmem [shape: bf16[1024,128], index: 1, kind: input, shape index: {}]   ;;  %s1229_s0 = inlined_call_operand.vmem [shape: bf16[16,1024], index: 0, kind: input, shape index: {}]   ;;  %s1230_s2 = inlined_call_operand.vmem [shape: f32[1,128], index: 2, kind: input, shape index: {}]   ;;  %s1231_s3 = inlined_call_operand.vmem [shape: f32[16,128], index: 3, kind: output, shape index: {}]  }
   0x1   :  { %v915_v0 = vld [vmem:[%s1228_s1 + $0x40] sm:$0xff]   ;;  %v919_v4 = vld [vmem:[%s1228_s1 + $0x48] sm:$0xff]   ;;  %v923_v8 = vld [vmem:[%s1228_s1 + $0x50] sm:$0xff]  }
   0x2   :  { %v916_v1 = vld [vmem:[%s1228_s1 + $0xc0] sm:$0xff]   ;;  %827 = vmatprep.subr.bf16.mxu0 %v915_v0  ;;  %v920_v5 = vld [vmem:[%s1228_s1 + $0xc8] sm:$0xff]   ;;  %v924_v9 = vld [vmem:[%s1228_s1 + $0xd0] sm:$0xff]  }
   0x3   :  { %v917_v2 = vld [vmem:[%s1228_s1] sm:$0xff]   ;;  %849 = vmatprep.subr.bf16.mxu1 %v916_v1  ;;  %v921_v6 = vld [vmem:[%s1228_s1 + $0x8] sm:$0xff]   ;;  %v925_v10 = vld [vmem:[%s1228_s1 + $0x10] sm:$0xff]  }
   0x4   :  { %v918_v3 = vld [vmem:[%s1228_s1 + $0x80] sm:$0xff]   ;;  %828 = vmatpush3.bf16.msra.mxu0 %v917_v2  ;;  %v922_v7 = vld [vmem:[%s1228_s1 + $0x88] sm:$0xff]   ;;  %v926_v11 = vld [vmem:[%s1228_s1 + $0x90] sm:$0xff]  }
   0x5   :  { %850 = vmatpush3.bf16.msra.mxu1 %v918_v3  ;;  %829 = vmatprep.subr.bf16.mxu0 %v919_v4  ;;  %v927_v12 = vld [vmem:[%s1228_s1 + $0x58] sm:$0xff]   ;;  %v931_v16 = vld [vmem:[%s1228_s1 + $0x60] sm:$0xff]   ;;  %v935_v20 = vld [vmem:[%s1228_s1 + $0x68] sm:$0xff]  }
   0x6   :  { %851 = vmatprep.subr.bf16.mxu1 %v920_v5  ;;  %v928_v13 = vld [vmem:[%s1228_s1 + $0xd8] sm:$0xff]   ;;  %v932_v17 = vld [vmem:[%s1228_s1 + $0xe0] sm:$0xff]   ;;  %v936_v21 = vld [vmem:[%s1228_s1 + $0xe8] sm:$0xff]  }
   0x7   :  { %v929_v14 = vld [vmem:[%s1228_s1 + $0x18] sm:$0xff]   ;;  %v933_v18 = vld [vmem:[%s1228_s1 + $0x20] sm:$0xff]   ;;  %v937_v22 = vld [vmem:[%s1228_s1 + $0x28] sm:$0xff]  }
   0x8   :  { %830 = vmatpush3.bf16.msra.mxu0 %v921_v6  ;;  %v930_v15 = vld [vmem:[%s1228_s1 + $0x98] sm:$0xff]   ;;  %v934_v19 = vld [vmem:[%s1228_s1 + $0xa0] sm:$0xff]   ;;  %v938_v23 = vld [vmem:[%s1228_s1 + $0xa8] sm:$0xff]  }
   0x9   :  { %852 = vmatpush3.bf16.msra.mxu1 %v922_v7  ;;  %831 = vmatprep.subr.bf16.mxu0 %v923_v8  ;;  %v939_v24 = vld [vmem:[%s1228_s1 + $0x70] sm:$0xff]   ;;  %v943_v28 = vld [vmem:[%s1228_s1 + $0x78] sm:$0xff]   ;;  %v15_v32 = vld [vmem:[%s1229_s0] sm:$0xff] }
   0xa   :  { %853 = vmatprep.subr.bf16.mxu1 %v924_v9  ;;  %v940_v25 = vld [vmem:[%s1228_s1 + $0xf0] sm:$0xff]   ;;  %v944_v29 = vld [vmem:[%s1228_s1 + $0xf8] sm:$0xff]   ;;  %v19_v33 = vld [vmem:[%s1229_s0 + $0x20] sm:$0xff] }
   0xb   :  { %v941_v26 = vld [vmem:[%s1228_s1 + $0x30] sm:$0xff]   ;;  %v945_v30 = vld [vmem:[%s1228_s1 + $0x38] sm:$0xff]   ;;  %v16_v34 = vld [vmem:[%s1229_s0 + $0x8] sm:$0xff]  ;;  %v755_v35 = vcombine.low %v15_v32, %v19_v33  ;;  %v756_v36 = vcombine.high %v15_v32, %v19_v33 }
   0xc   :  { %832 = vmatpush3.bf16.msra.mxu0 %v925_v10  ;;  %v942_v27 = vld [vmem:[%s1228_s1 + $0xb0] sm:$0xff]   ;;  %v946_v31 = vld [vmem:[%s1228_s1 + $0xb8] sm:$0xff]   ;;  %v20_v37 = vld [vmem:[%s1229_s0 + $0x28] sm:$0xff] }
   0xd   :  { %854 = vmatpush3.bf16.msra.mxu1 %v926_v11  ;;  %833 = vmatprep.subr.bf16.mxu0 %v927_v12  ;;  %v757_v38 = vcombine.low %v16_v34, %v20_v37  ;;  %v758_v39 = vcombine.high %v16_v34, %v20_v37  ;;  %v947_v40 = vld [vmem:[%s1228_s1 + $0x140] sm:$0xff]   ;;  %v951_v44 = vld [vmem:[%s1228_s1 + $0x148] sm:$0xff]   ;;  %v955_v48 = vld [vmem:[%s1228_s1 + $0x150] sm:$0xff]  }
   0xe   :  { %855 = vmatprep.subr.bf16.mxu1 %v928_v13  ;;  %614 = vmatprep.mubr.bf16.mxu0 %v756_v36  ;;  %v948_v41 = vld [vmem:[%s1228_s1 + $0x1c0] sm:$0xff]   ;;  %v952_v45 = vld [vmem:[%s1228_s1 + $0x1c8] sm:$0xff]   ;;  %v956_v49 = vld [vmem:[%s1228_s1 + $0x1d0] sm:$0xff]  }
   0xf   :  { %655 = vmatprep.mubr.bf16.mxu1 %v758_v39  ;;  %v949_v42 = vld [vmem:[%s1228_s1 + $0x100] sm:$0xff]   ;;  %v953_v46 = vld [vmem:[%s1228_s1 + $0x108] sm:$0xff]   ;;  %v957_v50 = vld [vmem:[%s1228_s1 + $0x110] sm:$0xff]  }
  0x10   :  { %834 = vmatpush3.bf16.msra.mxu0 %v929_v14  ;;  %v950_v43 = vld [vmem:[%s1228_s1 + $0x180] sm:$0xff]   ;;  %v954_v47 = vld [vmem:[%s1228_s1 + $0x188] sm:$0xff]   ;;  %v958_v51 = vld [vmem:[%s1228_s1 + $0x190] sm:$0xff]  }
  0x11   :  { %856 = vmatpush3.bf16.msra.mxu1 %v930_v15  ;;  %835 = vmatprep.subr.bf16.mxu0 %v931_v16  ;;  %v959_v52 = vld [vmem:[%s1228_s1 + $0x158] sm:$0xff]   ;;  %v963_v56 = vld [vmem:[%s1228_s1 + $0x160] sm:$0xff]   ;;  %v967_v60 = vld [vmem:[%s1228_s1 + $0x168] sm:$0xff]  }
  0x12   :  { %857 = vmatprep.subr.bf16.mxu1 %v932_v17  ;;  %v960_v53 = vld [vmem:[%s1228_s1 + $0x1d8] sm:$0xff]   ;;  %v964_v57 = vld [vmem:[%s1228_s1 + $0x1e0] sm:$0xff]   ;;  %v968_v61 = vld [vmem:[%s1228_s1 + $0x1e8] sm:$0xff]  }
  0x13   :  { %v961_v54 = vld [vmem:[%s1228_s1 + $0x118] sm:$0xff]   ;;  %v965_v58 = vld [vmem:[%s1228_s1 + $0x120] sm:$0xff]   ;;  %v969_v62 = vld [vmem:[%s1228_s1 + $0x128] sm:$0xff]  }
  0x14   :  { %836 = vmatpush3.bf16.msra.mxu0 %v933_v18  ;;  %v962_v55 = vld [vmem:[%s1228_s1 + $0x198] sm:$0xff]   ;;  %v966_v59 = vld [vmem:[%s1228_s1 + $0x1a0] sm:$0xff]   ;;  %v970_v63 = vld [vmem:[%s1228_s1 + $0x1a8] sm:$0xff]  }
  0x15   :  { %858 = vmatpush3.bf16.msra.mxu1 %v934_v19  ;;  %837 = vmatprep.subr.bf16.mxu0 %v935_v20  ;;  %v971_v0 = vld [vmem:[%s1228_s1 + $0x170] sm:$0xff]   ;;  %v975_v4 = vld [vmem:[%s1228_s1 + $0x178] sm:$0xff]   ;;  %v754_v18 = vld [vmem:[%s1230_s2] ss:$0 sm:$0xff] }
  0x16   :  { %859 = vmatprep.subr.bf16.mxu1 %v936_v21  ;;  %v972_v1 = vld [vmem:[%s1228_s1 + $0x1f0] sm:$0xff]   ;;  %v976_v5 = vld [vmem:[%s1228_s1 + $0x1f8] sm:$0xff]  }
  0x17   :  { %v973_v2 = vld [vmem:[%s1228_s1 + $0x130] sm:$0xff]   ;;  %v977_v6 = vld [vmem:[%s1228_s1 + $0x138] sm:$0xff]  }
  0x18   :  { %838 = vmatpush3.bf16.msra.mxu0 %v937_v22  ;;  %v974_v3 = vld [vmem:[%s1228_s1 + $0x1b0] sm:$0xff]   ;;  %v978_v7 = vld [vmem:[%s1228_s1 + $0x1b8] sm:$0xff]  }
  0x19   :  { %860 = vmatpush3.bf16.msra.mxu1 %v938_v23  ;;  %839 = vmatprep.subr.bf16.mxu0 %v939_v24  ;;  %v17_v8 = vld [vmem:[%s1229_s0 + $0x10] sm:$0xff]  ;;  %v18_v12 = vld [vmem:[%s1229_s0 + $0x18] sm:$0xff] }
  0x1a   :  { %861 = vmatprep.subr.bf16.mxu1 %v940_v25  ;;  %v21_v9 = vld [vmem:[%s1229_s0 + $0x30] sm:$0xff]  ;;  %v22_v13 = vld [vmem:[%s1229_s0 + $0x38] sm:$0xff] }
  0x1b   :  { %v759_v10 = vcombine.low %v17_v8, %v21_v9  ;;  %v760_v11 = vcombine.high %v17_v8, %v21_v9  ;;  %v761_v14 = vcombine.low %v18_v12, %v22_v13  ;;  %v762_v15 = vcombine.high %v18_v12, %v22_v13 }
  0x1c   :  { %840 = vmatpush3.bf16.msra.mxu0 %v941_v26 }
  0x1d   :  { %862 = vmatpush3.bf16.msra.mxu1 %v942_v27  ;;  %841 = vmatprep.subr.bf16.mxu0 %v943_v28 }
  0x1e   :  { %863 = vmatprep.subr.bf16.mxu1 %v944_v29 }
  0x20   :  { %842 = vmatpush3.bf16.msra.mxu0 %v945_v30 }
  0x21   :  { %864 = vmatpush3.bf16.msra.mxu1 %v946_v31  ;;  %871 = vmatprep.subr.bf16.mxu0 %v947_v40 }
  0x22   :  { %893 = vmatprep.subr.bf16.mxu1 %v948_v41 }
  0x23   :  { %615 = vmatmul.mubr.bf16.vlgmr.msra.gmra.mrb[0].mxu0 %v755_v35 }
  0x24   :  { %656 = vmatmul.mubr.bf16.vlgmr.msra.gmra.mrb[0].mxu1 %v757_v38  ;;  %872 = vmatpush3.bf16.msra.mxu0 %v949_v42 }
  0x25   :  { %894 = vmatpush3.bf16.msra.mxu1 %v950_v43  ;;  %873 = vmatprep.subr.bf16.mxu0 %v951_v44 }
  0x26   :  { %895 = vmatprep.subr.bf16.mxu1 %v952_v45  ;;  %696 = vmatprep.mubr.bf16.mxu0 %v760_v11 }
  0x27   :  { %737 = vmatprep.mubr.bf16.mxu1 %v762_v15 }
  0x28   :  { %874 = vmatpush3.bf16.msra.mxu0 %v953_v46 }
  0x29   :  { %896 = vmatpush3.bf16.msra.mxu1 %v954_v47  ;;  %875 = vmatprep.subr.bf16.mxu0 %v955_v48 }
  0x2a   :  { %897 = vmatprep.subr.bf16.mxu1 %v956_v49 }
  0x2c   :  { %876 = vmatpush3.bf16.msra.mxu0 %v957_v50 }
  0x2d   :  { %898 = vmatpush3.bf16.msra.mxu1 %v958_v51  ;;  %877 = vmatprep.subr.bf16.mxu0 %v959_v52 }
  0x2e   :  { %899 = vmatprep.subr.bf16.mxu1 %v960_v53 }
  0x30   :  { %878 = vmatpush3.bf16.msra.mxu0 %v961_v54 }
  0x31   :  { %900 = vmatpush3.bf16.msra.mxu1 %v962_v55  ;;  %879 = vmatprep.subr.bf16.mxu0 %v963_v56 }
  0x32   :  { %901 = vmatprep.subr.bf16.mxu1 %v964_v57 }
  0x34   :  { %880 = vmatpush3.bf16.msra.mxu0 %v965_v58 }
  0x35   :  { %902 = vmatpush3.bf16.msra.mxu1 %v966_v59  ;;  %881 = vmatprep.subr.bf16.mxu0 %v967_v60 }
  0x36   :  { %903 = vmatprep.subr.bf16.mxu1 %v968_v61 }
  0x38   :  { %882 = vmatpush3.bf16.msra.mxu0 %v969_v62 }
  0x39   :  { %904 = vmatpush3.bf16.msra.mxu1 %v970_v63  ;;  %883 = vmatprep.subr.bf16.mxu0 %v971_v0 }
  0x3a   :  { %905 = vmatprep.subr.bf16.mxu1 %v972_v1 }
  0x3c   :  { %884 = vmatpush3.bf16.msra.mxu0 %v973_v2 }
  0x3d   :  { %906 = vmatpush3.bf16.msra.mxu1 %v974_v3  ;;  %885 = vmatprep.subr.bf16.mxu0 %v975_v4 }
  0x3e   :  { %907 = vmatprep.subr.bf16.mxu1 %v976_v5 }
  0x40   :  { %886 = vmatpush3.bf16.msra.mxu0 %v977_v6 }
  0x41   :  { %908 = vmatpush3.bf16.msra.mxu1 %v978_v7 }
  0x43   :  { %697 = vmatmul.mubr.bf16.vlgmr.msra.gmra.mrb[4].mxu0 %v759_v10 }
  0x44   :  { %738 = vmatmul.mubr.bf16.vlgmr.msra.gmra.mrb[4].mxu1 %v761_v14 }
  0xf6   :  { %v843_v16 = vpop.f32.mrb[0].mxu0 }
  0xf7   :  { %v865_v17 = vpop.f32.mrb[0].mxu1  ;;  %v844_v19 = vpop.f32.mrb[1].mxu0 }
  0xf8   :  { %v845_v20 = vadd.f32 %v844_v19, %v843_v16  ;;  %v866_v21 = vpop.f32.mrb[1].mxu1  ;;  %v846_v22 = vpop.f32.mrb[2].mxu0 }
  0xf9   :  { %v867_v23 = vadd.f32 %v866_v21, %v865_v17  ;;  %v868_v24 = vpop.f32.mrb[2].mxu1  ;;  %v847_v25 = vpop.f32.mrb[3].mxu0 }
  0xfa   :  { %v617_v26 = vadd.f32 %v845_v20, %v754_v18  ;;  %v848_v27 = vadd.f32 %v847_v25, %v846_v22  ;;  %v869_v28 = vpop.f32.mrb[3].mxu1 }
  0xfb   :  { %v870_v29 = vadd.f32 %v869_v28, %v868_v24 }
  0xfc   :  { %v658_v30 = vadd.f32 %v867_v23, %v617_v26  ;;  %v620_v31 = vadd.f32 %v848_v27, %v754_v18 }
  0xfe   :  { %v661_v32 = vadd.f32 %v870_v29, %v620_v31 }
 0x116   :  { %v887_v33 = vpop.f32.mrb[4].mxu0 }
 0x117   :  { %v909_v34 = vpop.f32.mrb[4].mxu1  ;;  %v888_v35 = vpop.f32.mrb[5].mxu0 }
 0x118   :  { %v889_v36 = vadd.f32 %v888_v35, %v887_v33  ;;  %v910_v37 = vpop.f32.mrb[5].mxu1  ;;  %v890_v38 = vpop.f32.mrb[6].mxu0 }
 0x119   :  { %v911_v39 = vadd.f32 %v910_v37, %v909_v34  ;;  %v912_v40 = vpop.f32.mrb[6].mxu1  ;;  %v891_v41 = vpop.f32.mrb[7].mxu0 }
 0x11a   :  { %v699_v42 = vadd.f32 %v889_v36, %v658_v30  ;;  %v892_v43 = vadd.f32 %v891_v41, %v890_v38  ;;  %v913_v44 = vpop.f32.mrb[7].mxu1 }
 0x11b   :  { %v914_v45 = vadd.f32 %v913_v44, %v912_v40 }
 0x11c   :  { %v740_v46 = vadd.f32 %v911_v39, %v699_v42  ;;  %v702_v47 = vadd.f32 %v892_v43, %v661_v32 }
 0x11e   :  { %979 = vtanh.f32 %v740_v46  ;;  %v743_v48 = vadd.f32 %v914_v45, %v702_v47 }
 0x120   :  { %981 = vtanh.f32 %v743_v48 }
 0x128   :  { %v980_v49 = vpop.eup %979 }
 0x129   :  { %748 = vst [vmem:[%s1231_s3] sm:$0xff] %v980_v49 }
 0x12a   :  { %v982_v50 = vpop.eup %981 }
 0x12b   :  { %749 = vst [vmem:[%s1231_s3 + $0x8] sm:$0xff] %v982_v50 }

</bundles_post_ra>
